<compile_context>
chip_gen: v7x
topology: tpu7x:2x2x1
jax: 0.10.0
libtpu: 0.0.40
codegen_flags: <defaults>
</compile_context>

<pallas_src>
import functools

import jax
import jax.numpy as jnp
from jax.experimental import pallas as pl
from jax.experimental.pallas import tpu as pltpu


# ----------------------------- in-kernel helpers -----------------------------

def _layernorm(x, gamma, beta, eps=1e-5):
    # PyTorch nn.LayerNorm: biased variance over last axis, eps=1e-5.
    mu = jnp.mean(x, axis=-1, keepdims=True)
    var = jnp.mean((x - mu) ** 2, axis=-1, keepdims=True)
    return (x - mu) * jax.lax.rsqrt(var + eps) * gamma + beta


def _gelu(x):
    # Exact (erf) GELU -- matches torch.nn.functional.gelu default.
    return 0.5 * x * (1.0 + jax.lax.erf(x * jnp.float32(0.7071067811865476)))


def _full_spec(shape):
    nd = len(shape)
    return pl.BlockSpec(shape, lambda b, _nd=nd: (0,) * _nd)


# ------------------------------ fused Pallas kernel ---------------------------

def fused_mixer_kernel(p_ref, ew_ref, eb_ref,
                       g1_ref, be1_ref, tw1_ref, tb1_ref, tw2_ref, tb2_ref,
                       g2_ref, be2_ref, cw1_ref, cb1_ref, cw2_ref, cb2_ref,
                       ng_ref, nb_ref, fw_ref, fb_ref,
                       o_ref, *, n_blocks, batch_tile, n_patches, inv_p):
    # p_ref: (B_t*P, Kp) bf16 patches of a batch tile (row index = b*P + p).
    # All weights live in VMEM for the whole call (constant index maps).
    f32 = jnp.float32
    bf16 = jnp.bfloat16
    B, P = batch_tile, n_patches
    C = ew_ref.shape[1]

    # ---- patch embedding (Conv2d as matmul): (B*P, Kp) @ (Kp, C) -> f32 ----
    x = jnp.dot(p_ref[...], ew_ref[...], preferred_element_type=f32) + eb_ref[...]

    # ---- mixer blocks: statically unrolled (n_blocks is small).  For many
    # blocks this would become a lax.fori_loop / extra grid axis. ----
    for l in range(n_blocks):
        # token mixing, lane-dense: relayout (B*P, C) -> (P, B*C) with static
        # row-slices + lane-concat, then LEFT matmuls with torch-layout weights.
        h = _layernorm(x, g1_ref[l], be1_ref[l]).astype(bf16)                 # (B*P, C)
        hT = jnp.concatenate([h[b * P:(b + 1) * P, :] for b in range(B)],
                             axis=1)                                          # (P, B*C)
        t = jnp.dot(tw1_ref[l], hT, preferred_element_type=f32) + tb1_ref[l]  # (Dt, B*C)
        t = _gelu(t).astype(bf16)
        t = jnp.dot(tw2_ref[l], t, preferred_element_type=f32) + tb2_ref[l]   # (P, B*C)
        t_back = jnp.concatenate([t[:, b * C:(b + 1) * C] for b in range(B)],
                                 axis=0)                                      # (B*P, C)
        x = x + t_back                                                        # residual

        # channel mixing: flat (B*P, C) right matmuls with (in, out) weights.
        h2 = _layernorm(x, g2_ref[l], be2_ref[l]).astype(bf16)                # (B*P, C)
        c = jnp.dot(h2, cw1_ref[l], preferred_element_type=f32) + cb1_ref[l]  # (B*P, Dc)
        c = _gelu(c).astype(bf16)
        c = jnp.dot(c, cw2_ref[l], preferred_element_type=f32) + cb2_ref[l]   # (B*P, C)
        x = x + c

    # ---- head: LayerNorm, per-image mean over patches (kept f32), f32 fc ----
    hN = _layernorm(x, ng_ref[...], nb_ref[...])                              # (B*P, C)
    m = jnp.concatenate(
        [jnp.sum(hN[b * P:(b + 1) * P, :], axis=0, keepdims=True) for b in range(B)],
        axis=0) * inv_p                                                       # (B, C) f32
    o_ref[...] = jnp.dot(m, fw_ref[...], preferred_element_type=f32) + fb_ref[...]


# --------------------------------- wrappers -----------------------------------

def extract_patches(x_nchw, ps):
    # NCHW -> (N, n_patches, 3*ps*ps); feature order (c, kh, kw) matches Conv2d,
    # patch order row-major over the (h, w) grid ('n c h w -> n (h w) c').
    N, Cin, H, W = x_nchw.shape
    hp, wp = H // ps, W // ps
    x = x_nchw.reshape(N, Cin, hp, ps, wp, ps)
    x = jnp.transpose(x, (0, 2, 4, 1, 3, 5))   # N, hp, wp, Cin, ps, ps
    return x.reshape(N, hp * wp, Cin * ps * ps)


def mixer_model_forward(x_nchw, params, *, patch_size, n_classes, batch_tile):
    # TODO(synk): dropout layers are identity (inference semantics); training-mode
    # dropout would need pltpu.prng_* inside the kernel.
    patches = extract_patches(x_nchw, patch_size)                    # (N, P, K) f32
    N, P, K = patches.shape
    Kp = params["embed_w"].shape[0]                                  # K padded to 128
    patches = jnp.pad(patches, ((0, 0), (0, 0), (0, Kp - K)))
    patches = patches.reshape(N * P, Kp).astype(jnp.bfloat16)        # (N*P, Kp)

    n_blocks = params["tw1"].shape[0]
    C = params["embed_w"].shape[1]
    Dt = params["tw1"].shape[1]
    Dc = params["cw1"].shape[2]
    cls_pad = params["fc_w"].shape[1]

    bt = batch_tile
    assert N % bt == 0, "batch must be divisible by batch_tile"
    steps = N // bt

    weights = (params["embed_w"], params["embed_b"],
               params["g1"], params["be1"],
               params["tw1"], params["tb1"], params["tw2"], params["tb2"],
               params["g2"], params["be2"],
               params["cw1"], params["cb1"], params["cw2"], params["cb2"],
               params["norm_g"], params["norm_b"],
               params["fc_w"], params["fc_b"])

    kernel = functools.partial(fused_mixer_kernel, n_blocks=n_blocks,
                               batch_tile=bt, n_patches=P, inv_p=1.0 / P)

    # Whole-call cost estimate (advisory, helps XLA schedule the custom call).
    flops = steps * (2 * bt * P * Kp * C
                     + n_blocks * (4 * bt * C * P * Dt + 4 * bt * P * C * Dc)
                     + 2 * bt * C * cls_pad)
    transcendentals = steps * n_blocks * (bt * C * Dt + bt * P * Dc)
    bytes_accessed = (patches.size * 2
                      + sum(int(w.size) * w.dtype.itemsize for w in weights)
                      + N * cls_pad * 4)

    in_specs = [pl.BlockSpec((bt * P, Kp), lambda b: (b, 0))]
    in_specs += [_full_spec(w.shape) for w in weights]

    logits_padded = pl.pallas_call(
        kernel,
        out_shape=jax.ShapeDtypeStruct((N, cls_pad), jnp.float32),
        grid=(steps,),
        in_specs=in_specs,
        out_specs=pl.BlockSpec((bt, cls_pad), lambda b: (b, 0)),
        compiler_params=pltpu.CompilerParams(dimension_semantics=("parallel",)),
        cost_estimate=pl.CostEstimate(flops=int(flops),
                                      transcendentals=int(transcendentals),
                                      bytes_accessed=int(bytes_accessed)),
    )(patches, *weights)
    return logits_padded[:, :n_classes]


# ------------------------------ parameter setup -------------------------------

def init_params(key, image_size, patch_size, hidden_dim, token_mlp_dim,
                channel_mlp_dim, n_classes, n_blocks):
    P = (image_size // patch_size) ** 2
    K = 3 * patch_size * patch_size
    Kp = ((K + 127) // 128) * 128                      # lane-aligned patch features
    cls_pad = ((n_classes + 127) // 128) * 128         # lane-dense classifier output
    # BUGFIX: enough keys for embed_w, embed_b, 4 weights/block, fc_w.
    keys = iter(jax.random.split(key, 4 + 4 * n_blocks))

    def w(shape):
        return 0.02 * jax.random.normal(next(keys), shape, jnp.float32)

    params = {}
    # patch embedder: Conv2d(3, C, ps, stride=ps) as a (Kp, C) matmul (rows >= K
    # are zero, matching the zero-padded patch features), bf16 for the MXU.
    conv_w = w((hidden_dim, 3, patch_size, patch_size))
    ew = conv_w.reshape(hidden_dim, K).T                               # (K, C)
    ew_pad = jnp.zeros((Kp, hidden_dim), jnp.float32).at[:K, :].set(ew)
    params["embed_w"] = ew_pad.astype(jnp.bfloat16)                    # (Kp, C)
    params["embed_b"] = 0.01 * jax.random.normal(next(keys), (1, hidden_dim), jnp.float32)

    g1, be1, tw1, tb1, tw2, tb2 = [], [], [], [], [], []
    g2, be2, cw1, cb1, cw2, cb2 = [], [], [], [], [], []
    for _ in range(n_blocks):
        g1.append(jnp.ones((1, hidden_dim), jnp.float32))
        be1.append(jnp.zeros((1, hidden_dim), jnp.float32))
        # token MLP weights kept in torch (out, in) layout -> left matmuls.
        tw1.append(w((token_mlp_dim, P)))                              # (Dt, P)
        tb1.append(jnp.zeros((token_mlp_dim, 1), jnp.float32))         # column bias
        tw2.append(w((P, token_mlp_dim)))                              # (P, Dt)
        tb2.append(jnp.zeros((P, 1), jnp.float32))                     # column bias
        g2.append(jnp.ones((1, hidden_dim), jnp.float32))
        be2.append(jnp.zeros((1, hidden_dim), jnp.float32))
        # channel MLP weights pre-transposed to (in, out) -> right matmuls.
        cw1.append(w((channel_mlp_dim, hidden_dim)).T)                 # (C, Dc)
        cb1.append(jnp.zeros((1, channel_mlp_dim), jnp.float32))
        cw2.append(w((hidden_dim, channel_mlp_dim)).T)                 # (Dc, C)
        cb2.append(jnp.zeros((1, hidden_dim), jnp.float32))

    st = lambda xs: jnp.stack(xs, axis=0)
    params["g1"], params["be1"] = st(g1), st(be1)
    params["tw1"], params["tb1"] = st(tw1).astype(jnp.bfloat16), st(tb1)
    params["tw2"], params["tb2"] = st(tw2).astype(jnp.bfloat16), st(tb2)
    params["g2"], params["be2"] = st(g2), st(be2)
    params["cw1"], params["cb1"] = st(cw1).astype(jnp.bfloat16), st(cb1)
    params["cw2"], params["cb2"] = st(cw2).astype(jnp.bfloat16), st(cb2)

    params["norm_g"] = jnp.ones((1, hidden_dim), jnp.float32)
    params["norm_b"] = jnp.zeros((1, hidden_dim), jnp.float32)
    # classifier kept f32 (tiny) so the logits avoid an extra bf16 rounding stage.
    fc_w = w((n_classes, hidden_dim)).T                                # (C, n_classes)
    params["fc_w"] = (jnp.zeros((hidden_dim, cls_pad), jnp.float32)
                      .at[:, :n_classes].set(fc_w))                    # (C, 128) f32
    params["fc_b"] = jnp.zeros((1, cls_pad), jnp.float32)
    return params


# ----------------------------------- main --------------------------------------

if __name__ == "__main__":
    image_size = 16
    patch_size = 4           # -> P = 16 patches, K = 48 (padded to 128)
    hidden_dim = 32
    token_mlp_dim = 16
    channel_mlp_dim = 64
    n_classes = 10
    n_blocks = 2
    batch = 32               # small, but enough for 2 parallel grid steps
    batch_tile = 16          # B_t*P = 256 rows, B_t*C = 512 lanes per step

    key = jax.random.PRNGKey(0)
    k_x, k_p = jax.random.split(key)
    x = jax.random.normal(k_x, (batch, 3, image_size, image_size), jnp.float32)
    params = init_params(k_p, image_size, patch_size, hidden_dim,
                         token_mlp_dim, channel_mlp_dim, n_classes, n_blocks)

    fwd = jax.jit(functools.partial(mixer_model_forward, patch_size=patch_size,
                                    n_classes=n_classes, batch_tile=batch_tile))
    logits = fwd(x, params)
    jax.block_until_ready(logits)
    assert logits.shape == (batch, n_classes)
    print("KERNEL_OK")
</pallas_src>

<mosaic_0001>
module attributes {stable_mosaic.version = 11 : i64} {
  func.func @fused_mixer_kernel(%arg0: i32, %arg1: memref<256x128xbf16, #tpu.memory_space<vmem>>, %arg2: memref<128x32xbf16, #tpu.memory_space<vmem>>, %arg3: memref<1x32xf32, #tpu.memory_space<vmem>>, %arg4: memref<2x1x32xf32, #tpu.memory_space<vmem>>, %arg5: memref<2x1x32xf32, #tpu.memory_space<vmem>>, %arg6: memref<2x16x16xbf16, #tpu.memory_space<vmem>>, %arg7: memref<2x16x1xf32, #tpu.memory_space<vmem>>, %arg8: memref<2x16x16xbf16, #tpu.memory_space<vmem>>, %arg9: memref<2x16x1xf32, #tpu.memory_space<vmem>>, %arg10: memref<2x1x32xf32, #tpu.memory_space<vmem>>, %arg11: memref<2x1x32xf32, #tpu.memory_space<vmem>>, %arg12: memref<2x32x64xbf16, #tpu.memory_space<vmem>>, %arg13: memref<2x1x64xf32, #tpu.memory_space<vmem>>, %arg14: memref<2x64x32xbf16, #tpu.memory_space<vmem>>, %arg15: memref<2x1x32xf32, #tpu.memory_space<vmem>>, %arg16: memref<1x32xf32, #tpu.memory_space<vmem>>, %arg17: memref<1x32xf32, #tpu.memory_space<vmem>>, %arg18: memref<32x128xf32, #tpu.memory_space<vmem>>, %arg19: memref<1x128xf32, #tpu.memory_space<vmem>>, %arg20: memref<16x128xf32, #tpu.memory_space<vmem>>) attributes {dimension_semantics = [#tpu.dimension_semantics<parallel>], iteration_bounds = array<i64: 2>, scalar_prefetch = 0 : i64, scratch_operands = 0 : i64, tpu.core_type = #tpu.core_type<tc>, window_params = [{transform_indices = @transform_0, window_bounds = array<i64: 256, 128>}, {pipeline_mode = #tpu.pipeline_mode<synchronous>, transform_indices = @transform_1, window_bounds = array<i64: 128, 32>}, {pipeline_mode = #tpu.pipeline_mode<synchronous>, transform_indices = @transform_2, window_bounds = array<i64: 1, 32>}, {pipeline_mode = #tpu.pipeline_mode<synchronous>, transform_indices = @transform_3, window_bounds = array<i64: 2, 1, 32>}, {pipeline_mode = #tpu.pipeline_mode<synchronous>, transform_indices = @transform_4, window_bounds = array<i64: 2, 1, 32>}, {pipeline_mode = #tpu.pipeline_mode<synchronous>, transform_indices = @transform_5, window_bounds = array<i64: 2, 16, 16>}, {pipeline_mode = #tpu.pipeline_mode<synchronous>, transform_indices = @transform_6, window_bounds = array<i64: 2, 16, 1>}, {pipeline_mode = #tpu.pipeline_mode<synchronous>, transform_indices = @transform_7, window_bounds = array<i64: 2, 16, 16>}, {pipeline_mode = #tpu.pipeline_mode<synchronous>, transform_indices = @transform_8, window_bounds = array<i64: 2, 16, 1>}, {pipeline_mode = #tpu.pipeline_mode<synchronous>, transform_indices = @transform_9, window_bounds = array<i64: 2, 1, 32>}, {pipeline_mode = #tpu.pipeline_mode<synchronous>, transform_indices = @transform_10, window_bounds = array<i64: 2, 1, 32>}, {pipeline_mode = #tpu.pipeline_mode<synchronous>, transform_indices = @transform_11, window_bounds = array<i64: 2, 32, 64>}, {pipeline_mode = #tpu.pipeline_mode<synchronous>, transform_indices = @transform_12, window_bounds = array<i64: 2, 1, 64>}, {pipeline_mode = #tpu.pipeline_mode<synchronous>, transform_indices = @transform_13, window_bounds = array<i64: 2, 64, 32>}, {pipeline_mode = #tpu.pipeline_mode<synchronous>, transform_indices = @transform_14, window_bounds = array<i64: 2, 1, 32>}, {pipeline_mode = #tpu.pipeline_mode<synchronous>, transform_indices = @transform_15, window_bounds = array<i64: 1, 32>}, {pipeline_mode = #tpu.pipeline_mode<synchronous>, transform_indices = @transform_16, window_bounds = array<i64: 1, 32>}, {pipeline_mode = #tpu.pipeline_mode<synchronous>, transform_indices = @transform_17, window_bounds = array<i64: 32, 128>}, {pipeline_mode = #tpu.pipeline_mode<synchronous>, transform_indices = @transform_18, window_bounds = array<i64: 1, 128>}, {transform_indices = @transform_19, window_bounds = array<i64: 16, 128>}]} {
    %c0 = arith.constant 0 : index
    %c0_0 = arith.constant 0 : index
    %0 = vector.load %arg1[%c0, %c0_0] : memref<256x128xbf16, #tpu.memory_space<vmem>>, vector<256x128xbf16>
    %c0_1 = arith.constant 0 : index
    %c0_2 = arith.constant 0 : index
    %1 = vector.load %arg2[%c0_1, %c0_2] : memref<128x32xbf16, #tpu.memory_space<vmem>>, vector<128x32xbf16>
    %cst = arith.constant dense<0.000000e+00> : vector<256x32xf32>
    %2 = tpu.matmul %0, %1, %cst {dimension_numbers = #tpu.dot_dimension_numbers<[1], [0], [0], [1], [0, 0, 1, 1], [], []>} : vector<256x128xbf16>, vector<128x32xbf16>, vector<256x32xf32> -> vector<256x32xf32>
    %c0_3 = arith.constant 0 : index
    %c0_4 = arith.constant 0 : index
    %3 = vector.load %arg3[%c0_3, %c0_4] : memref<1x32xf32, #tpu.memory_space<vmem>>, vector<1x32xf32>
    %4 = vector.broadcast %3 : vector<1x32xf32> to vector<256x32xf32>
    %5 = arith.addf %2, %4 : vector<256x32xf32>
    %c0_5 = arith.constant 0 : index
    %c0_6 = arith.constant 0 : index
    %c0_7 = arith.constant 0 : index
    %6 = vector.load %arg4[%c0_5, %c0_6, %c0_7] : memref<2x1x32xf32, #tpu.memory_space<vmem>>, vector<1x1x32xf32>
    %7 = vector.shape_cast %6 : vector<1x1x32xf32> to vector<1x32xf32>
    %c0_8 = arith.constant 0 : index
    %c0_9 = arith.constant 0 : index
    %c0_10 = arith.constant 0 : index
    %8 = vector.load %arg5[%c0_8, %c0_9, %c0_10] : memref<2x1x32xf32, #tpu.memory_space<vmem>>, vector<1x1x32xf32>
    %9 = vector.shape_cast %8 : vector<1x1x32xf32> to vector<1x32xf32>
    %cst_11 = arith.constant dense<0.000000e+00> : vector<256xf32>
    %10 = vector.multi_reduction <add>, %5, %cst_11 [1] : vector<256x32xf32> to vector<256xf32>
    %11 = vector.shape_cast %10 : vector<256xf32> to vector<256x1xf32>
    %cst_12 = arith.constant 3.200000e+01 : f32
    %12 = vector.broadcast %cst_12 : f32 to vector<256x1xf32>
    %13 = arith.divf %11, %12 : vector<256x1xf32>
    %14 = vector.broadcast %13 : vector<256x1xf32> to vector<256x32xf32>
    %15 = arith.subf %5, %14 : vector<256x32xf32>
    %16 = arith.mulf %15, %15 : vector<256x32xf32>
    %cst_13 = arith.constant dense<0.000000e+00> : vector<256xf32>
    %17 = vector.multi_reduction <add>, %16, %cst_13 [1] : vector<256x32xf32> to vector<256xf32>
    %18 = vector.shape_cast %17 : vector<256xf32> to vector<256x1xf32>
    %cst_14 = arith.constant 3.200000e+01 : f32
    %19 = vector.broadcast %cst_14 : f32 to vector<256x1xf32>
    %20 = arith.divf %18, %19 : vector<256x1xf32>
    %21 = vector.broadcast %13 : vector<256x1xf32> to vector<256x32xf32>
    %22 = arith.subf %5, %21 : vector<256x32xf32>
    %cst_15 = arith.constant 9.99999974E-6 : f32
    %23 = vector.broadcast %cst_15 : f32 to vector<256x1xf32>
    %24 = arith.addf %20, %23 : vector<256x1xf32>
    %25 = math.rsqrt %24 : vector<256x1xf32>
    %26 = vector.broadcast %25 : vector<256x1xf32> to vector<256x32xf32>
    %27 = arith.mulf %22, %26 : vector<256x32xf32>
    %28 = vector.broadcast %7 : vector<1x32xf32> to vector<256x32xf32>
    %29 = arith.mulf %27, %28 : vector<256x32xf32>
    %30 = vector.broadcast %9 : vector<1x32xf32> to vector<256x32xf32>
    %31 = arith.addf %29, %30 : vector<256x32xf32>
    %32 = arith.truncf %31 : vector<256x32xf32> to vector<256x32xbf16>
    %33 = vector.extract_strided_slice %32 {offsets = [0, 0], sizes = [16, 32], strides = [1, 1]} : vector<256x32xbf16> to vector<16x32xbf16>
    %34 = vector.extract_strided_slice %32 {offsets = [16, 0], sizes = [16, 32], strides = [1, 1]} : vector<256x32xbf16> to vector<16x32xbf16>
    %35 = vector.extract_strided_slice %32 {offsets = [32, 0], sizes = [16, 32], strides = [1, 1]} : vector<256x32xbf16> to vector<16x32xbf16>
    %36 = vector.extract_strided_slice %32 {offsets = [48, 0], sizes = [16, 32], strides = [1, 1]} : vector<256x32xbf16> to vector<16x32xbf16>
    %37 = vector.extract_strided_slice %32 {offsets = [64, 0], sizes = [16, 32], strides = [1, 1]} : vector<256x32xbf16> to vector<16x32xbf16>
    %38 = vector.extract_strided_slice %32 {offsets = [80, 0], sizes = [16, 32], strides = [1, 1]} : vector<256x32xbf16> to vector<16x32xbf16>
    %39 = vector.extract_strided_slice %32 {offsets = [96, 0], sizes = [16, 32], strides = [1, 1]} : vector<256x32xbf16> to vector<16x32xbf16>
    %40 = vector.extract_strided_slice %32 {offsets = [112, 0], sizes = [16, 32], strides = [1, 1]} : vector<256x32xbf16> to vector<16x32xbf16>
    %41 = vector.extract_strided_slice %32 {offsets = [128, 0], sizes = [16, 32], strides = [1, 1]} : vector<256x32xbf16> to vector<16x32xbf16>
    %42 = vector.extract_strided_slice %32 {offsets = [144, 0], sizes = [16, 32], strides = [1, 1]} : vector<256x32xbf16> to vector<16x32xbf16>
    %43 = vector.extract_strided_slice %32 {offsets = [160, 0], sizes = [16, 32], strides = [1, 1]} : vector<256x32xbf16> to vector<16x32xbf16>
    %44 = vector.extract_strided_slice %32 {offsets = [176, 0], sizes = [16, 32], strides = [1, 1]} : vector<256x32xbf16> to vector<16x32xbf16>
    %45 = vector.extract_strided_slice %32 {offsets = [192, 0], sizes = [16, 32], strides = [1, 1]} : vector<256x32xbf16> to vector<16x32xbf16>
    %46 = vector.extract_strided_slice %32 {offsets = [208, 0], sizes = [16, 32], strides = [1, 1]} : vector<256x32xbf16> to vector<16x32xbf16>
    %47 = vector.extract_strided_slice %32 {offsets = [224, 0], sizes = [16, 32], strides = [1, 1]} : vector<256x32xbf16> to vector<16x32xbf16>
    %48 = vector.extract_strided_slice %32 {offsets = [240, 0], sizes = [16, 32], strides = [1, 1]} : vector<256x32xbf16> to vector<16x32xbf16>
    %49 = tpu.concatenate %33, %34, %35, %36, %37, %38, %39, %40, %41, %42, %43, %44, %45, %46, %47, %48 in 1 : vector<16x32xbf16>, vector<16x32xbf16>, vector<16x32xbf16>, vector<16x32xbf16>, vector<16x32xbf16>, vector<16x32xbf16>, vector<16x32xbf16>, vector<16x32xbf16>, vector<16x32xbf16>, vector<16x32xbf16>, vector<16x32xbf16>, vector<16x32xbf16>, vector<16x32xbf16>, vector<16x32xbf16>, vector<16x32xbf16>, vector<16x32xbf16> -> vector<16x512xbf16>
    %c0_16 = arith.constant 0 : index
    %c0_17 = arith.constant 0 : index
    %c0_18 = arith.constant 0 : index
    %50 = vector.load %arg6[%c0_16, %c0_17, %c0_18] : memref<2x16x16xbf16, #tpu.memory_space<vmem>>, vector<1x16x16xbf16>
    %51 = vector.shape_cast %50 : vector<1x16x16xbf16> to vector<16x16xbf16>
    %cst_19 = arith.constant dense<0.000000e+00> : vector<16x512xf32>
    %52 = tpu.matmul %51, %49, %cst_19 {dimension_numbers = #tpu.dot_dimension_numbers<[1], [0], [0], [1], [0, 0, 1, 1], [], []>} : vector<16x16xbf16>, vector<16x512xbf16>, vector<16x512xf32> -> vector<16x512xf32>
    %c0_20 = arith.constant 0 : index
    %c0_21 = arith.constant 0 : index
    %c0_22 = arith.constant 0 : index
    %53 = vector.load %arg7[%c0_20, %c0_21, %c0_22] : memref<2x16x1xf32, #tpu.memory_space<vmem>>, vector<1x16x1xf32>
    %54 = vector.shape_cast %53 : vector<1x16x1xf32> to vector<16x1xf32>
    %55 = vector.broadcast %54 : vector<16x1xf32> to vector<16x512xf32>
    %56 = arith.addf %52, %55 : vector<16x512xf32>
    %cst_23 = arith.constant 5.000000e-01 : f32
    %57 = vector.broadcast %cst_23 : f32 to vector<16x512xf32>
    %58 = arith.mulf %57, %56 : vector<16x512xf32>
    %cst_24 = arith.constant 0.707106769 : f32
    %59 = vector.broadcast %cst_24 : f32 to vector<16x512xf32>
    %60 = arith.mulf %56, %59 : vector<16x512xf32>
    %61 = math.erf %60 : vector<16x512xf32>
    %cst_25 = arith.constant 1.000000e+00 : f32
    %62 = vector.broadcast %cst_25 : f32 to vector<16x512xf32>
    %63 = arith.addf %62, %61 : vector<16x512xf32>
    %64 = arith.mulf %58, %63 : vector<16x512xf32>
    %65 = arith.truncf %64 : vector<16x512xf32> to vector<16x512xbf16>
    %c0_26 = arith.constant 0 : index
    %c0_27 = arith.constant 0 : index
    %c0_28 = arith.constant 0 : index
    %66 = vector.load %arg8[%c0_26, %c0_27, %c0_28] : memref<2x16x16xbf16, #tpu.memory_space<vmem>>, vector<1x16x16xbf16>
    %67 = vector.shape_cast %66 : vector<1x16x16xbf16> to vector<16x16xbf16>
    %cst_29 = arith.constant dense<0.000000e+00> : vector<16x512xf32>
    %68 = tpu.matmul %67, %65, %cst_29 {dimension_numbers = #tpu.dot_dimension_numbers<[1], [0], [0], [1], [0, 0, 1, 1], [], []>} : vector<16x16xbf16>, vector<16x512xbf16>, vector<16x512xf32> -> vector<16x512xf32>
    %c0_30 = arith.constant 0 : index
    %c0_31 = arith.constant 0 : index
    %c0_32 = arith.constant 0 : index
    %69 = vector.load %arg9[%c0_30, %c0_31, %c0_32] : memref<2x16x1xf32, #tpu.memory_space<vmem>>, vector<1x16x1xf32>
    %70 = vector.shape_cast %69 : vector<1x16x1xf32> to vector<16x1xf32>
    %71 = vector.broadcast %70 : vector<16x1xf32> to vector<16x512xf32>
    %72 = arith.addf %68, %71 : vector<16x512xf32>
    %73 = vector.extract_strided_slice %72 {offsets = [0, 0], sizes = [16, 32], strides = [1, 1]} : vector<16x512xf32> to vector<16x32xf32>
    %74 = vector.extract_strided_slice %72 {offsets = [0, 32], sizes = [16, 32], strides = [1, 1]} : vector<16x512xf32> to vector<16x32xf32>
    %75 = vector.extract_strided_slice %72 {offsets = [0, 64], sizes = [16, 32], strides = [1, 1]} : vector<16x512xf32> to vector<16x32xf32>
    %76 = vector.extract_strided_slice %72 {offsets = [0, 96], sizes = [16, 32], strides = [1, 1]} : vector<16x512xf32> to vector<16x32xf32>
    %77 = vector.extract_strided_slice %72 {offsets = [0, 128], sizes = [16, 32], strides = [1, 1]} : vector<16x512xf32> to vector<16x32xf32>
    %78 = vector.extract_strided_slice %72 {offsets = [0, 160], sizes = [16, 32], strides = [1, 1]} : vector<16x512xf32> to vector<16x32xf32>
    %79 = vector.extract_strided_slice %72 {offsets = [0, 192], sizes = [16, 32], strides = [1, 1]} : vector<16x512xf32> to vector<16x32xf32>
    %80 = vector.extract_strided_slice %72 {offsets = [0, 224], sizes = [16, 32], strides = [1, 1]} : vector<16x512xf32> to vector<16x32xf32>
    %81 = vector.extract_strided_slice %72 {offsets = [0, 256], sizes = [16, 32], strides = [1, 1]} : vector<16x512xf32> to vector<16x32xf32>
    %82 = vector.extract_strided_slice %72 {offsets = [0, 288], sizes = [16, 32], strides = [1, 1]} : vector<16x512xf32> to vector<16x32xf32>
    %83 = vector.extract_strided_slice %72 {offsets = [0, 320], sizes = [16, 32], strides = [1, 1]} : vector<16x512xf32> to vector<16x32xf32>
    %84 = vector.extract_strided_slice %72 {offsets = [0, 352], sizes = [16, 32], strides = [1, 1]} : vector<16x512xf32> to vector<16x32xf32>
    %85 = vector.extract_strided_slice %72 {offsets = [0, 384], sizes = [16, 32], strides = [1, 1]} : vector<16x512xf32> to vector<16x32xf32>
    %86 = vector.extract_strided_slice %72 {offsets = [0, 416], sizes = [16, 32], strides = [1, 1]} : vector<16x512xf32> to vector<16x32xf32>
    %87 = vector.extract_strided_slice %72 {offsets = [0, 448], sizes = [16, 32], strides = [1, 1]} : vector<16x512xf32> to vector<16x32xf32>
    %88 = vector.extract_strided_slice %72 {offsets = [0, 480], sizes = [16, 32], strides = [1, 1]} : vector<16x512xf32> to vector<16x32xf32>
    %89 = tpu.concatenate %73, %74, %75, %76, %77, %78, %79, %80, %81, %82, %83, %84, %85, %86, %87, %88 in 0 : vector<16x32xf32>, vector<16x32xf32>, vector<16x32xf32>, vector<16x32xf32>, vector<16x32xf32>, vector<16x32xf32>, vector<16x32xf32>, vector<16x32xf32>, vector<16x32xf32>, vector<16x32xf32>, vector<16x32xf32>, vector<16x32xf32>, vector<16x32xf32>, vector<16x32xf32>, vector<16x32xf32>, vector<16x32xf32> -> vector<256x32xf32>
    %90 = arith.addf %5, %89 : vector<256x32xf32>
    %c0_33 = arith.constant 0 : index
    %c0_34 = arith.constant 0 : index
    %c0_35 = arith.constant 0 : index
    %91 = vector.load %arg10[%c0_33, %c0_34, %c0_35] : memref<2x1x32xf32, #tpu.memory_space<vmem>>, vector<1x1x32xf32>
    %92 = vector.shape_cast %91 : vector<1x1x32xf32> to vector<1x32xf32>
    %c0_36 = arith.constant 0 : index
    %c0_37 = arith.constant 0 : index
    %c0_38 = arith.constant 0 : index
    %93 = vector.load %arg11[%c0_36, %c0_37, %c0_38] : memref<2x1x32xf32, #tpu.memory_space<vmem>>, vector<1x1x32xf32>
    %94 = vector.shape_cast %93 : vector<1x1x32xf32> to vector<1x32xf32>
    %cst_39 = arith.constant dense<0.000000e+00> : vector<256xf32>
    %95 = vector.multi_reduction <add>, %90, %cst_39 [1] : vector<256x32xf32> to vector<256xf32>
    %96 = vector.shape_cast %95 : vector<256xf32> to vector<256x1xf32>
    %cst_40 = arith.constant 3.200000e+01 : f32
    %97 = vector.broadcast %cst_40 : f32 to vector<256x1xf32>
    %98 = arith.divf %96, %97 : vector<256x1xf32>
    %99 = vector.broadcast %98 : vector<256x1xf32> to vector<256x32xf32>
    %100 = arith.subf %90, %99 : vector<256x32xf32>
    %101 = arith.mulf %100, %100 : vector<256x32xf32>
    %cst_41 = arith.constant dense<0.000000e+00> : vector<256xf32>
    %102 = vector.multi_reduction <add>, %101, %cst_41 [1] : vector<256x32xf32> to vector<256xf32>
    %103 = vector.shape_cast %102 : vector<256xf32> to vector<256x1xf32>
    %cst_42 = arith.constant 3.200000e+01 : f32
    %104 = vector.broadcast %cst_42 : f32 to vector<256x1xf32>
    %105 = arith.divf %103, %104 : vector<256x1xf32>
    %106 = vector.broadcast %98 : vector<256x1xf32> to vector<256x32xf32>
    %107 = arith.subf %90, %106 : vector<256x32xf32>
    %cst_43 = arith.constant 9.99999974E-6 : f32
    %108 = vector.broadcast %cst_43 : f32 to vector<256x1xf32>
    %109 = arith.addf %105, %108 : vector<256x1xf32>
    %110 = math.rsqrt %109 : vector<256x1xf32>
    %111 = vector.broadcast %110 : vector<256x1xf32> to vector<256x32xf32>
    %112 = arith.mulf %107, %111 : vector<256x32xf32>
    %113 = vector.broadcast %92 : vector<1x32xf32> to vector<256x32xf32>
    %114 = arith.mulf %112, %113 : vector<256x32xf32>
    %115 = vector.broadcast %94 : vector<1x32xf32> to vector<256x32xf32>
    %116 = arith.addf %114, %115 : vector<256x32xf32>
    %117 = arith.truncf %116 : vector<256x32xf32> to vector<256x32xbf16>
    %c0_44 = arith.constant 0 : index
    %c0_45 = arith.constant 0 : index
    %c0_46 = arith.constant 0 : index
    %118 = vector.load %arg12[%c0_44, %c0_45, %c0_46] : memref<2x32x64xbf16, #tpu.memory_space<vmem>>, vector<1x32x64xbf16>
    %119 = vector.shape_cast %118 : vector<1x32x64xbf16> to vector<32x64xbf16>
    %cst_47 = arith.constant dense<0.000000e+00> : vector<256x64xf32>
    %120 = tpu.matmul %117, %119, %cst_47 {dimension_numbers = #tpu.dot_dimension_numbers<[1], [0], [0], [1], [0, 0, 1, 1], [], []>} : vector<256x32xbf16>, vector<32x64xbf16>, vector<256x64xf32> -> vector<256x64xf32>
    %c0_48 = arith.constant 0 : index
    %c0_49 = arith.constant 0 : index
    %c0_50 = arith.constant 0 : index
    %121 = vector.load %arg13[%c0_48, %c0_49, %c0_50] : memref<2x1x64xf32, #tpu.memory_space<vmem>>, vector<1x1x64xf32>
    %122 = vector.shape_cast %121 : vector<1x1x64xf32> to vector<1x64xf32>
    %123 = vector.broadcast %122 : vector<1x64xf32> to vector<256x64xf32>
    %124 = arith.addf %120, %123 : vector<256x64xf32>
    %cst_51 = arith.constant 5.000000e-01 : f32
    %125 = vector.broadcast %cst_51 : f32 to vector<256x64xf32>
    %126 = arith.mulf %125, %124 : vector<256x64xf32>
    %cst_52 = arith.constant 0.707106769 : f32
    %127 = vector.broadcast %cst_52 : f32 to vector<256x64xf32>
    %128 = arith.mulf %124, %127 : vector<256x64xf32>
    %129 = math.erf %128 : vector<256x64xf32>
    %cst_53 = arith.constant 1.000000e+00 : f32
    %130 = vector.broadcast %cst_53 : f32 to vector<256x64xf32>
    %131 = arith.addf %130, %129 : vector<256x64xf32>
    %132 = arith.mulf %126, %131 : vector<256x64xf32>
    %133 = arith.truncf %132 : vector<256x64xf32> to vector<256x64xbf16>
    %c0_54 = arith.constant 0 : index
    %c0_55 = arith.constant 0 : index
    %c0_56 = arith.constant 0 : index
    %134 = vector.load %arg14[%c0_54, %c0_55, %c0_56] : memref<2x64x32xbf16, #tpu.memory_space<vmem>>, vector<1x64x32xbf16>
    %135 = vector.shape_cast %134 : vector<1x64x32xbf16> to vector<64x32xbf16>
    %cst_57 = arith.constant dense<0.000000e+00> : vector<256x32xf32>
    %136 = tpu.matmul %133, %135, %cst_57 {dimension_numbers = #tpu.dot_dimension_numbers<[1], [0], [0], [1], [0, 0, 1, 1], [], []>} : vector<256x64xbf16>, vector<64x32xbf16>, vector<256x32xf32> -> vector<256x32xf32>
    %c0_58 = arith.constant 0 : index
    %c0_59 = arith.constant 0 : index
    %c0_60 = arith.constant 0 : index
    %137 = vector.load %arg15[%c0_58, %c0_59, %c0_60] : memref<2x1x32xf32, #tpu.memory_space<vmem>>, vector<1x1x32xf32>
    %138 = vector.shape_cast %137 : vector<1x1x32xf32> to vector<1x32xf32>
    %139 = vector.broadcast %138 : vector<1x32xf32> to vector<256x32xf32>
    %140 = arith.addf %136, %139 : vector<256x32xf32>
    %141 = arith.addf %90, %140 : vector<256x32xf32>
    %c1 = arith.constant 1 : index
    %c0_61 = arith.constant 0 : index
    %c0_62 = arith.constant 0 : index
    %142 = vector.load %arg4[%c1, %c0_61, %c0_62] : memref<2x1x32xf32, #tpu.memory_space<vmem>>, vector<1x1x32xf32>
    %143 = vector.shape_cast %142 : vector<1x1x32xf32> to vector<1x32xf32>
    %c1_63 = arith.constant 1 : index
    %c0_64 = arith.constant 0 : index
    %c0_65 = arith.constant 0 : index
    %144 = vector.load %arg5[%c1_63, %c0_64, %c0_65] : memref<2x1x32xf32, #tpu.memory_space<vmem>>, vector<1x1x32xf32>
    %145 = vector.shape_cast %144 : vector<1x1x32xf32> to vector<1x32xf32>
    %cst_66 = arith.constant dense<0.000000e+00> : vector<256xf32>
    %146 = vector.multi_reduction <add>, %141, %cst_66 [1] : vector<256x32xf32> to vector<256xf32>
    %147 = vector.shape_cast %146 : vector<256xf32> to vector<256x1xf32>
    %cst_67 = arith.constant 3.200000e+01 : f32
    %148 = vector.broadcast %cst_67 : f32 to vector<256x1xf32>
    %149 = arith.divf %147, %148 : vector<256x1xf32>
    %150 = vector.broadcast %149 : vector<256x1xf32> to vector<256x32xf32>
    %151 = arith.subf %141, %150 : vector<256x32xf32>
    %152 = arith.mulf %151, %151 : vector<256x32xf32>
    %cst_68 = arith.constant dense<0.000000e+00> : vector<256xf32>
    %153 = vector.multi_reduction <add>, %152, %cst_68 [1] : vector<256x32xf32> to vector<256xf32>
    %154 = vector.shape_cast %153 : vector<256xf32> to vector<256x1xf32>
    %cst_69 = arith.constant 3.200000e+01 : f32
    %155 = vector.broadcast %cst_69 : f32 to vector<256x1xf32>
    %156 = arith.divf %154, %155 : vector<256x1xf32>
    %157 = vector.broadcast %149 : vector<256x1xf32> to vector<256x32xf32>
    %158 = arith.subf %141, %157 : vector<256x32xf32>
    %cst_70 = arith.constant 9.99999974E-6 : f32
    %159 = vector.broadcast %cst_70 : f32 to vector<256x1xf32>
    %160 = arith.addf %156, %159 : vector<256x1xf32>
    %161 = math.rsqrt %160 : vector<256x1xf32>
    %162 = vector.broadcast %161 : vector<256x1xf32> to vector<256x32xf32>
    %163 = arith.mulf %158, %162 : vector<256x32xf32>
    %164 = vector.broadcast %143 : vector<1x32xf32> to vector<256x32xf32>
    %165 = arith.mulf %163, %164 : vector<256x32xf32>
    %166 = vector.broadcast %145 : vector<1x32xf32> to vector<256x32xf32>
    %167 = arith.addf %165, %166 : vector<256x32xf32>
    %168 = arith.truncf %167 : vector<256x32xf32> to vector<256x32xbf16>
    %169 = vector.extract_strided_slice %168 {offsets = [0, 0], sizes = [16, 32], strides = [1, 1]} : vector<256x32xbf16> to vector<16x32xbf16>
    %170 = vector.extract_strided_slice %168 {offsets = [16, 0], sizes = [16, 32], strides = [1, 1]} : vector<256x32xbf16> to vector<16x32xbf16>
    %171 = vector.extract_strided_slice %168 {offsets = [32, 0], sizes = [16, 32], strides = [1, 1]} : vector<256x32xbf16> to vector<16x32xbf16>
    %172 = vector.extract_strided_slice %168 {offsets = [48, 0], sizes = [16, 32], strides = [1, 1]} : vector<256x32xbf16> to vector<16x32xbf16>
    %173 = vector.extract_strided_slice %168 {offsets = [64, 0], sizes = [16, 32], strides = [1, 1]} : vector<256x32xbf16> to vector<16x32xbf16>
    %174 = vector.extract_strided_slice %168 {offsets = [80, 0], sizes = [16, 32], strides = [1, 1]} : vector<256x32xbf16> to vector<16x32xbf16>
    %175 = vector.extract_strided_slice %168 {offsets = [96, 0], sizes = [16, 32], strides = [1, 1]} : vector<256x32xbf16> to vector<16x32xbf16>
    %176 = vector.extract_strided_slice %168 {offsets = [112, 0], sizes = [16, 32], strides = [1, 1]} : vector<256x32xbf16> to vector<16x32xbf16>
    %177 = vector.extract_strided_slice %168 {offsets = [128, 0], sizes = [16, 32], strides = [1, 1]} : vector<256x32xbf16> to vector<16x32xbf16>
    %178 = vector.extract_strided_slice %168 {offsets = [144, 0], sizes = [16, 32], strides = [1, 1]} : vector<256x32xbf16> to vector<16x32xbf16>
    %179 = vector.extract_strided_slice %168 {offsets = [160, 0], sizes = [16, 32], strides = [1, 1]} : vector<256x32xbf16> to vector<16x32xbf16>
    %180 = vector.extract_strided_slice %168 {offsets = [176, 0], sizes = [16, 32], strides = [1, 1]} : vector<256x32xbf16> to vector<16x32xbf16>
    %181 = vector.extract_strided_slice %168 {offsets = [192, 0], sizes = [16, 32], strides = [1, 1]} : vector<256x32xbf16> to vector<16x32xbf16>
    %182 = vector.extract_strided_slice %168 {offsets = [208, 0], sizes = [16, 32], strides = [1, 1]} : vector<256x32xbf16> to vector<16x32xbf16>
    %183 = vector.extract_strided_slice %168 {offsets = [224, 0], sizes = [16, 32], strides = [1, 1]} : vector<256x32xbf16> to vector<16x32xbf16>
    %184 = vector.extract_strided_slice %168 {offsets = [240, 0], sizes = [16, 32], strides = [1, 1]} : vector<256x32xbf16> to vector<16x32xbf16>
    %185 = tpu.concatenate %169, %170, %171, %172, %173, %174, %175, %176, %177, %178, %179, %180, %181, %182, %183, %184 in 1 : vector<16x32xbf16>, vector<16x32xbf16>, vector<16x32xbf16>, vector<16x32xbf16>, vector<16x32xbf16>, vector<16x32xbf16>, vector<16x32xbf16>, vector<16x32xbf16>, vector<16x32xbf16>, vector<16x32xbf16>, vector<16x32xbf16>, vector<16x32xbf16>, vector<16x32xbf16>, vector<16x32xbf16>, vector<16x32xbf16>, vector<16x32xbf16> -> vector<16x512xbf16>
    %c1_71 = arith.constant 1 : index
    %c0_72 = arith.constant 0 : index
    %c0_73 = arith.constant 0 : index
    %186 = vector.load %arg6[%c1_71, %c0_72, %c0_73] : memref<2x16x16xbf16, #tpu.memory_space<vmem>>, vector<1x16x16xbf16>
    %187 = vector.shape_cast %186 : vector<1x16x16xbf16> to vector<16x16xbf16>
    %cst_74 = arith.constant dense<0.000000e+00> : vector<16x512xf32>
    %188 = tpu.matmul %187, %185, %cst_74 {dimension_numbers = #tpu.dot_dimension_numbers<[1], [0], [0], [1], [0, 0, 1, 1], [], []>} : vector<16x16xbf16>, vector<16x512xbf16>, vector<16x512xf32> -> vector<16x512xf32>
    %c1_75 = arith.constant 1 : index
    %c0_76 = arith.constant 0 : index
    %c0_77 = arith.constant 0 : index
    %189 = vector.load %arg7[%c1_75, %c0_76, %c0_77] : memref<2x16x1xf32, #tpu.memory_space<vmem>>, vector<1x16x1xf32>
    %190 = vector.shape_cast %189 : vector<1x16x1xf32> to vector<16x1xf32>
    %191 = vector.broadcast %190 : vector<16x1xf32> to vector<16x512xf32>
    %192 = arith.addf %188, %191 : vector<16x512xf32>
    %cst_78 = arith.constant 5.000000e-01 : f32
    %193 = vector.broadcast %cst_78 : f32 to vector<16x512xf32>
    %194 = arith.mulf %193, %192 : vector<16x512xf32>
    %cst_79 = arith.constant 0.707106769 : f32
    %195 = vector.broadcast %cst_79 : f32 to vector<16x512xf32>
    %196 = arith.mulf %192, %195 : vector<16x512xf32>
    %197 = math.erf %196 : vector<16x512xf32>
    %cst_80 = arith.constant 1.000000e+00 : f32
    %198 = vector.broadcast %cst_80 : f32 to vector<16x512xf32>
    %199 = arith.addf %198, %197 : vector<16x512xf32>
    %200 = arith.mulf %194, %199 : vector<16x512xf32>
    %201 = arith.truncf %200 : vector<16x512xf32> to vector<16x512xbf16>
    %c1_81 = arith.constant 1 : index
    %c0_82 = arith.constant 0 : index
    %c0_83 = arith.constant 0 : index
    %202 = vector.load %arg8[%c1_81, %c0_82, %c0_83] : memref<2x16x16xbf16, #tpu.memory_space<vmem>>, vector<1x16x16xbf16>
    %203 = vector.shape_cast %202 : vector<1x16x16xbf16> to vector<16x16xbf16>
    %cst_84 = arith.constant dense<0.000000e+00> : vector<16x512xf32>
    %204 = tpu.matmul %203, %201, %cst_84 {dimension_numbers = #tpu.dot_dimension_numbers<[1], [0], [0], [1], [0, 0, 1, 1], [], []>} : vector<16x16xbf16>, vector<16x512xbf16>, vector<16x512xf32> -> vector<16x512xf32>
    %c1_85 = arith.constant 1 : index
    %c0_86 = arith.constant 0 : index
    %c0_87 = arith.constant 0 : index
    %205 = vector.load %arg9[%c1_85, %c0_86, %c0_87] : memref<2x16x1xf32, #tpu.memory_space<vmem>>, vector<1x16x1xf32>
    %206 = vector.shape_cast %205 : vector<1x16x1xf32> to vector<16x1xf32>
    %207 = vector.broadcast %206 : vector<16x1xf32> to vector<16x512xf32>
    %208 = arith.addf %204, %207 : vector<16x512xf32>
    %209 = vector.extract_strided_slice %208 {offsets = [0, 0], sizes = [16, 32], strides = [1, 1]} : vector<16x512xf32> to vector<16x32xf32>
    %210 = vector.extract_strided_slice %208 {offsets = [0, 32], sizes = [16, 32], strides = [1, 1]} : vector<16x512xf32> to vector<16x32xf32>
    %211 = vector.extract_strided_slice %208 {offsets = [0, 64], sizes = [16, 32], strides = [1, 1]} : vector<16x512xf32> to vector<16x32xf32>
    %212 = vector.extract_strided_slice %208 {offsets = [0, 96], sizes = [16, 32], strides = [1, 1]} : vector<16x512xf32> to vector<16x32xf32>
    %213 = vector.extract_strided_slice %208 {offsets = [0, 128], sizes = [16, 32], strides = [1, 1]} : vector<16x512xf32> to vector<16x32xf32>
    %214 = vector.extract_strided_slice %208 {offsets = [0, 160], sizes = [16, 32], strides = [1, 1]} : vector<16x512xf32> to vector<16x32xf32>
    %215 = vector.extract_strided_slice %208 {offsets = [0, 192], sizes = [16, 32], strides = [1, 1]} : vector<16x512xf32> to vector<16x32xf32>
    %216 = vector.extract_strided_slice %208 {offsets = [0, 224], sizes = [16, 32], strides = [1, 1]} : vector<16x512xf32> to vector<16x32xf32>
    %217 = vector.extract_strided_slice %208 {offsets = [0, 256], sizes = [16, 32], strides = [1, 1]} : vector<16x512xf32> to vector<16x32xf32>
    %218 = vector.extract_strided_slice %208 {offsets = [0, 288], sizes = [16, 32], strides = [1, 1]} : vector<16x512xf32> to vector<16x32xf32>
    %219 = vector.extract_strided_slice %208 {offsets = [0, 320], sizes = [16, 32], strides = [1, 1]} : vector<16x512xf32> to vector<16x32xf32>
    %220 = vector.extract_strided_slice %208 {offsets = [0, 352], sizes = [16, 32], strides = [1, 1]} : vector<16x512xf32> to vector<16x32xf32>
    %221 = vector.extract_strided_slice %208 {offsets = [0, 384], sizes = [16, 32], strides = [1, 1]} : vector<16x512xf32> to vector<16x32xf32>
    %222 = vector.extract_strided_slice %208 {offsets = [0, 416], sizes = [16, 32], strides = [1, 1]} : vector<16x512xf32> to vector<16x32xf32>
    %223 = vector.extract_strided_slice %208 {offsets = [0, 448], sizes = [16, 32], strides = [1, 1]} : vector<16x512xf32> to vector<16x32xf32>
    %224 = vector.extract_strided_slice %208 {offsets = [0, 480], sizes = [16, 32], strides = [1, 1]} : vector<16x512xf32> to vector<16x32xf32>
    %225 = tpu.concatenate %209, %210, %211, %212, %213, %214, %215, %216, %217, %218, %219, %220, %221, %222, %223, %224 in 0 : vector<16x32xf32>, vector<16x32xf32>, vector<16x32xf32>, vector<16x32xf32>, vector<16x32xf32>, vector<16x32xf32>, vector<16x32xf32>, vector<16x32xf32>, vector<16x32xf32>, vector<16x32xf32>, vector<16x32xf32>, vector<16x32xf32>, vector<16x32xf32>, vector<16x32xf32>, vector<16x32xf32>, vector<16x32xf32> -> vector<256x32xf32>
    %226 = arith.addf %141, %225 : vector<256x32xf32>
    %c1_88 = arith.constant 1 : index
    %c0_89 = arith.constant 0 : index
    %c0_90 = arith.constant 0 : index
    %227 = vector.load %arg10[%c1_88, %c0_89, %c0_90] : memref<2x1x32xf32, #tpu.memory_space<vmem>>, vector<1x1x32xf32>
    %228 = vector.shape_cast %227 : vector<1x1x32xf32> to vector<1x32xf32>
    %c1_91 = arith.constant 1 : index
    %c0_92 = arith.constant 0 : index
    %c0_93 = arith.constant 0 : index
    %229 = vector.load %arg11[%c1_91, %c0_92, %c0_93] : memref<2x1x32xf32, #tpu.memory_space<vmem>>, vector<1x1x32xf32>
    %230 = vector.shape_cast %229 : vector<1x1x32xf32> to vector<1x32xf32>
    %cst_94 = arith.constant dense<0.000000e+00> : vector<256xf32>
    %231 = vector.multi_reduction <add>, %226, %cst_94 [1] : vector<256x32xf32> to vector<256xf32>
    %232 = vector.shape_cast %231 : vector<256xf32> to vector<256x1xf32>
    %cst_95 = arith.constant 3.200000e+01 : f32
    %233 = vector.broadcast %cst_95 : f32 to vector<256x1xf32>
    %234 = arith.divf %232, %233 : vector<256x1xf32>
    %235 = vector.broadcast %234 : vector<256x1xf32> to vector<256x32xf32>
    %236 = arith.subf %226, %235 : vector<256x32xf32>
    %237 = arith.mulf %236, %236 : vector<256x32xf32>
    %cst_96 = arith.constant dense<0.000000e+00> : vector<256xf32>
    %238 = vector.multi_reduction <add>, %237, %cst_96 [1] : vector<256x32xf32> to vector<256xf32>
    %239 = vector.shape_cast %238 : vector<256xf32> to vector<256x1xf32>
    %cst_97 = arith.constant 3.200000e+01 : f32
    %240 = vector.broadcast %cst_97 : f32 to vector<256x1xf32>
    %241 = arith.divf %239, %240 : vector<256x1xf32>
    %242 = vector.broadcast %234 : vector<256x1xf32> to vector<256x32xf32>
    %243 = arith.subf %226, %242 : vector<256x32xf32>
    %cst_98 = arith.constant 9.99999974E-6 : f32
    %244 = vector.broadcast %cst_98 : f32 to vector<256x1xf32>
    %245 = arith.addf %241, %244 : vector<256x1xf32>
    %246 = math.rsqrt %245 : vector<256x1xf32>
    %247 = vector.broadcast %246 : vector<256x1xf32> to vector<256x32xf32>
    %248 = arith.mulf %243, %247 : vector<256x32xf32>
    %249 = vector.broadcast %228 : vector<1x32xf32> to vector<256x32xf32>
    %250 = arith.mulf %248, %249 : vector<256x32xf32>
    %251 = vector.broadcast %230 : vector<1x32xf32> to vector<256x32xf32>
    %252 = arith.addf %250, %251 : vector<256x32xf32>
    %253 = arith.truncf %252 : vector<256x32xf32> to vector<256x32xbf16>
    %c1_99 = arith.constant 1 : index
    %c0_100 = arith.constant 0 : index
    %c0_101 = arith.constant 0 : index
    %254 = vector.load %arg12[%c1_99, %c0_100, %c0_101] : memref<2x32x64xbf16, #tpu.memory_space<vmem>>, vector<1x32x64xbf16>
    %255 = vector.shape_cast %254 : vector<1x32x64xbf16> to vector<32x64xbf16>
    %cst_102 = arith.constant dense<0.000000e+00> : vector<256x64xf32>
    %256 = tpu.matmul %253, %255, %cst_102 {dimension_numbers = #tpu.dot_dimension_numbers<[1], [0], [0], [1], [0, 0, 1, 1], [], []>} : vector<256x32xbf16>, vector<32x64xbf16>, vector<256x64xf32> -> vector<256x64xf32>
    %c1_103 = arith.constant 1 : index
    %c0_104 = arith.constant 0 : index
    %c0_105 = arith.constant 0 : index
    %257 = vector.load %arg13[%c1_103, %c0_104, %c0_105] : memref<2x1x64xf32, #tpu.memory_space<vmem>>, vector<1x1x64xf32>
    %258 = vector.shape_cast %257 : vector<1x1x64xf32> to vector<1x64xf32>
    %259 = vector.broadcast %258 : vector<1x64xf32> to vector<256x64xf32>
    %260 = arith.addf %256, %259 : vector<256x64xf32>
    %cst_106 = arith.constant 5.000000e-01 : f32
    %261 = vector.broadcast %cst_106 : f32 to vector<256x64xf32>
    %262 = arith.mulf %261, %260 : vector<256x64xf32>
    %cst_107 = arith.constant 0.707106769 : f32
    %263 = vector.broadcast %cst_107 : f32 to vector<256x64xf32>
    %264 = arith.mulf %260, %263 : vector<256x64xf32>
    %265 = math.erf %264 : vector<256x64xf32>
    %cst_108 = arith.constant 1.000000e+00 : f32
    %266 = vector.broadcast %cst_108 : f32 to vector<256x64xf32>
    %267 = arith.addf %266, %265 : vector<256x64xf32>
    %268 = arith.mulf %262, %267 : vector<256x64xf32>
    %269 = arith.truncf %268 : vector<256x64xf32> to vector<256x64xbf16>
    %c1_109 = arith.constant 1 : index
    %c0_110 = arith.constant 0 : index
    %c0_111 = arith.constant 0 : index
    %270 = vector.load %arg14[%c1_109, %c0_110, %c0_111] : memref<2x64x32xbf16, #tpu.memory_space<vmem>>, vector<1x64x32xbf16>
    %271 = vector.shape_cast %270 : vector<1x64x32xbf16> to vector<64x32xbf16>
    %cst_112 = arith.constant dense<0.000000e+00> : vector<256x32xf32>
    %272 = tpu.matmul %269, %271, %cst_112 {dimension_numbers = #tpu.dot_dimension_numbers<[1], [0], [0], [1], [0, 0, 1, 1], [], []>} : vector<256x64xbf16>, vector<64x32xbf16>, vector<256x32xf32> -> vector<256x32xf32>
    %c1_113 = arith.constant 1 : index
    %c0_114 = arith.constant 0 : index
    %c0_115 = arith.constant 0 : index
    %273 = vector.load %arg15[%c1_113, %c0_114, %c0_115] : memref<2x1x32xf32, #tpu.memory_space<vmem>>, vector<1x1x32xf32>
    %274 = vector.shape_cast %273 : vector<1x1x32xf32> to vector<1x32xf32>
    %275 = vector.broadcast %274 : vector<1x32xf32> to vector<256x32xf32>
    %276 = arith.addf %272, %275 : vector<256x32xf32>
    %277 = arith.addf %226, %276 : vector<256x32xf32>
    %c0_116 = arith.constant 0 : index
    %c0_117 = arith.constant 0 : index
    %278 = vector.load %arg16[%c0_116, %c0_117] : memref<1x32xf32, #tpu.memory_space<vmem>>, vector<1x32xf32>
    %c0_118 = arith.constant 0 : index
    %c0_119 = arith.constant 0 : index
    %279 = vector.load %arg17[%c0_118, %c0_119] : memref<1x32xf32, #tpu.memory_space<vmem>>, vector<1x32xf32>
    %cst_120 = arith.constant dense<0.000000e+00> : vector<256xf32>
    %280 = vector.multi_reduction <add>, %277, %cst_120 [1] : vector<256x32xf32> to vector<256xf32>
    %281 = vector.shape_cast %280 : vector<256xf32> to vector<256x1xf32>
    %cst_121 = arith.constant 3.200000e+01 : f32
    %282 = vector.broadcast %cst_121 : f32 to vector<256x1xf32>
    %283 = arith.divf %281, %282 : vector<256x1xf32>
    %284 = vector.broadcast %283 : vector<256x1xf32> to vector<256x32xf32>
    %285 = arith.subf %277, %284 : vector<256x32xf32>
    %286 = arith.mulf %285, %285 : vector<256x32xf32>
    %cst_122 = arith.constant dense<0.000000e+00> : vector<256xf32>
    %287 = vector.multi_reduction <add>, %286, %cst_122 [1] : vector<256x32xf32> to vector<256xf32>
    %288 = vector.shape_cast %287 : vector<256xf32> to vector<256x1xf32>
    %cst_123 = arith.constant 3.200000e+01 : f32
    %289 = vector.broadcast %cst_123 : f32 to vector<256x1xf32>
    %290 = arith.divf %288, %289 : vector<256x1xf32>
    %291 = vector.broadcast %283 : vector<256x1xf32> to vector<256x32xf32>
    %292 = arith.subf %277, %291 : vector<256x32xf32>
    %cst_124 = arith.constant 9.99999974E-6 : f32
    %293 = vector.broadcast %cst_124 : f32 to vector<256x1xf32>
    %294 = arith.addf %290, %293 : vector<256x1xf32>
    %295 = math.rsqrt %294 : vector<256x1xf32>
    %296 = vector.broadcast %295 : vector<256x1xf32> to vector<256x32xf32>
    %297 = arith.mulf %292, %296 : vector<256x32xf32>
    %298 = vector.broadcast %278 : vector<1x32xf32> to vector<256x32xf32>
    %299 = arith.mulf %297, %298 : vector<256x32xf32>
    %300 = vector.broadcast %279 : vector<1x32xf32> to vector<256x32xf32>
    %301 = arith.addf %299, %300 : vector<256x32xf32>
    %302 = vector.extract_strided_slice %301 {offsets = [0, 0], sizes = [16, 32], strides = [1, 1]} : vector<256x32xf32> to vector<16x32xf32>
    %cst_125 = arith.constant dense<0.000000e+00> : vector<32xf32>
    %303 = vector.multi_reduction <add>, %302, %cst_125 [0] : vector<16x32xf32> to vector<32xf32>
    %304 = vector.shape_cast %303 : vector<32xf32> to vector<1x32xf32>
    %305 = vector.extract_strided_slice %301 {offsets = [16, 0], sizes = [16, 32], strides = [1, 1]} : vector<256x32xf32> to vector<16x32xf32>
    %cst_126 = arith.constant dense<0.000000e+00> : vector<32xf32>
    %306 = vector.multi_reduction <add>, %305, %cst_126 [0] : vector<16x32xf32> to vector<32xf32>
    %307 = vector.shape_cast %306 : vector<32xf32> to vector<1x32xf32>
    %308 = vector.extract_strided_slice %301 {offsets = [32, 0], sizes = [16, 32], strides = [1, 1]} : vector<256x32xf32> to vector<16x32xf32>
    %cst_127 = arith.constant dense<0.000000e+00> : vector<32xf32>
    %309 = vector.multi_reduction <add>, %308, %cst_127 [0] : vector<16x32xf32> to vector<32xf32>
    %310 = vector.shape_cast %309 : vector<32xf32> to vector<1x32xf32>
    %311 = vector.extract_strided_slice %301 {offsets = [48, 0], sizes = [16, 32], strides = [1, 1]} : vector<256x32xf32> to vector<16x32xf32>
    %cst_128 = arith.constant dense<0.000000e+00> : vector<32xf32>
    %312 = vector.multi_reduction <add>, %311, %cst_128 [0] : vector<16x32xf32> to vector<32xf32>
    %313 = vector.shape_cast %312 : vector<32xf32> to vector<1x32xf32>
    %314 = vector.extract_strided_slice %301 {offsets = [64, 0], sizes = [16, 32], strides = [1, 1]} : vector<256x32xf32> to vector<16x32xf32>
    %cst_129 = arith.constant dense<0.000000e+00> : vector<32xf32>
    %315 = vector.multi_reduction <add>, %314, %cst_129 [0] : vector<16x32xf32> to vector<32xf32>
    %316 = vector.shape_cast %315 : vector<32xf32> to vector<1x32xf32>
    %317 = vector.extract_strided_slice %301 {offsets = [80, 0], sizes = [16, 32], strides = [1, 1]} : vector<256x32xf32> to vector<16x32xf32>
    %cst_130 = arith.constant dense<0.000000e+00> : vector<32xf32>
    %318 = vector.multi_reduction <add>, %317, %cst_130 [0] : vector<16x32xf32> to vector<32xf32>
    %319 = vector.shape_cast %318 : vector<32xf32> to vector<1x32xf32>
    %320 = vector.extract_strided_slice %301 {offsets = [96, 0], sizes = [16, 32], strides = [1, 1]} : vector<256x32xf32> to vector<16x32xf32>
    %cst_131 = arith.constant dense<0.000000e+00> : vector<32xf32>
    %321 = vector.multi_reduction <add>, %320, %cst_131 [0] : vector<16x32xf32> to vector<32xf32>
    %322 = vector.shape_cast %321 : vector<32xf32> to vector<1x32xf32>
    %323 = vector.extract_strided_slice %301 {offsets = [112, 0], sizes = [16, 32], strides = [1, 1]} : vector<256x32xf32> to vector<16x32xf32>
    %cst_132 = arith.constant dense<0.000000e+00> : vector<32xf32>
    %324 = vector.multi_reduction <add>, %323, %cst_132 [0] : vector<16x32xf32> to vector<32xf32>
    %325 = vector.shape_cast %324 : vector<32xf32> to vector<1x32xf32>
    %326 = vector.extract_strided_slice %301 {offsets = [128, 0], sizes = [16, 32], strides = [1, 1]} : vector<256x32xf32> to vector<16x32xf32>
    %cst_133 = arith.constant dense<0.000000e+00> : vector<32xf32>
    %327 = vector.multi_reduction <add>, %326, %cst_133 [0] : vector<16x32xf32> to vector<32xf32>
    %328 = vector.shape_cast %327 : vector<32xf32> to vector<1x32xf32>
    %329 = vector.extract_strided_slice %301 {offsets = [144, 0], sizes = [16, 32], strides = [1, 1]} : vector<256x32xf32> to vector<16x32xf32>
    %cst_134 = arith.constant dense<0.000000e+00> : vector<32xf32>
    %330 = vector.multi_reduction <add>, %329, %cst_134 [0] : vector<16x32xf32> to vector<32xf32>
    %331 = vector.shape_cast %330 : vector<32xf32> to vector<1x32xf32>
    %332 = vector.extract_strided_slice %301 {offsets = [160, 0], sizes = [16, 32], strides = [1, 1]} : vector<256x32xf32> to vector<16x32xf32>
    %cst_135 = arith.constant dense<0.000000e+00> : vector<32xf32>
    %333 = vector.multi_reduction <add>, %332, %cst_135 [0] : vector<16x32xf32> to vector<32xf32>
    %334 = vector.shape_cast %333 : vector<32xf32> to vector<1x32xf32>
    %335 = vector.extract_strided_slice %301 {offsets = [176, 0], sizes = [16, 32], strides = [1, 1]} : vector<256x32xf32> to vector<16x32xf32>
    %cst_136 = arith.constant dense<0.000000e+00> : vector<32xf32>
    %336 = vector.multi_reduction <add>, %335, %cst_136 [0] : vector<16x32xf32> to vector<32xf32>
    %337 = vector.shape_cast %336 : vector<32xf32> to vector<1x32xf32>
    %338 = vector.extract_strided_slice %301 {offsets = [192, 0], sizes = [16, 32], strides = [1, 1]} : vector<256x32xf32> to vector<16x32xf32>
    %cst_137 = arith.constant dense<0.000000e+00> : vector<32xf32>
    %339 = vector.multi_reduction <add>, %338, %cst_137 [0] : vector<16x32xf32> to vector<32xf32>
    %340 = vector.shape_cast %339 : vector<32xf32> to vector<1x32xf32>
    %341 = vector.extract_strided_slice %301 {offsets = [208, 0], sizes = [16, 32], strides = [1, 1]} : vector<256x32xf32> to vector<16x32xf32>
    %cst_138 = arith.constant dense<0.000000e+00> : vector<32xf32>
    %342 = vector.multi_reduction <add>, %341, %cst_138 [0] : vector<16x32xf32> to vector<32xf32>
    %343 = vector.shape_cast %342 : vector<32xf32> to vector<1x32xf32>
    %344 = vector.extract_strided_slice %301 {offsets = [224, 0], sizes = [16, 32], strides = [1, 1]} : vector<256x32xf32> to vector<16x32xf32>
    %cst_139 = arith.constant dense<0.000000e+00> : vector<32xf32>
    %345 = vector.multi_reduction <add>, %344, %cst_139 [0] : vector<16x32xf32> to vector<32xf32>
    %346 = vector.shape_cast %345 : vector<32xf32> to vector<1x32xf32>
    %347 = vector.extract_strided_slice %301 {offsets = [240, 0], sizes = [16, 32], strides = [1, 1]} : vector<256x32xf32> to vector<16x32xf32>
    %cst_140 = arith.constant dense<0.000000e+00> : vector<32xf32>
    %348 = vector.multi_reduction <add>, %347, %cst_140 [0] : vector<16x32xf32> to vector<32xf32>
    %349 = vector.shape_cast %348 : vector<32xf32> to vector<1x32xf32>
    %350 = tpu.concatenate %304, %307, %310, %313, %316, %319, %322, %325, %328, %331, %334, %337, %340, %343, %346, %349 in 0 : vector<1x32xf32>, vector<1x32xf32>, vector<1x32xf32>, vector<1x32xf32>, vector<1x32xf32>, vector<1x32xf32>, vector<1x32xf32>, vector<1x32xf32>, vector<1x32xf32>, vector<1x32xf32>, vector<1x32xf32>, vector<1x32xf32>, vector<1x32xf32>, vector<1x32xf32>, vector<1x32xf32>, vector<1x32xf32> -> vector<16x32xf32>
    %cst_141 = arith.constant 6.250000e-02 : f32
    %351 = vector.broadcast %cst_141 : f32 to vector<16x32xf32>
    %352 = arith.mulf %350, %351 : vector<16x32xf32>
    %c0_142 = arith.constant 0 : index
    %c0_143 = arith.constant 0 : index
    %353 = vector.load %arg18[%c0_142, %c0_143] : memref<32x128xf32, #tpu.memory_space<vmem>>, vector<32x128xf32>
    %cst_144 = arith.constant dense<0.000000e+00> : vector<16x128xf32>
    %354 = tpu.matmul %352, %353, %cst_144 {dimension_numbers = #tpu.dot_dimension_numbers<[1], [0], [0], [1], [0, 0, 1, 1], [], []>} : vector<16x32xf32>, vector<32x128xf32>, vector<16x128xf32> -> vector<16x128xf32>
    %c0_145 = arith.constant 0 : index
    %c0_146 = arith.constant 0 : index
    %355 = vector.load %arg19[%c0_145, %c0_146] : memref<1x128xf32, #tpu.memory_space<vmem>>, vector<1x128xf32>
    %356 = vector.broadcast %355 : vector<1x128xf32> to vector<16x128xf32>
    %357 = arith.addf %354, %356 : vector<16x128xf32>
    %c0_147 = arith.constant 0 : index
    %c0_148 = arith.constant 0 : index
    %358 = vector.load %arg20[%c0_147, %c0_148] : memref<16x128xf32, #tpu.memory_space<vmem>>, vector<16x128xf32>
    tpu.vector_store %arg20[%c0_147, %c0_148], %357 {strides = array<i32>} : memref<16x128xf32, #tpu.memory_space<vmem>>, vector<16x128xf32>,
    return
  }
  func.func @transform_0(%arg0: i32) -> (i32, i32) {
    %c0_i32 = arith.constant 0 : i32
    %c0_i32_0 = arith.constant 0 : i32
    return %arg0, %c0_i32 : i32, i32
  }
  func.func @transform_1(%arg0: i32) -> (i32, i32) {
    %c0_i32 = arith.constant 0 : i32
    %c0_i32_0 = arith.constant 0 : i32
    %c0_i32_1 = arith.constant 0 : i32
    return %c0_i32, %c0_i32_0 : i32, i32
  }
  func.func @transform_2(%arg0: i32) -> (i32, i32) {
    %c0_i32 = arith.constant 0 : i32
    %c0_i32_0 = arith.constant 0 : i32
    %c0_i32_1 = arith.constant 0 : i32
    return %c0_i32, %c0_i32_0 : i32, i32
  }
  func.func @transform_3(%arg0: i32) -> (i32, i32, i32) {
    %c0_i32 = arith.constant 0 : i32
    %c0_i32_0 = arith.constant 0 : i32
    %c0_i32_1 = arith.constant 0 : i32
    %c0_i32_2 = arith.constant 0 : i32
    return %c0_i32, %c0_i32_0, %c0_i32_1 : i32, i32, i32
  }
  func.func @transform_4(%arg0: i32) -> (i32, i32, i32) {
    %c0_i32 = arith.constant 0 : i32
    %c0_i32_0 = arith.constant 0 : i32
    %c0_i32_1 = arith.constant 0 : i32
    %c0_i32_2 = arith.constant 0 : i32
    return %c0_i32, %c0_i32_0, %c0_i32_1 : i32, i32, i32
  }
  func.func @transform_5(%arg0: i32) -> (i32, i32, i32) {
    %c0_i32 = arith.constant 0 : i32
    %c0_i32_0 = arith.constant 0 : i32
    %c0_i32_1 = arith.constant 0 : i32
    %c0_i32_2 = arith.constant 0 : i32
    return %c0_i32, %c0_i32_0, %c0_i32_1 : i32, i32, i32
  }
  func.func @transform_6(%arg0: i32) -> (i32, i32, i32) {
    %c0_i32 = arith.constant 0 : i32
    %c0_i32_0 = arith.constant 0 : i32
    %c0_i32_1 = arith.constant 0 : i32
    %c0_i32_2 = arith.constant 0 : i32
    return %c0_i32, %c0_i32_0, %c0_i32_1 : i32, i32, i32
  }
  func.func @transform_7(%arg0: i32) -> (i32, i32, i32) {
    %c0_i32 = arith.constant 0 : i32
    %c0_i32_0 = arith.constant 0 : i32
    %c0_i32_1 = arith.constant 0 : i32
    %c0_i32_2 = arith.constant 0 : i32
    return %c0_i32, %c0_i32_0, %c0_i32_1 : i32, i32, i32
  }
  func.func @transform_8(%arg0: i32) -> (i32, i32, i32) {
    %c0_i32 = arith.constant 0 : i32
    %c0_i32_0 = arith.constant 0 : i32
    %c0_i32_1 = arith.constant 0 : i32
    %c0_i32_2 = arith.constant 0 : i32
    return %c0_i32, %c0_i32_0, %c0_i32_1 : i32, i32, i32
  }
  func.func @transform_9(%arg0: i32) -> (i32, i32, i32) {
    %c0_i32 = arith.constant 0 : i32
    %c0_i32_0 = arith.constant 0 : i32
    %c0_i32_1 = arith.constant 0 : i32
    %c0_i32_2 = arith.constant 0 : i32
    return %c0_i32, %c0_i32_0, %c0_i32_1 : i32, i32, i32
  }
  func.func @transform_10(%arg0: i32) -> (i32, i32, i32) {
    %c0_i32 = arith.constant 0 : i32
    %c0_i32_0 = arith.constant 0 : i32
    %c0_i32_1 = arith.constant 0 : i32
    %c0_i32_2 = arith.constant 0 : i32
    return %c0_i32, %c0_i32_0, %c0_i32_1 : i32, i32, i32
  }
  func.func @transform_11(%arg0: i32) -> (i32, i32, i32) {
    %c0_i32 = arith.constant 0 : i32
    %c0_i32_0 = arith.constant 0 : i32
    %c0_i32_1 = arith.constant 0 : i32
    %c0_i32_2 = arith.constant 0 : i32
    return %c0_i32, %c0_i32_0, %c0_i32_1 : i32, i32, i32
  }
  func.func @transform_12(%arg0: i32) -> (i32, i32, i32) {
    %c0_i32 = arith.constant 0 : i32
    %c0_i32_0 = arith.constant 0 : i32
    %c0_i32_1 = arith.constant 0 : i32
    %c0_i32_2 = arith.constant 0 : i32
    return %c0_i32, %c0_i32_0, %c0_i32_1 : i32, i32, i32
  }
  func.func @transform_13(%arg0: i32) -> (i32, i32, i32) {
    %c0_i32 = arith.constant 0 : i32
    %c0_i32_0 = arith.constant 0 : i32
    %c0_i32_1 = arith.constant 0 : i32
    %c0_i32_2 = arith.constant 0 : i32
    return %c0_i32, %c0_i32_0, %c0_i32_1 : i32, i32, i32
  }
  func.func @transform_14(%arg0: i32) -> (i32, i32, i32) {
    %c0_i32 = arith.constant 0 : i32
    %c0_i32_0 = arith.constant 0 : i32
    %c0_i32_1 = arith.constant 0 : i32
    %c0_i32_2 = arith.constant 0 : i32
    return %c0_i32, %c0_i32_0, %c0_i32_1 : i32, i32, i32
  }
  func.func @transform_15(%arg0: i32) -> (i32, i32) {
    %c0_i32 = arith.constant 0 : i32
    %c0_i32_0 = arith.constant 0 : i32
    %c0_i32_1 = arith.constant 0 : i32
    return %c0_i32, %c0_i32_0 : i32, i32
  }
  func.func @transform_16(%arg0: i32) -> (i32, i32) {
    %c0_i32 = arith.constant 0 : i32
    %c0_i32_0 = arith.constant 0 : i32
    %c0_i32_1 = arith.constant 0 : i32
    return %c0_i32, %c0_i32_0 : i32, i32
  }
  func.func @transform_17(%arg0: i32) -> (i32, i32) {
    %c0_i32 = arith.constant 0 : i32
    %c0_i32_0 = arith.constant 0 : i32
    %c0_i32_1 = arith.constant 0 : i32
    return %c0_i32, %c0_i32_0 : i32, i32
  }
  func.func @transform_18(%arg0: i32) -> (i32, i32) {
    %c0_i32 = arith.constant 0 : i32
    %c0_i32_0 = arith.constant 0 : i32
    %c0_i32_1 = arith.constant 0 : i32
    return %c0_i32, %c0_i32_0 : i32, i32
  }
  func.func @transform_19(%arg0: i32) -> (i32, i32) {
    %c0_i32 = arith.constant 0 : i32
    %c0_i32_0 = arith.constant 0 : i32
    return %arg0, %c0_i32 : i32, i32
  }
}

</mosaic_0001>

<bundles_post_ra>
// kernel: mixer_model_forward.1
= control target key start
LH: loop header
LB: loop body
LE: loop exit
PB: predicated region body
PF: predicated region fallthrough
CT: control target
= control target key end

     0   :  { %s10200_s0 = inlined_call_operand.vmem [shape: bf16[512,128], index: 0, kind: input, shape index: {}]   ;;  %s10201_s1 = inlined_call_operand.vmem [shape: bf16[128,32], index: 1, kind: input, shape index: {}]   ;;  %s10202_s2 = inlined_call_operand.vmem [shape: f32[1,32], index: 2, kind: input, shape index: {}]   ;;  %s10203_s3 = inlined_call_operand.vmem [shape: f32[2,1,32], index: 3, kind: input, shape index: {}]   ;;  %s10204_s4 = inlined_call_operand.vmem [shape: f32[2,1,32], index: 4, kind: input, shape index: {}]   ;;  %s10205_s5 = inlined_call_operand.vmem [shape: bf16[2,16,16], index: 5, kind: input, shape index: {}]   ;;  %s10206_s6 = inlined_call_operand.vmem [shape: f32[2,16,1], index: 6, kind: input, shape index: {}]   ;;  %s10207_s7 = inlined_call_operand.vmem [shape: bf16[2,16,16], index: 7, kind: input, shape index: {}]   ;;  %s10208_s8 = inlined_call_operand.vmem [shape: f32[2,16,1], index: 8, kind: input, shape index: {}]   ;;  %s10209_s9 = inlined_call_operand.vmem [shape: f32[2,1,32], index: 9, kind: input, shape index: {}]   ;;  %s10210_s10 = inlined_call_operand.vmem [shape: f32[2,1,32], index: 10, kind: input, shape index: {}]   ;;  %s10211_s11 = inlined_call_operand.vmem [shape: bf16[2,32,64], index: 11, kind: input, shape index: {}]   ;;  %s10212_s12 = inlined_call_operand.vmem [shape: f32[2,1,64], index: 12, kind: input, shape index: {}]   ;;  %s10213_s13 = inlined_call_operand.vmem [shape: bf16[2,64,32], index: 13, kind: input, shape index: {}]   ;;  %s10214_s14 = inlined_call_operand.vmem [shape: f32[2,1,32], index: 14, kind: input, shape index: {}]   ;;  %s10215_s15 = inlined_call_operand.vmem [shape: f32[1,32], index: 15, kind: input, shape index: {}]   ;;  %s10216_s16 = inlined_call_operand.vmem [shape: f32[1,32], index: 16, kind: input, shape index: {}]   ;;  %s10217_s17 = inlined_call_operand.vmem [shape: f32[32,128], index: 17, kind: input, shape index: {}]   ;;  %s10218_s18 = inlined_call_operand.vmem [shape: f32[1,128], index: 18, kind: input, shape index: {}]   ;;  %s10219_s19 = inlined_call_operand.vmem [shape: f32[32,128], index: 19, kind: output, shape index: {}]  }
   0x1   :  { %10313 = sst [smem:[#allocation30_spill]] %s10200_s0  ;;  %s7237_s0 = smov 0  }
   0x2   :  { %10314 = sst [smem:[#allocation31_spill]] %s10201_s1 }
   0x3   :  { %10315 = sst [smem:[#allocation32_spill]] %s10202_s2 }
   0x4   :  { %10316 = sst [smem:[#allocation33_spill]] %s10203_s3 }
   0x5 LB: > { %s6091_s30 = sadd.s32 4294967295, %s7131_s0   ;;  %p6095_p0 = scmp.ge.s32.totalorder %s7131_s0, 1  ;;  %s7131_s0 = sphi %s7237_s0, %s29_s0  }
   0x6   : > { %p538_p1 = scmp.lt.s32.totalorder %s7131_s0, 3 }
   0x8   : > { %p539_p2 = pnand %p6095_p0, %p538_p1 }
   0xa   : > { %542 = sbr.rel (%p539_p2) target bundleno = 4650 (0x122a), region = 96 }
  0x11   : > { %s10317_s1 = sld [smem:[#allocation31_spill]]  ;;  %s6096_s22 = sshll.u32 %s6091_s30, 5  ;;  %vm969_vm0 = vcmask 261120   ;;  %vm1518_vm1 = vcmask 523264   ;;  %vm1521_vm2 = vcmask 785408   ;;  %vm1568_vm3 = vcmask 130048  }
  0x12   : > { %p595_p3 = scmp.lt.s32.totalorder %s6096_s22, 63  ;;  %s10318_s28 = sld [smem:[#allocation30_spill]]  ;;  %vm5918_vm4 = vcmask 1040384   ;;  %vm5920_vm5 = vcmask 1041408   ;;  %vm5922_vm6 = vcmask 1042432   ;;  %vm5924_vm7 = vcmask 1043456  }
  0x13   : > { %s10319_s21 = sld [smem:[#allocation32_spill]]  ;;  %s7133_s25 = smov 32   ;;  %vm5926_vm8 = vcmask 1044480   ;;  %vm5928_vm9 = vcmask 1045504   ;;  %vm5930_vm10 = vcmask 1046528  }
  0x14   : > { %s10501_s22 = smov (!%p595_p3, %s6096_s22), 63  ;;  %s7135_s26 = smov 96  }
  0x15   : > { %s6097_s3 = sshll.u32 %s10501_s22, 2  ;;  %s10344_s22 = sld [smem:[#allocation33_spill]] }
  0x16   : > { %s6098_s24 = sshll.u32 %s6091_s30, 1 }
  0x17   : > { %v6605_v0 = vld [vmem:[%s10317_s1] sm:$0xff]   ;;  %v6606_v1 = vld [vmem:[%s10317_s1 + $0x8] sm:$0xff]   ;;  %v6607_v2 = vld [vmem:[%s10317_s1 + $0x10] sm:$0xff]   ;;  %p601_p4 = scmp.lt.s32.totalorder %s6098_s24, 3 }
  0x18   : > { %6364 = vmatprep.subr.bf16.mxu0 %v6605_v0  ;;  %s7259_s29 = scalar_lea.vmem %s10318_s28, %s6097_s3  ;;  %v6608_v3 = vld [vmem:[%s10317_s1 + $0x18] sm:$0xff]   ;;  %v6609_v5 = vld [vmem:[%s10317_s1 + $0x20] sm:$0xff]   ;;  %v6610_v6 = vld [vmem:[%s10317_s1 + $0x28] sm:$0xff]   ;;  %s7134_s3 = smov 64  }
  0x19   : > { %6365 = vmatpush3.bf16.msra.mxu0 %v6605_v0  ;;  %v6613_v4 = vld [vmem:[%s7259_s29] sm:$0xff]   ;;  %v6611_v7 = vld [vmem:[%s10317_s1 + $0x30] sm:$0xff]   ;;  %v6612_v8 = vld [vmem:[%s10317_s1 + $0x38] sm:$0xff]   ;;  %s10503_s24 = smov (!%p601_p4, %s6098_s24), 3 }
  0x1a   : > { %6366 = vmatprep.subr.bf16.mxu0 %v6606_v1  ;;  %6380 = vmatprep.mubr.bf16.mxu0 %v6613_v4  ;;  %v6614_v9 = vld [vmem:[%s7259_s29 + $0x8] sm:$0xff]   ;;  %v6615_v10 = vld [vmem:[%s7259_s29 + $0x10] sm:$0xff]   ;;  %v6616_v11 = vld [vmem:[%s7259_s29 + $0x18] sm:$0xff]  }
  0x1b   : > { %v6617_v12 = vld [vmem:[%s7259_s29 + $0x20] sm:$0xff]   ;;  %v6618_v13 = vld [vmem:[%s7259_s29 + $0x28] sm:$0xff]   ;;  %v6619_v14 = vld [vmem:[%s7259_s29 + $0x30] sm:$0xff]  }
  0x1c   : > { %v6620_v15 = vld [vmem:[%s7259_s29 + $0x38] sm:$0xff]   ;;  %v6621_v16 = vld [vmem:[%s7259_s29 + $0x40] sm:$0xff]   ;;  %v6622_v17 = vld [vmem:[%s7259_s29 + $0x48] sm:$0xff]  }
  0x1d   : > { %6367 = vmatpush3.bf16.msra.mxu0 %v6606_v1  ;;  %v6623_v18 = vld [vmem:[%s7259_s29 + $0x50] sm:$0xff]   ;;  %v6624_v19 = vld [vmem:[%s7259_s29 + $0x58] sm:$0xff]   ;;  %v6625_v20 = vld [vmem:[%s7259_s29 + $0x60] sm:$0xff]  }
  0x1e   : > { %6368 = vmatprep.subr.bf16.mxu0 %v6607_v2  ;;  %v6626_v21 = vld [vmem:[%s7259_s29 + $0x68] sm:$0xff]   ;;  %v6627_v22 = vld [vmem:[%s7259_s29 + $0x70] sm:$0xff]   ;;  %v6628_v23 = vld [vmem:[%s7259_s29 + $0x78] sm:$0xff]  }
  0x1f   : > { %v7295_v24 = vld [vmem:[%s10319_s21] ss:$0 sm:$0xff] }
  0x21   : > { %6369 = vmatpush3.bf16.msra.mxu0 %v6607_v2 }
  0x22   : > { %6370 = vmatprep.subr.bf16.mxu0 %v6608_v3 }
  0x25   : > { %6371 = vmatpush3.bf16.msra.mxu0 %v6608_v3 }
  0x26   : > { %6372 = vmatprep.subr.bf16.mxu0 %v6609_v5 }
  0x29   : > { %6373 = vmatpush3.bf16.msra.mxu0 %v6609_v5 }
  0x2a   : > { %6374 = vmatprep.subr.bf16.mxu0 %v6610_v6 }
  0x2d   : > { %6375 = vmatpush3.bf16.msra.mxu0 %v6610_v6 }
  0x2e   : > { %6376 = vmatprep.subr.bf16.mxu0 %v6611_v7 }
  0x31   : > { %6377 = vmatpush3.bf16.msra.mxu0 %v6611_v7 }
  0x32   : > { %6378 = vmatprep.subr.bf16.mxu0 %v6612_v8 }
  0x35   : > { %6379 = vmatpush3.bf16.msra.mxu0 %v6612_v8 }
  0x38   : > { %6381 = vmatmul.mubr.bf16.vlgmr.msra.gmra.mrb[0].mxu0 %v6614_v9 }
  0x39   : > { %6384 = vmatprep.mubr.bf16.mxu0 %v6615_v10 }
  0x40   : > { %6385 = vmatmul.mubr.bf16.gmra.mrb[4].mxu0 %v6616_v11 }
  0x41   : > { %6388 = vmatprep.mubr.bf16.mxu0 %v6617_v12 }
  0x48   : > { %6389 = vmatmul.mubr.bf16.gmra.mrb[8].mxu0 %v6618_v13 }
  0x49   : > { %6392 = vmatprep.mubr.bf16.mxu0 %v6619_v14 }
  0x50   : > { %6393 = vmatmul.mubr.bf16.gmra.mrb[12].mxu0 %v6620_v15 }
  0x51   : > { %6396 = vmatprep.mubr.bf16.mxu0 %v6621_v16 }
  0x58   : > { %6397 = vmatmul.mubr.bf16.gmra.mrb[16].mxu0 %v6622_v17 }
  0x59   : > { %6400 = vmatprep.mubr.bf16.mxu0 %v6623_v18 }
  0x60   : > { %6401 = vmatmul.mubr.bf16.gmra.mrb[20].mxu0 %v6624_v19 }
  0x61   : > { %6404 = vmatprep.mubr.bf16.mxu0 %v6625_v20 }
  0x68   : > { %6405 = vmatmul.mubr.bf16.gmra.mrb[24].mxu0 %v6626_v21 }
  0x69   : > { %6408 = vmatprep.mubr.bf16.mxu0 %v6627_v22 }
  0x70   : > { %6409 = vmatmul.mubr.bf16.gmra.mrb[28].mxu0 %v6628_v23 }
 0x10b   : > { %v6382_v25 = vpop.f32.mrb[0].mxu0 }
 0x10c   : > { %v7298_v26 = vadd.f32 %v6382_v25, %v7295_v24  ;;  %v840_v27 = vpop.f32.mrb[1].mxu0 }
 0x10d   : > { %v7301_v28 = vadd.f32 %v7295_v24, %v840_v27  ;;  %v6383_v29 = vpop.f32.mrb[2].mxu0 }
 0x10e   : > { %v7304_v30 = vadd.f32 %v6383_v29, %v7295_v24  ;;  %v843_v31 = vpop.f32.mrb[3].mxu0  ;;  %v976_v32 = vsel %vm969_vm0, %v7298_v26, 0.0 }
 0x10f   : > { %v7309_v33 = vadd.f32 %v7295_v24, %v843_v31  ;;  %977 = vadd.xlane.f32.xlu1 %v976_v32 }
 0x110   : > { %v979_v34 = vsel %vm969_vm0, %v7304_v30, 0.0 }
 0x113   : > { %980 = vadd.xlane.f32.xlu1 %v979_v34  ;;  %v6386_v35 = vpop.f32.mrb[4].mxu0 }
 0x114   : > { %v856_v36 = vpop.f32.mrb[5].mxu0  ;;  %v7356_v63 = vadd.f32 %v6386_v35, %v7295_v24 }
 0x115   : > { %v7314_v37 = vadd.f32 %v7295_v24, %v856_v36  ;;  %v6387_v38 = vpop.f32.mrb[6].mxu0 }
 0x116   : > { %v859_v39 = vpop.f32.mrb[7].mxu0  ;;  %10329 = vst [vmem:[#allocation11_spill] sm:$0xff] %v7356_v63  ;;  %v7361_v2 = vadd.f32 %v6387_v38, %v7295_v24  ;;  %v988_v8 = vsel %vm969_vm0, %v7356_v63, 0.0 }
 0x117   : > { %v7317_v40 = vadd.f32 %v7295_v24, %v859_v39  ;;  %v982_v41 = vsel %vm969_vm0, %v7314_v37, 0.0 }
 0x118   : > { %983 = vadd.xlane.f32.xlu0 %v982_v41  ;;  %10330 = vst [vmem:[#allocation12_spill] sm:$0xff] %v7361_v2  ;;  %v991_v12 = vsel %vm969_vm0, %v7361_v2, 0.0 }
 0x119   : > { %10320 = vst [vmem:[#allocation2_spill] sm:$0xff] %v7317_v40  ;;  %v985_v42 = vsel %vm969_vm0, %v7317_v40, 0.0 }
 0x11a   : > { %986 = vadd.xlane.f32.xlu1 %v985_v42 }
 0x11b   : > { %v6390_v43 = vpop.f32.mrb[8].mxu0 }
 0x11c   : > { %v7324_v44 = vadd.f32 %v6390_v43, %v7295_v24  ;;  %v872_v45 = vpop.f32.mrb[9].mxu0 }
 0x11d   : > { %v7327_v46 = vadd.f32 %v7295_v24, %v872_v45  ;;  %v6391_v47 = vpop.f32.mrb[10].mxu0 }
 0x11e   : > { %10321 = vst [vmem:[#allocation3_spill] sm:$0xff] %v7324_v44  ;;  %v7330_v48 = vadd.f32 %v6391_v47, %v7295_v24  ;;  %v875_v49 = vpop.f32.mrb[11].mxu0  ;;  %v1000_v50 = vsel %vm969_vm0, %v7324_v44, 0.0 }
 0x11f   : > { %10322 = vst [vmem:[#allocation4_spill] sm:$0xff] %v7327_v46  ;;  %v7335_v51 = vadd.f32 %v7295_v24, %v875_v49  ;;  %1001 = vadd.xlane.f32.xlu0 %v1000_v50 }
 0x120   : > { %10323 = vst [vmem:[#allocation5_spill] sm:$0xff] %v7330_v48  ;;  %v1003_v52 = vsel %vm969_vm0, %v7330_v48, 0.0 }
 0x121   : > { %10324 = vst [vmem:[#allocation6_spill] sm:$0xff] %v7335_v51 }
 0x123   : > { %v6394_v53 = vpop.f32.mrb[12].mxu0  ;;  %1004 = vadd.xlane.f32.xlu0 %v1003_v52 }
 0x124   : > { %v7340_v54 = vadd.f32 %v6394_v53, %v7295_v24  ;;  %v888_v55 = vpop.f32.mrb[13].mxu0 }
 0x125   : > { %v6395_v56 = vpop.f32.mrb[14].mxu0  ;;  %v7343_v57 = vadd.f32 %v7295_v24, %v888_v55 }
 0x126   : > { %10325 = vst [vmem:[#allocation7_spill] sm:$0xff] %v7340_v54  ;;  %v7346_v58 = vadd.f32 %v6395_v56, %v7295_v24  ;;  %v891_v59 = vpop.f32.mrb[15].mxu0  ;;  %v1012_v60 = vsel %vm969_vm0, %v7340_v54, 0.0 }
 0x127   : > { %10326 = vst [vmem:[#allocation8_spill] sm:$0xff] %v7343_v57  ;;  %1013 = vadd.xlane.f32.xlu0 %v1012_v60  ;;  %v7351_v61 = vadd.f32 %v7295_v24, %v891_v59  ;;  %v1006_v0 = vsel %vm969_vm0, %v7343_v57, 0.0 }
 0x128   : > { %10327 = vst [vmem:[#allocation9_spill] sm:$0xff] %v7346_v58  ;;  %v1015_v62 = vsel %vm969_vm0, %v7346_v58, 0.0 }
 0x129   : > { %10328 = vst [vmem:[#allocation10_spill] sm:$0xff] %v7351_v61  ;;  %1016 = vadd.xlane.f32.xlu1 %v1015_v62  ;;  %v1009_v3 = vsel %vm969_vm0, %v7351_v61, 0.0 }
 0x12b   : > { %1007 = vadd.xlane.f32.xlu0 %v1006_v0  ;;  %v6398_v1 = vpop.f32.mrb[16].mxu0 }
 0x12c   : > { %v7366_v4 = vadd.f32 %v6398_v1, %v7295_v24  ;;  %v904_v5 = vpop.f32.mrb[17].mxu0  ;;  %v997_v1 = vsel %vm969_vm0, %v7335_v51, 0.0 }
 0x12d   : > { %1010 = vadd.xlane.f32.xlu1 %v1009_v3  ;;  %v7369_v6 = vadd.f32 %v7295_v24, %v904_v5  ;;  %v6399_v7 = vpop.f32.mrb[18].mxu0  ;;  %v970_v3 = vsel %vm969_vm0, %v7301_v28, 0.0  ;;  %v973_v5 = vsel %vm969_vm0, %v7309_v33, 0.0 }
 0x12e   : > { %10331 = vst [vmem:[#allocation13_spill] sm:$0xff] %v7366_v4  ;;  %v7374_v9 = vadd.f32 %v6399_v7, %v7295_v24  ;;  %v907_v10 = vpop.f32.mrb[19].mxu0  ;;  %v1024_v13 = vsel %vm969_vm0, %v7366_v4, 0.0 }
 0x12f   : > { %989 = vadd.xlane.f32.xlu0 %v988_v8  ;;  %v7377_v11 = vadd.f32 %v7295_v24, %v907_v10 }
 0x130   : > { %10332 = vst [vmem:[#allocation14_spill] sm:$0xff] %v7374_v9  ;;  %v1027_v14 = vsel %vm969_vm0, %v7374_v9, 0.0 }
 0x131   : > { %992 = vadd.xlane.f32.xlu1 %v991_v12 }
 0x133   : > { %v6402_v15 = vpop.f32.mrb[20].mxu0  ;;  %1025 = vadd.xlane.f32.xlu0 %v1024_v13 }
 0x134   : > { %v7386_v16 = vadd.f32 %v6402_v15, %v7295_v24  ;;  %v920_v17 = vpop.f32.mrb[21].mxu0 }
 0x135   : > { %v7389_v18 = vadd.f32 %v7295_v24, %v920_v17  ;;  %v6403_v19 = vpop.f32.mrb[22].mxu0  ;;  %1028 = vadd.xlane.f32.xlu1 %v1027_v14 }
 0x136   : > { %10333 = vst [vmem:[#allocation15_spill] sm:$0xff] %v7386_v16  ;;  %v7392_v20 = vadd.f32 %v6403_v19, %v7295_v24  ;;  %v923_v21 = vpop.f32.mrb[23].mxu0  ;;  %v1036_v62 = vsel %vm969_vm0, %v7386_v16, 0.0 }
 0x137   : > { %10334 = vst [vmem:[#allocation16_spill] sm:$0xff] %v7389_v18  ;;  %v7395_v22 = vadd.f32 %v7295_v24, %v923_v21  ;;  %v1030_v23 = vsel %vm969_vm0, %v7389_v18, 0.0 }
 0x138   : > { %10335 = vst [vmem:[#allocation17_spill] sm:$0xff] %v7392_v20  ;;  %1031 = vadd.xlane.f32.xlu0 %v1030_v23  ;;  %v1039_v0 = vsel %vm969_vm0, %v7392_v20, 0.0 }
 0x139   : > { %10336 = vst [vmem:[#allocation18_spill] sm:$0xff] %v7395_v22  ;;  %v1033_v25 = vsel %vm969_vm0, %v7395_v22, 0.0 }
 0x13a   : > { %1034 = vadd.xlane.f32.xlu1 %v1033_v25 }
 0x13b   : > { %v6406_v27 = vpop.f32.mrb[24].mxu0 }
 0x13c   : > { %v7402_v29 = vadd.f32 %v6406_v27, %v7295_v24  ;;  %v936_v31 = vpop.f32.mrb[25].mxu0 }
 0x13d   : > { %v7405_v32 = vadd.f32 %v7295_v24, %v936_v31  ;;  %v6407_v34 = vpop.f32.mrb[26].mxu0 }
 0x13e   : > { %10337 = vst [vmem:[#allocation19_spill] sm:$0xff] %v7402_v29  ;;  %v7408_v35 = vadd.f32 %v6407_v34, %v7295_v24  ;;  %v1048_v36 = vsel %vm969_vm0, %v7402_v29, 0.0  ;;  %v939_v38 = vpop.f32.mrb[27].mxu0 }
 0x13f   : > { %10338 = vst [vmem:[#allocation20_spill] sm:$0xff] %v7405_v32  ;;  %1049 = vadd.xlane.f32.xlu0 %v1048_v36  ;;  %v7413_v39 = vadd.f32 %v7295_v24, %v939_v38 }
 0x140   : > { %10339 = vst [vmem:[#allocation21_spill] sm:$0xff] %v7408_v35  ;;  %v1051_v41 = vsel %vm969_vm0, %v7408_v35, 0.0 }
 0x141   : > { %1052 = vadd.xlane.f32.xlu1 %v1051_v41 }
 0x143   : > { %v6410_v42 = vpop.f32.mrb[28].mxu0 }
 0x144   : > { %v7418_v43 = vadd.f32 %v6410_v42, %v7295_v24  ;;  %v952_v45 = vpop.f32.mrb[29].mxu0 }
 0x145   : > { %v7421_v47 = vadd.f32 %v7295_v24, %v952_v45  ;;  %v6411_v49 = vpop.f32.mrb[30].mxu0 }
 0x146   : > { %10340 = vst [vmem:[#allocation22_spill] sm:$0xff] %v7418_v43  ;;  %v7424_v50 = vadd.f32 %v6411_v49, %v7295_v24  ;;  %v1060_v52 = vsel %vm969_vm0, %v7418_v43, 0.0  ;;  %v955_v53 = vpop.f32.mrb[31].mxu0 }
 0x147   : > { %10341 = vst [vmem:[#allocation23_spill] sm:$0xff] %v7421_v47  ;;  %1061 = vadd.xlane.f32.xlu0 %v1060_v52  ;;  %v7429_v55 = vadd.f32 %v7295_v24, %v955_v53  ;;  %v1054_v59 = vsel %vm969_vm0, %v7421_v47, 0.0  ;;  %v994_v24 = vsel %vm969_vm0, %v7327_v46, 0.0 }
 0x148   : > { %10342 = vst [vmem:[#allocation24_spill] sm:$0xff] %v7424_v50  ;;  %v1063_v56 = vsel %vm969_vm0, %v7424_v50, 0.0 }
 0x149   : > { %10343 = vst [vmem:[#allocation25_spill] sm:$0xff] %v7429_v55  ;;  %1064 = vadd.xlane.f32.xlu1 %v1063_v56  ;;  %v1057_v60 = vsel %vm969_vm0, %v7429_v55, 0.0 }
 0x14b   : > { %1055 = vadd.xlane.f32.xlu0 %v1054_v59 }
 0x14d   : > { %1058 = vadd.xlane.f32.xlu1 %v1057_v60 }
 0x14f   : > { %1037 = vadd.xlane.f32.xlu0 %v1036_v62 }
 0x151   : > { %1040 = vadd.xlane.f32.xlu1 %v1039_v0 }
 0x153   : > { %995 = vadd.xlane.f32.xlu0 %v994_v24 }
 0x155   : > { %998 = vadd.xlane.f32.xlu1 %v997_v1 }
 0x157   : > { %971 = vadd.xlane.f32.xlu0 %v970_v3 }
 0x159   : > { %974 = vadd.xlane.f32.xlu1 %v973_v5 }
 0x19c   : > { %v978_v7 = vpop.xlane.xlu1 %977 }
 0x19d   : > { %v1069_v8 = vmul.f32 0.03125, %v978_v7 }
 0x19f   : > { %v7450_v10 = vsub.f32 %v7298_v26, %v1069_v8 }
 0x1a0   : > { %v981_v12 = vpop.xlane.xlu1 %980 }
 0x1a1   : > { %v1070_v13 = vmul.f32 0.03125, %v981_v12  ;;  %v1133_v14 = vmul.f32 %v7450_v10, %v7450_v10 }
 0x1a3   : > { %v7455_v15 = vsub.f32 %v7304_v30, %v1070_v13  ;;  %v1169_v17 = vsel %vm969_vm0, %v1133_v14, 0.0 }
 0x1a4   : > { %1170 = vadd.xlane.f32.xlu0 %v1169_v17 }
 0x1a5   : > { %v984_v19 = vpop.xlane.xlu0 %983  ;;  %v1134_v21 = vmul.f32 %v7455_v15, %v7455_v15 }
 0x1a6   : > { %v1071_v23 = vmul.f32 0.03125, %v984_v19 }
 0x1a7   : > { %v987_v25 = vpop.xlane.xlu1 %986  ;;  %v1172_v27 = vsel %vm969_vm0, %v1134_v21, 0.0 }
 0x1a8   : > { %v7462_v31 = vsub.f32 %v7314_v37, %v1071_v23  ;;  %v1072_v34 = vmul.f32 0.03125, %v987_v25  ;;  %1173 = vadd.xlane.f32.xlu1 %v1172_v27 }
 0x1aa   : > { %v7465_v36 = vsub.f32 %v7317_v40, %v1072_v34  ;;  %v1135_v38 = vmul.f32 %v7462_v31, %v7462_v31 }
 0x1ac   : > { %v1002_v41 = vpop.xlane.xlu0 %1001  ;;  %v1175_v42 = vsel %vm969_vm0, %v1135_v38, 0.0  ;;  %v1136_v45 = vmul.f32 %v7465_v36, %v7465_v36 }
 0x1ad   : > { %v1077_v49 = vmul.f32 0.03125, %v1002_v41  ;;  %1176 = vadd.xlane.f32.xlu0 %v1175_v42 }
 0x1ae   : > { %v1178_v52 = vsel %vm969_vm0, %v1136_v45, 0.0 }
 0x1af   : > { %v7474_v53 = vsub.f32 %v7324_v44, %v1077_v49  ;;  %1179 = vadd.xlane.f32.xlu1 %v1178_v52 }
 0x1b0   : > { %v1005_v56 = vpop.xlane.xlu0 %1004 }
 0x1b1   : > { %v1078_v59 = vmul.f32 0.03125, %v1005_v56  ;;  %v1141_v60 = vmul.f32 %v7474_v53, %v7474_v53 }
 0x1b3   : > { %v7479_v62 = vsub.f32 %v7330_v48, %v1078_v59  ;;  %v1193_v0 = vsel %vm969_vm0, %v1141_v60, 0.0 }
 0x1b4   : > { %v1014_v24 = vpop.xlane.xlu0 %1013  ;;  %1194 = vadd.xlane.f32.xlu0 %v1193_v0 }
 0x1b5   : > { %v1081_v1 = vmul.f32 0.03125, %v1014_v24  ;;  %v1142_v3 = vmul.f32 %v7479_v62, %v7479_v62 }
 0x1b6   : > { %v1017_v5 = vpop.xlane.xlu1 %1016 }
 0x1b7   : > { %v7485_v7 = vsub.f32 %v7340_v54, %v1081_v1  ;;  %v1082_v8 = vmul.f32 0.03125, %v1017_v5  ;;  %v1196_v12 = vsel %vm969_vm0, %v1142_v3, 0.0 }
 0x1b8   : > { %v1008_v13 = vpop.xlane.xlu0 %1007  ;;  %1197 = vadd.xlane.f32.xlu1 %v1196_v12 }
 0x1b9   : > { %v7489_v14 = vsub.f32 %v7346_v58, %v1082_v8  ;;  %v1079_v17 = vmul.f32 0.03125, %v1008_v13  ;;  %v1145_v19 = vmul.f32 %v7485_v7, %v7485_v7 }
 0x1ba   : > { %v1011_v21 = vpop.xlane.xlu1 %1010 }
 0x1bb   : > { %v7494_v23 = vsub.f32 %v7343_v57, %v1079_v17  ;;  %v1080_v25 = vmul.f32 0.03125, %v1011_v21  ;;  %v1205_v27 = vsel %vm969_vm0, %v1145_v19, 0.0  ;;  %v1146_v34 = vmul.f32 %v7489_v14, %v7489_v14 }
 0x1bc   : > { %v990_v38 = vpop.xlane.xlu0 %989  ;;  %1206 = vadd.xlane.f32.xlu0 %v1205_v27 }
 0x1bd   : > { %v7500_v41 = vsub.f32 %v7351_v61, %v1080_v25  ;;  %v1073_v42 = vmul.f32 0.03125, %v990_v38  ;;  %v1208_v45 = vsel %vm969_vm0, %v1146_v34, 0.0  ;;  %v1143_v49 = vmul.f32 %v7494_v23, %v7494_v23 }
 0x1be   : > { %v993_v52 = vpop.xlane.xlu1 %992  ;;  %1209 = vadd.xlane.f32.xlu1 %v1208_v45 }
 0x1bf   : > { %v7506_v56 = vsub.f32 %v7356_v63, %v1073_v42  ;;  %v1074_v59 = vmul.f32 0.03125, %v993_v52  ;;  %v1199_v60 = vsel %vm969_vm0, %v1143_v49, 0.0  ;;  %v1144_v0 = vmul.f32 %v7500_v41, %v7500_v41 }
 0x1c0   : > { %v1026_v24 = vpop.xlane.xlu0 %1025  ;;  %1200 = vadd.xlane.f32.xlu0 %v1199_v60  ;;  %v1042_v42 = vsel %vm969_vm0, %v7405_v32, 0.0  ;;  %v1045_v52 = vsel %vm969_vm0, %v7413_v39, 0.0  ;;  %v1018_v60 = vsel %vm969_vm0, %v7369_v6, 0.0 }
 0x1c1   : > { %v7512_v1 = vsub.f32 %v7361_v2, %v1074_v59  ;;  %v1202_v3 = vsel %vm969_vm0, %v1144_v0, 0.0  ;;  %v1137_v5 = vmul.f32 %v7506_v56, %v7506_v56  ;;  %v1085_v12 = vmul.f32 0.03125, %v1026_v24 }
 0x1c2   : > { %v1029_v8 = vpop.xlane.xlu1 %1028  ;;  %1203 = vadd.xlane.f32.xlu1 %v1202_v3 }
 0x1c3   : > { %v1181_v13 = vsel %vm969_vm0, %v1137_v5, 0.0  ;;  %v1138_v17 = vmul.f32 %v7512_v1, %v7512_v1  ;;  %v1086_v19 = vmul.f32 0.03125, %v1029_v8  ;;  %v7522_v27 = vsub.f32 %v7366_v4, %v1085_v12 }
 0x1c4   : > { %1182 = vadd.xlane.f32.xlu0 %v1181_v13  ;;  %v1021_v8 = vsel %vm969_vm0, %v7377_v11, 0.0 }
 0x1c5   : > { %v1032_v21 = vpop.xlane.xlu0 %1031  ;;  %v1184_v25 = vsel %vm969_vm0, %v1138_v17, 0.0  ;;  %v7527_v45 = vsub.f32 %v7374_v9, %v1086_v19  ;;  %v1149_v0 = vmul.f32 %v7522_v27, %v7522_v27 }
 0x1c6   : > { %1185 = vadd.xlane.f32.xlu1 %v1184_v25  ;;  %v1087_v34 = vmul.f32 0.03125, %v1032_v21 }
 0x1c7   : > { %v1035_v38 = vpop.xlane.xlu1 %1034  ;;  %v1150_v12 = vmul.f32 %v7527_v45, %v7527_v45  ;;  %v1217_v21 = vsel %vm969_vm0, %v1149_v0, 0.0 }
 0x1c8   : > { %1043 = vadd.xlane.f32.xlu0 %v1042_v42  ;;  %v1088_v49 = vmul.f32 0.03125, %v1035_v38  ;;  %v7532_v59 = vsub.f32 %v7389_v18, %v1087_v34 }
 0x1c9   : > { %v1220_v38 = vsel %vm969_vm0, %v1150_v12, 0.0 }
 0x1ca   : > { %1046 = vadd.xlane.f32.xlu1 %v1045_v52  ;;  %v7539_v3 = vsub.f32 %v7395_v22, %v1088_v49  ;;  %v1151_v25 = vmul.f32 %v7532_v59, %v7532_v59 }
 0x1cc   : > { %v1050_v24 = vpop.xlane.xlu0 %1049  ;;  %1019 = vadd.xlane.f32.xlu0 %v1018_v60  ;;  %v1152_v42 = vmul.f32 %v7539_v3, %v7539_v3  ;;  %v1223_v49 = vsel %vm969_vm0, %v1151_v25, 0.0 }
 0x1cd   : > { %v1093_v5 = vmul.f32 0.03125, %v1050_v24 }
 0x1ce   : > { %v1053_v13 = vpop.xlane.xlu1 %1052  ;;  %1022 = vadd.xlane.f32.xlu1 %v1021_v8  ;;  %v1226_v24 = vsel %vm969_vm0, %v1152_v42, 0.0 }
 0x1cf   : > { %v7546_v17 = vsub.f32 %v7402_v29, %v1093_v5  ;;  %v1094_v19 = vmul.f32 0.03125, %v1053_v13 }
 0x1d0   : > { %1218 = vadd.xlane.f32.xlu0 %v1217_v21 }
 0x1d1   : > { %v7552_v34 = vsub.f32 %v7408_v35, %v1094_v19  ;;  %v1157_v52 = vmul.f32 %v7546_v17, %v7546_v17 }
 0x1d2   : > { %1221 = vadd.xlane.f32.xlu1 %v1220_v38 }
 0x1d3   : > { %v1158_v5 = vmul.f32 %v7552_v34, %v7552_v34  ;;  %v1241_v19 = vsel %vm969_vm0, %v1157_v52, 0.0 }
 0x1d4   : > { %v1062_v60 = vpop.xlane.xlu0 %1061  ;;  %1224 = vadd.xlane.f32.xlu0 %v1223_v49 }
 0x1d5   : > { %v1097_v0 = vmul.f32 0.03125, %v1062_v60  ;;  %v1244_v49 = vsel %vm969_vm0, %v1158_v5, 0.0 }
 0x1d6   : > { %v1065_v8 = vpop.xlane.xlu1 %1064  ;;  %1227 = vadd.xlane.f32.xlu1 %v1226_v24 }
 0x1d7   : > { %v7564_v12 = vsub.f32 %v7418_v43, %v1097_v0  ;;  %v1098_v13 = vmul.f32 0.03125, %v1065_v8 }
 0x1d8   : > { %v1056_v21 = vpop.xlane.xlu0 %1055  ;;  %1242 = vadd.xlane.f32.xlu0 %v1241_v19 }
 0x1d9   : > { %v7568_v25 = vsub.f32 %v7424_v50, %v1098_v13  ;;  %v1095_v38 = vmul.f32 0.03125, %v1056_v21  ;;  %v1161_v42 = vmul.f32 %v7564_v12, %v7564_v12 }
 0x1da   : > { %v1059_v60 = vpop.xlane.xlu1 %1058  ;;  %1245 = vadd.xlane.f32.xlu1 %v1244_v49 }
 0x1db   : > { %v7574_v24 = vsub.f32 %v7421_v47, %v1095_v38  ;;  %v1096_v0 = vmul.f32 0.03125, %v1059_v60  ;;  %v1253_v8 = vsel %vm969_vm0, %v1161_v42, 0.0  ;;  %v1162_v52 = vmul.f32 %v7568_v25, %v7568_v25 }
 0x1dc   : > { %v1038_v19 = vpop.xlane.xlu0 %1037  ;;  %1254 = vadd.xlane.f32.xlu0 %v1253_v8 }
 0x1dd   : > { %v7580_v13 = vsub.f32 %v7429_v55, %v1096_v0  ;;  %v1089_v5 = vmul.f32 0.03125, %v1038_v19  ;;  %v1256_v21 = vsel %vm969_vm0, %v1162_v52, 0.0  ;;  %v1159_v49 = vmul.f32 %v7574_v24, %v7574_v24 }
 0x1de   : > { %v1041_v43 = vpop.xlane.xlu1 %1040  ;;  %1257 = vadd.xlane.f32.xlu1 %v1256_v21 }
 0x1df   : > { %v7586_v38 = vsub.f32 %v7386_v16, %v1089_v5  ;;  %v1090_v42 = vmul.f32 0.03125, %v1041_v43  ;;  %v1247_v60 = vsel %vm969_vm0, %v1159_v49, 0.0  ;;  %v1160_v8 = vmul.f32 %v7580_v13, %v7580_v13 }
 0x1e0   : > { %v996_v50 = vpop.xlane.xlu0 %995  ;;  %1248 = vadd.xlane.f32.xlu0 %v1247_v60 }
 0x1e1   : > { %v7592_v0 = vsub.f32 %v7392_v20, %v1090_v42  ;;  %v1075_v52 = vmul.f32 0.03125, %v996_v50  ;;  %v1250_v19 = vsel %vm969_vm0, %v1160_v8, 0.0  ;;  %v1153_v21 = vmul.f32 %v7586_v38, %v7586_v38 }
 0x1e2   : > { %v999_v47 = vpop.xlane.xlu1 %998  ;;  %1251 = vadd.xlane.f32.xlu1 %v1250_v19 }
 0x1e3   : > { %v7598_v43 = vsub.f32 %v7327_v46, %v1075_v52  ;;  %v1076_v5 = vmul.f32 0.03125, %v999_v47  ;;  %v1229_v49 = vsel %vm969_vm0, %v1153_v21, 0.0  ;;  %v1154_v60 = vmul.f32 %v7592_v0, %v7592_v0 }
 0x1e4   : > { %1230 = vadd.xlane.f32.xlu0 %v1229_v49  ;;  %v972_v42 = vpop.xlane.xlu0 %971 }
 0x1e5   : > { %v7604_v50 = vsub.f32 %v7335_v51, %v1076_v5  ;;  %v1067_v8 = vmul.f32 0.03125, %v972_v42  ;;  %v1232_v55 = vsel %vm969_vm0, %v1154_v60, 0.0  ;;  %v1139_v19 = vmul.f32 %v7598_v43, %v7598_v43 }
 0x1e6   : > { %1233 = vadd.xlane.f32.xlu1 %v1232_v55  ;;  %v975_v52 = vpop.xlane.xlu1 %974 }
 0x1e7   : > { %v7610_v47 = vsub.f32 %v7301_v28, %v1067_v8  ;;  %v1068_v21 = vmul.f32 0.03125, %v975_v52  ;;  %v1187_v29 = vsel %vm969_vm0, %v1139_v19, 0.0  ;;  %v1140_v49 = vmul.f32 %v7604_v50, %v7604_v50 }
 0x1e8   : > { %1188 = vadd.xlane.f32.xlu0 %v1187_v29 }
 0x1e9   : > { %v7616_v5 = vsub.f32 %v7309_v33, %v1068_v21  ;;  %v1190_v60 = vsel %vm969_vm0, %v1140_v49, 0.0  ;;  %v1131_v42 = vmul.f32 %v7610_v47, %v7610_v47 }
 0x1ea   : > { %1191 = vadd.xlane.f32.xlu1 %v1190_v60 }
 0x1eb   : > { %v1163_v55 = vsel %vm969_vm0, %v1131_v42, 0.0  ;;  %v1132_v8 = vmul.f32 %v7616_v5, %v7616_v5 }
 0x1ec   : > { %1164 = vadd.xlane.f32.xlu0 %v1163_v55 }
 0x1ed   : > { %v1166_v19 = vsel %vm969_vm0, %v1132_v8, 0.0 }
 0x1ee   : > { %1167 = vadd.xlane.f32.xlu1 %v1166_v19 }
 0x231   : > { %v1171_v52 = vpop.xlane.xlu0 %1170 }
 0x232   : > { %v1261_v60 = vmul.f32 0.03125, %v1171_v52 }
 0x234   : > { %v1293_v55 = vadd.f32 1e-05, %v1261_v60 }
 0x235   : > { %v1174_v29 = vpop.xlane.xlu1 %1173 }
 0x236   : > { %v1262_v22 = vmul.f32 0.03125, %v1174_v29 }
 0x238   : > { %v1294_v42 = vadd.f32 1e-05, %v1262_v22 }
 0x23a   : > { %v1177_v35 = vpop.xlane.xlu0 %1176  ;;  %6645 = vrsqrt.f32 %v1294_v42 }
 0x23b   : > { %v1263_v58 = vmul.f32 0.03125, %v1177_v35  ;;  %6647 = vrsqrt.f32 %v1293_v55 }
 0x23c   : > { %v1180_v21 = vpop.xlane.xlu1 %1179 }
 0x23d   : > { %v1264_v61 = vmul.f32 0.03125, %v1180_v21  ;;  %v1295_v19 = vadd.f32 1e-05, %v1263_v58 }
 0x23f   : > { %v1296_v57 = vadd.f32 1e-05, %v1264_v61  ;;  %6649 = vrsqrt.f32 %v1295_v19 }
 0x241   : > { %v1195_v16 = vpop.xlane.xlu0 %1194  ;;  %6651 = vrsqrt.f32 %v1296_v57 }
 0x242   : > { %v1269_v51 = vmul.f32 0.03125, %v1195_v16 }
 0x244   : > { %v1301_v52 = vadd.f32 1e-05, %v1269_v51  ;;  %v6646_v42 = vpop.eup %6645 }
 0x245   : > { %v1198_v20 = vpop.xlane.xlu1 %1197 }
 0x246   : > { %v1270_v48 = vmul.f32 0.03125, %v1198_v20 }
 0x248   : > { %v1302_v46 = vadd.f32 1e-05, %v1270_v48 }
 0x249   : > { %v1207_v49 = vpop.xlane.xlu0 %1206 }
 0x24a   : > { %v1273_v20 = vmul.f32 0.03125, %v1207_v49  ;;  %6653 = vrsqrt.f32 %v1302_v46 }
 0x24b   : > { %v1210_v18 = vpop.xlane.xlu1 %1209  ;;  %6655 = vrsqrt.f32 %v1301_v52 }
 0x24c   : > { %v1274_v40 = vmul.f32 0.03125, %v1210_v18 }
 0x24d   : > { %v1201_v4 = vpop.xlane.xlu0 %1200 }
 0x24e   : > { %v1271_v60 = vmul.f32 0.03125, %v1201_v4  ;;  %v1306_v48 = vadd.f32 1e-05, %v1274_v40  ;;  %v1305_v4 = vadd.f32 1e-05, %v1273_v20 }
 0x24f   : > { %v1204_v9 = vpop.xlane.xlu1 %1203 }
 0x250   : > { %v1272_v29 = vmul.f32 0.03125, %v1204_v9  ;;  %v1303_v55 = vadd.f32 1e-05, %v1271_v60  ;;  %6657 = vrsqrt.f32 %v1306_v48 }
 0x251   : > { %v1183_v54 = vpop.xlane.xlu0 %1182 }
 0x252   : > { %v1304_v9 = vadd.f32 1e-05, %v1272_v29  ;;  %v1265_v29 = vmul.f32 0.03125, %v1183_v54 }
 0x253   : > { %v1186_v8 = vpop.xlane.xlu1 %1185 }
 0x254   : > { %v1266_v18 = vmul.f32 0.03125, %v1186_v8  ;;  %6659 = vrsqrt.f32 %v1304_v9 }
 0x255   : > { %v1044_v44 = vpop.xlane.xlu0 %1043  ;;  %6661 = vrsqrt.f32 %v1305_v4  ;;  %v7654_v4 = vld [vmem:[%s10344_s22] ss:$0 sm:$0xff] }
 0x256   : > { %v1091_v2 = vmul.f32 0.03125, %v1044_v44  ;;  %v1298_v20 = vadd.f32 1e-05, %v1266_v18  ;;  %6663 = vrsqrt.f32 %v1303_v55 }
 0x257   : > { %v1047_v63 = vpop.xlane.xlu1 %1046 }
 0x258   : > { %v7626_v22 = vsub.f32 %v7405_v32, %v1091_v2  ;;  %v1092_v35 = vmul.f32 0.03125, %v1047_v63  ;;  %6665 = vrsqrt.f32 %v1298_v20  ;;  %v7662_v20 = vld [vmem:[%s10204_s4] ss:$0 sm:$0xff] }
 0x259   : > { %v1020_v21 = vpop.xlane.xlu0 %1019 }
 0x25a   : > { %v7629_v58 = vsub.f32 %v7413_v39, %v1092_v35  ;;  %v1083_v61 = vmul.f32 0.03125, %v1020_v21  ;;  %v1155_v44 = vmul.f32 %v7626_v22, %v7626_v22  ;;  %v6648_v21 = vpop.eup %6647 }
 0x25b   : > { %v1023_v16 = vpop.xlane.xlu1 %1022 }
 0x25c   : > { %v7634_v2 = vsub.f32 %v7369_v6, %v1083_v61  ;;  %v1084_v63 = vmul.f32 0.03125, %v1023_v16  ;;  %v1235_v51 = vsel %vm969_vm0, %v1155_v44, 0.0  ;;  %v1156_v57 = vmul.f32 %v7629_v58, %v7629_v58  ;;  %v6650_v16 = vpop.eup %6649 }
 0x25d   : > { %1236 = vadd.xlane.f32.xlu0 %v1235_v51  ;;  %v1219_v49 = vpop.xlane.xlu0 %1218  ;;  %v1358_v44 = vmul.f32 %v6646_v42, %v7455_v15  ;;  %v6652_v48 = vpop.eup %6651 }
 0x25e   : > { %v7640_v40 = vsub.f32 %v7377_v11, %v1084_v63  ;;  %v1238_v46 = vsel %vm969_vm0, %v1156_v57, 0.0  ;;  %v1147_v19 = vmul.f32 %v7634_v2, %v7634_v2  ;;  %v1297_v63 = vadd.f32 1e-05, %v1265_v29  ;;  %v6654_v18 = vpop.eup %6653 }
 0x25f   : > { %1239 = vadd.xlane.f32.xlu1 %v1238_v46  ;;  %v1222_v35 = vpop.xlane.xlu1 %1221  ;;  %v1277_v51 = vmul.f32 0.03125, %v1219_v49  ;;  %v1357_v57 = vmul.f32 %v6648_v21, %v7450_v10  ;;  %v1396_v55 = vmul.f32 %v7654_v4, %v1358_v44  ;;  %v1360_v29 = vmul.f32 %v6652_v48, %v7465_v36  ;;  %v6656_v49 = vpop.eup %6655 }
 0x260   : > { %v1211_v8 = vsel %vm969_vm0, %v1147_v19, 0.0  ;;  %v1148_v52 = vmul.f32 %v7640_v40, %v7640_v40  ;;  %v1278_v60 = vmul.f32 0.03125, %v1222_v35  ;;  %6667 = vrsqrt.f32 %v1297_v63 }
 0x261   : > { %1212 = vadd.xlane.f32.xlu0 %v1211_v8  ;;  %v1225_v61 = vpop.xlane.xlu0 %1224  ;;  %v1309_v35 = vadd.f32 1e-05, %v1277_v51  ;;  %v1395_v21 = vmul.f32 %v7654_v4, %v1357_v57  ;;  %v1359_v44 = vmul.f32 %v6650_v16, %v7462_v31  ;;  %v1365_v31 = vmul.f32 %v6656_v49, %v7474_v53 }
 0x262   : > { %v1214_v54 = vsel %vm969_vm0, %v1148_v52, 0.0  ;;  %v1310_v46 = vadd.f32 1e-05, %v1278_v60  ;;  %v1279_v8 = vmul.f32 0.03125, %v1225_v61  ;;  %v1366_v60 = vmul.f32 %v6654_v18, %v7479_v62 }
 0x263   : > { %1215 = vadd.xlane.f32.xlu1 %v1214_v54  ;;  %v1228_v9 = vpop.xlane.xlu1 %1227  ;;  %v1434_v61 = vadd.f32 %v7662_v20, %v1396_v55  ;;  %v1433_v62 = vadd.f32 %v7662_v20, %v1395_v21 }
 0x264   : > { %v1280_v15 = vmul.f32 0.03125, %v1228_v9  ;;  %v6658_v9 = vpop.eup %6657  ;;  %6669 = vrsqrt.f32 %v1310_v46  ;;  %v1404_v46 = vmul.f32 %v7654_v4, %v1366_v60 }
 0x265   : > { %v1243_v42 = vpop.xlane.xlu0 %1242  ;;  %v6660_v63 = vpop.eup %6659 }
 0x266   : > { %v1285_v19 = vmul.f32 0.03125, %v1243_v42  ;;  %v1312_v36 = vadd.f32 1e-05, %v1280_v15  ;;  %v1398_v42 = vmul.f32 %v7654_v4, %v1360_v29  ;;  %v1397_v15 = vmul.f32 %v7654_v4, %v1359_v44 }
 0x267   : > { %v1246_v10 = vpop.xlane.xlu1 %1245  ;;  %v1370_v29 = vmul.f32 %v6658_v9, %v7489_v14 }
 0x268   : > { %v1317_v52 = vadd.f32 1e-05, %v1285_v19  ;;  %v1286_v54 = vmul.f32 0.03125, %v1246_v10  ;;  %v6662_v19 = vpop.eup %6661  ;;  %v1311_v10 = vadd.f32 1e-05, %v1279_v8  ;;  %v1436_v21 = vadd.f32 %v7662_v20, %v1398_v42 }
 0x269   : > { %v1255_v48 = vpop.xlane.xlu0 %1254  ;;  %v6664_v16 = vpop.eup %6663  ;;  %v1369_v60 = vmul.f32 %v6662_v19, %v7485_v7  ;;  %v1435_v14 = vadd.f32 %v7662_v20, %v1397_v15 }
 0x26a   : > { %6671 = vrsqrt.f32 %v1317_v52  ;;  %v1318_v51 = vadd.f32 1e-05, %v1286_v54  ;;  %v1289_v57 = vmul.f32 0.03125, %v1255_v48  ;;  %v1464_v48 = vpack.c.bf16 %v1434_v61, %v1433_v62  ;;  %v6666_v53 = vpop.eup %6665 }
 0x26b   : > { %6673 = vrsqrt.f32 %v1309_v35  ;;  %v1258_v32 = vpop.xlane.xlu1 %1257  ;;  %v1368_v35 = vmul.f32 %v6660_v63, %v7500_v41  ;;  %v1367_v44 = vmul.f32 %v6664_v16, %v7494_v23  ;;  %v6668_v41 = vpop.eup %6667  ;;  %v1442_v61 = vadd.f32 %v7662_v20, %v1404_v46 }
 0x26c   : > { %6675 = vrsqrt.f32 %v1318_v51  ;;  %v1290_v18 = vmul.f32 0.03125, %v1258_v32  ;;  %v1321_v55 = vadd.f32 1e-05, %v1289_v57  ;;  %v1403_v32 = vmul.f32 %v7654_v4, %v1365_v31 }
 0x26d   : > { %6677 = vrsqrt.f32 %v1312_v36  ;;  %v1249_v52 = vpop.xlane.xlu0 %1248  ;;  %v1408_v63 = vmul.f32 %v7654_v4, %v1370_v29  ;;  %v1406_v57 = vmul.f32 %v7654_v4, %v1368_v35  ;;  %v1362_v7 = vmul.f32 %v6666_v53, %v7512_v1 }
 0x26e   : > { %v1322_v8 = vadd.f32 1e-05, %v1290_v18  ;;  %v1287_v54 = vmul.f32 0.03125, %v1249_v52  ;;  %6679 = vrsqrt.f32 %v1311_v10  ;;  %v6670_v23 = vpop.eup %6669  ;;  %v1441_v62 = vadd.f32 %v7662_v20, %v1403_v32 }
 0x26f   : > { %v1252_v49 = vpop.xlane.xlu1 %1251  ;;  %v1465_v31 = vpack.c.bf16 %v1436_v21, %v1435_v14  ;;  %v1407_v16 = vmul.f32 %v7654_v4, %v1369_v60  ;;  %v1405_v18 = vmul.f32 %v7654_v4, %v1367_v44  ;;  %v1361_v52 = vmul.f32 %v6668_v41, %v7506_v56 }
 0x270   : > { %6681 = vrsqrt.f32 %v1322_v8  ;;  %v1319_v36 = vadd.f32 1e-05, %v1287_v54  ;;  %v1288_v51 = vmul.f32 0.03125, %v1252_v49  ;;  %v1468_v1 = vpack.c.bf16 %v1442_v61, %v1441_v62 }
 0x271   : > { %6683 = vrsqrt.f32 %v1321_v55  ;;  %v1231_v9 = vpop.xlane.xlu0 %1230  ;;  %v1446_v35 = vadd.f32 %v7662_v20, %v1408_v63  ;;  %v1444_v8 = vadd.f32 %v7662_v20, %v1406_v57  ;;  %v1400_v49 = vmul.f32 %v7654_v4, %v1362_v7 }
 0x272   : > { %6685 = vrsqrt.f32 %v1319_v36  ;;  %v1320_v42 = vadd.f32 1e-05, %v1288_v51  ;;  %v1281_v10 = vmul.f32 0.03125, %v1231_v9  ;;  %v1374_v32 = vmul.f32 %v6670_v23, %v7527_v45 }
 0x273   : > { %v1234_v19 = vpop.xlane.xlu1 %1233  ;;  %v1445_v56 = vadd.f32 %v7662_v20, %v1407_v16  ;;  %v1399_v36 = vmul.f32 %v7654_v4, %v1361_v52 }
 0x274   : > { %v6672_v15 = vpop.eup %6671  ;;  %6687 = vrsqrt.f32 %v1320_v42  ;;  %v1313_v46 = vadd.f32 1e-05, %v1281_v10  ;;  %v1282_v55 = vmul.f32 0.03125, %v1234_v19  ;;  %1480 = vrot.lane.b32.xlu1 %v1464_v48, %s7133_s25  ;;  %v1412_v63 = vmul.f32 %v7654_v4, %v1374_v32 }
 0x275   : > { %v6674_v29 = vpop.eup %6673  ;;  %v1381_v54 = vmul.f32 %v6672_v15, %v7546_v17  ;;  %v1443_v17 = vadd.f32 %v7662_v20, %v1405_v18  ;;  %v1470_v14 = vpack.c.bf16 %v1446_v35, %v1445_v56  ;;  %v1437_v23 = vadd.f32 %v7662_v20, %v1399_v36 }
 0x276   : > { %v6676_v21 = vpop.eup %6675  ;;  %6689 = vrsqrt.f32 %v1313_v46  ;;  %v1314_v53 = vadd.f32 1e-05, %v1282_v55  ;;  %v1373_v51 = vmul.f32 %v6674_v29, %v7522_v27  ;;  %v1450_v46 = vadd.f32 %v7662_v20, %v1412_v63  ;;  %v1705_v63 = vld [vmem:[%s10208_s8 + $0x8] sm:$0xff] }
 0x277   : > { %v6678_v60 = vpop.eup %6677  ;;  %1489 = vrot.lane.b32.xlu0 %v1468_v1, %s7133_s25  ;;  %v1382_v48 = vmul.f32 %v6676_v21, %v7552_v34  ;;  %v1419_v44 = vmul.f32 %v7654_v4, %v1381_v54  ;;  %v1469_v61 = vpack.c.bf16 %v1444_v8, %v1443_v17  ;;  %v1438_v34 = vadd.f32 %v7662_v20, %v1400_v49 }
 0x278   : > { %6691 = vrsqrt.f32 %v1314_v53  ;;  %1483 = vrot.lane.b32.xlu1 %v1465_v31, %s7134_s3  ;;  %v6680_v45 = vpop.eup %6679  ;;  %v1376_v57 = vmul.f32 %v6678_v60, %v7539_v3  ;;  %v1411_v19 = vmul.f32 %v7654_v4, %v1373_v51  ;;  %v10246_v36 = vmov 0  }
 0x279   : > { %v1420_v41 = vmul.f32 %v7654_v4, %v1382_v48  ;;  %v1457_v10 = vadd.f32 %v7662_v20, %v1419_v44  ;;  %v1375_v62 = vmul.f32 %v6680_v45, %v7532_v59  ;;  %v1466_v15 = vpack.c.bf16 %v1438_v34, %v1437_v23  ;;  %1604 = vmatprep.mubr.bf16.mxu1 %v10246_v36  ;;  %v1552_v34 = vld [vmem:[%s10206_s6 + $0x8] sm:$0xff] }
 0x27a   : > { %v6682_v9 = vpop.eup %6681  ;;  %v1414_v55 = vmul.f32 %v7654_v4, %v1376_v57  ;;  %6604 = vset.pattern.permute.xlu1 %v10246_v36  ;;  %6603 = vset.pattern.permute.xlu0 %v10246_v36  ;;  %v1704_v57 = vld [vmem:[%s10208_s8] sm:$0xff] }
 0x27b   : > { %v6684_v42 = vpop.eup %6683  ;;  %1495 = vrot.lane.b32.xlu0 %v1470_v14, %s7135_s26  ;;  %v1458_v27 = vadd.f32 %v7662_v20, %v1420_v41  ;;  %v1386_v16 = vmul.f32 %v6682_v9, %v7568_v25  ;;  %v1413_v25 = vmul.f32 %v7654_v4, %v1375_v62 }
 0x27c   : > { %v6686_v7 = vpop.eup %6685  ;;  %1492 = vrot.lane.b32.xlu1 %v1469_v61, %s7134_s3  ;;  %v1385_v52 = vmul.f32 %v6684_v42, %v7564_v12  ;;  %v1452_v53 = vadd.f32 %v7662_v20, %v1414_v55  ;;  %v1551_v61 = vld [vmem:[%s10206_s6] sm:$0xff]  ;;  %v1192_v42 = vpop.xlane.xlu1 %1191 }
 0x27d   : > { %v1476_v31 = vpack.c.bf16 %v1458_v27, %v1457_v10  ;;  %v1383_v3 = vmul.f32 %v6686_v7, %v7574_v24  ;;  %v1449_v24 = vadd.f32 %v7662_v20, %v1411_v19  ;;  %v1424_v8 = vmul.f32 %v7654_v4, %v1386_v16  ;;  %v1189_v10 = vpop.xlane.xlu0 %1188 }
 0x27e   : > { %v6688_v18 = vpop.eup %6687  ;;  %v1451_v48 = vadd.f32 %v7662_v20, %v1413_v25  ;;  %v1268_v7 = vmul.f32 0.03125, %v1192_v42  ;;  %v1267_v23 = vmul.f32 0.03125, %v1189_v10 }
 0x27f   : > { %1507 = vrot.lane.b32.xlu0 %v1476_v31, %s7133_s25  ;;  %v1384_v29 = vmul.f32 %v6688_v18, %v7580_v13  ;;  %v1421_v1 = vmul.f32 %v7654_v4, %v1383_v3  ;;  %v1472_v21 = vpack.c.bf16 %v1450_v46, %v1449_v24  ;;  %v1423_v13 = vmul.f32 %v7654_v4, %v1385_v52 }
 0x280   : > { %v6690_v59 = vpop.eup %6689  ;;  %1486 = vrot.lane.b32.xlu1 %v1466_v15, %s7135_s26  ;;  %v1473_v51 = vpack.c.bf16 %v1452_v53, %v1451_v48  ;;  %v1168_v27 = vpop.xlane.xlu1 %1167  ;;  %v1300_v31 = vadd.f32 1e-05, %v1268_v7  ;;  %v1299_v16 = vadd.f32 1e-05, %v1267_v23 }
 0x281   : > { %v1422_v35 = vmul.f32 %v7654_v4, %v1384_v29  ;;  %v1377_v54 = vmul.f32 %v6690_v59, %v7586_v38  ;;  %v1459_v49 = vadd.f32 %v7662_v20, %v1421_v1  ;;  %v1462_v38 = vadd.f32 %v7662_v20, %v1424_v8  ;;  %v1165_v19 = vpop.xlane.xlu0 %1164 }
 0x282   : > { %v6692_v12 = vpop.eup %6691  ;;  %v1260_v62 = vmul.f32 0.03125, %v1168_v27  ;;  %v1259_v3 = vmul.f32 0.03125, %v1165_v19  ;;  %6693 = vrsqrt.f32 %v1300_v31 }
 0x283   : > { %v1460_v32 = vadd.f32 %v7662_v20, %v1422_v35  ;;  %v1378_v60 = vmul.f32 %v6692_v12, %v7592_v0  ;;  %v1415_v56 = vmul.f32 %v7654_v4, %v1377_v54  ;;  %v1461_v0 = vadd.f32 %v7662_v20, %v1423_v13 }
 0x284   : > { %1498 = vrot.lane.b32.xlu1 %v1472_v21, %s7133_s25  ;;  %v1292_v18 = vadd.f32 1e-05, %v1260_v62  ;;  %v1291_v15 = vadd.f32 1e-05, %v1259_v3  ;;  %6695 = vrsqrt.f32 %v1299_v16 }
 0x285   : > { %v1477_v44 = vpack.c.bf16 %v1460_v32, %v1459_v49  ;;  %v1416_v17 = vmul.f32 %v7654_v4, %v1378_v60  ;;  %v1453_v45 = vadd.f32 %v7662_v20, %v1415_v56  ;;  %v1478_v41 = vpack.c.bf16 %v1462_v38, %v1461_v0 }
 0x286   : > { %6697 = vrsqrt.f32 %v1292_v18 }
 0x287   : > { %1510 = vrot.lane.b32.xlu0 %v1477_v44, %s7134_s3  ;;  %v1454_v14 = vadd.f32 %v7662_v20, %v1416_v17  ;;  %6699 = vrsqrt.f32 %v1291_v15 }
 0x288   : > { %1501 = vrot.lane.b32.xlu1 %v1473_v51, %s7134_s3 }
 0x289   : > { %v1474_v9 = vpack.c.bf16 %v1454_v14, %v1453_v45 }
 0x28b   : > { %1513 = vrot.lane.b32.xlu0 %v1478_v41, %s7135_s26 }
 0x28c   : > { %1504 = vrot.lane.b32.xlu1 %v1474_v9, %s7135_s26  ;;  %v6694_v55 = vpop.eup %6693 }
 0x28d   : > { %v1364_v8 = vmul.f32 %v6694_v55, %v7604_v50 }
 0x28e   : > { %v6696_v29 = vpop.eup %6695 }
 0x28f   : > { %1555 = vperm.xlu0 %6603, %v1551_v61   ;;  %v1363_v13 = vmul.f32 %v6696_v29, %v7598_v43  ;;  %v1402_v56 = vmul.f32 %v7654_v4, %v1364_v8 }
 0x290   : > { %1560 = vperm.xlu1 %6604, %v1552_v34   ;;  %v6698_v59 = vpop.eup %6697 }
 0x291   : > { %v6700_v54 = vpop.eup %6699  ;;  %v1356_v49 = vmul.f32 %v6698_v59, %v7616_v5  ;;  %v1401_v50 = vmul.f32 %v7654_v4, %v1363_v13  ;;  %v1440_v43 = vadd.f32 %v7662_v20, %v1402_v56 }
 0x292   : > { %v1355_v44 = vmul.f32 %v6700_v54, %v7610_v47 }
 0x293   : > { %1713 = vperm.xlu0 %6603, %v1705_v63   ;;  %v1394_v17 = vmul.f32 %v7654_v4, %v1356_v49  ;;  %v1439_v45 = vadd.f32 %v7662_v20, %v1401_v50 }
 0x294   : > { %1708 = vperm.xlu1 %6604, %v1704_v57   ;;  %v1393_v5 = vmul.f32 %v7654_v4, %v1355_v44 }
 0x295   : > { %v1432_v14 = vadd.f32 %v7662_v20, %v1394_v17  ;;  %v1467_v47 = vpack.c.bf16 %v1440_v43, %v1439_v45 }
 0x296   : > { %v1431_v61 = vadd.f32 %v7662_v20, %v1393_v5 }
 0x298   : > { %v1463_v10 = vpack.c.bf16 %v1432_v14, %v1431_v61 }
 0x2ea   : > { %v1237_v46 = vpop.xlane.xlu0 %1236 }
 0x2eb   : > { %v1283_v52 = vmul.f32 0.03125, %v1237_v46 }
 0x2ec   : > { %v1240_v1 = vpop.xlane.xlu1 %1239 }
 0x2ed   : > { %v1315_v24 = vadd.f32 1e-05, %v1283_v52  ;;  %v1284_v25 = vmul.f32 0.03125, %v1240_v1 }
 0x2ee   : > { %v1213_v35 = vpop.xlane.xlu0 %1212 }
 0x2ef   : > { %6701 = vrsqrt.f32 %v1315_v24  ;;  %v1316_v12 = vadd.f32 1e-05, %v1284_v25  ;;  %v1275_v21 = vmul.f32 0.03125, %v1213_v35 }
 0x2f0   : > { %v1216_v53 = vpop.xlane.xlu1 %1215 }
 0x2f1   : > { %6703 = vrsqrt.f32 %v1316_v12  ;;  %v1307_v32 = vadd.f32 1e-05, %v1275_v21  ;;  %v1276_v60 = vmul.f32 0.03125, %v1216_v53 }
 0x2f2   : > { %v1490_v48 = vpop.permute.xlu0 %1489 }
 0x2f3   : > { %6705 = vrsqrt.f32 %v1307_v32  ;;  %v1308_v38 = vadd.f32 1e-05, %v1276_v60  ;;  %v1527_v42 = vsel %vm969_vm0, %v1467_v47, %v1490_v48 }
 0x2f4   : > { %v1481_v51 = vpop.permute.xlu1 %1480 }
 0x2f5   : > { %6707 = vrsqrt.f32 %v1308_v38  ;;  %v1517_v31 = vsel %vm969_vm0, %v1463_v10, %v1481_v51 }
 0x2f6   : > { %v1496_v0 = vpop.permute.xlu0 %1495 }
 0x2f8   : > { %v1484_v41 = vpop.permute.xlu1 %1483 }
 0x2f9   : > { %v6702_v9 = vpop.eup %6701  ;;  %v1520_v15 = vsel %vm1518_vm1, %v1517_v31, %v1484_v41 }
 0x2fa   : > { %v1379_v34 = vmul.f32 %v6702_v9, %v7626_v22  ;;  %v1508_v63 = vpop.permute.xlu0 %1507 }
 0x2fb   : > { %v6704_v57 = vpop.eup %6703 }
 0x2fc   : > { %v1380_v27 = vmul.f32 %v6704_v57, %v7629_v58  ;;  %v1417_v7 = vmul.f32 %v7654_v4, %v1379_v34  ;;  %v1493_v23 = vpop.permute.xlu1 %1492 }
 0x2fd   : > { %v6706_v19 = vpop.eup %6705  ;;  %v1529_v62 = vsel %vm1518_vm1, %v1527_v42, %v1493_v23 }
 0x2fe   : > { %v1418_v3 = vmul.f32 %v7654_v4, %v1380_v27  ;;  %v1531_v22 = vsel %vm1521_vm2, %v1529_v62, %v1496_v0  ;;  %v1371_v16 = vmul.f32 %v6706_v19, %v7634_v2  ;;  %v1511_v46 = vpop.permute.xlu0 %1510  ;;  %v1455_v58 = vadd.f32 %v7662_v20, %v1417_v7  ;;  %v6629_v2 = vld [vmem:[%s10205_s5] sm:$0xff]  }
 0x2ff   : > { %v6708_v18 = vpop.eup %6707  ;;  %1572 = vmatprep.subr.bf16.mxu1 %v1531_v22 }
 0x300   : > { %v1456_v55 = vadd.f32 %v7662_v20, %v1418_v3  ;;  %v1487_v52 = vpop.permute.xlu1 %1486  ;;  %v1372_v29 = vmul.f32 %v6708_v18, %v7640_v40  ;;  %v1409_v1 = vmul.f32 %v7654_v4, %v1371_v16 }
 0x301   : > { %v1523_v59 = vsel %vm1521_vm2, %v1520_v15, %v1487_v52 }
 0x302   : > { %v1475_v24 = vpack.c.bf16 %v1456_v55, %v1455_v58  ;;  %1573 = vmatpush1.bf16.msra.mxu1 %v1523_v59  ;;  %v1410_v25 = vmul.f32 %v7654_v4, %v1372_v29  ;;  %v1447_v40 = vadd.f32 %v7662_v20, %v1409_v1  ;;  %v1514_v21 = vpop.permute.xlu0 %1513 }
 0x304   : > { %v1543_v35 = vsel %vm969_vm0, %v1475_v24, %v1508_v63  ;;  %v1448_v8 = vadd.f32 %v7662_v20, %v1410_v25  ;;  %v1499_v54 = vpop.permute.xlu1 %1498 }
 0x305   : > { %v1545_v12 = vsel %vm1518_vm1, %v1543_v35, %v1511_v46  ;;  %6128 = vmatmul.mubr.msk.bf16.vlgmr.msra.gmra.mrb[0].mxu1 %vm1568_vm3, %v6629_v2 }
 0x306   : > { %v1471_v53 = vpack.c.bf16 %v1448_v8, %v1447_v40  ;;  %v1547_v13 = vsel %vm1521_vm2, %v1545_v12, %v1514_v21  ;;  %1647 = vmatprep.mubr.bf16.mxu1 %v10246_v36 }
 0x307   : > { %1615 = vmatprep.subr.bf16.mxu1 %v1547_v13 }
 0x308   : > { %v1502_v4 = vpop.permute.xlu1 %1501  ;;  %v1535_v49 = vsel %vm969_vm0, %v1471_v53, %v1499_v54  ;;  %v6630_v54 = vld [vmem:[%s10207_s7] sm:$0xff]  }
 0x309   : > { %v1537_v32 = vsel %vm1518_vm1, %v1535_v49, %v1502_v4 }
 0x30c   : > { %v1505_v60 = vpop.permute.xlu1 %1504 }
 0x30d   : > { %v1539_v56 = vsel %vm1521_vm2, %v1537_v32, %v1505_v60 }
 0x30e   : > { %1616 = vmatpush1.bf16.msra.mxu1 %v1539_v56  ;;  %v1556_v20 = vpop.permute.xlu0 %1555 }
 0x310   : > { %v1561_v50 = vpop.permute.xlu1 %1560 }
 0x311   : > { %6129 = vmatmul.mubr.msk.bf16.vlgmr.msra.gmra.mrb[4].mxu1 %vm1568_vm3, %v6629_v2 }
 0x312   : > { %1756 = vmatprep.mubr.bf16.mxu1 %v10246_v36 }
 0x3d8   : > { %v1606_v48 = vpop.f32.mrb[0].mxu1 }
 0x3d9   : > { %v1607_v44 = vadd.f32 %v1606_v48, %v1556_v20  ;;  %v1608_v38 = vpop.f32.mrb[1].mxu1 }
 0x3da   : > { %v1609_v17 = vadd.f32 %v1608_v38, %v1556_v20  ;;  %v1610_v51 = vpop.f32.mrb[2].mxu1 }
 0x3db   : > { %v1666_v43 = vmul.f32 0.70710677, %v1607_v44  ;;  %v1611_v5 = vadd.f32 %v1610_v51, %v1561_v50  ;;  %v1612_v0 = vpop.f32.mrb[3].mxu1  ;;  %v1658_v22 = vmul.f32 0.5, %v1607_v44 }
 0x3dc   : > { %v1667_v45 = vmul.f32 0.70710677, %v1609_v17  ;;  %v1613_v14 = vadd.f32 %v1612_v0, %v1561_v50  ;;  %v1659_v46 = vmul.f32 0.5, %v1609_v17 }
 0x3dd   : > { %6709 = verf.f32 %v1666_v43  ;;  %v1670_v41 = vmul.f32 0.70710677, %v1611_v5  ;;  %v1662_v58 = vmul.f32 0.5, %v1611_v5  ;;  %v1709_v5 = vpop.permute.xlu1 %1708 }
 0x3de   : > { %6711 = verf.f32 %v1667_v45  ;;  %v1671_v9 = vmul.f32 0.70710677, %v1613_v14  ;;  %v1663_v52 = vmul.f32 0.5, %v1613_v14 }
 0x3df   : > { %6713 = verf.f32 %v1670_v41  ;;  %v1714_v41 = vpop.permute.xlu0 %1713 }
 0x3e0   : > { %6715 = verf.f32 %v1671_v9 }
 0x3e4   : > { %v1649_v47 = vpop.f32.mrb[4].mxu1 }
 0x3e5   : > { %v1650_v61 = vadd.f32 %v1649_v47, %v1556_v20  ;;  %v1651_v34 = vpop.f32.mrb[5].mxu1 }
 0x3e6   : > { %v1652_v63 = vadd.f32 %v1651_v34, %v1556_v20  ;;  %v1653_v57 = vpop.f32.mrb[6].mxu1 }
 0x3e7   : > { %v6710_v42 = vpop.eup %6709  ;;  %v1668_v10 = vmul.f32 0.70710677, %v1650_v61  ;;  %v1654_v27 = vadd.f32 %v1653_v57, %v1561_v50  ;;  %v1655_v7 = vpop.f32.mrb[7].mxu1  ;;  %v1660_v13 = vmul.f32 0.5, %v1650_v61 }
 0x3e8   : > { %v6712_v23 = vpop.eup %6711  ;;  %v1682_v19 = vadd.f32 1.0, %v6710_v42  ;;  %v1669_v62 = vmul.f32 0.70710677, %v1652_v63  ;;  %v1656_v31 = vadd.f32 %v1655_v7, %v1561_v50  ;;  %v1661_v56 = vmul.f32 0.5, %v1652_v63 }
 0x3e9   : > { %v6714_v3 = vpop.eup %6713  ;;  %v1683_v16 = vadd.f32 1.0, %v6712_v23  ;;  %6717 = verf.f32 %v1668_v10  ;;  %v1672_v18 = vmul.f32 0.70710677, %v1654_v27  ;;  %v1664_v49 = vmul.f32 0.5, %v1654_v27 }
 0x3ea   : > { %v6716_v15 = vpop.eup %6715  ;;  %v1686_v55 = vadd.f32 1.0, %v6714_v3  ;;  %6719 = verf.f32 %v1669_v62  ;;  %v1673_v1 = vmul.f32 0.70710677, %v1656_v31  ;;  %v1690_v59 = vmul.f32 %v1682_v19, %v1658_v22 }
 0x3eb   : > { %v1687_v29 = vadd.f32 1.0, %v6716_v15  ;;  %6721 = verf.f32 %v1672_v18  ;;  %v1691_v24 = vmul.f32 %v1683_v16, %v1659_v46  ;;  %v1665_v44 = vmul.f32 0.5, %v1656_v31 }
 0x3ec   : > { %v1694_v2 = vmul.f32 %v1686_v55, %v1662_v58  ;;  %6723 = verf.f32 %v1673_v1  ;;  %v10347_v1 = vld [vmem:[#allocation11_spill] sm:$0xff] }
 0x3ed   : > { %v1695_v25 = vmul.f32 %v1687_v29, %v1663_v52 }
 0x3ee   : > { %v1698_v35 = vpack.c.bf16 %v1694_v2, %v1690_v59 }
 0x3ef   : > { %v1699_v8 = vpack.c.bf16 %v1695_v25, %v1691_v24  ;;  %v10349_v24 = vld [vmem:[#allocation2_spill] sm:$0xff] }
 0x3f1   : > { %1724 = vmatprep.subr.bf16.mxu1 %v1699_v8  ;;  %v10350_v8 = vld [vmem:[#allocation4_spill] sm:$0xff] }
 0x3f2   : > { %1725 = vmatpush1.bf16.msra.mxu1 %v1698_v35 }
 0x3f3   : > { %v6718_v40 = vpop.eup %6717 }
 0x3f4   : > { %v6720_v12 = vpop.eup %6719  ;;  %v1684_v21 = vadd.f32 1.0, %v6718_v40  ;;  %v10352_v40 = vld [vmem:[#allocation12_spill] sm:$0xff] }
 0x3f5   : > { %v6722_v53 = vpop.eup %6721  ;;  %6131 = vmatmul.mubr.msk.bf16.vlgmr.msra.gmra.mrb[8].mxu1 %vm1568_vm3, %v6630_v54  ;;  %v1685_v4 = vadd.f32 1.0, %v6720_v12 }
 0x3f6   : > { %v1688_v32 = vadd.f32 1.0, %v6722_v53  ;;  %1799 = vmatprep.mubr.bf16.mxu1 %v10246_v36  ;;  %v6724_v60 = vpop.eup %6723  ;;  %v1692_v20 = vmul.f32 %v1684_v21, %v1660_v13 }
 0x3f7   : > { %v1689_v38 = vadd.f32 1.0, %v6724_v60  ;;  %v1693_v50 = vmul.f32 %v1685_v4, %v1661_v56  ;;  %v10354_v4 = vld [vmem:[#allocation3_spill] sm:$0xff]  ;;  %v10355_v56 = vld [vmem:[#allocation6_spill] sm:$0xff] }
 0x3f8   : > { %v1696_v48 = vmul.f32 %v1688_v32, %v1664_v49 }
 0x3f9   : > { %v1697_v51 = vmul.f32 %v1689_v38, %v1665_v44 }
 0x3fa   : > { %v1700_v17 = vpack.c.bf16 %v1696_v48, %v1692_v20  ;;  %v10357_v48 = vld [vmem:[#allocation8_spill] sm:$0xff] }
 0x3fb   : > { %v1701_v43 = vpack.c.bf16 %v1697_v51, %v1693_v50 }
 0x3fd   : > { %1767 = vmatprep.subr.bf16.mxu1 %v1701_v43 }
 0x3fe   : > { %1768 = vmatpush1.bf16.msra.mxu1 %v1700_v17  ;;  %v10358_v17 = vld [vmem:[#allocation5_spill] sm:$0xff] }
 0x401   : > { %6132 = vmatmul.mubr.msk.bf16.vlgmr.msra.gmra.mrb[12].mxu1 %vm1568_vm3, %v6630_v54 }
 0x4c8   : > { %v1758_v0 = vpop.f32.mrb[8].mxu1 }
 0x4c9   : > { %v1759_v45 = vadd.f32 %v1758_v0, %v1709_v5  ;;  %v1760_v14 = vpop.f32.mrb[9].mxu1  ;;  %v10359_v0 = vld [vmem:[#allocation7_spill] sm:$0xff] }
 0x4ca   : > { %v1762_v9 = vpop.f32.mrb[10].mxu1  ;;  %v1761_v34 = vadd.f32 %v1760_v14, %v1709_v5 }
 0x4cb   : > { %v1763_v47 = vadd.f32 %v1762_v9, %v1714_v41  ;;  %v1764_v61 = vpop.f32.mrb[11].mxu1  ;;  %1812 = vrot.lane.b32.xlu1 %v1759_v45, %s7135_s26  ;;  %v7823_v23 = vadd.f32 %v1759_v45, %v7301_v28 }
 0x4cc   : > { %v1765_v42 = vadd.f32 %v1764_v61, %v1714_v41  ;;  %v7885_v54 = vadd.f32 %v1761_v34, %v10350_v8 }
 0x4cd   : > { %1814 = vrot.lane.b32.xlu0 %v1763_v47, %s7135_s26  ;;  %v7820_v7 = vadd.f32 %v1763_v47, %v7309_v33  ;;  %10346 = vst [vmem:[#allocation27_spill] sm:$0xff] %v7823_v23  ;;  %v1924_v62 = vsel %vm969_vm0, %v7823_v23, 0.0 }
 0x4ce   : > { %10351 = vst [vmem:[#allocation2_spill] sm:$0xff] %v7885_v54  ;;  %v1948_v32 = vsel %vm969_vm0, %v7885_v54, 0.0  ;;  %v7900_v20 = vadd.f32 %v1765_v42, %v10355_v56  ;;  %v10376_v56 = vld [vmem:[#allocation15_spill] sm:$0xff] }
 0x4cf   : > { %1818 = vrot.lane.b32.xlu1 %v1759_v45, %s7134_s3  ;;  %10345 = vst [vmem:[#allocation26_spill] sm:$0xff] %v7820_v7  ;;  %v1927_v19 = vsel %vm969_vm0, %v7820_v7, 0.0 }
 0x4d0   : > { %10356 = vst [vmem:[#allocation12_spill] sm:$0xff] %v7900_v20 }
 0x4d1   : > { %1820 = vrot.lane.b32.xlu0 %v1763_v47, %s7134_s3 }
 0x4d3   : > { %1824 = vrot.lane.b32.xlu1 %v1759_v45, %s7133_s25 }
 0x4d4   : > { %v1801_v63 = vpop.f32.mrb[12].mxu1 }
 0x4d5   : > { %1826 = vrot.lane.b32.xlu0 %v1763_v47, %s7133_s25  ;;  %v1803_v57 = vpop.f32.mrb[13].mxu1  ;;  %v7829_v31 = vadd.f32 %v1801_v63, %v1709_v5 }
 0x4d6   : > { %v1805_v10 = vpop.f32.mrb[14].mxu1  ;;  %v7843_v28 = vadd.f32 %v1803_v57, %v1709_v5  ;;  %v1951_v5 = vsel %vm969_vm0, %v7900_v20, 0.0  ;;  %v10363_v57 = vld [vmem:[#allocation9_spill] sm:$0xff] }
 0x4d7   : > { %1832 = vrot.lane.b32.xlu1 %v1761_v34, %s7135_s26  ;;  %v1807_v27 = vpop.f32.mrb[15].mxu1  ;;  %v7831_v3 = vadd.f32 %v1805_v10, %v1714_v41  ;;  %v7926_v63 = vadd.f32 %v7829_v31, %v7369_v6 }
 0x4d8   : > { %v7847_v33 = vadd.f32 %v1807_v27, %v1714_v41  ;;  %v10360_v41 = vld [vmem:[#allocation10_spill] sm:$0xff] }
 0x4d9   : > { %1834 = vrot.lane.b32.xlu0 %v1765_v42, %s7135_s26  ;;  %10362 = vst [vmem:[#allocation6_spill] sm:$0xff] %v7926_v63  ;;  %v1972_v27 = vsel %vm969_vm0, %v7926_v63, 0.0 }
 0x4db   : > { %1838 = vrot.lane.b32.xlu1 %v1761_v34, %s7134_s3 }
 0x4dd   : > { %1840 = vrot.lane.b32.xlu0 %v1765_v42, %s7134_s3 }
 0x4df   : > { %1844 = vrot.lane.b32.xlu1 %v1761_v34, %s7133_s25 }
 0x4e1   : > { %1846 = vrot.lane.b32.xlu0 %v1765_v42, %s7133_s25 }
 0x500   : > { %1928 = vadd.xlane.f32.xlu0 %v1927_v19 }
 0x503   : > { %1925 = vadd.xlane.f32.xlu1 %v1924_v62  ;;  %v7939_v62 = vadd.f32 %v7831_v3, %v7377_v11 }
 0x505   : > { %10364 = vst [vmem:[#allocation8_spill] sm:$0xff] %v7939_v62  ;;  %v1975_v6 = vsel %vm969_vm0, %v7939_v62, 0.0 }
 0x514   : > { %1852 = vrot.lane.b32.xlu1 %v7829_v31, %s7135_s26 }
 0x516   : > { %1854 = vrot.lane.b32.xlu0 %v7831_v3, %s7135_s26 }
 0x518   : > { %1858 = vrot.lane.b32.xlu1 %v7829_v31, %s7134_s3 }
 0x51a   : > { %1860 = vrot.lane.b32.xlu0 %v7831_v3, %s7134_s3 }
 0x51c   : > { %1864 = vrot.lane.b32.xlu1 %v7829_v31, %s7133_s25 }
 0x51e   : > { %1866 = vrot.lane.b32.xlu0 %v7831_v3, %s7133_s25  ;;  %v10369_v3 = vld [vmem:[#allocation18_spill] sm:$0xff] }
 0x520   : > { %1872 = vrot.lane.b32.xlu1 %v7843_v28, %s7135_s26 }
 0x522   : > { %1874 = vrot.lane.b32.xlu0 %v7847_v33, %s7135_s26 }
 0x524   : > { %1878 = vrot.lane.b32.xlu1 %v7843_v28, %s7134_s3 }
 0x526   : > { %1880 = vrot.lane.b32.xlu0 %v7847_v33, %s7134_s3 }
 0x528   : > { %1884 = vrot.lane.b32.xlu1 %v7843_v28, %s7133_s25 }
 0x52a   : > { %1886 = vrot.lane.b32.xlu0 %v7847_v33, %s7133_s25 }
 0x53d   : > { %v1813_v22 = vpop.permute.xlu1 %1812 }
 0x53e   : > { %v7862_v15 = vadd.f32 %v1813_v22, %v7298_v26 }
 0x53f   : > { %v1815_v16 = vpop.permute.xlu0 %1814 }
 0x540   : > { %v7868_v52 = vadd.f32 %v1815_v16, %v7304_v30  ;;  %v1930_v29 = vsel %vm969_vm0, %v7862_v15, 0.0 }
 0x541   : > { %v1819_v18 = vpop.permute.xlu1 %1818 }
 0x542   : > { %v7865_v55 = vadd.f32 %v1819_v18, %v7314_v37  ;;  %v1933_v30 = vsel %vm969_vm0, %v7868_v52, 0.0  ;;  %v10365_v18 = vld [vmem:[#allocation14_spill] sm:$0xff] }
 0x543   : > { %v1821_v46 = vpop.permute.xlu0 %1820 }
 0x544   : > { %v1936_v26 = vsel %vm969_vm0, %v7865_v55, 0.0  ;;  %v7878_v25 = vadd.f32 %v1821_v46, %v10349_v24 }
 0x545   : > { %v1825_v58 = vpop.permute.xlu1 %1824 }
 0x546   : > { %v7873_v59 = vadd.f32 %v1825_v58, %v10347_v1  ;;  %v1939_v21 = vsel %vm969_vm0, %v7878_v25, 0.0  ;;  %v10367_v1 = vld [vmem:[#allocation13_spill] sm:$0xff] }
 0x547   : > { %v1827_v2 = vpop.permute.xlu0 %1826 }
 0x548   : > { %10348 = vst [vmem:[#allocation11_spill] sm:$0xff] %v7873_v59  ;;  %v1942_v37 = vsel %vm969_vm0, %v7873_v59, 0.0  ;;  %v7888_v12 = vadd.f32 %v1827_v2, %v10352_v40 }
 0x549   : > { %1931 = vadd.xlane.f32.xlu0 %v1930_v29  ;;  %v1833_v35 = vpop.permute.xlu1 %1832 }
 0x54a   : > { %10353 = vst [vmem:[#allocation4_spill] sm:$0xff] %v7888_v12  ;;  %v7893_v49 = vadd.f32 %v1833_v35, %v10354_v4  ;;  %v1945_v60 = vsel %vm969_vm0, %v7888_v12, 0.0 }
 0x54b   : > { %v1835_v53 = vpop.permute.xlu0 %1834 }
 0x54c   : > { %1937 = vadd.xlane.f32.xlu1 %v1936_v26  ;;  %v1954_v50 = vsel %vm969_vm0, %v7893_v49, 0.0  ;;  %v7908_v51 = vadd.f32 %v1835_v53, %v10358_v17  ;;  %v10378_v17 = vld [vmem:[#allocation20_spill] sm:$0xff] }
 0x54d   : > { %1934 = vadd.xlane.f32.xlu0 %v1933_v30  ;;  %v1839_v13 = vpop.permute.xlu1 %1838 }
 0x54e   : > { %v7903_v44 = vadd.f32 %v1839_v13, %v10357_v48  ;;  %v1957_v47 = vsel %vm969_vm0, %v7908_v51, 0.0 }
 0x54f   : > { %v1841_v38 = vpop.permute.xlu0 %1840 }
 0x550   : > { %1943 = vadd.xlane.f32.xlu1 %v1942_v37  ;;  %v1960_v14 = vsel %vm969_vm0, %v7903_v44, 0.0  ;;  %v7918_v9 = vadd.f32 %v1841_v38, %v10360_v41  ;;  %v10371_v37 = vld [vmem:[#allocation16_spill] sm:$0xff]  ;;  %v10382_v41 = vld [vmem:[#allocation19_spill] sm:$0xff] }
 0x551   : > { %1940 = vadd.xlane.f32.xlu0 %v1939_v21  ;;  %v1845_v43 = vpop.permute.xlu1 %1844  ;;  %v10373_v21 = vld [vmem:[#allocation17_spill] sm:$0xff] }
 0x552   : > { %v7913_v45 = vadd.f32 %v1845_v43, %v10359_v0  ;;  %10361 = vst [vmem:[#allocation3_spill] sm:$0xff] %v7918_v9  ;;  %v1963_v10 = vsel %vm969_vm0, %v7918_v9, 0.0  ;;  %v7979_v43 = vadd.f32 %v7843_v28, %v10378_v17 }
 0x553   : > { %v1847_v61 = vpop.permute.xlu0 %1846 }
 0x554   : > { %1949 = vadd.xlane.f32.xlu1 %v1948_v32  ;;  %v1966_v34 = vsel %vm969_vm0, %v7913_v45, 0.0  ;;  %v7929_v42 = vadd.f32 %v1847_v61, %v10363_v57  ;;  %10379 = vst [vmem:[#allocation16_spill] sm:$0xff] %v7979_v43  ;;  %v1996_v61 = vsel %vm969_vm0, %v7979_v43, 0.0  ;;  %v10384_v57 = vld [vmem:[#allocation25_spill] sm:$0xff] }
 0x555   : > { %1946 = vadd.xlane.f32.xlu0 %v1945_v60  ;;  %v7970_v60 = vadd.f32 %v7847_v33, %v7413_v39 }
 0x556   : > { %v1969_v19 = vsel %vm969_vm0, %v7929_v42, 0.0 }
 0x557   : > { %10375 = vst [vmem:[#allocation13_spill] sm:$0xff] %v7970_v60  ;;  %v1999_v39 = vsel %vm969_vm0, %v7970_v60, 0.0 }
 0x558   : > { %1955 = vadd.xlane.f32.xlu1 %v1954_v50 }
 0x559   : > { %1952 = vadd.xlane.f32.xlu0 %v1951_v5  ;;  %v10380_v5 = vld [vmem:[#allocation21_spill] sm:$0xff] }
 0x55c   : > { %1961 = vadd.xlane.f32.xlu1 %v1960_v14 }
 0x55d   : > { %1958 = vadd.xlane.f32.xlu0 %v1957_v47 }
 0x560   : > { %1967 = vadd.xlane.f32.xlu1 %v1966_v34 }
 0x561   : > { %1964 = vadd.xlane.f32.xlu0 %v1963_v10 }
 0x564   : > { %1973 = vadd.xlane.f32.xlu1 %v1972_v27 }
 0x565   : > { %1970 = vadd.xlane.f32.xlu0 %v1969_v19 }
 0x569   : > { %1976 = vadd.xlane.f32.xlu0 %v1975_v6 }
 0x58d   : > { %v1929_v31 = vpop.xlane.xlu0 %1928 }
 0x58e   : > { %v2021_v34 = vmul.f32 0.03125, %v1929_v31  ;;  %v10388_v31 = vld [vmem:[#allocation24_spill] sm:$0xff] }
 0x590   : > { %v1926_v22 = vpop.xlane.xlu1 %1925 }
 0x591   : > { %v1855_v16 = vpop.permute.xlu0 %1854  ;;  %v2020_v6 = vmul.f32 0.03125, %v1926_v22 }
 0x592   : > { %v7944_v46 = vadd.f32 %v1855_v16, %v10365_v18  ;;  %v10386_v16 = vld [vmem:[#allocation23_spill] sm:$0xff] }
 0x593   : > { %v8010_v22 = vsub.f32 %v7823_v23, %v2020_v6 }
 0x594   : > { %10366 = vst [vmem:[#allocation5_spill] sm:$0xff] %v7944_v46  ;;  %v1853_v58 = vpop.permute.xlu1 %1852  ;;  %v1981_v29 = vsel %vm969_vm0, %v7944_v46, 0.0 }
 0x595   : > { %v7949_v2 = vadd.f32 %v1853_v58, %v10367_v1  ;;  %1982 = vadd.xlane.f32.xlu0 %v1981_v29  ;;  %v1861_v11 = vpop.permute.xlu0 %1860  ;;  %v8002_v29 = vsub.f32 %v7820_v7, %v2021_v34 }
 0x596   : > { %v7952_v26 = vadd.f32 %v1861_v11, %v10369_v3 }
 0x597   : > { %10368 = vst [vmem:[#allocation7_spill] sm:$0xff] %v7949_v2  ;;  %v1978_v24 = vsel %vm969_vm0, %v7949_v2, 0.0 }
 0x598   : > { %10370 = vst [vmem:[#allocation10_spill] sm:$0xff] %v7952_v26  ;;  %1979 = vadd.xlane.f32.xlu1 %v1978_v24  ;;  %v1859_v35 = vpop.permute.xlu1 %1858  ;;  %v1987_v30 = vsel %vm969_vm0, %v7952_v26, 0.0  ;;  %v10390_v24 = vld [vmem:[#allocation22_spill] sm:$0xff] }
 0x599   : > { %v7959_v8 = vadd.f32 %v1859_v35, %v10371_v37  ;;  %1988 = vadd.xlane.f32.xlu0 %v1987_v30  ;;  %v1867_v40 = vpop.permute.xlu0 %1866 }
 0x59a   : > { %v7962_v53 = vadd.f32 %v1867_v40, %v10373_v21  ;;  %v2085_v40 = vmul.f32 %v8002_v29, %v8002_v29 }
 0x59b   : > { %10372 = vst [vmem:[#allocation9_spill] sm:$0xff] %v7959_v8  ;;  %v1984_v13 = vsel %vm969_vm0, %v7959_v8, 0.0 }
 0x59c   : > { %10374 = vst [vmem:[#allocation14_spill] sm:$0xff] %v7962_v53  ;;  %1985 = vadd.xlane.f32.xlu1 %v1984_v13  ;;  %v1865_v4 = vpop.permute.xlu1 %1864  ;;  %v1993_v32 = vsel %vm969_vm0, %v7962_v53, 0.0  ;;  %v2084_v13 = vmul.f32 %v8010_v22, %v8010_v22 }
 0x59d   : > { %v7973_v48 = vadd.f32 %v1865_v4, %v10376_v56  ;;  %1994 = vadd.xlane.f32.xlu0 %v1993_v32  ;;  %v1875_v38 = vpop.permute.xlu0 %1874  ;;  %v2119_v4 = vsel %vm969_vm0, %v2085_v40, 0.0 }
 0x59e   : > { %v7982_v0 = vadd.f32 %v1875_v38, %v10380_v5  ;;  %v2116_v32 = vsel %vm969_vm0, %v2084_v13, 0.0 }
 0x59f   : > { %10377 = vst [vmem:[#allocation18_spill] sm:$0xff] %v7973_v48  ;;  %v1990_v50 = vsel %vm969_vm0, %v7973_v48, 0.0 }
 0x5a0   : > { %10381 = vst [vmem:[#allocation17_spill] sm:$0xff] %v7982_v0  ;;  %1991 = vadd.xlane.f32.xlu1 %v1990_v50  ;;  %v1873_v14 = vpop.permute.xlu1 %1872  ;;  %v2005_v27 = vsel %vm969_vm0, %v7982_v0, 0.0 }
 0x5a1   : > { %2000 = vadd.xlane.f32.xlu0 %v1999_v39  ;;  %v1881_v33 = vpop.permute.xlu0 %1880  ;;  %v7987_v47 = vadd.f32 %v1873_v14, %v10382_v41 }
 0x5a2   : > { %v7992_v28 = vadd.f32 %v1881_v33, %v10384_v57 }
 0x5a3   : > { %10383 = vst [vmem:[#allocation15_spill] sm:$0xff] %v7987_v47  ;;  %v2002_v58 = vsel %vm969_vm0, %v7987_v47, 0.0 }
 0x5a4   : > { %10385 = vst [vmem:[#allocation20_spill] sm:$0xff] %v7992_v28  ;;  %1997 = vadd.xlane.f32.xlu1 %v1996_v61  ;;  %v1879_v10 = vpop.permute.xlu1 %1878  ;;  %v2011_v3 = vsel %vm969_vm0, %v7992_v28, 0.0 }
 0x5a5   : > { %2006 = vadd.xlane.f32.xlu0 %v2005_v27  ;;  %v1887_v19 = vpop.permute.xlu0 %1886  ;;  %v7997_v18 = vadd.f32 %v1879_v10, %v10386_v16 }
 0x5a6   : > { %v8005_v1 = vadd.f32 %v1887_v19, %v10388_v31 }
 0x5a7   : > { %10387 = vst [vmem:[#allocation21_spill] sm:$0xff] %v7997_v18  ;;  %v2008_v30 = vsel %vm969_vm0, %v7997_v18, 0.0 }
 0x5a8   : > { %10389 = vst [vmem:[#allocation19_spill] sm:$0xff] %v8005_v1  ;;  %2003 = vadd.xlane.f32.xlu1 %v2002_v58  ;;  %v1885_v11 = vpop.permute.xlu1 %1884  ;;  %v2017_v37 = vsel %vm969_vm0, %v8005_v1, 0.0 }
 0x5a9   : > { %2012 = vadd.xlane.f32.xlu0 %v2011_v3  ;;  %v8013_v35 = vadd.f32 %v1885_v11, %v10390_v24 }
 0x5ab   : > { %10391 = vst [vmem:[#allocation25_spill] sm:$0xff] %v8013_v35  ;;  %v2014_v21 = vsel %vm969_vm0, %v8013_v35, 0.0 }
 0x5ac   : > { %2009 = vadd.xlane.f32.xlu1 %v2008_v30 }
 0x5ad   : > { %2018 = vadd.xlane.f32.xlu0 %v2017_v37 }
 0x5b0   : > { %2015 = vadd.xlane.f32.xlu1 %v2014_v21 }
 0x5b1   : > { %2120 = vadd.xlane.f32.xlu0 %v2119_v4 }
 0x5b4   : > { %2117 = vadd.xlane.f32.xlu1 %v2116_v32 }
 0x5d6   : > { %v1932_v56 = vpop.xlane.xlu0 %1931 }
 0x5d7   : > { %v2022_v38 = vmul.f32 0.03125, %v1932_v56 }
 0x5d9   : > { %v8028_v50 = vsub.f32 %v7862_v15, %v2022_v38  ;;  %v1938_v17 = vpop.xlane.xlu1 %1937 }
 0x5da   : > { %v2024_v5 = vmul.f32 0.03125, %v1938_v17  ;;  %v1935_v14 = vpop.xlane.xlu0 %1934 }
 0x5db   : > { %v2023_v39 = vmul.f32 0.03125, %v1935_v14  ;;  %v2086_v33 = vmul.f32 %v8028_v50, %v8028_v50 }
 0x5dc   : > { %v8033_v41 = vsub.f32 %v7865_v55, %v2024_v5 }
 0x5dd   : > { %v8036_v61 = vsub.f32 %v7868_v52, %v2023_v39  ;;  %v1944_v34 = vpop.xlane.xlu1 %1943  ;;  %v2122_v57 = vsel %vm969_vm0, %v2086_v33, 0.0 }
 0x5de   : > { %v2026_v10 = vmul.f32 0.03125, %v1944_v34  ;;  %2123 = vadd.xlane.f32.xlu1 %v2122_v57  ;;  %v1941_v27 = vpop.xlane.xlu0 %1940  ;;  %v2088_v19 = vmul.f32 %v8033_v41, %v8033_v41 }
 0x5df   : > { %v2025_v6 = vmul.f32 0.03125, %v1941_v27  ;;  %v2087_v16 = vmul.f32 %v8036_v61, %v8036_v61 }
 0x5e0   : > { %v8044_v58 = vsub.f32 %v7873_v59, %v2026_v10  ;;  %v2128_v31 = vsel %vm969_vm0, %v2088_v19, 0.0 }
 0x5e1   : > { %v8048_v11 = vsub.f32 %v7878_v25, %v2025_v6  ;;  %v1950_v3 = vpop.xlane.xlu1 %1949  ;;  %v2125_v24 = vsel %vm969_vm0, %v2087_v16, 0.0 }
 0x5e2   : > { %v2028_v30 = vmul.f32 0.03125, %v1950_v3  ;;  %2129 = vadd.xlane.f32.xlu1 %v2128_v31  ;;  %2126 = vadd.xlane.f32.xlu0 %v2125_v24  ;;  %v1947_v37 = vpop.xlane.xlu0 %1946  ;;  %v2090_v40 = vmul.f32 %v8044_v58, %v8044_v58 }
 0x5e3   : > { %v2027_v21 = vmul.f32 0.03125, %v1947_v37  ;;  %v2089_v13 = vmul.f32 %v8048_v11, %v8048_v11 }
 0x5e4   : > { %v8056_v4 = vsub.f32 %v7885_v54, %v2028_v30  ;;  %v2134_v32 = vsel %vm969_vm0, %v2090_v40, 0.0 }
 0x5e5   : > { %v8060_v56 = vsub.f32 %v7888_v12, %v2027_v21  ;;  %v1956_v38 = vpop.xlane.xlu1 %1955  ;;  %v2131_v17 = vsel %vm969_vm0, %v2089_v13, 0.0 }
 0x5e6   : > { %v2030_v5 = vmul.f32 0.03125, %v1956_v38  ;;  %2135 = vadd.xlane.f32.xlu1 %v2134_v32  ;;  %2132 = vadd.xlane.f32.xlu0 %v2131_v17  ;;  %v1953_v14 = vpop.xlane.xlu0 %1952  ;;  %v2092_v39 = vmul.f32 %v8056_v4, %v8056_v4 }
 0x5e7   : > { %v2029_v33 = vmul.f32 0.03125, %v1953_v14  ;;  %v2091_v34 = vmul.f32 %v8060_v56, %v8060_v56 }
 0x5e8   : > { %v8068_v57 = vsub.f32 %v7893_v49, %v2030_v5  ;;  %v2140_v10 = vsel %vm969_vm0, %v2092_v39, 0.0 }
 0x5e9   : > { %v8072_v27 = vsub.f32 %v7900_v20, %v2029_v33  ;;  %v1962_v19 = vpop.xlane.xlu1 %1961  ;;  %v2137_v6 = vsel %vm969_vm0, %v2091_v34, 0.0 }
 0x5ea   : > { %v2032_v16 = vmul.f32 0.03125, %v1962_v19  ;;  %2141 = vadd.xlane.f32.xlu1 %v2140_v10  ;;  %2138 = vadd.xlane.f32.xlu0 %v2137_v6  ;;  %v1959_v31 = vpop.xlane.xlu0 %1958  ;;  %v2094_v3 = vmul.f32 %v8068_v57, %v8068_v57 }
 0x5eb   : > { %v2031_v24 = vmul.f32 0.03125, %v1959_v31  ;;  %v2093_v30 = vmul.f32 %v8072_v27, %v8072_v27 }
 0x5ec   : > { %v8080_v37 = vsub.f32 %v7903_v44, %v2032_v16  ;;  %v2146_v40 = vsel %vm969_vm0, %v2094_v3, 0.0 }
 0x5ed   : > { %v8084_v21 = vsub.f32 %v7908_v51, %v2031_v24  ;;  %v1968_v13 = vpop.xlane.xlu1 %1967  ;;  %v2143_v32 = vsel %vm969_vm0, %v2093_v30, 0.0 }
 0x5ee   : > { %v2034_v38 = vmul.f32 0.03125, %v1968_v13  ;;  %2147 = vadd.xlane.f32.xlu1 %v2146_v40  ;;  %2144 = vadd.xlane.f32.xlu0 %v2143_v32  ;;  %v1965_v17 = vpop.xlane.xlu0 %1964  ;;  %v2096_v5 = vmul.f32 %v8080_v37, %v8080_v37 }
 0x5ef   : > { %v2033_v14 = vmul.f32 0.03125, %v1965_v17  ;;  %v2095_v39 = vmul.f32 %v8084_v21, %v8084_v21 }
 0x5f0   : > { %v8092_v33 = vsub.f32 %v7913_v45, %v2034_v38  ;;  %v2152_v34 = vsel %vm969_vm0, %v2096_v5, 0.0 }
 0x5f1   : > { %v8096_v10 = vsub.f32 %v7918_v9, %v2033_v14  ;;  %v1974_v19 = vpop.xlane.xlu1 %1973  ;;  %v2149_v6 = vsel %vm969_vm0, %v2095_v39, 0.0 }
 0x5f2   : > { %v2036_v16 = vmul.f32 0.03125, %v1974_v19  ;;  %2153 = vadd.xlane.f32.xlu1 %v2152_v34  ;;  %2150 = vadd.xlane.f32.xlu0 %v2149_v6  ;;  %v1971_v31 = vpop.xlane.xlu0 %1970  ;;  %v2098_v3 = vmul.f32 %v8092_v33, %v8092_v33 }
 0x5f3   : > { %v2035_v24 = vmul.f32 0.03125, %v1971_v31  ;;  %v2097_v30 = vmul.f32 %v8096_v10, %v8096_v10 }
 0x5f4   : > { %v8104_v40 = vsub.f32 %v7926_v63, %v2036_v16  ;;  %v2158_v13 = vsel %vm969_vm0, %v2098_v3, 0.0  ;;  %v6631_v3 = vld [vmem:[%s10211_s11] sm:$0xff]  }
 0x5f5   : > { %v8108_v32 = vsub.f32 %v7929_v42, %v2035_v24  ;;  %v2155_v38 = vsel %vm969_vm0, %v2097_v30, 0.0  ;;  %6412 = vmatprep.subr.bf16.mxu1 %v6631_v3  ;;  %v6632_v24 = vld [vmem:[%s10211_s11 + $0x8] sm:$0xff]  }
 0x5f6   : > { %2159 = vadd.xlane.f32.xlu1 %v2158_v13  ;;  %2156 = vadd.xlane.f32.xlu0 %v2155_v38  ;;  %v1977_v17 = vpop.xlane.xlu0 %1976  ;;  %v2100_v5 = vmul.f32 %v8104_v40, %v8104_v40 }
 0x5f7   : > { %v2037_v14 = vmul.f32 0.03125, %v1977_v17  ;;  %v2099_v39 = vmul.f32 %v8108_v32, %v8108_v32  ;;  %6413 = vmatpush3.bf16.msra.mxu1 %v6631_v3 }
 0x5f8   : > { %v2164_v34 = vsel %vm969_vm0, %v2100_v5, 0.0  ;;  %6414 = vmatprep.subr.bf16.mxu1 %v6632_v24 }
 0x5f9   : > { %v8117_v19 = vsub.f32 %v7939_v62, %v2037_v14  ;;  %v2161_v6 = vsel %vm969_vm0, %v2099_v39, 0.0 }
 0x5fa   : > { %2165 = vadd.xlane.f32.xlu1 %v2164_v34  ;;  %2162 = vadd.xlane.f32.xlu0 %v2161_v6 }
 0x5fb   : > { %v2101_v16 = vmul.f32 %v8117_v19, %v8117_v19  ;;  %6415 = vmatpush3.bf16.msra.mxu1 %v6632_v24 }
 0x5fd   : > { %v2167_v31 = vsel %vm969_vm0, %v2101_v16, 0.0 }
 0x5fe   : > { %2168 = vadd.xlane.f32.xlu0 %v2167_v31 }
 0x622   : > { %v1983_v30 = vpop.xlane.xlu0 %1982 }
 0x623   : > { %v2039_v13 = vmul.f32 0.03125, %v1983_v30 }
 0x625   : > { %v8130_v38 = vsub.f32 %v7944_v46, %v2039_v13  ;;  %v1980_v17 = vpop.xlane.xlu1 %1979 }
 0x626   : > { %v2038_v5 = vmul.f32 0.03125, %v1980_v17  ;;  %v1989_v14 = vpop.xlane.xlu0 %1988 }
 0x627   : > { %v2041_v39 = vmul.f32 0.03125, %v1989_v14  ;;  %v2103_v34 = vmul.f32 %v8130_v38, %v8130_v38 }
 0x628   : > { %v8135_v6 = vsub.f32 %v7949_v2, %v2038_v5 }
 0x629   : > { %v8138_v16 = vsub.f32 %v7952_v26, %v2041_v39  ;;  %v1986_v31 = vpop.xlane.xlu1 %1985  ;;  %v2173_v3 = vsel %vm969_vm0, %v2103_v34, 0.0 }
 0x62a   : > { %v2040_v24 = vmul.f32 0.03125, %v1986_v31  ;;  %2174 = vadd.xlane.f32.xlu0 %v2173_v3  ;;  %v1995_v30 = vpop.xlane.xlu0 %1994  ;;  %v2102_v13 = vmul.f32 %v8135_v6, %v8135_v6 }
 0x62b   : > { %v2043_v17 = vmul.f32 0.03125, %v1995_v30  ;;  %v2105_v14 = vmul.f32 %v8138_v16, %v8138_v16 }
 0x62c   : > { %v8146_v36 = vsub.f32 %v7959_v8, %v2040_v24  ;;  %v2170_v5 = vsel %vm969_vm0, %v2102_v13, 0.0 }
 0x62d   : > { %v8150_v39 = vsub.f32 %v7962_v53, %v2043_v17  ;;  %v1992_v63 = vpop.xlane.xlu1 %1991  ;;  %2171 = vadd.xlane.f32.xlu1 %v2170_v5  ;;  %v2179_v34 = vsel %vm969_vm0, %v2105_v14, 0.0 }
 0x62e   : > { %v2042_v31 = vmul.f32 0.03125, %v1992_v63  ;;  %2180 = vadd.xlane.f32.xlu0 %v2179_v34  ;;  %v2001_v3 = vpop.xlane.xlu0 %2000  ;;  %v2104_v30 = vmul.f32 %v8146_v36, %v8146_v36 }
 0x62f   : > { %v2045_v62 = vmul.f32 0.03125, %v2001_v3  ;;  %v2107_v24 = vmul.f32 %v8150_v39, %v8150_v39 }
 0x630   : > { %v8158_v7 = vsub.f32 %v7973_v48, %v2042_v31  ;;  %v2176_v13 = vsel %vm969_vm0, %v2104_v30, 0.0 }
 0x631   : > { %v8162_v17 = vsub.f32 %v7970_v60, %v2045_v62  ;;  %v1998_v5 = vpop.xlane.xlu1 %1997  ;;  %2177 = vadd.xlane.f32.xlu1 %v2176_v13  ;;  %v2185_v63 = vsel %vm969_vm0, %v2107_v24, 0.0 }
 0x632   : > { %v2044_v14 = vmul.f32 0.03125, %v1998_v5  ;;  %2186 = vadd.xlane.f32.xlu0 %v2185_v63  ;;  %v2007_v34 = vpop.xlane.xlu0 %2006  ;;  %v2106_v3 = vmul.f32 %v8158_v7, %v8158_v7 }
 0x633   : > { %v2047_v23 = vmul.f32 0.03125, %v2007_v34  ;;  %v2109_v31 = vmul.f32 %v8162_v17, %v8162_v17 }
 0x634   : > { %v8170_v20 = vsub.f32 %v7979_v43, %v2044_v14  ;;  %v2182_v62 = vsel %vm969_vm0, %v2106_v3, 0.0 }
 0x635   : > { %v8174_v30 = vsub.f32 %v7982_v0, %v2047_v23  ;;  %v2004_v13 = vpop.xlane.xlu1 %2003  ;;  %2183 = vadd.xlane.f32.xlu1 %v2182_v62  ;;  %v2191_v24 = vsel %vm969_vm0, %v2109_v31, 0.0 }
 0x636   : > { %v2046_v5 = vmul.f32 0.03125, %v2004_v13  ;;  %2192 = vadd.xlane.f32.xlu0 %v2191_v24  ;;  %v2013_v63 = vpop.xlane.xlu0 %2012  ;;  %v2108_v34 = vmul.f32 %v8170_v20, %v8170_v20 }
 0x637   : > { %v2049_v60 = vmul.f32 0.03125, %v2013_v63  ;;  %v2111_v14 = vmul.f32 %v8174_v30, %v8174_v30 }
 0x638   : > { %v8182_v43 = vsub.f32 %v7987_v47, %v2046_v5  ;;  %v2188_v23 = vsel %vm969_vm0, %v2108_v34, 0.0 }
 0x639   : > { %v8186_v3 = vsub.f32 %v7992_v28, %v2049_v60  ;;  %v2010_v62 = vpop.xlane.xlu1 %2009  ;;  %2189 = vadd.xlane.f32.xlu1 %v2188_v23  ;;  %v2197_v31 = vsel %vm969_vm0, %v2111_v14, 0.0 }
 0x63a   : > { %v2048_v13 = vmul.f32 0.03125, %v2010_v62  ;;  %2198 = vadd.xlane.f32.xlu0 %v2197_v31  ;;  %v2019_v24 = vpop.xlane.xlu0 %2018  ;;  %v2110_v63 = vmul.f32 %v8182_v43, %v8182_v43 }
 0x63b   : > { %v2051_v54 = vmul.f32 0.03125, %v2019_v24  ;;  %v2113_v5 = vmul.f32 %v8186_v3, %v8186_v3 }
 0x63c   : > { %v8194_v53 = vsub.f32 %v7997_v18, %v2048_v13  ;;  %v2194_v60 = vsel %vm969_vm0, %v2110_v63, 0.0 }
 0x63d   : > { %v8198_v34 = vsub.f32 %v8005_v1, %v2051_v54  ;;  %v2016_v23 = vpop.xlane.xlu1 %2015  ;;  %2195 = vadd.xlane.f32.xlu1 %v2194_v60  ;;  %v2203_v14 = vsel %vm969_vm0, %v2113_v5, 0.0 }
 0x63e   : > { %v2050_v62 = vmul.f32 0.03125, %v2016_v23  ;;  %2204 = vadd.xlane.f32.xlu0 %v2203_v14  ;;  %v2121_v31 = vpop.xlane.xlu0 %2120  ;;  %v2112_v24 = vmul.f32 %v8194_v53, %v8194_v53 }
 0x63f   : > { %v2213_v48 = vmul.f32 0.03125, %v2121_v31  ;;  %v2115_v13 = vmul.f32 %v8198_v34, %v8198_v34 }
 0x640   : > { %v8206_v28 = vsub.f32 %v8013_v35, %v2050_v62  ;;  %v2200_v54 = vsel %vm969_vm0, %v2112_v24, 0.0 }
 0x641   : > { %v2245_v63 = vadd.f32 1e-05, %v2213_v48  ;;  %v2118_v1 = vpop.xlane.xlu1 %2117  ;;  %2201 = vadd.xlane.f32.xlu1 %v2200_v54  ;;  %v2209_v5 = vsel %vm969_vm0, %v2115_v13, 0.0  ;;  %v8216_v48 = vld [vmem:[%s10209_s9] ss:$0 sm:$0xff] }
 0x642   : > { %v2212_v60 = vmul.f32 0.03125, %v2118_v1  ;;  %2210 = vadd.xlane.f32.xlu0 %v2209_v5  ;;  %v2114_v23 = vmul.f32 %v8206_v28, %v8206_v28 }
 0x643   : > { %6725 = vrsqrt.f32 %v2245_v63  ;;  %v8224_v63 = vld [vmem:[%s10210_s10] ss:$0 sm:$0xff] }
 0x644   : > { %v2244_v14 = vadd.f32 1e-05, %v2212_v60  ;;  %v2206_v31 = vsel %vm969_vm0, %v2114_v23, 0.0 }
 0x645   : > { %2207 = vadd.xlane.f32.xlu1 %v2206_v31 }
 0x646   : > { %6727 = vrsqrt.f32 %v2244_v14 }
 0x64d   : > { %v6726_v62 = vpop.eup %6725 }
 0x64e   : > { %v2309_v24 = vmul.f32 %v6726_v62, %v8002_v29  ;;  %v8233_v29 = vld [vmem:[%s10213_s13] sm:$0xff]  }
 0x64f   : > { %6448 = vmatprep.subr.bf16.mxu0 %v8233_v29  ;;  %6583 = vmatprep.subr.bf16.mxu1 %v8233_v29 }
 0x650   : > { %v6728_v13 = vpop.eup %6727  ;;  %v2347_v54 = vmul.f32 %v8216_v48, %v2309_v24  ;;  %6449 = vmatpush3.bf16.msra.mxu0 %v8233_v29 }
 0x651   : > { %v2308_v1 = vmul.f32 %v6728_v13, %v8010_v22  ;;  %v8238_v22 = vld [vmem:[%s10213_s13 + $0x8] sm:$0xff]   ;;  %v8247_v13 = vld [vmem:[%s10213_s13 + $0x10] sm:$0xff]  }
 0x652   : > { %v2385_v23 = vadd.f32 %v8224_v63, %v2347_v54  ;;  %6450 = vmatprep.subr.bf16.mxu0 %v8238_v22 }
 0x653   : > { %v2346_v5 = vmul.f32 %v8216_v48, %v2308_v1 }
 0x654   : > { %6451 = vmatpush3.bf16.msra.mxu0 %v8238_v22 }
 0x655   : > { %v2384_v60 = vadd.f32 %v8224_v63, %v2346_v5  ;;  %6452 = vmatprep.subr.bf16.mxu0 %v8247_v13 }
 0x657   : > { %v2416_v14 = vpack.c.bf16 %v2385_v23, %v2384_v60 }
 0x658   : > { %6453 = vmatpush3.bf16.msra.mxu0 %v8247_v13 }
 0x659   : > { %6416 = vmatprep.mubr.msk.bf16.mxu1 %vm969_vm0, %v2416_v14 }
 0x66b   : > { %v2124_v31 = vpop.xlane.xlu1 %2123 }
 0x66c   : > { %v2214_v62 = vmul.f32 0.03125, %v2124_v31 }
 0x66e   : > { %v2246_v24 = vadd.f32 1e-05, %v2214_v62 }
 0x66f   : > { %v2130_v1 = vpop.xlane.xlu1 %2129  ;;  %v2127_v54 = vpop.xlane.xlu0 %2126 }
 0x670   : > { %6729 = vrsqrt.f32 %v2246_v24  ;;  %v2216_v5 = vmul.f32 0.03125, %v2130_v1  ;;  %v2215_v60 = vmul.f32 0.03125, %v2127_v54 }
 0x672   : > { %v2248_v23 = vadd.f32 1e-05, %v2216_v5  ;;  %v2247_v14 = vadd.f32 1e-05, %v2215_v60 }
 0x673   : > { %v2136_v31 = vpop.xlane.xlu1 %2135  ;;  %v2133_v62 = vpop.xlane.xlu0 %2132 }
 0x674   : > { %6731 = vrsqrt.f32 %v2248_v23  ;;  %v2218_v18 = vmul.f32 0.03125, %v2136_v31  ;;  %v2217_v35 = vmul.f32 0.03125, %v2133_v62 }
 0x675   : > { %6733 = vrsqrt.f32 %v2247_v14 }
 0x676   : > { %v2250_v0 = vadd.f32 1e-05, %v2218_v18  ;;  %v2249_v47 = vadd.f32 1e-05, %v2217_v35 }
 0x677   : > { %v2142_v26 = vpop.xlane.xlu1 %2141  ;;  %v2139_v24 = vpop.xlane.xlu0 %2138 }
 0x678   : > { %6735 = vrsqrt.f32 %v2250_v0  ;;  %v2220_v1 = vmul.f32 0.03125, %v2142_v26  ;;  %v2219_v54 = vmul.f32 0.03125, %v2139_v24 }
 0x679   : > { %6737 = vrsqrt.f32 %v2249_v47 }
 0x67a   : > { %v6730_v5 = vpop.eup %6729  ;;  %v2252_v60 = vadd.f32 1e-05, %v2220_v1  ;;  %v2251_v8 = vadd.f32 1e-05, %v2219_v54 }
 0x67b   : > { %v2310_v46 = vmul.f32 %v6730_v5, %v8028_v50  ;;  %v2148_v2 = vpop.xlane.xlu1 %2147  ;;  %v2145_v23 = vpop.xlane.xlu0 %2144 }
 0x67c   : > { %6739 = vrsqrt.f32 %v2252_v60  ;;  %v2222_v31 = vmul.f32 0.03125, %v2148_v2  ;;  %v2221_v14 = vmul.f32 0.03125, %v2145_v23 }
 0x67d   : > { %6741 = vrsqrt.f32 %v2251_v8  ;;  %v2348_v0 = vmul.f32 %v8216_v48, %v2310_v46 }
 0x67e   : > { %v6732_v62 = vpop.eup %6731  ;;  %v2254_v18 = vadd.f32 1e-05, %v2222_v31  ;;  %v2253_v35 = vadd.f32 1e-05, %v2221_v14 }
 0x67f   : > { %v6734_v12 = vpop.eup %6733  ;;  %v2154_v26 = vpop.xlane.xlu1 %2153  ;;  %v2312_v50 = vmul.f32 %v6732_v62, %v8033_v41  ;;  %v2386_v46 = vadd.f32 %v8224_v63, %v2348_v0 }
 0x680   : > { %v2151_v24 = vpop.xlane.xlu0 %2150  ;;  %v2311_v47 = vmul.f32 %v6734_v12, %v8036_v61  ;;  %6743 = vrsqrt.f32 %v2254_v18  ;;  %v2224_v1 = vmul.f32 0.03125, %v2154_v26 }
 0x681   : > { %v2223_v54 = vmul.f32 0.03125, %v2151_v24  ;;  %6745 = vrsqrt.f32 %v2253_v35  ;;  %v2350_v62 = vmul.f32 %v8216_v48, %v2312_v50 }
 0x682   : > { %v6736_v5 = vpop.eup %6735  ;;  %v2349_v2 = vmul.f32 %v8216_v48, %v2311_v47  ;;  %v2256_v8 = vadd.f32 1e-05, %v2224_v1 }
 0x683   : > { %v2255_v60 = vadd.f32 1e-05, %v2223_v54  ;;  %v6738_v23 = vpop.eup %6737  ;;  %v2160_v31 = vpop.xlane.xlu1 %2159  ;;  %v2314_v59 = vmul.f32 %v6736_v5, %v8044_v58 }
 0x684   : > { %v2157_v14 = vpop.xlane.xlu0 %2156  ;;  %6747 = vrsqrt.f32 %v2256_v8  ;;  %v2226_v12 = vmul.f32 0.03125, %v2160_v31  ;;  %v2387_v18 = vadd.f32 %v8224_v63, %v2349_v2  ;;  %v2313_v41 = vmul.f32 %v6738_v23, %v8048_v11 }
 0x685   : > { %v2225_v61 = vmul.f32 0.03125, %v2157_v14  ;;  %6749 = vrsqrt.f32 %v2255_v60  ;;  %v2352_v58 = vmul.f32 %v8216_v48, %v2314_v59  ;;  %v2388_v8 = vadd.f32 %v8224_v63, %v2350_v62 }
 0x686   : > { %v6740_v35 = vpop.eup %6739  ;;  %v2258_v26 = vadd.f32 1e-05, %v2226_v12  ;;  %v2417_v47 = vpack.c.bf16 %v2387_v18, %v2386_v46  ;;  %v2351_v0 = vmul.f32 %v8216_v48, %v2313_v41 }
 0x687   : > { %v2257_v24 = vadd.f32 1e-05, %v2225_v61  ;;  %v6742_v1 = vpop.eup %6741  ;;  %v2166_v54 = vpop.xlane.xlu1 %2165  ;;  %v2316_v5 = vmul.f32 %v6740_v35, %v8056_v4 }
 0x688   : > { %v2163_v9 = vpop.xlane.xlu0 %2162  ;;  %6751 = vrsqrt.f32 %v2258_v26  ;;  %v2228_v2 = vmul.f32 0.03125, %v2166_v54  ;;  %6417 = vmatmul.mubr.msk.bf16.vlgmr.msra.gmra.mrb[16].mxu1 %vm969_vm0, %v2417_v47  ;;  %v2315_v50 = vmul.f32 %v6742_v1, %v8060_v56  ;;  %v2389_v60 = vadd.f32 %v8224_v63, %v2351_v0 }
 0x689   : > { %v2227_v11 = vmul.f32 0.03125, %v2163_v9  ;;  %6753 = vrsqrt.f32 %v2257_v24  ;;  %6587 = vmatpush3.bf16.msra.mxu1 %v8233_v29  ;;  %v2390_v9 = vadd.f32 %v8224_v63, %v2352_v58  ;;  %v2354_v56 = vmul.f32 %v8216_v48, %v2316_v5 }
 0x68a   : > { %v6744_v23 = vpop.eup %6743  ;;  %v2260_v31 = vadd.f32 1e-05, %v2228_v2  ;;  %v2353_v59 = vmul.f32 %v8216_v48, %v2315_v50  ;;  %6584 = vmatprep.subr.bf16.mxu1 %v8238_v22  ;;  %v2418_v46 = vpack.c.bf16 %v2389_v60, %v2388_v8 }
 0x68b   : > { %v2259_v14 = vadd.f32 1e-05, %v2227_v11  ;;  %v6746_v4 = vpop.eup %6745  ;;  %v2318_v61 = vmul.f32 %v6744_v23, %v8068_v57  ;;  %v2392_v57 = vadd.f32 %v8224_v63, %v2354_v56 }
 0x68c   : > { %v2169_v12 = vpop.xlane.xlu0 %2168  ;;  %6755 = vrsqrt.f32 %v2260_v31  ;;  %v2391_v29 = vadd.f32 %v8224_v63, %v2353_v59  ;;  %v2317_v41 = vmul.f32 %v6746_v4, %v8072_v27  ;;  %6420 = vmatprep.mubr.msk.bf16.mxu1 %vm969_vm0, %v2418_v46 }
 0x68d   : > { %v2229_v18 = vmul.f32 0.03125, %v2169_v12  ;;  %6757 = vrsqrt.f32 %v2259_v14  ;;  %6588 = vmatpush3.bf16.msra.mxu1 %v8238_v22  ;;  %v2356_v1 = vmul.f32 %v8216_v48, %v2318_v61 }
 0x68e   : > { %v6748_v62 = vpop.eup %6747  ;;  %v2419_v26 = vpack.c.bf16 %v2391_v29, %v2390_v9  ;;  %v2355_v24 = vmul.f32 %v8216_v48, %v2317_v41  ;;  %6585 = vmatprep.subr.bf16.mxu1 %v8247_v13 }
 0x68f   : > { %v2261_v35 = vadd.f32 1e-05, %v2229_v18  ;;  %v6750_v47 = vpop.eup %6749  ;;  %v2320_v22 = vmul.f32 %v6748_v62, %v8080_v37  ;;  %v2394_v11 = vadd.f32 %v8224_v63, %v2356_v1 }
 0x690   : > { %6421 = vmatmul.mubr.msk.bf16.gmra.mrb[20].mxu1 %vm969_vm0, %v2419_v26  ;;  %v2393_v27 = vadd.f32 %v8224_v63, %v2355_v24  ;;  %v2319_v54 = vmul.f32 %v6750_v47, %v8084_v21 }
 0x691   : > { %6759 = vrsqrt.f32 %v2261_v35  ;;  %6589 = vmatpush3.bf16.msra.mxu1 %v8247_v13  ;;  %v2358_v60 = vmul.f32 %v8216_v48, %v2320_v22 }
 0x692   : > { %v6752_v0 = vpop.eup %6751  ;;  %v2420_v58 = vpack.c.bf16 %v2393_v27, %v2392_v57  ;;  %v2357_v5 = vmul.f32 %v8216_v48, %v2319_v54 }
 0x693   : > { %v6754_v2 = vpop.eup %6753  ;;  %v2322_v21 = vmul.f32 %v6752_v0, %v8092_v33  ;;  %v2396_v59 = vadd.f32 %v8224_v63, %v2358_v60 }
 0x694   : > { %6424 = vmatprep.mubr.msk.bf16.mxu1 %vm969_vm0, %v2420_v58  ;;  %v2395_v50 = vadd.f32 %v8224_v63, %v2357_v5  ;;  %v2321_v8 = vmul.f32 %v6754_v2, %v8096_v10 }
 0x695   : > { %v2360_v10 = vmul.f32 %v8216_v48, %v2322_v21 }
 0x696   : > { %v6756_v37 = vpop.eup %6755  ;;  %v2421_v23 = vpack.c.bf16 %v2395_v50, %v2394_v11  ;;  %v2359_v13 = vmul.f32 %v8216_v48, %v2321_v8 }
 0x697   : > { %v6758_v31 = vpop.eup %6757  ;;  %v2324_v14 = vmul.f32 %v6756_v37, %v8104_v40  ;;  %v2398_v40 = vadd.f32 %v8224_v63, %v2360_v10 }
 0x698   : > { %6425 = vmatmul.mubr.msk.bf16.gmra.mrb[24].mxu1 %vm969_vm0, %v2421_v23  ;;  %v2397_v4 = vadd.f32 %v8224_v63, %v2359_v13  ;;  %v2323_v46 = vmul.f32 %v6758_v31, %v8108_v32 }
 0x699   : > { %v2362_v61 = vmul.f32 %v8216_v48, %v2324_v14 }
 0x69a   : > { %v2422_v9 = vpack.c.bf16 %v2397_v4, %v2396_v59  ;;  %v2361_v33 = vmul.f32 %v8216_v48, %v2323_v46 }
 0x69b   : > { %v6760_v12 = vpop.eup %6759  ;;  %v2400_v32 = vadd.f32 %v8224_v63, %v2362_v61 }
 0x69c   : > { %v2325_v56 = vmul.f32 %v6760_v12, %v8117_v19  ;;  %6428 = vmatprep.mubr.msk.bf16.mxu1 %vm969_vm0, %v2422_v9  ;;  %v2399_v18 = vadd.f32 %v8224_v63, %v2361_v33 }
 0x69e   : > { %v2363_v29 = vmul.f32 %v8216_v48, %v2325_v56  ;;  %v2423_v41 = vpack.c.bf16 %v2399_v18, %v2398_v40 }
 0x6a0   : > { %v2401_v62 = vadd.f32 %v8224_v63, %v2363_v29  ;;  %6429 = vmatmul.mubr.msk.bf16.gmra.mrb[28].mxu1 %vm969_vm0, %v2423_v41 }
 0x6a2   : > { %v2424_v35 = vpack.c.bf16 %v2401_v62, %v2400_v32 }
 0x6a4   : > { %6432 = vmatprep.mubr.msk.bf16.mxu1 %vm969_vm0, %v2424_v35 }
 0x6b7   : > { %v2175_v19 = vpop.xlane.xlu0 %2174 }
 0x6b8   : > { %v2231_v26 = vmul.f32 0.03125, %v2175_v19 }
 0x6ba   : > { %v2263_v24 = vadd.f32 1e-05, %v2231_v26  ;;  %v2172_v47 = vpop.xlane.xlu1 %2171 }
 0x6bb   : > { %v2230_v57 = vmul.f32 0.03125, %v2172_v47  ;;  %v2181_v1 = vpop.xlane.xlu0 %2180 }
 0x6bc   : > { %6761 = vrsqrt.f32 %v2263_v24  ;;  %v2233_v27 = vmul.f32 0.03125, %v2181_v1 }
 0x6bd   : > { %v2262_v54 = vadd.f32 1e-05, %v2230_v57 }
 0x6be   : > { %v2265_v22 = vadd.f32 1e-05, %v2233_v27  ;;  %v2178_v0 = vpop.xlane.xlu1 %2177 }
 0x6bf   : > { %6763 = vrsqrt.f32 %v2262_v54  ;;  %v2232_v58 = vmul.f32 0.03125, %v2178_v0  ;;  %v2187_v5 = vpop.xlane.xlu0 %2186 }
 0x6c0   : > { %6765 = vrsqrt.f32 %v2265_v22  ;;  %v2235_v2 = vmul.f32 0.03125, %v2187_v5 }
 0x6c1   : > { %v2264_v11 = vadd.f32 1e-05, %v2232_v58 }
 0x6c2   : > { %v2267_v50 = vadd.f32 1e-05, %v2235_v2  ;;  %v2184_v8 = vpop.xlane.xlu1 %2183 }
 0x6c3   : > { %6767 = vrsqrt.f32 %v2264_v11  ;;  %v2234_v60 = vmul.f32 0.03125, %v2184_v8  ;;  %v2193_v21 = vpop.xlane.xlu0 %2192 }
 0x6c4   : > { %6769 = vrsqrt.f32 %v2267_v50  ;;  %v2237_v37 = vmul.f32 0.03125, %v2193_v21 }
 0x6c5   : > { %v2266_v23 = vadd.f32 1e-05, %v2234_v60 }
 0x6c6   : > { %v6762_v13 = vpop.eup %6761  ;;  %v2269_v31 = vadd.f32 1e-05, %v2237_v37  ;;  %v2190_v14 = vpop.xlane.xlu1 %2189 }
 0x6c7   : > { %6771 = vrsqrt.f32 %v2266_v23  ;;  %v2236_v59 = vmul.f32 0.03125, %v2190_v14  ;;  %v2199_v4 = vpop.xlane.xlu0 %2198  ;;  %v2327_v46 = vmul.f32 %v6762_v13, %v8130_v38 }
 0x6c8   : > { %6773 = vrsqrt.f32 %v2269_v31  ;;  %v2239_v10 = vmul.f32 0.03125, %v2199_v4 }
 0x6c9   : > { %v6764_v12 = vpop.eup %6763  ;;  %v2268_v9 = vadd.f32 1e-05, %v2236_v59  ;;  %v2365_v18 = vmul.f32 %v8216_v48, %v2327_v46 }
 0x6ca   : > { %v6766_v33 = vpop.eup %6765  ;;  %v2271_v56 = vadd.f32 1e-05, %v2239_v10  ;;  %v2196_v61 = vpop.xlane.xlu1 %2195  ;;  %v2326_v40 = vmul.f32 %v6764_v12, %v8135_v6 }
 0x6cb   : > { %6775 = vrsqrt.f32 %v2268_v9  ;;  %v2238_v29 = vmul.f32 0.03125, %v2196_v61  ;;  %v2205_v41 = vpop.xlane.xlu0 %2204  ;;  %v2329_v32 = vmul.f32 %v6766_v33, %v8138_v16  ;;  %v2403_v1 = vadd.f32 %v8224_v63, %v2365_v18 }
 0x6cc   : > { %6777 = vrsqrt.f32 %v2271_v56  ;;  %v2241_v62 = vmul.f32 0.03125, %v2205_v41  ;;  %v2364_v38 = vmul.f32 %v8216_v48, %v2326_v40 }
 0x6cd   : > { %v6768_v35 = vpop.eup %6767  ;;  %v2270_v19 = vadd.f32 1e-05, %v2238_v29  ;;  %v2367_v26 = vmul.f32 %v8216_v48, %v2329_v32 }
 0x6ce   : > { %v6770_v24 = vpop.eup %6769  ;;  %v2273_v47 = vadd.f32 1e-05, %v2241_v62  ;;  %v2202_v57 = vpop.xlane.xlu1 %2201  ;;  %v2402_v6 = vadd.f32 %v8224_v63, %v2364_v38  ;;  %v2328_v27 = vmul.f32 %v6768_v35, %v8146_v36 }
 0x6cf   : > { %6779 = vrsqrt.f32 %v2270_v19  ;;  %v2240_v54 = vmul.f32 0.03125, %v2202_v57  ;;  %v2211_v16 = vpop.xlane.xlu0 %2210  ;;  %v2331_v22 = vmul.f32 %v6770_v24, %v8150_v39  ;;  %v2405_v50 = vadd.f32 %v8224_v63, %v2367_v26 }
 0x6d0   : > { %6781 = vrsqrt.f32 %v2273_v47  ;;  %v2243_v0 = vmul.f32 0.03125, %v2211_v16  ;;  %v2425_v58 = vpack.c.bf16 %v2403_v1, %v2402_v6  ;;  %v2366_v5 = vmul.f32 %v8216_v48, %v2328_v27 }
 0x6d1   : > { %v6772_v2 = vpop.eup %6771  ;;  %v2272_v11 = vadd.f32 1e-05, %v2240_v54  ;;  %v2369_v39 = vmul.f32 %v8216_v48, %v2331_v22 }
 0x6d2   : > { %v6774_v8 = vpop.eup %6773  ;;  %v2275_v60 = vadd.f32 1e-05, %v2243_v0  ;;  %v2208_v21 = vpop.xlane.xlu1 %2207  ;;  %6433 = vmatmul.mubr.msk.bf16.gmra.mrb[32].mxu1 %vm969_vm0, %v2425_v58  ;;  %v2404_v36 = vadd.f32 %v8224_v63, %v2366_v5  ;;  %v2330_v37 = vmul.f32 %v6772_v2, %v8158_v7  ;;  %v6636_v5 = vld [vmem:[%s10213_s13 + $0x18] sm:$0xff]  }
 0x6d3   : > { %6783 = vrsqrt.f32 %v2272_v11  ;;  %v2242_v23 = vmul.f32 0.03125, %v2208_v21  ;;  %v2333_v13 = vmul.f32 %v6774_v8, %v8162_v17  ;;  %v2407_v12 = vadd.f32 %v8224_v63, %v2369_v39  ;;  %6454 = vmatprep.subr.bf16.mxu0 %v6636_v5  ;;  %6586 = vmatprep.subr.bf16.mxu1 %v6636_v5 }
 0x6d4   : > { %6785 = vrsqrt.f32 %v2275_v60  ;;  %v2426_v31 = vpack.c.bf16 %v2405_v50, %v2404_v36  ;;  %v2368_v14 = vmul.f32 %v8216_v48, %v2330_v37  ;;  %6455 = vmatpush3.bf16.msra.mxu0 %v6636_v5  ;;  %6590 = vmatpush3.bf16.msra.mxu1 %v6636_v5 }
 0x6d5   : > { %v6776_v59 = vpop.eup %6775  ;;  %v2274_v4 = vadd.f32 1e-05, %v2242_v23  ;;  %v2371_v9 = vmul.f32 %v8216_v48, %v2333_v13 }
 0x6d6   : > { %v6778_v46 = vpop.eup %6777  ;;  %6436 = vmatprep.mubr.msk.bf16.mxu1 %vm969_vm0, %v2426_v31  ;;  %v2406_v10 = vadd.f32 %v8224_v63, %v2368_v14  ;;  %v2332_v7 = vmul.f32 %v6776_v59, %v8170_v20 }
 0x6d7   : > { %6787 = vrsqrt.f32 %v2274_v4  ;;  %v2335_v17 = vmul.f32 %v6778_v46, %v8174_v30  ;;  %v2409_v29 = vadd.f32 %v8224_v63, %v2371_v9 }
 0x6d8   : > { %v2427_v33 = vpack.c.bf16 %v2407_v12, %v2406_v10  ;;  %v2370_v56 = vmul.f32 %v8216_v48, %v2332_v7 }
 0x6d9   : > { %v6780_v61 = vpop.eup %6779  ;;  %v2373_v20 = vmul.f32 %v8216_v48, %v2335_v17 }
 0x6da   : > { %v6782_v40 = vpop.eup %6781  ;;  %6437 = vmatmul.mubr.msk.bf16.gmra.mrb[36].mxu1 %vm969_vm0, %v2427_v33  ;;  %v2408_v18 = vadd.f32 %v8224_v63, %v2370_v56  ;;  %v2334_v41 = vmul.f32 %v6780_v61, %v8182_v43 }
 0x6db   : > { %v2337_v32 = vmul.f32 %v6782_v40, %v8186_v3  ;;  %v2411_v26 = vadd.f32 %v8224_v63, %v2373_v20 }
 0x6dc   : > { %v2428_v62 = vpack.c.bf16 %v2409_v29, %v2408_v18  ;;  %v2372_v30 = vmul.f32 %v8216_v48, %v2334_v41 }
 0x6dd   : > { %v6784_v38 = vpop.eup %6783  ;;  %v2375_v47 = vmul.f32 %v8216_v48, %v2337_v32 }
 0x6de   : > { %v6786_v35 = vpop.eup %6785  ;;  %6440 = vmatprep.mubr.msk.bf16.mxu1 %vm969_vm0, %v2428_v62  ;;  %v2410_v19 = vadd.f32 %v8224_v63, %v2372_v30  ;;  %v2336_v24 = vmul.f32 %v6784_v38, %v8194_v53 }
 0x6df   : > { %v2339_v43 = vmul.f32 %v6786_v35, %v8198_v34  ;;  %v2413_v27 = vadd.f32 %v8224_v63, %v2375_v47 }
 0x6e0   : > { %v2429_v57 = vpack.c.bf16 %v2411_v26, %v2410_v19  ;;  %v2374_v3 = vmul.f32 %v8216_v48, %v2336_v24 }
 0x6e1   : > { %v6788_v6 = vpop.eup %6787  ;;  %v2377_v16 = vmul.f32 %v8216_v48, %v2339_v43 }
 0x6e2   : > { %6441 = vmatmul.mubr.msk.bf16.gmra.mrb[40].mxu1 %vm969_vm0, %v2429_v57  ;;  %v2412_v1 = vadd.f32 %v8224_v63, %v2374_v3  ;;  %v2338_v54 = vmul.f32 %v6788_v6, %v8206_v28  ;;  %v8368_v28 = vld [vmem:[%s10212_s12] ss:$0 sm:$0xff] }
 0x6e3   : > { %v2415_v0 = vadd.f32 %v8224_v63, %v2377_v16 }
 0x6e4   : > { %v2430_v22 = vpack.c.bf16 %v2413_v27, %v2412_v1  ;;  %v2376_v53 = vmul.f32 %v8216_v48, %v2338_v54 }
 0x6e6   : > { %6444 = vmatprep.mubr.msk.bf16.mxu1 %vm969_vm0, %v2430_v22  ;;  %v2414_v34 = vadd.f32 %v8224_v63, %v2376_v53 }
 0x6e8   : > { %v2431_v58 = vpack.c.bf16 %v2415_v0, %v2414_v34 }
 0x6ea   : > { %6445 = vmatmul.mubr.msk.bf16.gmra.mrb[44].mxu1 %vm969_vm0, %v2431_v58 }
 0x75b   : > { %v6418_v48 = vpop.f32.mrb[16].mxu1 }
 0x75c   : > { %v2546_v2 = vadd.f32 %v6418_v48, %v8368_v28  ;;  %v2537_v63 = vpop.f32.mrb[17].mxu1 }
 0x75d   : > { %v2538_v11 = vadd.f32 %v8368_v28, %v2537_v63  ;;  %v6419_v50 = vpop.f32.mrb[18].mxu1 }
 0x75e   : > { %v2698_v8 = vmul.f32 0.70710677, %v2546_v2  ;;  %v2549_v60 = vadd.f32 %v6419_v50, %v8368_v28  ;;  %v2540_v21 = vpop.f32.mrb[19].mxu1  ;;  %v2666_v30 = vmul.f32 0.5, %v2546_v2 }
 0x75f   : > { %v2696_v36 = vmul.f32 0.70710677, %v2538_v11  ;;  %v2541_v37 = vadd.f32 %v8368_v28, %v2540_v21  ;;  %v2664_v24 = vmul.f32 0.5, %v2538_v11 }
 0x760   : > { %6789 = verf.f32 %v2698_v8  ;;  %v2699_v39 = vmul.f32 0.70710677, %v2549_v60  ;;  %v2667_v38 = vmul.f32 0.5, %v2549_v60 }
 0x761   : > { %6791 = verf.f32 %v2696_v36  ;;  %v2697_v23 = vmul.f32 0.70710677, %v2541_v37  ;;  %v2665_v47 = vmul.f32 0.5, %v2541_v37 }
 0x762   : > { %6793 = verf.f32 %v2699_v39 }
 0x763   : > { %6795 = verf.f32 %v2697_v23  ;;  %v6422_v13 = vpop.f32.mrb[20].mxu1 }
 0x764   : > { %v2562_v31 = vadd.f32 %v6422_v13, %v8368_v28  ;;  %v2553_v14 = vpop.f32.mrb[21].mxu1 }
 0x765   : > { %v8376_v59 = vadd.f32 %v8368_v28, %v2553_v14  ;;  %v6423_v4 = vpop.f32.mrb[22].mxu1 }
 0x766   : > { %v2702_v46 = vmul.f32 0.70710677, %v2562_v31  ;;  %v2565_v10 = vadd.f32 %v6423_v4, %v8368_v28  ;;  %v2556_v12 = vpop.f32.mrb[23].mxu1  ;;  %v2670_v37 = vmul.f32 0.5, %v2562_v31 }
 0x767   : > { %v2700_v7 = vmul.f32 0.70710677, %v8376_v59  ;;  %v2557_v9 = vadd.f32 %v8368_v28, %v2556_v12  ;;  %v2668_v4 = vmul.f32 0.5, %v8376_v59 }
 0x768   : > { %6797 = verf.f32 %v2702_v46  ;;  %v2703_v17 = vmul.f32 0.70710677, %v2565_v10  ;;  %v2671_v39 = vmul.f32 0.5, %v2565_v10 }
 0x769   : > { %6799 = verf.f32 %v2700_v7  ;;  %v2701_v33 = vmul.f32 0.70710677, %v2557_v9  ;;  %v2669_v46 = vmul.f32 0.5, %v2557_v9 }
 0x76a   : > { %v6790_v56 = vpop.eup %6789  ;;  %6801 = verf.f32 %v2703_v17 }
 0x76b   : > { %v6792_v61 = vpop.eup %6791  ;;  %v2762_v40 = vadd.f32 1.0, %v6790_v56  ;;  %6803 = verf.f32 %v2701_v33  ;;  %v6426_v18 = vpop.f32.mrb[24].mxu1 }
 0x76c   : > { %v6794_v29 = vpop.eup %6793  ;;  %v2760_v41 = vadd.f32 1.0, %v6792_v61  ;;  %v8382_v20 = vadd.f32 %v6426_v18, %v8368_v28  ;;  %v2569_v32 = vpop.f32.mrb[25].mxu1 }
 0x76d   : > { %v6796_v62 = vpop.eup %6795  ;;  %v2763_v35 = vadd.f32 1.0, %v6794_v29  ;;  %v8385_v19 = vadd.f32 %v8368_v28, %v2569_v32  ;;  %v6427_v26 = vpop.f32.mrb[26].mxu1  ;;  %v2794_v6 = vmul.f32 %v2762_v40, %v2666_v30 }
 0x76e   : > { %v2761_v43 = vadd.f32 1.0, %v6796_v62  ;;  %v2706_v57 = vmul.f32 0.70710677, %v8382_v20  ;;  %v2572_v3 = vpop.f32.mrb[27].mxu1  ;;  %v2581_v54 = vadd.f32 %v6427_v26, %v8368_v28  ;;  %v2792_v16 = vmul.f32 %v2760_v41, %v2664_v24 }
 0x76f   : > { %v2795_v1 = vmul.f32 %v2763_v35, %v2667_v38  ;;  %v2704_v27 = vmul.f32 0.70710677, %v8385_v19  ;;  %v2573_v53 = vadd.f32 %v8368_v28, %v2572_v3  ;;  %v2674_v24 = vmul.f32 0.5, %v8382_v20 }
 0x770   : > { %v2793_v22 = vmul.f32 %v2761_v43, %v2665_v47  ;;  %6805 = verf.f32 %v2706_v57  ;;  %v2707_v0 = vmul.f32 0.70710677, %v2581_v54  ;;  %v2675_v47 = vmul.f32 0.5, %v2581_v54 }
 0x771   : > { %v2825_v34 = vpack.c.bf16 %v2795_v1, %v2794_v6  ;;  %6807 = verf.f32 %v2704_v27  ;;  %v2705_v48 = vmul.f32 0.70710677, %v2573_v53  ;;  %v2672_v57 = vmul.f32 0.5, %v8385_v19 }
 0x772   : > { %v6798_v58 = vpop.eup %6797  ;;  %v2824_v5 = vpack.c.bf16 %v2793_v22, %v2792_v16  ;;  %6809 = verf.f32 %v2707_v0  ;;  %v2673_v3 = vmul.f32 0.5, %v2573_v53 }
 0x773   : > { %v6800_v2 = vpop.eup %6799  ;;  %v2766_v63 = vadd.f32 1.0, %v6798_v58  ;;  %v6430_v11 = vpop.f32.mrb[28].mxu1  ;;  %6811 = verf.f32 %v2705_v48 }
 0x774   : > { %v6802_v50 = vpop.eup %6801  ;;  %v2764_v8 = vadd.f32 1.0, %v6800_v2  ;;  %v2594_v60 = vadd.f32 %v6430_v11, %v8368_v28  ;;  %v2585_v21 = vpop.f32.mrb[29].mxu1  ;;  %6456 = vmatprep.mubr.msk.bf16.mxu0 %vm1518_vm1, %v2824_v5 }
 0x775   : > { %v6804_v36 = vpop.eup %6803  ;;  %v2767_v23 = vadd.f32 1.0, %v6802_v50  ;;  %v2586_v13 = vadd.f32 %v8368_v28, %v2585_v21  ;;  %v6431_v14 = vpop.f32.mrb[30].mxu1  ;;  %6457 = vmatmul.mubr.msk.bf16.vlgmr.msra.gmra.mrb[32].mxu0 %vm1518_vm1, %v2825_v34  ;;  %v2798_v33 = vmul.f32 %v2766_v63, %v2670_v37 }
 0x776   : > { %v2765_v12 = vadd.f32 1.0, %v6804_v36  ;;  %v2710_v7 = vmul.f32 0.70710677, %v2594_v60  ;;  %v2588_v17 = vpop.f32.mrb[31].mxu1  ;;  %v2597_v40 = vadd.f32 %v6431_v14, %v8368_v28  ;;  %v2796_v18 = vmul.f32 %v2764_v8, %v2668_v4 }
 0x777   : > { %v2799_v56 = vmul.f32 %v2767_v23, %v2671_v39  ;;  %v2708_v61 = vmul.f32 0.70710677, %v2586_v13  ;;  %v2589_v10 = vadd.f32 %v8368_v28, %v2588_v17  ;;  %v2678_v54 = vmul.f32 0.5, %v2594_v60 }
 0x778   : > { %v2797_v31 = vmul.f32 %v2765_v12, %v2669_v46  ;;  %6813 = verf.f32 %v2710_v7  ;;  %v2711_v41 = vmul.f32 0.70710677, %v2597_v40  ;;  %v2679_v11 = vmul.f32 0.5, %v2597_v40 }
 0x779   : > { %v2827_v29 = vpack.c.bf16 %v2799_v56, %v2798_v33  ;;  %6815 = verf.f32 %v2708_v61  ;;  %v2709_v59 = vmul.f32 0.70710677, %v2589_v10  ;;  %v2676_v19 = vmul.f32 0.5, %v2586_v13 }
 0x77a   : > { %v6806_v32 = vpop.eup %6805  ;;  %v2826_v62 = vpack.c.bf16 %v2797_v31, %v2796_v18  ;;  %6817 = verf.f32 %v2711_v41  ;;  %v2677_v53 = vmul.f32 0.5, %v2589_v10 }
 0x77b   : > { %v6808_v9 = vpop.eup %6807  ;;  %v2770_v30 = vadd.f32 1.0, %v6806_v32  ;;  %6819 = verf.f32 %v2709_v59 }
 0x77c   : > { %6460 = vmatprep.mubr.msk.bf16.mxu0 %vm1518_vm1, %v2826_v62  ;;  %v6810_v38 = vpop.eup %6809  ;;  %v2768_v35 = vadd.f32 1.0, %v6808_v9 }
 0x77d   : > { %6461 = vmatmul.mubr.msk.bf16.gmra.mrb[36].mxu0 %vm1518_vm1, %v2827_v29  ;;  %v6812_v26 = vpop.eup %6811  ;;  %v2771_v43 = vadd.f32 1.0, %v6810_v38  ;;  %v2802_v1 = vmul.f32 %v2770_v30, %v2674_v24 }
 0x77e   : > { %v2769_v6 = vadd.f32 1.0, %v6812_v26  ;;  %v2800_v16 = vmul.f32 %v2768_v35, %v2672_v57 }
 0x77f   : > { %v2803_v27 = vmul.f32 %v2771_v43, %v2675_v47 }
 0x780   : > { %v2801_v22 = vmul.f32 %v2769_v6, %v2673_v3 }
 0x781   : > { %v2829_v0 = vpack.c.bf16 %v2803_v27, %v2802_v1 }
 0x782   : > { %v6814_v34 = vpop.eup %6813  ;;  %v2828_v5 = vpack.c.bf16 %v2801_v22, %v2800_v16 }
 0x783   : > { %v6816_v58 = vpop.eup %6815  ;;  %v2774_v48 = vadd.f32 1.0, %v6814_v34 }
 0x784   : > { %v6818_v2 = vpop.eup %6817  ;;  %v2772_v63 = vadd.f32 1.0, %v6816_v58  ;;  %6464 = vmatprep.mubr.msk.bf16.mxu0 %vm1518_vm1, %v2828_v5 }
 0x785   : > { %v6820_v20 = vpop.eup %6819  ;;  %v2775_v50 = vadd.f32 1.0, %v6818_v2  ;;  %6465 = vmatmul.mubr.msk.bf16.gmra.mrb[40].mxu0 %vm1518_vm1, %v2829_v0  ;;  %v2806_v21 = vmul.f32 %v2774_v48, %v2678_v54 }
 0x786   : > { %v2773_v8 = vadd.f32 1.0, %v6820_v20  ;;  %v2804_v37 = vmul.f32 %v2772_v63, %v2676_v19 }
 0x787   : > { %v2807_v36 = vmul.f32 %v2775_v50, %v2679_v11 }
 0x788   : > { %v2805_v39 = vmul.f32 %v2773_v8, %v2677_v53 }
 0x789   : > { %v2831_v23 = vpack.c.bf16 %v2807_v36, %v2806_v21 }
 0x78a   : > { %v2830_v14 = vpack.c.bf16 %v2805_v39, %v2804_v37 }
 0x78c   : > { %6468 = vmatprep.mubr.msk.bf16.mxu0 %vm1518_vm1, %v2830_v14 }
 0x78d   : > { %6469 = vmatmul.mubr.msk.bf16.gmra.mrb[44].mxu0 %vm1518_vm1, %v2831_v23 }
 0x7a5   : > { %v6434_v4 = vpop.f32.mrb[32].mxu1 }
 0x7a6   : > { %v2610_v60 = vadd.f32 %v6434_v4, %v8368_v28  ;;  %v2601_v46 = vpop.f32.mrb[33].mxu1 }
 0x7a7   : > { %v2602_v12 = vadd.f32 %v8368_v28, %v2601_v46  ;;  %v6435_v7 = vpop.f32.mrb[34].mxu1 }
 0x7a8   : > { %v2714_v13 = vmul.f32 0.70710677, %v2610_v60  ;;  %v2613_v17 = vadd.f32 %v6435_v7, %v8368_v28  ;;  %v2604_v33 = vpop.f32.mrb[35].mxu1  ;;  %v2682_v22 = vmul.f32 0.5, %v2610_v60 }
 0x7a9   : > { %v2712_v56 = vmul.f32 0.70710677, %v2602_v12  ;;  %v2605_v61 = vadd.f32 %v8368_v28, %v2604_v33  ;;  %v2680_v48 = vmul.f32 0.5, %v2602_v12 }
 0x7aa   : > { %6821 = verf.f32 %v2714_v13  ;;  %v2715_v40 = vmul.f32 0.70710677, %v2613_v17  ;;  %v2683_v34 = vmul.f32 0.5, %v2613_v17 }
 0x7ab   : > { %6823 = verf.f32 %v2712_v56  ;;  %v2713_v18 = vmul.f32 0.70710677, %v2605_v61  ;;  %v2681_v2 = vmul.f32 0.5, %v2605_v61 }
 0x7ac   : > { %6825 = verf.f32 %v2715_v40 }
 0x7ad   : > { %6827 = verf.f32 %v2713_v18  ;;  %v6438_v31 = vpop.f32.mrb[36].mxu1 }
 0x7ae   : > { %v2626_v10 = vadd.f32 %v6438_v31, %v8368_v28  ;;  %v2617_v29 = vpop.f32.mrb[37].mxu1 }
 0x7af   : > { %v8412_v41 = vadd.f32 %v8368_v28, %v2617_v29  ;;  %v6439_v32 = vpop.f32.mrb[38].mxu1 }
 0x7b0   : > { %v2718_v62 = vmul.f32 0.70710677, %v2626_v10  ;;  %v2629_v59 = vadd.f32 %v6439_v32, %v8368_v28  ;;  %v2620_v9 = vpop.f32.mrb[39].mxu1  ;;  %v2686_v61 = vmul.f32 0.5, %v2626_v10 }
 0x7b1   : > { %v2716_v30 = vmul.f32 0.70710677, %v8412_v41  ;;  %v2621_v38 = vadd.f32 %v8368_v28, %v2620_v9  ;;  %v2684_v32 = vmul.f32 0.5, %v8412_v41 }
 0x7b2   : > { %6829 = verf.f32 %v2718_v62  ;;  %v2719_v35 = vmul.f32 0.70710677, %v2629_v59  ;;  %v2687_v40 = vmul.f32 0.5, %v2629_v59 }
 0x7b3   : > { %6831 = verf.f32 %v2716_v30  ;;  %v2717_v26 = vmul.f32 0.70710677, %v2621_v38  ;;  %v2685_v62 = vmul.f32 0.5, %v2621_v38 }
 0x7b4   : > { %v6822_v24 = vpop.eup %6821  ;;  %6833 = verf.f32 %v2719_v35 }
 0x7b5   : > { %v6824_v47 = vpop.eup %6823  ;;  %v2778_v43 = vadd.f32 1.0, %v6822_v24  ;;  %6835 = verf.f32 %v2717_v26  ;;  %v6442_v57 = vpop.f32.mrb[40].mxu1 }
 0x7b6   : > { %v6826_v3 = vpop.eup %6825  ;;  %v2776_v6 = vadd.f32 1.0, %v6824_v47  ;;  %v8418_v1 = vadd.f32 %v6442_v57, %v8368_v28  ;;  %v2633_v27 = vpop.f32.mrb[41].mxu1 }
 0x7b7   : > { %v6828_v16 = vpop.eup %6827  ;;  %v2779_v0 = vadd.f32 1.0, %v6826_v3  ;;  %v8421_v58 = vadd.f32 %v8368_v28, %v2633_v27  ;;  %v6443_v5 = vpop.f32.mrb[42].mxu1  ;;  %v2810_v11 = vmul.f32 %v2778_v43, %v2682_v22 }
 0x7b8   : > { %v2777_v63 = vadd.f32 1.0, %v6828_v16  ;;  %v2722_v20 = vmul.f32 0.70710677, %v8418_v1  ;;  %v2636_v54 = vpop.f32.mrb[43].mxu1  ;;  %v2645_v53 = vadd.f32 %v6443_v5, %v8368_v28  ;;  %v2808_v8 = vmul.f32 %v2776_v6, %v2680_v48 }
 0x7b9   : > { %v2811_v50 = vmul.f32 %v2779_v0, %v2683_v34  ;;  %v2720_v19 = vmul.f32 0.70710677, %v8421_v58  ;;  %v2637_v36 = vadd.f32 %v8368_v28, %v2636_v54  ;;  %v2690_v48 = vmul.f32 0.5, %v8418_v1 }
 0x7ba   : > { %v2809_v21 = vmul.f32 %v2777_v63, %v2681_v2  ;;  %6837 = verf.f32 %v2722_v20  ;;  %v2723_v39 = vmul.f32 0.70710677, %v2645_v53  ;;  %v2688_v63 = vmul.f32 0.5, %v8421_v58 }
 0x7bb   : > { %v2833_v37 = vpack.c.bf16 %v2811_v50, %v2810_v11  ;;  %6839 = verf.f32 %v2720_v19  ;;  %v2721_v4 = vmul.f32 0.70710677, %v2637_v36  ;;  %v2689_v20 = vmul.f32 0.5, %v2637_v36 }
 0x7bc   : > { %v6830_v23 = vpop.eup %6829  ;;  %v2832_v14 = vpack.c.bf16 %v2809_v21, %v2808_v8  ;;  %6841 = verf.f32 %v2723_v39 }
 0x7bd   : > { %v6832_v60 = vpop.eup %6831  ;;  %v2782_v46 = vadd.f32 1.0, %v6830_v23  ;;  %v6446_v12 = vpop.f32.mrb[44].mxu1  ;;  %6843 = verf.f32 %v2721_v4 }
 0x7be   : > { %v6834_v7 = vpop.eup %6833  ;;  %v2780_v13 = vadd.f32 1.0, %v6832_v60  ;;  %v2658_v17 = vadd.f32 %v6446_v12, %v8368_v28  ;;  %v2649_v33 = vpop.f32.mrb[45].mxu1  ;;  %6472 = vmatprep.mubr.msk.bf16.mxu0 %vm1518_vm1, %v2832_v14 }
 0x7bf   : > { %v6836_v56 = vpop.eup %6835  ;;  %v2783_v18 = vadd.f32 1.0, %v6834_v7  ;;  %v2650_v31 = vadd.f32 %v8368_v28, %v2649_v33  ;;  %v6447_v29 = vpop.f32.mrb[46].mxu1  ;;  %6473 = vmatmul.mubr.msk.bf16.gmra.mrb[48].mxu0 %vm1518_vm1, %v2833_v37  ;;  %v2814_v26 = vmul.f32 %v2782_v46, %v2686_v61 }
 0x7c0   : > { %v2781_v9 = vadd.f32 1.0, %v6836_v56  ;;  %v2726_v30 = vmul.f32 0.70710677, %v2658_v17  ;;  %v2652_v35 = vpop.f32.mrb[47].mxu1  ;;  %v2661_v43 = vadd.f32 %v6447_v29, %v8368_v28  ;;  %v2812_v57 = vmul.f32 %v2780_v13, %v2684_v32 }
 0x7c1   : > { %v2815_v24 = vmul.f32 %v2783_v18, %v2687_v40  ;;  %v2724_v47 = vmul.f32 0.70710677, %v2650_v31  ;;  %v2653_v59 = vadd.f32 %v8368_v28, %v2652_v35  ;;  %v2691_v28 = vmul.f32 0.5, %v2645_v53 }
 0x7c2   : > { %v2813_v10 = vmul.f32 %v2781_v9, %v2685_v62  ;;  %6845 = verf.f32 %v2726_v30  ;;  %v2727_v6 = vmul.f32 0.70710677, %v2661_v43  ;;  %v2694_v53 = vmul.f32 0.5, %v2658_v17  ;;  %v8446_v17 = vld [vmem:[%s10214_s14] ss:$0 sm:$0xff] }
 0x7c3   : > { %v2835_v3 = vpack.c.bf16 %v2815_v24, %v2814_v26  ;;  %6847 = verf.f32 %v2724_v47  ;;  %v2725_v41 = vmul.f32 0.70710677, %v2653_v59  ;;  %v2695_v46 = vmul.f32 0.5, %v2661_v43 }
 0x7c4   : > { %v6838_v27 = vpop.eup %6837  ;;  %v2834_v16 = vpack.c.bf16 %v2813_v10, %v2812_v57  ;;  %6849 = verf.f32 %v2727_v6  ;;  %v2692_v58 = vmul.f32 0.5, %v2650_v31  ;;  %v2693_v36 = vmul.f32 0.5, %v2653_v59 }
 0x7c5   : > { %v6840_v38 = vpop.eup %6839  ;;  %v2786_v22 = vadd.f32 1.0, %v6838_v27  ;;  %6851 = verf.f32 %v2725_v41  ;;  %v10392_v29 = vmov 0  }
 0x7c6   : > { %6476 = vmatprep.mubr.msk.bf16.mxu0 %vm1518_vm1, %v2834_v16  ;;  %v6842_v34 = vpop.eup %6841  ;;  %v2784_v0 = vadd.f32 1.0, %v6840_v38 }
 0x7c7   : > { %6477 = vmatmul.mubr.msk.bf16.gmra.mrb[52].mxu0 %vm1518_vm1, %v2835_v3  ;;  %v6844_v5 = vpop.eup %6843  ;;  %v2787_v2 = vadd.f32 1.0, %v6842_v34  ;;  %v2818_v11 = vmul.f32 %v2786_v22, %v2690_v48 }
 0x7c8   : > { %v2785_v54 = vadd.f32 1.0, %v6844_v5  ;;  %v2816_v19 = vmul.f32 %v2784_v0, %v2688_v63 }
 0x7c9   : > { %v2819_v50 = vmul.f32 %v2787_v2, %v2691_v28 }
 0x7ca   : > { %v2817_v8 = vmul.f32 %v2785_v54, %v2689_v20 }
 0x7cb   : > { %v2837_v37 = vpack.c.bf16 %v2819_v50, %v2818_v11 }
 0x7cc   : > { %v6846_v21 = vpop.eup %6845  ;;  %v2836_v23 = vpack.c.bf16 %v2817_v8, %v2816_v19 }
 0x7cd   : > { %v6848_v39 = vpop.eup %6847  ;;  %v2790_v14 = vadd.f32 1.0, %v6846_v21 }
 0x7ce   : > { %v6850_v4 = vpop.eup %6849  ;;  %v2788_v60 = vadd.f32 1.0, %v6848_v39  ;;  %6480 = vmatprep.mubr.msk.bf16.mxu0 %vm1518_vm1, %v2836_v23 }
 0x7cf   : > { %v6852_v1 = vpop.eup %6851  ;;  %v2791_v12 = vadd.f32 1.0, %v6850_v4  ;;  %6481 = vmatmul.mubr.msk.bf16.gmra.mrb[56].mxu0 %vm1518_vm1, %v2837_v37  ;;  %v2822_v13 = vmul.f32 %v2790_v14, %v2694_v53  ;;  %v10398_v14 = vld [vmem:[#allocation3_spill] sm:$0xff] }
 0x7d0   : > { %v2789_v7 = vadd.f32 1.0, %v6852_v1  ;;  %v2820_v56 = vmul.f32 %v2788_v60, %v2692_v58  ;;  %v10400_v1 = vld [vmem:[#allocation11_spill] sm:$0xff] }
 0x7d1   : > { %v2823_v33 = vmul.f32 %v2791_v12, %v2695_v46 }
 0x7d2   : > { %v2821_v61 = vmul.f32 %v2789_v7, %v2693_v36 }
 0x7d3   : > { %v2839_v40 = vpack.c.bf16 %v2823_v33, %v2822_v13 }
 0x7d4   : > { %v2838_v18 = vpack.c.bf16 %v2821_v61, %v2820_v56  ;;  %v10403_v61 = vld [vmem:[#allocation7_spill] sm:$0xff] }
 0x7d6   : > { %6484 = vmatprep.mubr.msk.bf16.mxu1 %vm1518_vm1, %v2838_v18 }
 0x7d7   : > { %6485 = vmatmul.mubr.msk.bf16.vlgmr.msra.gmra.mrb[48].mxu1 %vm1518_vm1, %v2839_v40 }
 0x7d8   : > { %3756 = vmatprep.mubr.bf16.mxu1 %v10392_v29 }
 0x848   : > { %v6458_v31 = vpop.f32.mrb[32].mxu0 }
 0x849   : > { %v2970_v32 = vadd.f32 %v6458_v31, %v8446_v17  ;;  %v8449_v62 = vpop.f32.mrb[33].mxu0 }
 0x84a   : > { %v6459_v9 = vpop.f32.mrb[34].mxu0 }
 0x84b   : > { %v8452_v30 = vadd.f32 %v2970_v32, %v7862_v15  ;;  %v2973_v35 = vadd.f32 %v6459_v9, %v8446_v17  ;;  %v8455_v26 = vpop.f32.mrb[35].mxu0  ;;  %v10405_v32 = vld [vmem:[#allocation5_spill] sm:$0xff] }
 0x84d   : > { %v8458_v24 = vadd.f32 %v2973_v35, %v7868_v52  ;;  %v3130_v47 = vsel %vm969_vm0, %v8452_v30, 0.0 }
 0x84e   : > { %3131 = vadd.xlane.f32.xlu1 %v3130_v47 }
 0x84f   : > { %v3133_v43 = vsel %vm969_vm0, %v8458_v24, 0.0 }
 0x850   : > { %3134 = vadd.xlane.f32.xlu0 %v3133_v43  ;;  %v6462_v57 = vpop.f32.mrb[36].mxu0 }
 0x851   : > { %v2977_v10 = vpop.f32.mrb[37].mxu0  ;;  %v2986_v21 = vadd.f32 %v6462_v57, %v8446_v17 }
 0x852   : > { %v2978_v15 = vadd.f32 %v8446_v17, %v2977_v10  ;;  %v6463_v59 = vpop.f32.mrb[38].mxu0 }
 0x853   : > { %v2980_v3 = vpop.f32.mrb[39].mxu0  ;;  %v8515_v53 = vadd.f32 %v2986_v21, %v10400_v1 }
 0x854   : > { %v8466_v6 = vadd.f32 %v2978_v15, %v7865_v55  ;;  %v2981_v52 = vadd.f32 %v8446_v17, %v2980_v3  ;;  %v10407_v3 = vld [vmem:[#allocation9_spill] sm:$0xff] }
 0x855   : > { %v3142_v58 = vsel %vm969_vm0, %v8515_v53, 0.0 }
 0x856   : > { %v8470_v27 = vadd.f32 %v2981_v52, %v7878_v25  ;;  %v3136_v16 = vsel %vm969_vm0, %v8466_v6, 0.0 }
 0x857   : > { %3137 = vadd.xlane.f32.xlu1 %v3136_v16 }
 0x858   : > { %v3139_v41 = vsel %vm969_vm0, %v8470_v27, 0.0  ;;  %v6466_v38 = vpop.f32.mrb[40].mxu0 }
 0x859   : > { %3140 = vadd.xlane.f32.xlu0 %v3139_v41  ;;  %v3002_v22 = vadd.f32 %v6466_v38, %v8446_v17  ;;  %v8477_v34 = vpop.f32.mrb[41].mxu0  ;;  %v10409_v41 = vld [vmem:[#allocation10_spill] sm:$0xff] }
 0x85a   : > { %v6467_v55 = vpop.f32.mrb[42].mxu0 }
 0x85b   : > { %v8480_v0 = vadd.f32 %v3002_v22, %v7893_v49  ;;  %v3005_v25 = vadd.f32 %v6467_v55, %v8446_v17  ;;  %v8483_v5 = vpop.f32.mrb[43].mxu0 }
 0x85d   : > { %10393 = vst [vmem:[#allocation23_spill] sm:$0xff] %v8480_v0  ;;  %v8486_v48 = vadd.f32 %v3005_v25, %v7908_v51  ;;  %v3154_v28 = vsel %vm969_vm0, %v8480_v0, 0.0 }
 0x85e   : > { %3155 = vadd.xlane.f32.xlu1 %v3154_v28 }
 0x85f   : > { %10394 = vst [vmem:[#allocation24_spill] sm:$0xff] %v8486_v48  ;;  %v3157_v2 = vsel %vm969_vm0, %v8486_v48, 0.0 }
 0x860   : > { %3158 = vadd.xlane.f32.xlu0 %v3157_v2  ;;  %v6470_v63 = vpop.f32.mrb[44].mxu0 }
 0x861   : > { %v3018_v20 = vadd.f32 %v6470_v63, %v8446_v17  ;;  %v3009_v49 = vpop.f32.mrb[45].mxu0 }
 0x862   : > { %v3010_v54 = vadd.f32 %v8446_v17, %v3009_v49  ;;  %v6471_v11 = vpop.f32.mrb[46].mxu0 }
 0x863   : > { %v8495_v50 = vadd.f32 %v3018_v20, %v7913_v45  ;;  %v3021_v51 = vadd.f32 %v6471_v11, %v8446_v17  ;;  %v3012_v19 = vpop.f32.mrb[47].mxu0  ;;  %v2989_v45 = vadd.f32 %v6463_v59, %v8446_v17  ;;  %v10411_v20 = vld [vmem:[#allocation15_spill] sm:$0xff] }
 0x864   : > { %v3013_v8 = vadd.f32 %v8446_v17, %v3012_v19  ;;  %v8501_v37 = vadd.f32 %v3010_v54, %v7903_v44 }
 0x865   : > { %10395 = vst [vmem:[#allocation22_spill] sm:$0xff] %v8495_v50  ;;  %v8504_v39 = vadd.f32 %v3021_v51, %v7929_v42  ;;  %v3166_v23 = vsel %vm969_vm0, %v8495_v50, 0.0  ;;  %v10401_v42 = vld [vmem:[#allocation4_spill] sm:$0xff]  ;;  %v10413_v51 = vld [vmem:[#allocation17_spill] sm:$0xff] }
 0x866   : > { %10396 = vst [vmem:[#allocation28_spill] sm:$0xff] %v8501_v37  ;;  %3167 = vadd.xlane.f32.xlu1 %v3166_v23  ;;  %v8510_v4 = vadd.f32 %v3013_v8, %v10398_v14  ;;  %v3160_v44 = vsel %vm969_vm0, %v8501_v37, 0.0  ;;  %v8520_v46 = vadd.f32 %v2989_v45, %v10401_v42 }
 0x867   : > { %10397 = vst [vmem:[#allocation29_spill] sm:$0xff] %v8504_v39  ;;  %v3169_v60 = vsel %vm969_vm0, %v8504_v39, 0.0 }
 0x868   : > { %10399 = vst [vmem:[#allocation3_spill] sm:$0xff] %v8510_v4  ;;  %3170 = vadd.xlane.f32.xlu0 %v3169_v60  ;;  %10402 = vst [vmem:[#allocation11_spill] sm:$0xff] %v8520_v46  ;;  %v3163_v12 = vsel %vm969_vm0, %v8510_v4, 0.0  ;;  %v3145_v36 = vsel %vm969_vm0, %v8520_v46, 0.0 }
 0x86a   : > { %3161 = vadd.xlane.f32.xlu1 %v3160_v44  ;;  %v10415_v44 = vld [vmem:[#allocation25_spill] sm:$0xff] }
 0x86c   : > { %3164 = vadd.xlane.f32.xlu0 %v3163_v12 }
 0x86e   : > { %3143 = vadd.xlane.f32.xlu1 %v3142_v58 }
 0x870   : > { %3146 = vadd.xlane.f32.xlu0 %v3145_v36 }
 0x892   : > { %v6474_v7 = vpop.f32.mrb[48].mxu0 }
 0x893   : > { %v3034_v13 = vadd.f32 %v6474_v7, %v8446_v17  ;;  %v8529_v33 = vpop.f32.mrb[49].mxu0 }
 0x894   : > { %v6475_v56 = vpop.f32.mrb[50].mxu0 }
 0x895   : > { %v8532_v40 = vadd.f32 %v3034_v13, %v10403_v61  ;;  %v3037_v18 = vadd.f32 %v6475_v56, %v8446_v17  ;;  %v8535_v31 = vpop.f32.mrb[51].mxu0  ;;  %v10417_v13 = vld [vmem:[#allocation21_spill] sm:$0xff]  ;;  %v10419_v61 = vld [vmem:[#allocation19_spill] sm:$0xff] }
 0x897   : > { %10404 = vst [vmem:[#allocation4_spill] sm:$0xff] %v8532_v40  ;;  %v8538_v9 = vadd.f32 %v3037_v18, %v10405_v32  ;;  %v3178_v35 = vsel %vm969_vm0, %v8532_v40, 0.0 }
 0x898   : > { %3179 = vadd.xlane.f32.xlu1 %v3178_v35 }
 0x899   : > { %10406 = vst [vmem:[#allocation7_spill] sm:$0xff] %v8538_v9  ;;  %v3181_v47 = vsel %vm969_vm0, %v8538_v9, 0.0 }
 0x89a   : > { %3182 = vadd.xlane.f32.xlu0 %v3181_v47  ;;  %v6478_v43 = vpop.f32.mrb[52].mxu0  ;;  %v10421_v47 = vld [vmem:[#allocation20_spill] sm:$0xff] }
 0x89b   : > { %v3041_v57 = vpop.f32.mrb[53].mxu0  ;;  %v3050_v7 = vadd.f32 %v6478_v43, %v8446_v17  ;;  %v2994_v43 = vadd.f32 %v8446_v17, %v8477_v34  ;;  %v2962_v34 = vadd.f32 %v8446_v17, %v8449_v62 }
 0x89c   : > { %v3042_v10 = vadd.f32 %v8446_v17, %v3041_v57  ;;  %v6479_v15 = vpop.f32.mrb[54].mxu0 }
 0x89d   : > { %v3044_v59 = vpop.f32.mrb[55].mxu0  ;;  %v3053_v35 = vadd.f32 %v6479_v15, %v8446_v17  ;;  %v2997_v15 = vadd.f32 %v8446_v17, %v8483_v5  ;;  %v2965_v5 = vadd.f32 %v8446_v17, %v8455_v26 }
 0x89e   : > { %v8546_v52 = vadd.f32 %v3042_v10, %v10407_v3  ;;  %v3045_v16 = vadd.f32 %v8446_v17, %v3044_v59  ;;  %v10423_v59 = vld [vmem:[#allocation18_spill] sm:$0xff] }
 0x89f   : > { %v8597_v3 = vadd.f32 %v3050_v7, %v10423_v59 }
 0x8a0   : > { %10408 = vst [vmem:[#allocation5_spill] sm:$0xff] %v8546_v52  ;;  %v8550_v38 = vadd.f32 %v3045_v16, %v10409_v41  ;;  %v3184_v22 = vsel %vm969_vm0, %v8546_v52, 0.0  ;;  %v10425_v41 = vld [vmem:[#allocation14_spill] sm:$0xff] }
 0x8a1   : > { %3185 = vadd.xlane.f32.xlu1 %v3184_v22  ;;  %10424 = vst [vmem:[#allocation20_spill] sm:$0xff] %v8597_v3  ;;  %v8604_v22 = vadd.f32 %v3053_v35, %v10425_v41 }
 0x8a2   : > { %10410 = vst [vmem:[#allocation9_spill] sm:$0xff] %v8550_v38  ;;  %v3187_v55 = vsel %vm969_vm0, %v8550_v38, 0.0  ;;  %v6482_v25 = vpop.f32.mrb[56].mxu0 }
 0x8a3   : > { %3188 = vadd.xlane.f32.xlu0 %v3187_v55  ;;  %v3066_v28 = vadd.f32 %v6482_v25, %v8446_v17  ;;  %v8557_v2 = vpop.f32.mrb[57].mxu0  ;;  %10426 = vst [vmem:[#allocation18_spill] sm:$0xff] %v8604_v22  ;;  %v10427_v25 = vld [vmem:[#allocation2_spill] sm:$0xff] }
 0x8a4   : > { %v6483_v63 = vpop.f32.mrb[58].mxu0 }
 0x8a5   : > { %v8560_v49 = vadd.f32 %v3066_v28, %v10411_v20  ;;  %v3069_v54 = vadd.f32 %v6483_v63, %v8446_v17  ;;  %v8563_v11 = vpop.f32.mrb[59].mxu0  ;;  %v8611_v28 = vadd.f32 %v2994_v43, %v10427_v25  ;;  %v3190_v63 = vsel %vm969_vm0, %v8597_v3, 0.0  ;;  %v10429_v20 = vld [vmem:[#allocation12_spill] sm:$0xff] }
 0x8a7   : > { %10412 = vst [vmem:[#allocation10_spill] sm:$0xff] %v8560_v49  ;;  %v8566_v19 = vadd.f32 %v3069_v54, %v10413_v51  ;;  %v3202_v8 = vsel %vm969_vm0, %v8560_v49, 0.0  ;;  %10428 = vst [vmem:[#allocation14_spill] sm:$0xff] %v8611_v28  ;;  %v8618_v54 = vadd.f32 %v2997_v15, %v10429_v20  ;;  %v3193_v51 = vsel %vm969_vm0, %v8604_v22, 0.0 }
 0x8a8   : > { %3203 = vadd.xlane.f32.xlu1 %v3202_v8  ;;  %v10431_v8 = vld [vmem:[#allocation27_spill] sm:$0xff]  ;;  %v3148_v62 = vsel %vm969_vm0, %v8611_v28, 0.0 }
 0x8a9   : > { %10414 = vst [vmem:[#allocation15_spill] sm:$0xff] %v8566_v19  ;;  %v3205_v21 = vsel %vm969_vm0, %v8566_v19, 0.0  ;;  %10430 = vst [vmem:[#allocation2_spill] sm:$0xff] %v8618_v54  ;;  %v3151_v26 = vsel %vm969_vm0, %v8618_v54, 0.0 }
 0x8aa   : > { %3206 = vadd.xlane.f32.xlu0 %v3205_v21  ;;  %v6486_v23 = vpop.f32.mrb[48].mxu1  ;;  %v8623_v21 = vadd.f32 %v2962_v34, %v10431_v8 }
 0x8ab   : > { %v3082_v45 = vadd.f32 %v6486_v23, %v8446_v17  ;;  %v3073_v14 = vpop.f32.mrb[49].mxu1  ;;  %v10432_v23 = vld [vmem:[#allocation26_spill] sm:$0xff] }
 0x8ac   : > { %v3074_v60 = vadd.f32 %v8446_v17, %v3073_v14  ;;  %v6487_v1 = vpop.f32.mrb[50].mxu1  ;;  %v3124_v14 = vsel %vm969_vm0, %v8623_v21, 0.0 }
 0x8ad   : > { %v8575_v42 = vadd.f32 %v3082_v45, %v10415_v44  ;;  %v3085_v12 = vadd.f32 %v6487_v1, %v8446_v17  ;;  %v3076_v58 = vpop.f32.mrb[51].mxu1  ;;  %v8628_v45 = vadd.f32 %v2965_v5, %v10432_v23 }
 0x8ae   : > { %v3077_v36 = vadd.f32 %v8446_v17, %v3076_v58  ;;  %v8581_v56 = vadd.f32 %v3074_v60, %v10417_v13 }
 0x8af   : > { %10416 = vst [vmem:[#allocation17_spill] sm:$0xff] %v8575_v42  ;;  %v8584_v18 = vadd.f32 %v3085_v12, %v10419_v61  ;;  %v3214_v32 = vsel %vm969_vm0, %v8575_v42, 0.0  ;;  %v3127_v60 = vsel %vm969_vm0, %v8628_v45, 0.0 }
 0x8b0   : > { %10418 = vst [vmem:[#allocation25_spill] sm:$0xff] %v8581_v56  ;;  %3215 = vadd.xlane.f32.xlu1 %v3214_v32  ;;  %v8590_v57 = vadd.f32 %v3077_v36, %v10421_v47  ;;  %v3208_v16 = vsel %vm969_vm0, %v8581_v56, 0.0 }
 0x8b1   : > { %10420 = vst [vmem:[#allocation21_spill] sm:$0xff] %v8584_v18  ;;  %v3217_v10 = vsel %vm969_vm0, %v8584_v18, 0.0 }
 0x8b2   : > { %10422 = vst [vmem:[#allocation19_spill] sm:$0xff] %v8590_v57  ;;  %3218 = vadd.xlane.f32.xlu0 %v3217_v10  ;;  %v3211_v55 = vsel %vm969_vm0, %v8590_v57, 0.0 }
 0x8b4   : > { %3209 = vadd.xlane.f32.xlu1 %v3208_v16 }
 0x8b6   : > { %3212 = vadd.xlane.f32.xlu0 %v3211_v55 }
 0x8b8   : > { %3191 = vadd.xlane.f32.xlu1 %v3190_v63 }
 0x8ba   : > { %3194 = vadd.xlane.f32.xlu0 %v3193_v51 }
 0x8bc   : > { %3149 = vadd.xlane.f32.xlu1 %v3148_v62 }
 0x8be   : > { %3152 = vadd.xlane.f32.xlu0 %v3151_v26 }
 0x8c0   : > { %3125 = vadd.xlane.f32.xlu1 %v3124_v14 }
 0x8c2   : > { %3128 = vadd.xlane.f32.xlu0 %v3127_v60 }
 0x8db   : > { %v3132_v1 = vpop.xlane.xlu1 %3131 }
 0x8dc   : > { %v3222_v44 = vmul.f32 0.03125, %v3132_v1 }
 0x8dd   : > { %v3135_v12 = vpop.xlane.xlu0 %3134 }
 0x8de   : > { %v8637_v58 = vsub.f32 %v8452_v30, %v3222_v44  ;;  %v3223_v36 = vmul.f32 0.03125, %v3135_v12 }
 0x8e0   : > { %v8640_v7 = vsub.f32 %v8458_v24, %v3223_v36  ;;  %v3286_v13 = vmul.f32 %v8637_v58, %v8637_v58 }
 0x8e2   : > { %v3322_v61 = vsel %vm969_vm0, %v3286_v13, 0.0  ;;  %v3287_v32 = vmul.f32 %v8640_v7, %v8640_v7 }
 0x8e3   : > { %3323 = vadd.xlane.f32.xlu1 %v3322_v61 }
 0x8e4   : > { %v3325_v35 = vsel %vm969_vm0, %v3287_v32, 0.0  ;;  %v3138_v16 = vpop.xlane.xlu1 %3137 }
 0x8e5   : > { %3326 = vadd.xlane.f32.xlu0 %v3325_v35  ;;  %v3224_v26 = vmul.f32 0.03125, %v3138_v16  ;;  %v3061_v16 = vadd.f32 %v8446_v17, %v8563_v11 }
 0x8e6   : > { %v3141_v47 = vpop.xlane.xlu0 %3140 }
 0x8e7   : > { %v3225_v10 = vmul.f32 0.03125, %v3141_v47  ;;  %v8670_v61 = vsub.f32 %v8466_v6, %v3224_v26  ;;  %v10433_v26 = vld [vmem:[#allocation13_spill] sm:$0xff] }
 0x8e9   : > { %v8649_v43 = vsub.f32 %v8470_v27, %v3225_v10 }
 0x8eb   : > { %v3289_v59 = vmul.f32 %v8649_v43, %v8649_v43  ;;  %v3156_v34 = vpop.xlane.xlu1 %3155 }
 0x8ec   : > { %v3230_v35 = vmul.f32 0.03125, %v3156_v34  ;;  %v3288_v34 = vmul.f32 %v8670_v61, %v8670_v61 }
 0x8ed   : > { %v3331_v15 = vsel %vm969_vm0, %v3289_v59, 0.0  ;;  %v3159_v41 = vpop.xlane.xlu0 %3158 }
 0x8ee   : > { %3332 = vadd.xlane.f32.xlu0 %v3331_v15  ;;  %v3231_v55 = vmul.f32 0.03125, %v3159_v41 }
 0x8f0   : > { %v8655_v25 = vsub.f32 %v8486_v48, %v3231_v55 }
 0x8f2   : > { %v3295_v63 = vmul.f32 %v8655_v25, %v8655_v25 }
 0x8f3   : > { %v3168_v5 = vpop.xlane.xlu1 %3167 }
 0x8f4   : > { %v3349_v20 = vsel %vm969_vm0, %v3295_v63, 0.0  ;;  %v8688_v63 = vsub.f32 %v8480_v0, %v3230_v35 }
 0x8f5   : > { %3350 = vadd.xlane.f32.xlu0 %v3349_v20  ;;  %v3171_v51 = vpop.xlane.xlu0 %3170  ;;  %v3234_v20 = vmul.f32 0.03125, %v3168_v5  ;;  %v3328_v5 = vsel %vm969_vm0, %v3288_v34, 0.0  ;;  %v3026_v34 = vadd.f32 %v8446_v17, %v8529_v33 }
 0x8f6   : > { %v3235_v8 = vmul.f32 0.03125, %v3171_v51 }
 0x8f7   : > { %v3162_v62 = vpop.xlane.xlu1 %3161 }
 0x8f8   : > { %v8661_v23 = vsub.f32 %v8504_v39, %v3235_v8  ;;  %v3029_v8 = vadd.f32 %v8446_v17, %v8535_v31 }
 0x8f9   : > { %v3165_v14 = vpop.xlane.xlu0 %3164 }
 0x8fa   : > { %v3233_v60 = vmul.f32 0.03125, %v3165_v14  ;;  %v3299_v1 = vmul.f32 %v8661_v23, %v8661_v23  ;;  %v8696_v14 = vadd.f32 %v3061_v16, %v10433_v26  ;;  %v3058_v16 = vadd.f32 %v8446_v17, %v8557_v2 }
 0x8fb   : > { %v3144_v44 = vpop.xlane.xlu1 %3143 }
 0x8fc   : > { %v8666_v12 = vsub.f32 %v8510_v4, %v3233_v60  ;;  %v3226_v36 = vmul.f32 0.03125, %v3144_v44  ;;  %v3361_v13 = vsel %vm969_vm0, %v3299_v1, 0.0  ;;  %10434 = vst [vmem:[#allocation12_spill] sm:$0xff] %v8696_v14  ;;  %v8700_v1 = vsub.f32 %v8495_v50, %v3234_v20  ;;  %v10437_v20 = vld [vmem:[#allocation16_spill] sm:$0xff] }
 0x8fd   : > { %3362 = vadd.xlane.f32.xlu0 %v3361_v13  ;;  %v3147_v32 = vpop.xlane.xlu0 %3146  ;;  %v3232_v44 = vmul.f32 0.03125, %v3162_v62  ;;  %v10435_v13 = vld [vmem:[#allocation8_spill] sm:$0xff]  ;;  %v3199_v31 = vsel %vm969_vm0, %v8696_v14, 0.0 }
 0x8fe   : > { %v8673_v47 = vsub.f32 %v8515_v53, %v3226_v36  ;;  %v3227_v10 = vmul.f32 0.03125, %v3147_v32  ;;  %v3297_v59 = vmul.f32 %v8666_v12, %v8666_v12  ;;  %v3294_v36 = vmul.f32 %v8688_v63, %v8688_v63 }
 0x8ff   : > { %v8706_v32 = vadd.f32 %v3029_v8, %v10435_v13  ;;  %v8711_v35 = vsub.f32 %v8501_v37, %v3232_v44  ;;  %v3298_v62 = vmul.f32 %v8700_v1, %v8700_v1  ;;  %v10438_v8 = vld [vmem:[#allocation6_spill] sm:$0xff] }
 0x900   : > { %v8680_v15 = vsub.f32 %v8520_v46, %v3227_v10  ;;  %v3355_v41 = vsel %vm969_vm0, %v3297_v59, 0.0  ;;  %v3290_v55 = vmul.f32 %v8673_v47, %v8673_v47  ;;  %v3346_v10 = vsel %vm969_vm0, %v3294_v36, 0.0 }
 0x901   : > { %3356 = vadd.xlane.f32.xlu0 %v3355_v41  ;;  %10436 = vst [vmem:[#allocation27_spill] sm:$0xff] %v8706_v32  ;;  %v3175_v59 = vsel %vm969_vm0, %v8706_v32, 0.0  ;;  %v3358_v41 = vsel %vm969_vm0, %v3298_v62, 0.0  ;;  %v8730_v26 = vadd.f32 %v3026_v34, %v10438_v8 }
 0x902   : > { %v3334_v51 = vsel %vm969_vm0, %v3290_v55, 0.0  ;;  %v3291_v11 = vmul.f32 %v8680_v15, %v8680_v15  ;;  %v3296_v55 = vmul.f32 %v8711_v35, %v8711_v35 }
 0x903   : > { %3335 = vadd.xlane.f32.xlu1 %v3334_v51  ;;  %v8726_v51 = vadd.f32 %v3058_v16, %v10437_v20 }
 0x904   : > { %v3337_v60 = vsel %vm969_vm0, %v3291_v11, 0.0  ;;  %v3352_v11 = vsel %vm969_vm0, %v3296_v55, 0.0 }
 0x905   : > { %3338 = vadd.xlane.f32.xlu0 %v3337_v60  ;;  %v3196_v2 = vsel %vm969_vm0, %v8726_v51, 0.0  ;;  %v3172_v60 = vsel %vm969_vm0, %v8730_v26, 0.0 }
 0x907   : > { %3329 = vadd.xlane.f32.xlu1 %v3328_v5 }
 0x909   : > { %3200 = vadd.xlane.f32.xlu0 %v3199_v31 }
 0x90b   : > { %3347 = vadd.xlane.f32.xlu1 %v3346_v10 }
 0x90d   : > { %3176 = vadd.xlane.f32.xlu0 %v3175_v59 }
 0x90f   : > { %3359 = vadd.xlane.f32.xlu1 %v3358_v41 }
 0x913   : > { %3353 = vadd.xlane.f32.xlu1 %v3352_v11 }
 0x917   : > { %3197 = vadd.xlane.f32.xlu1 %v3196_v2 }
 0x91b   : > { %3173 = vadd.xlane.f32.xlu1 %v3172_v60 }
 0x925   : > { %v3180_v44 = vpop.xlane.xlu1 %3179 }
 0x926   : > { %v3238_v5 = vmul.f32 0.03125, %v3180_v44 }
 0x927   : > { %v3183_v17 = vpop.xlane.xlu0 %3182 }
 0x928   : > { %v8737_v33 = vsub.f32 %v8532_v40, %v3238_v5  ;;  %v3239_v36 = vmul.f32 0.03125, %v3183_v17 }
 0x92a   : > { %v8740_v13 = vsub.f32 %v8538_v9, %v3239_v36  ;;  %v3302_v31 = vmul.f32 %v8737_v33, %v8737_v33 }
 0x92c   : > { %v3370_v10 = vsel %vm969_vm0, %v3302_v31, 0.0  ;;  %v3303_v62 = vmul.f32 %v8740_v13, %v8740_v13 }
 0x92d   : > { %3371 = vadd.xlane.f32.xlu1 %v3370_v10 }
 0x92e   : > { %v3373_v59 = vsel %vm969_vm0, %v3303_v62, 0.0  ;;  %v3186_v20 = vpop.xlane.xlu1 %3185 }
 0x92f   : > { %3374 = vadd.xlane.f32.xlu0 %v3373_v59 }
 0x930   : > { %v3189_v16 = vpop.xlane.xlu0 %3188 }
 0x931   : > { %v3241_v41 = vmul.f32 0.03125, %v3189_v16  ;;  %v3240_v16 = vmul.f32 0.03125, %v3186_v20 }
 0x933   : > { %v8749_v55 = vsub.f32 %v8550_v38, %v3241_v41 }
 0x935   : > { %v3305_v34 = vmul.f32 %v8749_v55, %v8749_v55  ;;  %v3204_v60 = vpop.xlane.xlu1 %3203 }
 0x937   : > { %v3379_v11 = vsel %vm969_vm0, %v3305_v34, 0.0  ;;  %v3207_v8 = vpop.xlane.xlu0 %3206 }
 0x938   : > { %3380 = vadd.xlane.f32.xlu0 %v3379_v11  ;;  %v3247_v2 = vmul.f32 0.03125, %v3207_v8 }
 0x93a   : > { %v8755_v44 = vsub.f32 %v8566_v19, %v3247_v2 }
 0x93c   : > { %v3311_v5 = vmul.f32 %v8755_v44, %v8755_v44 }
 0x93d   : > { %v3216_v17 = vpop.xlane.xlu1 %3215 }
 0x93e   : > { %v3397_v36 = vsel %vm969_vm0, %v3311_v5, 0.0 }
 0x93f   : > { %3398 = vadd.xlane.f32.xlu0 %v3397_v36  ;;  %v3219_v31 = vpop.xlane.xlu0 %3218  ;;  %v8770_v36 = vsub.f32 %v8546_v52, %v3240_v16 }
 0x940   : > { %v3251_v10 = vmul.f32 0.03125, %v3219_v31  ;;  %v3246_v31 = vmul.f32 0.03125, %v3204_v60 }
 0x941   : > { %v3210_v62 = vpop.xlane.xlu1 %3209 }
 0x942   : > { %v8761_v59 = vsub.f32 %v8584_v18, %v3251_v10  ;;  %v8784_v16 = vsub.f32 %v8560_v49, %v3246_v31 }
 0x943   : > { %v3213_v41 = vpop.xlane.xlu0 %3212 }
 0x944   : > { %v3249_v34 = vmul.f32 0.03125, %v3213_v41  ;;  %v3315_v11 = vmul.f32 %v8761_v59, %v8761_v59 }
 0x945   : > { %v3192_v8 = vpop.xlane.xlu1 %3191 }
 0x946   : > { %v8766_v2 = vsub.f32 %v8590_v57, %v3249_v34  ;;  %v3242_v19 = vmul.f32 0.03125, %v3192_v8  ;;  %v3409_v5 = vsel %vm969_vm0, %v3315_v11, 0.0  ;;  %v3250_v8 = vmul.f32 0.03125, %v3216_v17 }
 0x947   : > { %3410 = vadd.xlane.f32.xlu0 %v3409_v5  ;;  %v3195_v10 = vpop.xlane.xlu0 %3194  ;;  %v3310_v17 = vmul.f32 %v8784_v16, %v8784_v16 }
 0x948   : > { %v8773_v20 = vsub.f32 %v8597_v3, %v3242_v19  ;;  %v3243_v41 = vmul.f32 0.03125, %v3195_v10  ;;  %v3313_v18 = vmul.f32 %v8766_v2, %v8766_v2  ;;  %v3304_v19 = vmul.f32 %v8770_v36, %v8770_v36 }
 0x949   : > { %v3150_v31 = vpop.xlane.xlu1 %3149 }
 0x94a   : > { %v8778_v38 = vsub.f32 %v8604_v22, %v3243_v41  ;;  %v3403_v34 = vsel %vm969_vm0, %v3313_v18, 0.0  ;;  %v3306_v11 = vmul.f32 %v8773_v20, %v8773_v20  ;;  %v3376_v49 = vsel %vm969_vm0, %v3304_v19, 0.0 }
 0x94b   : > { %3404 = vadd.xlane.f32.xlu0 %v3403_v34  ;;  %v3153_v60 = vpop.xlane.xlu0 %3152  ;;  %v3394_v19 = vsel %vm969_vm0, %v3310_v17, 0.0  ;;  %v3228_v22 = vmul.f32 0.03125, %v3150_v31 }
 0x94c   : > { %v3229_v5 = vmul.f32 0.03125, %v3153_v60  ;;  %v3382_v10 = vsel %vm969_vm0, %v3306_v11, 0.0  ;;  %v3307_v41 = vmul.f32 %v8778_v38, %v8778_v38  ;;  %v8799_v60 = vsub.f32 %v8575_v42, %v3250_v8 }
 0x94d   : > { %3383 = vadd.xlane.f32.xlu1 %v3382_v10  ;;  %v3248_v11 = vmul.f32 0.03125, %v3210_v62 }
 0x94e   : > { %v8792_v18 = vsub.f32 %v8618_v54, %v3229_v5  ;;  %v3385_v57 = vsel %vm969_vm0, %v3307_v41, 0.0  ;;  %v3314_v8 = vmul.f32 %v8799_v60, %v8799_v60 }
 0x94f   : > { %3386 = vadd.xlane.f32.xlu0 %v3385_v57  ;;  %v3129_v34 = vpop.xlane.xlu0 %3128  ;;  %v8809_v41 = vsub.f32 %v8581_v56, %v3248_v11 }
 0x950   : > { %v3221_v3 = vmul.f32 0.03125, %v3129_v34  ;;  %v3293_v10 = vmul.f32 %v8792_v18, %v8792_v18  ;;  %v3126_v34 = vpop.xlane.xlu1 %3125  ;;  %v3406_v17 = vsel %vm969_vm0, %v3314_v8, 0.0 }
 0x951   : > { %3377 = vadd.xlane.f32.xlu1 %v3376_v49  ;;  %v3312_v31 = vmul.f32 %v8809_v41, %v8809_v41 }
 0x952   : > { %v8804_v5 = vsub.f32 %v8628_v45, %v3221_v3  ;;  %v3343_v57 = vsel %vm969_vm0, %v3293_v10, 0.0  ;;  %v8817_v3 = vsub.f32 %v8611_v28, %v3228_v22  ;;  %v3220_v10 = vmul.f32 0.03125, %v3126_v34 }
 0x953   : > { %3344 = vadd.xlane.f32.xlu0 %v3343_v57  ;;  %v3400_v57 = vsel %vm969_vm0, %v3312_v31, 0.0 }
 0x954   : > { %v3285_v62 = vmul.f32 %v8804_v5, %v8804_v5  ;;  %v8823_v11 = vsub.f32 %v8623_v21, %v3220_v10 }
 0x955   : > { %3395 = vadd.xlane.f32.xlu1 %v3394_v19  ;;  %v3292_v19 = vmul.f32 %v8817_v3, %v8817_v3 }
 0x956   : > { %v3319_v49 = vsel %vm969_vm0, %v3285_v62, 0.0  ;;  %v3284_v22 = vmul.f32 %v8823_v11, %v8823_v11 }
 0x957   : > { %3320 = vadd.xlane.f32.xlu0 %v3319_v49  ;;  %v3340_v62 = vsel %vm969_vm0, %v3292_v19, 0.0 }
 0x958   : > { %v3316_v8 = vsel %vm969_vm0, %v3284_v22, 0.0 }
 0x959   : > { %3407 = vadd.xlane.f32.xlu1 %v3406_v17 }
 0x95d   : > { %3401 = vadd.xlane.f32.xlu1 %v3400_v57 }
 0x961   : > { %3341 = vadd.xlane.f32.xlu1 %v3340_v62 }
 0x965   : > { %3317 = vadd.xlane.f32.xlu1 %v3316_v8 }
 0x970   : > { %v3324_v42 = vpop.xlane.xlu1 %3323 }
 0x971   : > { %v3414_v39 = vmul.f32 0.03125, %v3324_v42 }
 0x972   : > { %v3327_v34 = vpop.xlane.xlu0 %3326 }
 0x973   : > { %v3415_v9 = vmul.f32 0.03125, %v3327_v34  ;;  %v3446_v8 = vadd.f32 1e-05, %v3414_v39 }
 0x975   : > { %v3447_v50 = vadd.f32 1e-05, %v3415_v9 }
 0x977   : > { %6853 = vrsqrt.f32 %v3447_v50 }
 0x978   : > { %6855 = vrsqrt.f32 %v3446_v8 }
 0x97b   : > { %v3333_v49 = vpop.xlane.xlu0 %3332 }
 0x982   : > { %v3351_v17 = vpop.xlane.xlu0 %3350 }
 0x98a   : > { %v3363_v10 = vpop.xlane.xlu0 %3362 }
 0x98e   : > { %v3357_v56 = vpop.xlane.xlu0 %3356 }
 0x990   : > { %v3336_v31 = vpop.xlane.xlu1 %3335 }
 0x991   : > { %v3418_v37 = vmul.f32 0.03125, %v3336_v31  ;;  %v3417_v31 = vmul.f32 0.03125, %v3333_v49 }
 0x992   : > { %v3339_v52 = vpop.xlane.xlu0 %3338 }
 0x993   : > { %v3419_v48 = vmul.f32 0.03125, %v3339_v52  ;;  %v3450_v52 = vadd.f32 1e-05, %v3418_v37  ;;  %v6854_v37 = vpop.eup %6853 }
 0x994   : > { %v3330_v40 = vpop.xlane.xlu1 %3329 }
 0x995   : > { %v3451_v28 = vadd.f32 1e-05, %v3419_v48  ;;  %v3416_v9 = vmul.f32 0.03125, %v3330_v40  ;;  %v3449_v48 = vadd.f32 1e-05, %v3417_v31 }
 0x996   : > { %v3201_v57 = vpop.xlane.xlu0 %3200 }
 0x997   : > { %v3245_v19 = vmul.f32 0.03125, %v3201_v57  ;;  %6857 = vrsqrt.f32 %v3451_v28  ;;  %v3425_v28 = vmul.f32 0.03125, %v3357_v56 }
 0x998   : > { %v3348_v4 = vpop.xlane.xlu1 %3347  ;;  %6859 = vrsqrt.f32 %v3450_v52 }
 0x999   : > { %v8833_v62 = vsub.f32 %v8696_v14, %v3245_v19  ;;  %v3422_v50 = vmul.f32 0.03125, %v3348_v4  ;;  %v3457_v56 = vadd.f32 1e-05, %v3425_v28 }
 0x99a   : > { %v3177_v22 = vpop.xlane.xlu0 %3176 }
 0x99b   : > { %v3237_v54 = vmul.f32 0.03125, %v3177_v22  ;;  %v3309_v0 = vmul.f32 %v8833_v62, %v8833_v62  ;;  %v3448_v22 = vadd.f32 1e-05, %v3416_v9  ;;  %v3454_v40 = vadd.f32 1e-05, %v3422_v50 }
 0x99c   : > { %v3360_v46 = vpop.xlane.xlu1 %3359 }
 0x99d   : > { %v8838_v34 = vsub.f32 %v8706_v32, %v3237_v54  ;;  %v3391_v42 = vsel %vm969_vm0, %v3309_v0, 0.0  ;;  %v3423_v54 = vmul.f32 0.03125, %v3351_v17  ;;  %6861 = vrsqrt.f32 %v3448_v22 }
 0x99e   : > { %3392 = vadd.xlane.f32.xlu0 %v3391_v42  ;;  %6863 = vrsqrt.f32 %v3449_v48  ;;  %v3426_v17 = vmul.f32 0.03125, %v3360_v46  ;;  %v3427_v22 = vmul.f32 0.03125, %v3363_v10  ;;  %v8860_v46 = vld [vmem:[%s10344_s22 + $0x1] ss:$0 sm:$0xff] }
 0x99f   : > { %v3301_v39 = vmul.f32 %v8838_v34, %v8838_v34  ;;  %v3455_v49 = vadd.f32 1e-05, %v3423_v54  ;;  %6865 = vrsqrt.f32 %v3454_v40 }
 0x9a0   : > { %v3354_v57 = vpop.xlane.xlu1 %3353 }
 0x9a1   : > { %v3367_v19 = vsel %vm969_vm0, %v3301_v39, 0.0  ;;  %v3424_v8 = vmul.f32 0.03125, %v3354_v57  ;;  %v6856_v39 = vpop.eup %6855  ;;  %6867 = vrsqrt.f32 %v3455_v49  ;;  %v8870_v49 = vld [vmem:[%s10204_s4 + $0x1] ss:$0 sm:$0xff] }
 0x9a2   : > { %3368 = vadd.xlane.f32.xlu0 %v3367_v19  ;;  %v6858_v31 = vpop.eup %6857 }
 0x9a3   : > { %v3456_v52 = vadd.f32 1e-05, %v3424_v8  ;;  %v6860_v50 = vpop.eup %6859  ;;  %v3459_v8 = vadd.f32 1e-05, %v3427_v22 }
 0x9a4   : > { %v3198_v14 = vpop.xlane.xlu1 %3197 }
 0x9a5   : > { %v3244_v0 = vmul.f32 0.03125, %v3198_v14  ;;  %v3511_v14 = vmul.f32 %v6854_v37, %v8640_v7  ;;  %v3458_v7 = vadd.f32 1e-05, %v3426_v17  ;;  %6869 = vrsqrt.f32 %v3456_v52 }
 0x9a6   : > { %6871 = vrsqrt.f32 %v3457_v56  ;;  %v3514_v37 = vmul.f32 %v6860_v50, %v8673_v47 }
 0x9a7   : > { %v8845_v42 = vsub.f32 %v8726_v51, %v3244_v0  ;;  %v3549_v54 = vmul.f32 %v8860_v46, %v3511_v14  ;;  %v3515_v0 = vmul.f32 %v6858_v31, %v8680_v15  ;;  %v6862_v40 = vpop.eup %6861  ;;  %6873 = vrsqrt.f32 %v3458_v7 }
 0x9a8   : > { %v3174_v32 = vpop.xlane.xlu1 %3173  ;;  %v6864_v28 = vpop.eup %6863  ;;  %6875 = vrsqrt.f32 %v3459_v8  ;;  %v3552_v52 = vmul.f32 %v8860_v46, %v3514_v37 }
 0x9a9   : > { %v3236_v9 = vmul.f32 0.03125, %v3174_v32  ;;  %v3308_v4 = vmul.f32 %v8845_v42, %v8845_v42  ;;  %v3510_v32 = vmul.f32 %v6856_v39, %v8637_v58  ;;  %v3587_v39 = vadd.f32 %v8870_v49, %v3549_v54 }
 0x9aa   : > { %v3553_v15 = vmul.f32 %v8860_v46, %v3515_v0  ;;  %v3513_v47 = vmul.f32 %v6864_v28, %v8649_v43 }
 0x9ab   : > { %v8851_v57 = vsub.f32 %v8730_v26, %v3236_v9  ;;  %v3388_v19 = vsel %vm969_vm0, %v3308_v4, 0.0  ;;  %v3548_v58 = vmul.f32 %v8860_v46, %v3510_v32  ;;  %v3512_v9 = vmul.f32 %v6862_v40, %v8670_v61  ;;  %v6866_v4 = vpop.eup %6865 }
 0x9ac   : > { %3389 = vadd.xlane.f32.xlu1 %v3388_v19  ;;  %v6868_v14 = vpop.eup %6867  ;;  %v3591_v19 = vadd.f32 %v8870_v49, %v3553_v15  ;;  %v3518_v56 = vmul.f32 %v6866_v4, %v8688_v63  ;;  %v3590_v61 = vadd.f32 %v8870_v49, %v3552_v52 }
 0x9ad   : > { %v3300_v48 = vmul.f32 %v8851_v57, %v8851_v57  ;;  %v3586_v17 = vadd.f32 %v8870_v49, %v3548_v58  ;;  %v3550_v22 = vmul.f32 %v8860_v46, %v3512_v9  ;;  %v3519_v7 = vmul.f32 %v6868_v14, %v8655_v25 }
 0x9ae   : > { %v3619_v0 = vpack.c.bf16 %v3591_v19, %v3590_v61  ;;  %v3556_v8 = vmul.f32 %v8860_v46, %v3518_v56 }
 0x9af   : > { %v3364_v10 = vsel %vm969_vm0, %v3300_v48, 0.0  ;;  %v3617_v31 = vpack.c.bf16 %v3587_v39, %v3586_v17  ;;  %v6870_v32 = vpop.eup %6869  ;;  %v3551_v48 = vmul.f32 %v8860_v46, %v3513_v47  ;;  %v3588_v40 = vadd.f32 %v8870_v49, %v3550_v22 }
 0x9b0   : > { %3365 = vadd.xlane.f32.xlu1 %v3364_v10  ;;  %v6872_v54 = vpop.eup %6871  ;;  %v3520_v63 = vmul.f32 %v6870_v32, %v8711_v35  ;;  %v3557_v15 = vmul.f32 %v8860_v46, %v3519_v7  ;;  %v3594_v52 = vadd.f32 %v8870_v49, %v3556_v8 }
 0x9b1   : > { %v6874_v58 = vpop.eup %6873  ;;  %v3589_v39 = vadd.f32 %v8870_v49, %v3551_v48  ;;  %v3521_v25 = vmul.f32 %v6872_v54, %v8666_v12 }
 0x9b2   : > { %v6876_v9 = vpop.eup %6875  ;;  %v3558_v47 = vmul.f32 %v8860_v46, %v3520_v63  ;;  %v3522_v35 = vmul.f32 %v6874_v58, %v8700_v1  ;;  %v3595_v14 = vadd.f32 %v8870_v49, %v3557_v15 }
 0x9b3   : > { %v3618_v17 = vpack.c.bf16 %v3589_v39, %v3588_v40  ;;  %v3523_v19 = vmul.f32 %v6876_v9, %v8661_v23 }
 0x9b4   : > { %v3621_v12 = vpack.c.bf16 %v3595_v14, %v3594_v52  ;;  %v3596_v22 = vadd.f32 %v8870_v49, %v3558_v47  ;;  %v3560_v56 = vmul.f32 %v8860_v46, %v3522_v35 }
 0x9b5   : > { %v3561_v1 = vmul.f32 %v8860_v46, %v3523_v19 }
 0x9b7   : > { %v3599_v7 = vadd.f32 %v8870_v49, %v3561_v1 }
 0x9b8   : > { %3633 = vrot.lane.b32.xlu0 %v3617_v31, %s7133_s25  ;;  %v3559_v31 = vmul.f32 %v8860_v46, %v3521_v25 }
 0x9ba   : > { %v3372_v50 = vpop.xlane.xlu1 %3371  ;;  %v3597_v32 = vadd.f32 %v8870_v49, %v3559_v31 }
 0x9bb   : > { %v3430_v43 = vmul.f32 0.03125, %v3372_v50  ;;  %v3598_v50 = vadd.f32 %v8870_v49, %v3560_v56 }
 0x9bc   : > { %v3375_v10 = vpop.xlane.xlu0 %3374  ;;  %3639 = vrot.lane.b32.xlu0 %v3619_v0, %s7135_s26  ;;  %v3622_v61 = vpack.c.bf16 %v3597_v32, %v3596_v22 }
 0x9bd   : > { %v3462_v37 = vadd.f32 1e-05, %v3430_v43  ;;  %v3431_v28 = vmul.f32 0.03125, %v3375_v10  ;;  %v3623_v43 = vpack.c.bf16 %v3599_v7, %v3598_v50 }
 0x9bf   : > { %6877 = vrsqrt.f32 %v3462_v37  ;;  %v3463_v4 = vadd.f32 1e-05, %v3431_v28 }
 0x9c1   : > { %6879 = vrsqrt.f32 %v3463_v4  ;;  %3636 = vrot.lane.b32.xlu1 %v3618_v17, %s7134_s3 }
 0x9c5   : > { %3642 = vrot.lane.b32.xlu1 %v3621_v12, %s7133_s25  ;;  %v3381_v40 = vpop.xlane.xlu0 %3380 }
 0x9c9   : > { %v6878_v48 = vpop.eup %6877  ;;  %3645 = vrot.lane.b32.xlu1 %v3622_v61, %s7134_s3 }
 0x9ca   : > { %v3526_v23 = vmul.f32 %v6878_v48, %v8737_v33  ;;  %v3433_v33 = vmul.f32 0.03125, %v3381_v40 }
 0x9cb   : > { %v6880_v54 = vpop.eup %6879 }
 0x9cc   : > { %v3527_v0 = vmul.f32 %v6880_v54, %v8740_v13  ;;  %v3564_v10 = vmul.f32 %v8860_v46, %v3526_v23  ;;  %v3399_v37 = vpop.xlane.xlu0 %3398  ;;  %v3465_v25 = vadd.f32 1e-05, %v3433_v33 }
 0x9cd   : > { %3648 = vrot.lane.b32.xlu1 %v3623_v43, %s7135_s26  ;;  %v3439_v15 = vmul.f32 0.03125, %v3399_v37 }
 0x9ce   : > { %v3565_v8 = vmul.f32 %v8860_v46, %v3527_v0  ;;  %v3602_v63 = vadd.f32 %v8870_v49, %v3564_v10  ;;  %6881 = vrsqrt.f32 %v3465_v25 }
 0x9cf   : > { %v3471_v4 = vadd.f32 1e-05, %v3439_v15 }
 0x9d0   : > { %v3603_v58 = vadd.f32 %v8870_v49, %v3565_v8 }
 0x9d1   : > { %6883 = vrsqrt.f32 %v3471_v4 }
 0x9d2   : > { %v3625_v28 = vpack.c.bf16 %v3603_v58, %v3602_v63 }
 0x9d4   : > { %3651 = vrot.lane.b32.xlu0 %v3625_v28, %s7133_s25  ;;  %v3411_v39 = vpop.xlane.xlu0 %3410 }
 0x9d5   : > { %v3443_v1 = vmul.f32 0.03125, %v3411_v39 }
 0x9d7   : > { %v3475_v43 = vadd.f32 1e-05, %v3443_v1 }
 0x9d8   : > { %v3405_v13 = vpop.xlane.xlu0 %3404  ;;  %v6882_v48 = vpop.eup %6881 }
 0x9d9   : > { %v3441_v12 = vmul.f32 0.03125, %v3405_v13  ;;  %v3529_v10 = vmul.f32 %v6882_v48, %v8749_v55 }
 0x9da   : > { %v3384_v9 = vpop.xlane.xlu1 %3383 }
 0x9db   : > { %v3434_v17 = vmul.f32 0.03125, %v3384_v9  ;;  %v3473_v61 = vadd.f32 1e-05, %v3441_v12  ;;  %v6884_v54 = vpop.eup %6883  ;;  %v3567_v39 = vmul.f32 %v8860_v46, %v3529_v10 }
 0x9dc   : > { %v3387_v52 = vpop.xlane.xlu0 %3386  ;;  %v3535_v25 = vmul.f32 %v6884_v54, %v8755_v44 }
 0x9dd   : > { %v3466_v47 = vadd.f32 1e-05, %v3434_v17  ;;  %v3435_v35 = vmul.f32 0.03125, %v3387_v52  ;;  %v3605_v17 = vadd.f32 %v8870_v49, %v3567_v39 }
 0x9de   : > { %v3378_v14 = vpop.xlane.xlu1 %3377 }
 0x9df   : > { %v3467_v31 = vadd.f32 1e-05, %v3435_v35  ;;  %v3432_v19 = vmul.f32 0.03125, %v3378_v14  ;;  %6885 = vrsqrt.f32 %v3466_v47  ;;  %v3573_v47 = vmul.f32 %v8860_v46, %v3535_v25 }
 0x9e1   : > { %6887 = vrsqrt.f32 %v3467_v31  ;;  %v3464_v22 = vadd.f32 1e-05, %v3432_v19  ;;  %v3611_v12 = vadd.f32 %v8870_v49, %v3573_v47 }
 0x9e2   : > { %v3396_v56 = vpop.xlane.xlu1 %3395 }
 0x9e3   : > { %6889 = vrsqrt.f32 %v3464_v22  ;;  %v3438_v32 = vmul.f32 0.03125, %v3396_v56 }
 0x9e5   : > { %v3470_v50 = vadd.f32 1e-05, %v3438_v32 }
 0x9e6   : > { %v3408_v7 = vpop.xlane.xlu1 %3407 }
 0x9e7   : > { %6891 = vrsqrt.f32 %v3470_v50  ;;  %v3442_v23 = vmul.f32 0.03125, %v3408_v7 }
 0x9e8   : > { %6893 = vrsqrt.f32 %v3473_v61 }
 0x9e9   : > { %v3474_v0 = vadd.f32 1e-05, %v3442_v23  ;;  %v6886_v40 = vpop.eup %6885 }
 0x9ea   : > { %v3402_v8 = vpop.xlane.xlu1 %3401  ;;  %v3530_v13 = vmul.f32 %v6886_v40, %v8773_v20 }
 0x9eb   : > { %v6888_v63 = vpop.eup %6887  ;;  %6895 = vrsqrt.f32 %v3474_v0  ;;  %v3440_v58 = vmul.f32 0.03125, %v3402_v8 }
 0x9ec   : > { %v3531_v37 = vmul.f32 %v6888_v63, %v8778_v38  ;;  %6897 = vrsqrt.f32 %v3475_v43 }
 0x9ed   : > { %v6890_v28 = vpop.eup %6889  ;;  %v3472_v33 = vadd.f32 1e-05, %v3440_v58  ;;  %v6181_v58 = vld [vmem:[%s10206_s6 + $0x10] sm:$0xff] }
 0x9ee   : > { %v3528_v15 = vmul.f32 %v6890_v28, %v8770_v36  ;;  %v3569_v9 = vmul.f32 %v8860_v46, %v3531_v37  ;;  %v3568_v36 = vmul.f32 %v8860_v46, %v3530_v13  ;;  %v6188_v37 = vld [vmem:[%s10208_s8 + $0x10] sm:$0xff]  ;;  %v3342_v28 = vpop.xlane.xlu1 %3341 }
 0x9ef   : > { %6899 = vrsqrt.f32 %v3472_v33  ;;  %v3345_v33 = vpop.xlane.xlu0 %3344  ;;  %v3420_v13 = vmul.f32 0.03125, %v3342_v28 }
 0x9f0   : > { %v3566_v55 = vmul.f32 %v8860_v46, %v3528_v15  ;;  %v3607_v14 = vadd.f32 %v8870_v49, %v3569_v9  ;;  %v3606_v22 = vadd.f32 %v8870_v49, %v3568_v36  ;;  %v3421_v9 = vmul.f32 0.03125, %v3345_v33 }
 0x9f1   : > { %v6892_v4 = vpop.eup %6891 }
 0x9f2   : > { %v3604_v38 = vadd.f32 %v8870_v49, %v3566_v55  ;;  %v3534_v52 = vmul.f32 %v6892_v4, %v8784_v16  ;;  %v6894_v35 = vpop.eup %6893  ;;  %v3627_v1 = vpack.c.bf16 %v3607_v14, %v3606_v22  ;;  %v3318_v39 = vpop.xlane.xlu1 %3317 }
 0x9f3   : > { %v3537_v16 = vmul.f32 %v6894_v35, %v8766_v2  ;;  %v6182_v2 = vld [vmem:[%s10206_s6 + $0x18] sm:$0xff]  ;;  %v3321_v15 = vpop.xlane.xlu0 %3320  ;;  %v3412_v25 = vmul.f32 0.03125, %v3318_v39 }
 0x9f4   : > { %v3626_v44 = vpack.c.bf16 %v3605_v17, %v3604_v38  ;;  %v3572_v20 = vmul.f32 %v8860_v46, %v3534_v52  ;;  %v3413_v55 = vmul.f32 0.03125, %v3321_v15  ;;  %v3452_v17 = vadd.f32 1e-05, %v3420_v13 }
 0x9f5   : > { %v6896_v31 = vpop.eup %6895  ;;  %v3575_v7 = vmul.f32 %v8860_v46, %v3537_v16  ;;  %v3444_v4 = vadd.f32 1e-05, %v3412_v25  ;;  %v3453_v52 = vadd.f32 1e-05, %v3421_v9 }
 0x9f6   : > { %3654 = vrot.lane.b32.xlu0 %v3626_v44, %s7134_s3  ;;  %v3610_v19 = vadd.f32 %v8870_v49, %v3572_v20  ;;  %v6898_v56 = vpop.eup %6897  ;;  %v3538_v61 = vmul.f32 %v6896_v31, %v8799_v60  ;;  %v3445_v38 = vadd.f32 1e-05, %v3413_v55 }
 0x9f7   : > { %v3539_v23 = vmul.f32 %v6898_v56, %v8761_v59  ;;  %v3613_v0 = vadd.f32 %v8870_v49, %v3575_v7  ;;  %6901 = vrsqrt.f32 %v3444_v4 }
 0x9f8   : > { %v3629_v32 = vpack.c.bf16 %v3611_v12, %v3610_v19  ;;  %v3576_v43 = vmul.f32 %v8860_v46, %v3538_v61  ;;  %6903 = vrsqrt.f32 %v3452_v17 }
 0x9f9   : > { %v6900_v50 = vpop.eup %6899  ;;  %v3577_v10 = vmul.f32 %v8860_v46, %v3539_v23  ;;  %6905 = vrsqrt.f32 %v3445_v38 }
 0x9fa   : > { %3660 = vrot.lane.b32.xlu1 %v3629_v32, %s7133_s25  ;;  %3657 = vrot.lane.b32.xlu0 %v3627_v1, %s7135_s26  ;;  %v3536_v48 = vmul.f32 %v6900_v50, %v8809_v41  ;;  %v6189_v41 = vld [vmem:[%s10208_s8 + $0x18] sm:$0xff]  ;;  %v3614_v40 = vadd.f32 %v8870_v49, %v3576_v43  ;;  %6907 = vrsqrt.f32 %v3453_v52 }
 0x9fb   : > { %v3615_v8 = vadd.f32 %v8870_v49, %v3577_v10 }
 0x9fc   : > { %v3574_v54 = vmul.f32 %v8860_v46, %v3536_v48 }
 0x9fd   : > { %v3631_v63 = vpack.c.bf16 %v3615_v8, %v3614_v40 }
 0x9fe   : > { %3713 = vperm.xlu0 %6603, %v6182_v2   ;;  %v3612_v60 = vadd.f32 %v8870_v49, %v3574_v54 }
 0xa00   : > { %v3630_v59 = vpack.c.bf16 %v3613_v0, %v3612_v60 }
 0xa01   : > { %v6902_v36 = vpop.eup %6901 }
 0xa02   : > { %3663 = vrot.lane.b32.xlu1 %v3630_v59, %s7134_s3  ;;  %3867 = vperm.xlu0 %6603, %v6189_v41   ;;  %v6904_v35 = vpop.eup %6903  ;;  %v3508_v31 = vmul.f32 %v6902_v36, %v8823_v11 }
 0xa03   : > { %v6906_v44 = vpop.eup %6905  ;;  %v3516_v12 = vmul.f32 %v6904_v35, %v8817_v3 }
 0xa04   : > { %v6908_v14 = vpop.eup %6907  ;;  %v3509_v22 = vmul.f32 %v6906_v44, %v8804_v5  ;;  %v3546_v56 = vmul.f32 %v8860_v46, %v3508_v31 }
 0xa05   : > { %v3517_v16 = vmul.f32 %v6908_v14, %v8792_v18  ;;  %v3554_v61 = vmul.f32 %v8860_v46, %v3516_v12 }
 0xa06   : > { %3666 = vrot.lane.b32.xlu1 %v3631_v63, %s7135_s26  ;;  %v3547_v50 = vmul.f32 %v8860_v46, %v3509_v22  ;;  %v3584_v7 = vadd.f32 %v8870_v49, %v3546_v56 }
 0xa07   : > { %v3555_v48 = vmul.f32 %v8860_v46, %v3517_v16  ;;  %v3592_v23 = vadd.f32 %v8870_v49, %v3554_v61 }
 0xa08   : > { %v3585_v3 = vadd.f32 %v8870_v49, %v3547_v50 }
 0xa09   : > { %v3593_v18 = vadd.f32 %v8870_v49, %v3555_v48 }
 0xa0a   : > { %3708 = vperm.xlu1 %6604, %v6181_v58   ;;  %v3616_v2 = vpack.c.bf16 %v3585_v3, %v3584_v7  ;;  %v6637_v58 = vld [vmem:[%s10205_s5 + $0x8] sm:$0xff]  }
 0xa0b   : > { %v3620_v43 = vpack.c.bf16 %v3593_v18, %v3592_v23 }
 0xa0e   : > { %3862 = vperm.xlu1 %6604, %v6188_v37  }
 0xa2b   : > { %v3393_v20 = vpop.xlane.xlu0 %3392 }
 0xa2c   : > { %v3437_v39 = vmul.f32 0.03125, %v3393_v20 }
 0xa2e   : > { %v3469_v55 = vadd.f32 1e-05, %v3437_v39 }
 0xa2f   : > { %v3369_v1 = vpop.xlane.xlu0 %3368 }
 0xa30   : > { %v3429_v33 = vmul.f32 0.03125, %v3369_v1 }
 0xa32   : > { %v3461_v13 = vadd.f32 1e-05, %v3429_v33 }
 0xa33   : > { %v3634_v5 = vpop.permute.xlu0 %3633 }
 0xa34   : > { %v3670_v60 = vsel %vm969_vm0, %v3616_v2, %v3634_v5 }
 0xa37   : > { %v3640_v40 = vpop.permute.xlu0 %3639 }
 0xa39   : > { %v3390_v47 = vpop.xlane.xlu1 %3389 }
 0xa3a   : > { %v3436_v28 = vmul.f32 0.03125, %v3390_v47 }
 0xa3c   : > { %v3468_v25 = vadd.f32 1e-05, %v3436_v28 }
 0xa3d   : > { %v3366_v19 = vpop.xlane.xlu1 %3365 }
 0xa3e   : > { %v3428_v37 = vmul.f32 0.03125, %v3366_v19 }
 0xa40   : > { %v3460_v15 = vadd.f32 1e-05, %v3428_v37 }
 0xa41   : > { %v3637_v32 = vpop.permute.xlu1 %3636 }
 0xa42   : > { %v3672_v0 = vsel %vm1518_vm1, %v3670_v60, %v3637_v32  ;;  %6909 = vrsqrt.f32 %v3460_v15 }
 0xa43   : > { %v3674_v63 = vsel %vm1521_vm2, %v3672_v0, %v3640_v40  ;;  %6911 = vrsqrt.f32 %v3468_v25 }
 0xa44   : > { %6913 = vrsqrt.f32 %v3461_v13 }
 0xa45   : > { %v3643_v11 = vpop.permute.xlu1 %3642  ;;  %6915 = vrsqrt.f32 %v3469_v55 }
 0xa46   : > { %v3678_v10 = vsel %vm969_vm0, %v3620_v43, %v3643_v11  ;;  %v3652_v20 = vpop.permute.xlu0 %3651 }
 0xa49   : > { %v3646_v54 = vpop.permute.xlu1 %3645 }
 0xa4a   : > { %v3680_v41 = vsel %vm1518_vm1, %v3678_v10, %v3646_v54 }
 0xa4c   : > { %v6910_v9 = vpop.eup %6909 }
 0xa4d   : > { %v3649_v59 = vpop.permute.xlu1 %3648  ;;  %v6912_v4 = vpop.eup %6911  ;;  %v3524_v52 = vmul.f32 %v6910_v9, %v8851_v57 }
 0xa4e   : > { %v3682_v8 = vsel %vm1521_vm2, %v3680_v41, %v3649_v59  ;;  %v6914_v17 = vpop.eup %6913  ;;  %v3532_v47 = vmul.f32 %v6912_v4, %v8845_v42 }
 0xa4f   : > { %3724 = vmatprep.subr.bf16.mxu1 %v3682_v8  ;;  %v6916_v38 = vpop.eup %6915  ;;  %v3525_v36 = vmul.f32 %v6914_v17, %v8838_v34  ;;  %v3562_v44 = vmul.f32 %v8860_v46, %v3524_v52 }
 0xa50   : > { %3725 = vmatpush1.bf16.msra.mxu1 %v3674_v63  ;;  %v3533_v35 = vmul.f32 %v6916_v38, %v8833_v62  ;;  %v3570_v14 = vmul.f32 %v8860_v46, %v3532_v47 }
 0xa51   : > { %v3563_v31 = vmul.f32 %v8860_v46, %v3525_v36  ;;  %v3600_v12 = vadd.f32 %v8870_v49, %v3562_v44  ;;  %v6638_v44 = vld [vmem:[%s10207_s7 + $0x8] sm:$0xff]  }
 0xa52   : > { %v3571_v19 = vmul.f32 %v8860_v46, %v3533_v35  ;;  %v3608_v57 = vadd.f32 %v8870_v49, %v3570_v14 }
 0xa53   : > { %6184 = vmatmul.mubr.msk.bf16.vlgmr.msra.gmra.mrb[52].mxu1 %vm1568_vm3, %v6637_v58  ;;  %v3601_v42 = vadd.f32 %v8870_v49, %v3563_v31 }
 0xa54   : > { %3799 = vmatprep.mubr.bf16.mxu1 %v10392_v29  ;;  %v3609_v34 = vadd.f32 %v8870_v49, %v3571_v19 }
 0xa55   : > { %v3624_v62 = vpack.c.bf16 %v3601_v42, %v3600_v12 }
 0xa56   : > { %v3628_v32 = vpack.c.bf16 %v3609_v34, %v3608_v57 }
 0xa57   : > { %v3686_v50 = vsel %vm969_vm0, %v3624_v62, %v3652_v20 }
 0xa68   : > { %v3655_v16 = vpop.permute.xlu0 %3654 }
 0xa69   : > { %v3688_v7 = vsel %vm1518_vm1, %v3686_v50, %v3655_v16 }
 0xa6c   : > { %v3661_v22 = vpop.permute.xlu1 %3660  ;;  %v3658_v61 = vpop.permute.xlu0 %3657 }
 0xa6d   : > { %v3694_v1 = vsel %vm969_vm0, %v3628_v32, %v3661_v22  ;;  %v3690_v23 = vsel %vm1521_vm2, %v3688_v7, %v3658_v61 }
 0xa74   : > { %v3664_v56 = vpop.permute.xlu1 %3663 }
 0xa75   : > { %v3696_v46 = vsel %vm1518_vm1, %v3694_v1, %v3664_v56 }
 0xa78   : > { %v3667_v48 = vpop.permute.xlu1 %3666 }
 0xa79   : > { %v3698_v11 = vsel %vm1521_vm2, %v3696_v46, %v3667_v48 }
 0xa7a   : > { %3767 = vmatprep.subr.bf16.mxu1 %v3698_v11 }
 0xa7b   : > { %3768 = vmatpush1.bf16.msra.mxu1 %v3690_v23 }
 0xa7d   : > { %v3714_v2 = vpop.permute.xlu0 %3713 }
 0xa7e   : > { %6185 = vmatmul.mubr.msk.bf16.vlgmr.msra.gmra.mrb[56].mxu1 %vm1568_vm3, %v6637_v58 }
 0xa7f   : > { %3910 = vmatprep.mubr.bf16.mxu1 %v10392_v29 }
 0xa89   : > { %v3709_v49 = vpop.permute.xlu1 %3708 }
 0xb26   : > { %v3758_v3 = vpop.f32.mrb[52].mxu1 }
 0xb27   : > { %v3759_v5 = vadd.f32 %v3758_v3, %v3709_v49  ;;  %v3760_v18 = vpop.f32.mrb[53].mxu1 }
 0xb28   : > { %v3761_v54 = vadd.f32 %v3760_v18, %v3709_v49  ;;  %v3762_v43 = vpop.f32.mrb[54].mxu1 }
 0xb29   : > { %v3818_v60 = vmul.f32 0.70710677, %v3759_v5  ;;  %v3763_v0 = vadd.f32 %v3762_v43, %v3714_v2  ;;  %v3764_v10 = vpop.f32.mrb[55].mxu1  ;;  %v3810_v15 = vmul.f32 0.5, %v3759_v5 }
 0xb2a   : > { %v3819_v41 = vmul.f32 0.70710677, %v3761_v54  ;;  %v3765_v59 = vadd.f32 %v3764_v10, %v3714_v2  ;;  %v3811_v55 = vmul.f32 0.5, %v3761_v54 }
 0xb2b   : > { %6917 = verf.f32 %v3818_v60  ;;  %v3822_v40 = vmul.f32 0.70710677, %v3763_v0  ;;  %v3814_v25 = vmul.f32 0.5, %v3763_v0  ;;  %v3863_v0 = vpop.permute.xlu1 %3862 }
 0xb2c   : > { %6919 = verf.f32 %v3819_v41  ;;  %v3823_v8 = vmul.f32 0.70710677, %v3765_v59  ;;  %v3815_v9 = vmul.f32 0.5, %v3765_v59 }
 0xb2d   : > { %6921 = verf.f32 %v3822_v40  ;;  %v3868_v40 = vpop.permute.xlu0 %3867 }
 0xb2e   : > { %6923 = verf.f32 %v3823_v8 }
 0xb35   : > { %v6918_v63 = vpop.eup %6917 }
 0xb36   : > { %v6920_v58 = vpop.eup %6919  ;;  %v3834_v37 = vadd.f32 1.0, %v6918_v63 }
 0xb37   : > { %v6922_v28 = vpop.eup %6921  ;;  %v3835_v33 = vadd.f32 1.0, %v6920_v58 }
 0xb38   : > { %v6924_v39 = vpop.eup %6923  ;;  %v3838_v13 = vadd.f32 1.0, %v6922_v28  ;;  %v3842_v17 = vmul.f32 %v3834_v37, %v3810_v15 }
 0xb39   : > { %v3839_v4 = vadd.f32 1.0, %v6924_v39  ;;  %v3843_v52 = vmul.f32 %v3835_v33, %v3811_v55 }
 0xb3a   : > { %v3846_v38 = vmul.f32 %v3838_v13, %v3814_v25 }
 0xb3b   : > { %v3847_v47 = vmul.f32 %v3839_v4, %v3815_v9 }
 0xb3c   : > { %v3850_v36 = vpack.c.bf16 %v3846_v38, %v3842_v17 }
 0xb3d   : > { %v3851_v35 = vpack.c.bf16 %v3847_v47, %v3843_v52 }
 0xb3f   : > { %3878 = vmatprep.subr.bf16.mxu1 %v3851_v35 }
 0xb40   : > { %3879 = vmatpush1.bf16.msra.mxu1 %v3850_v36 }
 0xb43   : > { %6191 = vmatmul.mubr.msk.bf16.vlgmr.msra.gmra.mrb[60].mxu1 %vm1568_vm3, %v6638_v44 }
 0xb44   : > { %3953 = vmatprep.mubr.bf16.mxu1 %v10392_v29 }
 0xb51   : > { %v3801_v20 = vpop.f32.mrb[56].mxu1 }
 0xb52   : > { %v3802_v14 = vadd.f32 %v3801_v20, %v3709_v49  ;;  %v3803_v31 = vpop.f32.mrb[57].mxu1 }
 0xb53   : > { %v3804_v19 = vadd.f32 %v3803_v31, %v3709_v49  ;;  %v3805_v12 = vpop.f32.mrb[58].mxu1 }
 0xb54   : > { %v3820_v22 = vmul.f32 0.70710677, %v3802_v14  ;;  %v3806_v16 = vadd.f32 %v3805_v12, %v3714_v2  ;;  %v3807_v57 = vpop.f32.mrb[59].mxu1  ;;  %v3812_v48 = vmul.f32 0.5, %v3802_v14 }
 0xb55   : > { %v3821_v42 = vmul.f32 0.70710677, %v3804_v19  ;;  %v3808_v34 = vadd.f32 %v3807_v57, %v3714_v2  ;;  %v3813_v23 = vmul.f32 0.5, %v3804_v19 }
 0xb56   : > { %6925 = verf.f32 %v3820_v22  ;;  %v3824_v62 = vmul.f32 0.70710677, %v3806_v16  ;;  %v3816_v7 = vmul.f32 0.5, %v3806_v16 }
 0xb57   : > { %6927 = verf.f32 %v3821_v42  ;;  %v3825_v56 = vmul.f32 0.70710677, %v3808_v34  ;;  %v3817_v49 = vmul.f32 0.5, %v3808_v34  ;;  %v10439_v42 = vld [vmem:[#allocation14_spill] sm:$0xff] }
 0xb58   : > { %6929 = verf.f32 %v3824_v62 }
 0xb59   : > { %6931 = verf.f32 %v3825_v56 }
 0xb60   : > { %v6926_v32 = vpop.eup %6925 }
 0xb61   : > { %v6928_v1 = vpop.eup %6927  ;;  %v3836_v61 = vadd.f32 1.0, %v6926_v32 }
 0xb62   : > { %v6930_v29 = vpop.eup %6929  ;;  %v3837_v50 = vadd.f32 1.0, %v6928_v1  ;;  %v10441_v1 = vld [vmem:[#allocation23_spill] sm:$0xff] }
 0xb63   : > { %v6932_v46 = vpop.eup %6931  ;;  %v3840_v11 = vadd.f32 1.0, %v6930_v29  ;;  %v3844_v5 = vmul.f32 %v3836_v61, %v3812_v48 }
 0xb64   : > { %v3841_v3 = vadd.f32 1.0, %v6932_v46  ;;  %v3845_v2 = vmul.f32 %v3837_v50, %v3813_v23  ;;  %v10442_v46 = vld [vmem:[#allocation2_spill] sm:$0xff] }
 0xb65   : > { %v3848_v18 = vmul.f32 %v3840_v11, %v3816_v7  ;;  %v10443_v7 = vld [vmem:[#allocation28_spill] sm:$0xff] }
 0xb66   : > { %v3849_v54 = vmul.f32 %v3841_v3, %v3817_v49  ;;  %v10445_v3 = vld [vmem:[#allocation24_spill] sm:$0xff] }
 0xb67   : > { %v3852_v43 = vpack.c.bf16 %v3848_v18, %v3844_v5 }
 0xb68   : > { %v3853_v60 = vpack.c.bf16 %v3849_v54, %v3845_v2  ;;  %v10446_v54 = vld [vmem:[#allocation22_spill] sm:$0xff] }
 0xb6a   : > { %3921 = vmatprep.subr.bf16.mxu1 %v3853_v60 }
 0xb6b   : > { %3922 = vmatpush1.bf16.msra.mxu1 %v3852_v43 }
 0xb6e   : > { %6192 = vmatmul.mubr.msk.bf16.vlgmr.msra.gmra.mrb[64].mxu1 %vm1568_vm3, %v6638_v44 }
 0xc16   : > { %v3912_v10 = vpop.f32.mrb[60].mxu1 }
 0xc17   : > { %v3913_v41 = vadd.f32 %v3912_v10, %v3863_v0  ;;  %v3914_v59 = vpop.f32.mrb[61].mxu1 }
 0xc18   : > { %v3916_v8 = vpop.f32.mrb[62].mxu1  ;;  %v3915_v37 = vadd.f32 %v3914_v59, %v3863_v0 }
 0xc19   : > { %v3917_v63 = vadd.f32 %v3916_v8, %v3868_v40  ;;  %v3918_v58 = vpop.f32.mrb[63].mxu1  ;;  %3966 = vrot.lane.b32.xlu1 %v3913_v41, %s7135_s26  ;;  %v9032_v55 = vadd.f32 %v3913_v41, %v8623_v21 }
 0xc1a   : > { %v9017_v28 = vadd.f32 %v3918_v58, %v3868_v40  ;;  %v9094_v34 = vadd.f32 %v3915_v37, %v10439_v42 }
 0xc1b   : > { %3968 = vrot.lane.b32.xlu0 %v3917_v63, %s7135_s26  ;;  %v9029_v13 = vadd.f32 %v3917_v63, %v8628_v45  ;;  %v4080_v4 = vsel %vm969_vm0, %v9032_v55, 0.0 }
 0xc1c   : > { %v4104_v29 = vsel %vm969_vm0, %v9094_v34, 0.0  ;;  %v9110_v48 = vadd.f32 %v9017_v28, %v10442_v46 }
 0xc1d   : > { %3972 = vrot.lane.b32.xlu1 %v3913_v41, %s7134_s3  ;;  %v4083_v9 = vsel %vm969_vm0, %v9029_v13, 0.0 }
 0xc1e   : > { %v4107_v2 = vsel %vm969_vm0, %v9110_v48, 0.0 }
 0xc1f   : > { %3974 = vrot.lane.b32.xlu0 %v3917_v63, %s7134_s3 }
 0xc21   : > { %3978 = vrot.lane.b32.xlu1 %v3913_v41, %s7133_s25 }
 0xc23   : > { %3980 = vrot.lane.b32.xlu0 %v3917_v63, %s7133_s25  ;;  %v10450_v63 = vld [vmem:[#allocation29_spill] sm:$0xff] }
 0xc25   : > { %3986 = vrot.lane.b32.xlu1 %v3915_v37, %s7135_s26 }
 0xc27   : > { %3988 = vrot.lane.b32.xlu0 %v9017_v28, %s7135_s26 }
 0xc29   : > { %3992 = vrot.lane.b32.xlu1 %v3915_v37, %s7134_s3 }
 0xc2b   : > { %3994 = vrot.lane.b32.xlu0 %v9017_v28, %s7134_s3 }
 0xc2d   : > { %3998 = vrot.lane.b32.xlu1 %v3915_v37, %s7133_s25 }
 0xc2f   : > { %4000 = vrot.lane.b32.xlu0 %v9017_v28, %s7133_s25 }
 0xc41   : > { %v3955_v33 = vpop.f32.mrb[64].mxu1 }
 0xc42   : > { %v3957_v39 = vpop.f32.mrb[65].mxu1  ;;  %v9038_v17 = vadd.f32 %v3955_v33, %v3863_v0 }
 0xc43   : > { %v3959_v15 = vpop.f32.mrb[66].mxu1  ;;  %v9052_v21 = vadd.f32 %v3957_v39, %v3863_v0  ;;  %v10447_v0 = vld [vmem:[#allocation3_spill] sm:$0xff] }
 0xc44   : > { %v3961_v25 = vpop.f32.mrb[67].mxu1  ;;  %v9040_v38 = vadd.f32 %v3959_v15, %v3868_v40  ;;  %v9136_v8 = vadd.f32 %v9038_v17, %v8730_v26  ;;  %v10452_v39 = vld [vmem:[#allocation27_spill] sm:$0xff] }
 0xc45   : > { %v9056_v45 = vadd.f32 %v3961_v25, %v3868_v40 }
 0xc46   : > { %10449 = vst [vmem:[#allocation8_spill] sm:$0xff] %v9136_v8  ;;  %v4128_v28 = vsel %vm969_vm0, %v9136_v8, 0.0  ;;  %v9149_v15 = vadd.f32 %v9040_v38, %v10452_v39 }
 0xc48   : > { %10453 = vst [vmem:[#allocation6_spill] sm:$0xff] %v9149_v15  ;;  %v4131_v26 = vsel %vm969_vm0, %v9149_v15, 0.0 }
 0xc4e   : > { %4084 = vadd.xlane.f32.xlu0 %v4083_v9 }
 0xc51   : > { %4081 = vadd.xlane.f32.xlu1 %v4080_v4 }
 0xc62   : > { %4006 = vrot.lane.b32.xlu1 %v9038_v17, %s7135_s26 }
 0xc64   : > { %4008 = vrot.lane.b32.xlu0 %v9040_v38, %s7135_s26 }
 0xc66   : > { %4012 = vrot.lane.b32.xlu1 %v9038_v17, %s7134_s3 }
 0xc68   : > { %4014 = vrot.lane.b32.xlu0 %v9040_v38, %s7134_s3 }
 0xc6a   : > { %4018 = vrot.lane.b32.xlu1 %v9038_v17, %s7133_s25  ;;  %v10454_v17 = vld [vmem:[#allocation7_spill] sm:$0xff] }
 0xc6c   : > { %4020 = vrot.lane.b32.xlu0 %v9040_v38, %s7133_s25 }
 0xc6e   : > { %4026 = vrot.lane.b32.xlu1 %v9052_v21, %s7135_s26 }
 0xc70   : > { %4028 = vrot.lane.b32.xlu0 %v9056_v45, %s7135_s26 }
 0xc72   : > { %4032 = vrot.lane.b32.xlu1 %v9052_v21, %s7134_s3 }
 0xc74   : > { %4034 = vrot.lane.b32.xlu0 %v9056_v45, %s7134_s3 }
 0xc76   : > { %4038 = vrot.lane.b32.xlu1 %v9052_v21, %s7133_s25 }
 0xc78   : > { %4040 = vrot.lane.b32.xlu0 %v9056_v45, %s7133_s25  ;;  %s6099_s25 = sshll.u32 %s10503_s24, 3 }
 0xc79   : > { %s604_s20 = scalar_lea.vmem %s10219_s19, %s6099_s25 }
 0xc8b   : > { %v3967_v52 = vpop.permute.xlu1 %3966 }
 0xc8c   : > { %v9071_v35 = vadd.f32 %v3967_v52, %v8452_v30 }
 0xc8d   : > { %v3969_v47 = vpop.permute.xlu0 %3968 }
 0xc8e   : > { %v9077_v31 = vadd.f32 %v3969_v47, %v8458_v24  ;;  %v4086_v19 = vsel %vm969_vm0, %v9071_v35, 0.0 }
 0xc8f   : > { %v3973_v36 = vpop.permute.xlu1 %3972 }
 0xc90   : > { %v9074_v14 = vadd.f32 %v3973_v36, %v8466_v6  ;;  %v4089_v24 = vsel %vm969_vm0, %v9077_v31, 0.0 }
 0xc91   : > { %v3975_v44 = vpop.permute.xlu0 %3974 }
 0xc92   : > { %v4092_v30 = vsel %vm969_vm0, %v9074_v14, 0.0  ;;  %v9087_v16 = vadd.f32 %v3975_v44, %v8470_v27  ;;  %v10456_v44 = vld [vmem:[#allocation4_spill] sm:$0xff] }
 0xc93   : > { %v3979_v20 = vpop.permute.xlu1 %3978 }
 0xc94   : > { %v9082_v12 = vadd.f32 %v3979_v20, %v8515_v53  ;;  %v10440_v53 = vld [vmem:[#allocation11_spill] sm:$0xff]  ;;  %v4095_v27 = vsel %vm969_vm0, %v9087_v16, 0.0 }
 0xc95   : > { %v3981_v22 = vpop.permute.xlu0 %3980 }
 0xc96   : > { %v4098_v6 = vsel %vm969_vm0, %v9082_v12, 0.0  ;;  %v9097_v62 = vadd.f32 %v3981_v22, %v10440_v53 }
 0xc97   : > { %4087 = vadd.xlane.f32.xlu0 %v4086_v19  ;;  %v3987_v57 = vpop.permute.xlu1 %3986  ;;  %v10458_v19 = vld [vmem:[#allocation9_spill] sm:$0xff] }
 0xc98   : > { %v9102_v61 = vadd.f32 %v3987_v57, %v10441_v1  ;;  %v4101_v50 = vsel %vm969_vm0, %v9097_v62, 0.0 }
 0xc99   : > { %v3989_v56 = vpop.permute.xlu0 %3988 }
 0xc9a   : > { %4093 = vadd.xlane.f32.xlu1 %v4092_v30  ;;  %v4110_v49 = vsel %vm969_vm0, %v9102_v61, 0.0  ;;  %v9118_v5 = vadd.f32 %v3989_v56, %v10445_v3 }
 0xc9b   : > { %4090 = vadd.xlane.f32.xlu0 %v4089_v24  ;;  %v3993_v32 = vpop.permute.xlu1 %3992 }
 0xc9c   : > { %v9113_v11 = vadd.f32 %v3993_v32, %v10443_v7  ;;  %v4113_v41 = vsel %vm969_vm0, %v9118_v5, 0.0  ;;  %v10466_v7 = vld [vmem:[#allocation20_spill] sm:$0xff] }
 0xc9d   : > { %v3995_v23 = vpop.permute.xlu0 %3994 }
 0xc9e   : > { %4099 = vadd.xlane.f32.xlu1 %v4098_v6  ;;  %10444 = vst [vmem:[#allocation26_spill] sm:$0xff] %v9113_v11  ;;  %v4116_v60 = vsel %vm969_vm0, %v9113_v11, 0.0  ;;  %v9128_v10 = vadd.f32 %v3995_v23, %v10447_v0  ;;  %v10460_v6 = vld [vmem:[#allocation5_spill] sm:$0xff] }
 0xc9f   : > { %4096 = vadd.xlane.f32.xlu0 %v4095_v27  ;;  %v3999_v18 = vpop.permute.xlu1 %3998  ;;  %v10462_v27 = vld [vmem:[#allocation18_spill] sm:$0xff] }
 0xca0   : > { %v9123_v43 = vadd.f32 %v3999_v18, %v10446_v54  ;;  %10448 = vst [vmem:[#allocation13_spill] sm:$0xff] %v9128_v10  ;;  %v4119_v37 = vsel %vm969_vm0, %v9128_v10, 0.0  ;;  %v9189_v18 = vadd.f32 %v9052_v21, %v8726_v51 }
 0xca1   : > { %v4001_v59 = vpop.permute.xlu0 %4000 }
 0xca2   : > { %4105 = vadd.xlane.f32.xlu1 %v4104_v29  ;;  %v4122_v40 = vsel %vm969_vm0, %v9123_v43, 0.0  ;;  %v9139_v58 = vadd.f32 %v4001_v59, %v10450_v63  ;;  %10468 = vst [vmem:[#allocation3_spill] sm:$0xff] %v9189_v18 }
 0xca3   : > { %4102 = vadd.xlane.f32.xlu0 %v4101_v50  ;;  %v10464_v50 = vld [vmem:[#allocation12_spill] sm:$0xff] }
 0xca4   : > { %10451 = vst [vmem:[#allocation16_spill] sm:$0xff] %v9139_v58  ;;  %v4125_v33 = vsel %vm969_vm0, %v9139_v58, 0.0  ;;  %v9180_v46 = vadd.f32 %v9056_v45, %v10464_v50 }
 0xca6   : > { %4111 = vadd.xlane.f32.xlu1 %v4110_v49  ;;  %10465 = vst [vmem:[#allocation24_spill] sm:$0xff] %v9180_v46  ;;  %v4155_v45 = vsel %vm969_vm0, %v9180_v46, 0.0 }
 0xca7   : > { %4108 = vadd.xlane.f32.xlu0 %v4107_v2  ;;  %v10469_v2 = vld [vmem:[#allocation15_spill] sm:$0xff] }
 0xcaa   : > { %4117 = vadd.xlane.f32.xlu1 %v4116_v60 }
 0xcab   : > { %4114 = vadd.xlane.f32.xlu0 %v4113_v41  ;;  %v10471_v41 = vld [vmem:[#allocation10_spill] sm:$0xff] }
 0xcae   : > { %4123 = vadd.xlane.f32.xlu1 %v4122_v40  ;;  %v4152_v40 = vsel %vm969_vm0, %v9189_v18, 0.0 }
 0xcaf   : > { %4120 = vadd.xlane.f32.xlu0 %v4119_v37  ;;  %v10473_v37 = vld [vmem:[#allocation19_spill] sm:$0xff] }
 0xcb2   : > { %4129 = vadd.xlane.f32.xlu1 %v4128_v28 }
 0xcb3   : > { %4126 = vadd.xlane.f32.xlu0 %v4125_v33 }
 0xcb7   : > { %4132 = vadd.xlane.f32.xlu0 %v4131_v26  ;;  %v10475_v26 = vld [vmem:[#allocation25_spill] sm:$0xff] }
 0xcdb   : > { %v4085_v25 = vpop.xlane.xlu0 %4084 }
 0xcdc   : > { %v4177_v63 = vmul.f32 0.03125, %v4085_v25  ;;  %v10477_v25 = vld [vmem:[#allocation21_spill] sm:$0xff] }
 0xcde   : > { %v4082_v9 = vpop.xlane.xlu1 %4081 }
 0xcdf   : > { %v4009_v4 = vpop.permute.xlu0 %4008  ;;  %v4176_v39 = vmul.f32 0.03125, %v4082_v9 }
 0xce0   : > { %v9154_v52 = vadd.f32 %v4009_v4, %v10454_v17 }
 0xce1   : > { %v9220_v9 = vsub.f32 %v9032_v55, %v4176_v39 }
 0xce2   : > { %10455 = vst [vmem:[#allocation14_spill] sm:$0xff] %v9154_v52  ;;  %v4007_v47 = vpop.permute.xlu1 %4006  ;;  %v4137_v36 = vsel %vm969_vm0, %v9154_v52, 0.0 }
 0xce3   : > { %v9159_v20 = vadd.f32 %v4007_v47, %v10456_v44  ;;  %4138 = vadd.xlane.f32.xlu0 %v4137_v36  ;;  %v4015_v38 = vpop.permute.xlu0 %4014  ;;  %v9212_v47 = vsub.f32 %v9029_v13, %v4177_v63 }
 0xce4   : > { %v9162_v22 = vadd.f32 %v4015_v38, %v10458_v19  ;;  %v10479_v19 = vld [vmem:[#allocation17_spill] sm:$0xff] }
 0xce5   : > { %10457 = vst [vmem:[#allocation11_spill] sm:$0xff] %v9159_v20  ;;  %v4134_v30 = vsel %vm969_vm0, %v9159_v20, 0.0 }
 0xce6   : > { %10459 = vst [vmem:[#allocation23_spill] sm:$0xff] %v9162_v22  ;;  %4135 = vadd.xlane.f32.xlu1 %v4134_v30  ;;  %v4013_v57 = vpop.permute.xlu1 %4012  ;;  %v4143_v24 = vsel %vm969_vm0, %v9162_v22, 0.0 }
 0xce7   : > { %v9169_v42 = vadd.f32 %v4013_v57, %v10460_v6  ;;  %4144 = vadd.xlane.f32.xlu0 %v4143_v24  ;;  %v4021_v53 = vpop.permute.xlu0 %4020  ;;  %v4241_v6 = vmul.f32 %v9212_v47, %v9212_v47 }
 0xce8   : > { %v9172_v56 = vadd.f32 %v4021_v53, %v10462_v27  ;;  %v4240_v27 = vmul.f32 %v9220_v9, %v9220_v9 }
 0xce9   : > { %10461 = vst [vmem:[#allocation2_spill] sm:$0xff] %v9169_v42  ;;  %v4140_v32 = vsel %vm969_vm0, %v9169_v42, 0.0 }
 0xcea   : > { %10463 = vst [vmem:[#allocation28_spill] sm:$0xff] %v9172_v56  ;;  %4141 = vadd.xlane.f32.xlu1 %v4140_v32  ;;  %v4019_v1 = vpop.permute.xlu1 %4018  ;;  %v4149_v29 = vsel %vm969_vm0, %v9172_v56, 0.0  ;;  %v4275_v32 = vsel %vm969_vm0, %v4241_v6, 0.0 }
 0xceb   : > { %v9183_v23 = vadd.f32 %v4019_v1, %v10466_v7  ;;  %4150 = vadd.xlane.f32.xlu0 %v4149_v29  ;;  %v4029_v49 = vpop.permute.xlu0 %4028  ;;  %v4272_v1 = vsel %vm969_vm0, %v4240_v27, 0.0 }
 0xcec   : > { %v9192_v54 = vadd.f32 %v4029_v49, %v10469_v2 }
 0xced   : > { %10467 = vst [vmem:[#allocation22_spill] sm:$0xff] %v9183_v23  ;;  %v4146_v3 = vsel %vm969_vm0, %v9183_v23, 0.0 }
 0xcee   : > { %10470 = vst [vmem:[#allocation29_spill] sm:$0xff] %v9192_v54  ;;  %4147 = vadd.xlane.f32.xlu1 %v4146_v3  ;;  %v4027_v60 = vpop.permute.xlu1 %4026  ;;  %v4161_v28 = vsel %vm969_vm0, %v9192_v54, 0.0 }
 0xcef   : > { %4156 = vadd.xlane.f32.xlu0 %v4155_v45  ;;  %v4035_v0 = vpop.permute.xlu0 %4034  ;;  %v9197_v59 = vadd.f32 %v4027_v60, %v10471_v41 }
 0xcf0   : > { %v9202_v51 = vadd.f32 %v4035_v0, %v10473_v37 }
 0xcf1   : > { %10472 = vst [vmem:[#allocation27_spill] sm:$0xff] %v9197_v59  ;;  %v4158_v17 = vsel %vm969_vm0, %v9197_v59, 0.0 }
 0xcf2   : > { %10474 = vst [vmem:[#allocation7_spill] sm:$0xff] %v9202_v51  ;;  %4153 = vadd.xlane.f32.xlu1 %v4152_v40  ;;  %v4033_v21 = vpop.permute.xlu1 %4032  ;;  %v4167_v38 = vsel %vm969_vm0, %v9202_v51, 0.0 }
 0xcf3   : > { %4162 = vadd.xlane.f32.xlu0 %v4161_v28  ;;  %v4041_v33 = vpop.permute.xlu0 %4040  ;;  %v9207_v4 = vadd.f32 %v4033_v21, %v10475_v26 }
 0xcf4   : > { %v9215_v36 = vadd.f32 %v4041_v33, %v10477_v25 }
 0xcf5   : > { %10476 = vst [vmem:[#allocation4_spill] sm:$0xff] %v9207_v4  ;;  %v4164_v57 = vsel %vm969_vm0, %v9207_v4, 0.0 }
 0xcf6   : > { %10478 = vst [vmem:[#allocation9_spill] sm:$0xff] %v9215_v36  ;;  %4159 = vadd.xlane.f32.xlu1 %v4158_v17  ;;  %v4039_v44 = vpop.permute.xlu1 %4038  ;;  %v4173_v24 = vsel %vm969_vm0, %v9215_v36, 0.0 }
 0xcf7   : > { %4168 = vadd.xlane.f32.xlu0 %v4167_v38  ;;  %v9223_v30 = vadd.f32 %v4039_v44, %v10479_v19 }
 0xcf9   : > { %10480 = vst [vmem:[#allocation5_spill] sm:$0xff] %v9223_v30  ;;  %v4170_v53 = vsel %vm969_vm0, %v9223_v30, 0.0 }
 0xcfa   : > { %4165 = vadd.xlane.f32.xlu1 %v4164_v57 }
 0xcfb   : > { %4174 = vadd.xlane.f32.xlu0 %v4173_v24 }
 0xcfe   : > { %4171 = vadd.xlane.f32.xlu1 %v4170_v53 }
 0xcff   : > { %4276 = vadd.xlane.f32.xlu0 %v4275_v32 }
 0xd02   : > { %4273 = vadd.xlane.f32.xlu1 %v4272_v1 }
 0xd24   : > { %v4088_v29 = vpop.xlane.xlu0 %4087 }
 0xd25   : > { %v4178_v50 = vmul.f32 0.03125, %v4088_v29 }
 0xd27   : > { %v9238_v7 = vsub.f32 %v9071_v35, %v4178_v50  ;;  %v4094_v49 = vpop.xlane.xlu1 %4093 }
 0xd28   : > { %v4180_v3 = vmul.f32 0.03125, %v4094_v49  ;;  %v4091_v2 = vpop.xlane.xlu0 %4090 }
 0xd29   : > { %v4179_v60 = vmul.f32 0.03125, %v4091_v2  ;;  %v4242_v45 = vmul.f32 %v9238_v7, %v9238_v7 }
 0xd2a   : > { %v9243_v0 = vsub.f32 %v9074_v14, %v4180_v3 }
 0xd2b   : > { %v9246_v41 = vsub.f32 %v9077_v31, %v4179_v60  ;;  %v4100_v40 = vpop.xlane.xlu1 %4099  ;;  %v4278_v63 = vsel %vm969_vm0, %v4242_v45, 0.0 }
 0xd2c   : > { %v4182_v37 = vmul.f32 0.03125, %v4100_v40  ;;  %4279 = vadd.xlane.f32.xlu1 %v4278_v63  ;;  %v4097_v21 = vpop.xlane.xlu0 %4096  ;;  %v4244_v28 = vmul.f32 %v9243_v0, %v9243_v0 }
 0xd2d   : > { %v4181_v33 = vmul.f32 0.03125, %v4097_v21  ;;  %v4243_v39 = vmul.f32 %v9246_v41, %v9246_v41 }
 0xd2e   : > { %v9254_v26 = vsub.f32 %v9082_v12, %v4182_v37  ;;  %v4284_v17 = vsel %vm969_vm0, %v4244_v28, 0.0 }
 0xd2f   : > { %v9258_v25 = vsub.f32 %v9087_v16, %v4181_v33  ;;  %v4106_v44 = vpop.xlane.xlu1 %4105  ;;  %v4281_v38 = vsel %vm969_vm0, %v4243_v39, 0.0 }
 0xd30   : > { %v4184_v19 = vmul.f32 0.03125, %v4106_v44  ;;  %4285 = vadd.xlane.f32.xlu1 %v4284_v17  ;;  %4282 = vadd.xlane.f32.xlu0 %v4281_v38  ;;  %v4103_v57 = vpop.xlane.xlu0 %4102  ;;  %v4246_v24 = vmul.f32 %v9254_v26, %v9254_v26 }
 0xd31   : > { %v4183_v6 = vmul.f32 0.03125, %v4103_v57  ;;  %v4245_v53 = vmul.f32 %v9258_v25, %v9258_v25 }
 0xd32   : > { %v9266_v27 = vsub.f32 %v9094_v34, %v4184_v19  ;;  %v4290_v32 = vsel %vm969_vm0, %v4246_v24, 0.0 }
 0xd33   : > { %v9270_v1 = vsub.f32 %v9097_v62, %v4183_v6  ;;  %v4112_v29 = vpop.xlane.xlu1 %4111  ;;  %v4287_v50 = vsel %vm969_vm0, %v4245_v53, 0.0 }
 0xd34   : > { %v4186_v49 = vmul.f32 0.03125, %v4112_v29  ;;  %4291 = vadd.xlane.f32.xlu1 %v4290_v32  ;;  %4288 = vadd.xlane.f32.xlu0 %v4287_v50  ;;  %v4109_v3 = vpop.xlane.xlu0 %4108  ;;  %v4248_v2 = vmul.f32 %v9266_v27, %v9266_v27 }
 0xd35   : > { %v4185_v60 = vmul.f32 0.03125, %v4109_v3  ;;  %v4247_v45 = vmul.f32 %v9270_v1, %v9270_v1 }
 0xd36   : > { %v9278_v40 = vsub.f32 %v9102_v61, %v4186_v49  ;;  %v4296_v63 = vsel %vm969_vm0, %v4248_v2, 0.0 }
 0xd37   : > { %v9282_v37 = vsub.f32 %v9110_v48, %v4185_v60  ;;  %v4118_v21 = vpop.xlane.xlu1 %4117  ;;  %v4293_v28 = vsel %vm969_vm0, %v4247_v45, 0.0 }
 0xd38   : > { %v4188_v33 = vmul.f32 0.03125, %v4118_v21  ;;  %4297 = vadd.xlane.f32.xlu1 %v4296_v63  ;;  %4294 = vadd.xlane.f32.xlu0 %v4293_v28  ;;  %v4115_v39 = vpop.xlane.xlu0 %4114  ;;  %v4250_v17 = vmul.f32 %v9278_v40, %v9278_v40 }
 0xd39   : > { %v4187_v44 = vmul.f32 0.03125, %v4115_v39  ;;  %v4249_v38 = vmul.f32 %v9282_v37, %v9282_v37 }
 0xd3a   : > { %v9290_v19 = vsub.f32 %v9113_v11, %v4188_v33  ;;  %v4302_v57 = vsel %vm969_vm0, %v4250_v17, 0.0 }
 0xd3b   : > { %v9294_v24 = vsub.f32 %v9118_v5, %v4187_v44  ;;  %v4124_v6 = vpop.xlane.xlu1 %4123  ;;  %v4299_v53 = vsel %vm969_vm0, %v4249_v38, 0.0 }
 0xd3c   : > { %v4190_v32 = vmul.f32 0.03125, %v4124_v6  ;;  %4303 = vadd.xlane.f32.xlu1 %v4302_v57  ;;  %4300 = vadd.xlane.f32.xlu0 %v4299_v53  ;;  %v4121_v29 = vpop.xlane.xlu0 %4120  ;;  %v4252_v50 = vmul.f32 %v9290_v19, %v9290_v19 }
 0xd3d   : > { %v4189_v49 = vmul.f32 0.03125, %v4121_v29  ;;  %v4251_v3 = vmul.f32 %v9294_v24, %v9294_v24 }
 0xd3e   : > { %v9302_v2 = vsub.f32 %v9123_v43, %v4190_v32  ;;  %v4308_v60 = vsel %vm969_vm0, %v4252_v50, 0.0 }
 0xd3f   : > { %v9306_v45 = vsub.f32 %v9128_v10, %v4189_v49  ;;  %v4130_v63 = vpop.xlane.xlu1 %4129  ;;  %v4305_v21 = vsel %vm969_vm0, %v4251_v3, 0.0 }
 0xd40   : > { %v4192_v28 = vmul.f32 0.03125, %v4130_v63  ;;  %4309 = vadd.xlane.f32.xlu1 %v4308_v60  ;;  %4306 = vadd.xlane.f32.xlu0 %v4305_v21  ;;  %v4127_v33 = vpop.xlane.xlu0 %4126  ;;  %v4254_v39 = vmul.f32 %v9302_v2, %v9302_v2 }
 0xd41   : > { %v4191_v17 = vmul.f32 0.03125, %v4127_v33  ;;  %v4253_v44 = vmul.f32 %v9306_v45, %v9306_v45  ;;  %v6639_v33 = vld [vmem:[%s10211_s11 + $0x10] sm:$0xff]  }
 0xd42   : > { %v9314_v38 = vsub.f32 %v9136_v8, %v4192_v28  ;;  %v4314_v57 = vsel %vm969_vm0, %v4254_v39, 0.0  ;;  %6488 = vmatprep.subr.bf16.mxu1 %v6639_v33  ;;  %v6640_v39 = vld [vmem:[%s10211_s11 + $0x18] sm:$0xff]  }
 0xd43   : > { %v9318_v6 = vsub.f32 %v9139_v58, %v4191_v17  ;;  %v4311_v53 = vsel %vm969_vm0, %v4253_v44, 0.0  ;;  %6489 = vmatpush3.bf16.msra.mxu1 %v6639_v33 }
 0xd44   : > { %4315 = vadd.xlane.f32.xlu1 %v4314_v57  ;;  %4312 = vadd.xlane.f32.xlu0 %v4311_v53  ;;  %v4133_v32 = vpop.xlane.xlu0 %4132  ;;  %v4256_v29 = vmul.f32 %v9314_v38, %v9314_v38 }
 0xd45   : > { %v4193_v50 = vmul.f32 0.03125, %v4133_v32  ;;  %v4255_v49 = vmul.f32 %v9318_v6, %v9318_v6  ;;  %6490 = vmatprep.subr.bf16.mxu1 %v6640_v39 }
 0xd46   : > { %v4320_v3 = vsel %vm969_vm0, %v4256_v29, 0.0 }
 0xd47   : > { %v9327_v60 = vsub.f32 %v9149_v15, %v4193_v50  ;;  %v4317_v63 = vsel %vm969_vm0, %v4255_v49, 0.0  ;;  %6491 = vmatpush3.bf16.msra.mxu1 %v6640_v39 }
 0xd48   : > { %4321 = vadd.xlane.f32.xlu1 %v4320_v3  ;;  %4318 = vadd.xlane.f32.xlu0 %v4317_v63 }
 0xd49   : > { %v4257_v21 = vmul.f32 %v9327_v60, %v9327_v60 }
 0xd4b   : > { %v4323_v28 = vsel %vm969_vm0, %v4257_v21, 0.0 }
 0xd4c   : > { %4324 = vadd.xlane.f32.xlu0 %v4323_v28 }
 0xd70   : > { %v4139_v17 = vpop.xlane.xlu0 %4138 }
 0xd71   : > { %v4195_v44 = vmul.f32 0.03125, %v4139_v17 }
 0xd73   : > { %v9340_v57 = vsub.f32 %v9154_v52, %v4195_v44  ;;  %v4136_v53 = vpop.xlane.xlu1 %4135 }
 0xd74   : > { %v4194_v32 = vmul.f32 0.03125, %v4136_v53  ;;  %v4145_v29 = vpop.xlane.xlu0 %4144 }
 0xd75   : > { %v4197_v50 = vmul.f32 0.03125, %v4145_v29  ;;  %v4259_v49 = vmul.f32 %v9340_v57, %v9340_v57 }
 0xd76   : > { %v9345_v3 = vsub.f32 %v9159_v20, %v4194_v32 }
 0xd77   : > { %v9348_v63 = vsub.f32 %v9162_v22, %v4197_v50  ;;  %v4142_v21 = vpop.xlane.xlu1 %4141  ;;  %v4329_v28 = vsel %vm969_vm0, %v4259_v49, 0.0 }
 0xd78   : > { %v4196_v33 = vmul.f32 0.03125, %v4142_v21  ;;  %4330 = vadd.xlane.f32.xlu0 %v4329_v28  ;;  %v4151_v39 = vpop.xlane.xlu0 %4150  ;;  %v4258_v17 = vmul.f32 %v9345_v3, %v9345_v3 }
 0xd79   : > { %v4199_v44 = vmul.f32 0.03125, %v4151_v39  ;;  %v4261_v53 = vmul.f32 %v9348_v63, %v9348_v63 }
 0xd7a   : > { %v9356_v29 = vsub.f32 %v9169_v42, %v4196_v33  ;;  %v4326_v32 = vsel %vm969_vm0, %v4258_v17, 0.0 }
 0xd7b   : > { %v9360_v50 = vsub.f32 %v9172_v56, %v4199_v44  ;;  %v4148_v22 = vpop.xlane.xlu1 %4147  ;;  %4327 = vadd.xlane.f32.xlu1 %v4326_v32  ;;  %v4335_v49 = vsel %vm969_vm0, %v4261_v53, 0.0 }
 0xd7c   : > { %v4198_v21 = vmul.f32 0.03125, %v4148_v22  ;;  %4336 = vadd.xlane.f32.xlu0 %v4335_v49  ;;  %v4157_v28 = vpop.xlane.xlu0 %4156  ;;  %v4260_v39 = vmul.f32 %v9356_v29, %v9356_v29 }
 0xd7d   : > { %v4201_v15 = vmul.f32 0.03125, %v4157_v28  ;;  %v4263_v33 = vmul.f32 %v9360_v50, %v9360_v50 }
 0xd7e   : > { %v9368_v42 = vsub.f32 %v9183_v23, %v4198_v21  ;;  %v4332_v17 = vsel %vm969_vm0, %v4260_v39, 0.0 }
 0xd7f   : > { %v9372_v44 = vsub.f32 %v9180_v46, %v4201_v15  ;;  %v4154_v32 = vpop.xlane.xlu1 %4153  ;;  %4333 = vadd.xlane.f32.xlu1 %v4332_v17  ;;  %v4341_v22 = vsel %vm969_vm0, %v4263_v33, 0.0 }
 0xd80   : > { %v4200_v53 = vmul.f32 0.03125, %v4154_v32  ;;  %4342 = vadd.xlane.f32.xlu0 %v4341_v22  ;;  %v4163_v49 = vpop.xlane.xlu0 %4162  ;;  %v4262_v28 = vmul.f32 %v9368_v42, %v9368_v42 }
 0xd81   : > { %v4203_v56 = vmul.f32 0.03125, %v4163_v49  ;;  %v4265_v21 = vmul.f32 %v9372_v44, %v9372_v44 }
 0xd82   : > { %v9380_v23 = vsub.f32 %v9189_v18, %v4200_v53  ;;  %v4338_v15 = vsel %vm969_vm0, %v4262_v28, 0.0 }
 0xd83   : > { %v9384_v39 = vsub.f32 %v9192_v54, %v4203_v56  ;;  %v4160_v17 = vpop.xlane.xlu1 %4159  ;;  %4339 = vadd.xlane.f32.xlu1 %v4338_v15  ;;  %v4347_v33 = vsel %vm969_vm0, %v4265_v21, 0.0 }
 0xd84   : > { %v4202_v32 = vmul.f32 0.03125, %v4160_v17  ;;  %4348 = vadd.xlane.f32.xlu0 %v4347_v33  ;;  %v4169_v22 = vpop.xlane.xlu0 %4168  ;;  %v4264_v49 = vmul.f32 %v9380_v23, %v9380_v23 }
 0xd85   : > { %v4205_v46 = vmul.f32 0.03125, %v4169_v22  ;;  %v4267_v53 = vmul.f32 %v9384_v39, %v9384_v39 }
 0xd86   : > { %v9392_v18 = vsub.f32 %v9197_v59, %v4202_v32  ;;  %v4344_v56 = vsel %vm969_vm0, %v4264_v49, 0.0 }
 0xd87   : > { %v9396_v28 = vsub.f32 %v9202_v51, %v4205_v46  ;;  %v4166_v15 = vpop.xlane.xlu1 %4165  ;;  %4345 = vadd.xlane.f32.xlu1 %v4344_v56  ;;  %v4353_v21 = vsel %vm969_vm0, %v4267_v53, 0.0 }
 0xd88   : > { %v4204_v17 = vmul.f32 0.03125, %v4166_v15  ;;  %4354 = vadd.xlane.f32.xlu0 %v4353_v21  ;;  %v4175_v33 = vpop.xlane.xlu0 %4174  ;;  %v4266_v22 = vmul.f32 %v9392_v18, %v9392_v18 }
 0xd89   : > { %v4207_v54 = vmul.f32 0.03125, %v4175_v33  ;;  %v4269_v32 = vmul.f32 %v9396_v28, %v9396_v28 }
 0xd8a   : > { %v9404_v59 = vsub.f32 %v9207_v4, %v4204_v17  ;;  %v4350_v46 = vsel %vm969_vm0, %v4266_v22, 0.0 }
 0xd8b   : > { %v9408_v49 = vsub.f32 %v9215_v36, %v4207_v54  ;;  %v4172_v56 = vpop.xlane.xlu1 %4171  ;;  %4351 = vadd.xlane.f32.xlu1 %v4350_v46  ;;  %v4359_v53 = vsel %vm969_vm0, %v4269_v32, 0.0 }
 0xd8c   : > { %v4206_v15 = vmul.f32 0.03125, %v4172_v56  ;;  %4360 = vadd.xlane.f32.xlu0 %v4359_v53  ;;  %v4277_v21 = vpop.xlane.xlu0 %4276  ;;  %v4268_v33 = vmul.f32 %v9404_v59, %v9404_v59 }
 0xd8d   : > { %v4369_v51 = vmul.f32 0.03125, %v4277_v21  ;;  %v4271_v17 = vmul.f32 %v9408_v49, %v9408_v49 }
 0xd8e   : > { %v9416_v4 = vsub.f32 %v9223_v30, %v4206_v15  ;;  %v4356_v54 = vsel %vm969_vm0, %v4268_v33, 0.0 }
 0xd8f   : > { %v4401_v22 = vadd.f32 1e-05, %v4369_v51  ;;  %v4274_v36 = vpop.xlane.xlu1 %4273  ;;  %4357 = vadd.xlane.f32.xlu1 %v4356_v54  ;;  %v4365_v32 = vsel %vm969_vm0, %v4271_v17, 0.0  ;;  %v9427_v51 = vld [vmem:[%s10209_s9 + $0x1] ss:$0 sm:$0xff] }
 0xd90   : > { %v4368_v46 = vmul.f32 0.03125, %v4274_v36  ;;  %4366 = vadd.xlane.f32.xlu0 %v4365_v32  ;;  %v4270_v56 = vmul.f32 %v9416_v4, %v9416_v4  ;;  %v9434_v54 = vld [vmem:[%s10210_s10 + $0x1] ss:$0 sm:$0xff] }
 0xd91   : > { %6933 = vrsqrt.f32 %v4401_v22 }
 0xd92   : > { %v4400_v53 = vadd.f32 1e-05, %v4368_v46  ;;  %v4362_v21 = vsel %vm969_vm0, %v4270_v56, 0.0 }
 0xd93   : > { %4363 = vadd.xlane.f32.xlu1 %v4362_v21 }
 0xd94   : > { %6935 = vrsqrt.f32 %v4400_v53 }
 0xd9b   : > { %v6934_v15 = vpop.eup %6933 }
 0xd9c   : > { %v4465_v30 = vmul.f32 %v6934_v15, %v9212_v47 }
 0xd9e   : > { %v6936_v33 = vpop.eup %6935  ;;  %v4503_v17 = vmul.f32 %v9427_v51, %v4465_v30 }
 0xd9f   : > { %v4464_v36 = vmul.f32 %v6936_v33, %v9220_v9 }
 0xda0   : > { %v4541_v47 = vadd.f32 %v9434_v54, %v4503_v17 }
 0xda1   : > { %v4502_v22 = vmul.f32 %v9427_v51, %v4464_v36 }
 0xda3   : > { %v4540_v32 = vadd.f32 %v9434_v54, %v4502_v22 }
 0xda5   : > { %v4572_v46 = vpack.c.bf16 %v4541_v47, %v4540_v32 }
 0xda7   : > { %6492 = vmatprep.mubr.msk.bf16.mxu1 %vm969_vm0, %v4572_v46 }
 0xdb9   : > { %v4280_v56 = vpop.xlane.xlu1 %4279 }
 0xdba   : > { %v4370_v53 = vmul.f32 0.03125, %v4280_v56 }
 0xdbc   : > { %v4402_v21 = vadd.f32 1e-05, %v4370_v53 }
 0xdbd   : > { %v4286_v9 = vpop.xlane.xlu1 %4285  ;;  %v4283_v15 = vpop.xlane.xlu0 %4282 }
 0xdbe   : > { %6937 = vrsqrt.f32 %v4402_v21  ;;  %v4372_v30 = vmul.f32 0.03125, %v4286_v9  ;;  %v4371_v33 = vmul.f32 0.03125, %v4283_v15 }
 0xdc0   : > { %v4404_v52 = vadd.f32 1e-05, %v4372_v30  ;;  %v4403_v8 = vadd.f32 1e-05, %v4371_v33 }
 0xdc1   : > { %v4292_v20 = vpop.xlane.xlu1 %4291  ;;  %v4289_v10 = vpop.xlane.xlu0 %4288 }
 0xdc2   : > { %6939 = vrsqrt.f32 %v4404_v52  ;;  %v4374_v36 = vmul.f32 0.03125, %v4292_v20  ;;  %v4373_v22 = vmul.f32 0.03125, %v4289_v10 }
 0xdc3   : > { %6941 = vrsqrt.f32 %v4403_v8 }
 0xdc4   : > { %v4406_v17 = vadd.f32 1e-05, %v4374_v36  ;;  %v4405_v32 = vadd.f32 1e-05, %v4373_v22 }
 0xdc5   : > { %v4298_v47 = vpop.xlane.xlu1 %4297  ;;  %v4295_v46 = vpop.xlane.xlu0 %4294 }
 0xdc6   : > { %6943 = vrsqrt.f32 %v4406_v17  ;;  %v4376_v56 = vmul.f32 0.03125, %v4298_v47  ;;  %v4375_v53 = vmul.f32 0.03125, %v4295_v46 }
 0xdc7   : > { %6945 = vrsqrt.f32 %v4405_v32 }
 0xdc8   : > { %v6938_v58 = vpop.eup %6937  ;;  %v4408_v21 = vadd.f32 1e-05, %v4376_v56  ;;  %v4407_v9 = vadd.f32 1e-05, %v4375_v53 }
 0xdc9   : > { %v4304_v15 = vpop.xlane.xlu1 %4303  ;;  %v4301_v30 = vpop.xlane.xlu0 %4300  ;;  %v4466_v52 = vmul.f32 %v6938_v58, %v9238_v7 }
 0xdca   : > { %6947 = vrsqrt.f32 %v4408_v21  ;;  %v4378_v33 = vmul.f32 0.03125, %v4304_v15  ;;  %v4377_v11 = vmul.f32 0.03125, %v4301_v30 }
 0xdcb   : > { %6949 = vrsqrt.f32 %v4407_v9  ;;  %v4504_v56 = vmul.f32 %v9427_v51, %v4466_v52 }
 0xdcc   : > { %v6940_v10 = vpop.eup %6939  ;;  %v4410_v8 = vadd.f32 1e-05, %v4378_v33  ;;  %v4409_v20 = vadd.f32 1e-05, %v4377_v11 }
 0xdcd   : > { %v6942_v36 = vpop.eup %6941  ;;  %v4310_v22 = vpop.xlane.xlu1 %4309  ;;  %v4468_v53 = vmul.f32 %v6940_v10, %v9243_v0  ;;  %v4542_v52 = vadd.f32 %v9434_v54, %v4504_v56 }
 0xdce   : > { %v4307_v17 = vpop.xlane.xlu0 %4306  ;;  %v4467_v47 = vmul.f32 %v6942_v36, %v9246_v41  ;;  %6951 = vrsqrt.f32 %v4410_v8  ;;  %v4380_v32 = vmul.f32 0.03125, %v4310_v22 }
 0xdcf   : > { %v4379_v46 = vmul.f32 0.03125, %v4307_v17  ;;  %6953 = vrsqrt.f32 %v4409_v20  ;;  %v4506_v10 = vmul.f32 %v9427_v51, %v4468_v53 }
 0xdd0   : > { %v6944_v21 = vpop.eup %6943  ;;  %v4505_v58 = vmul.f32 %v9427_v51, %v4467_v47  ;;  %v4412_v7 = vadd.f32 1e-05, %v4380_v32 }
 0xdd1   : > { %v4411_v9 = vadd.f32 1e-05, %v4379_v46  ;;  %v6946_v15 = vpop.eup %6945  ;;  %v4470_v11 = vmul.f32 %v6944_v21, %v9254_v26  ;;  %v4316_v30 = vpop.xlane.xlu1 %4315  ;;  %v4544_v53 = vadd.f32 %v9434_v54, %v4506_v10 }
 0xdd2   : > { %v4313_v33 = vpop.xlane.xlu0 %4312  ;;  %v4469_v41 = vmul.f32 %v6946_v15, %v9258_v25  ;;  %6955 = vrsqrt.f32 %v4412_v7  ;;  %v4382_v8 = vmul.f32 0.03125, %v4316_v30  ;;  %v4543_v0 = vadd.f32 %v9434_v54, %v4505_v58 }
 0xdd3   : > { %v4381_v36 = vmul.f32 0.03125, %v4313_v33  ;;  %6957 = vrsqrt.f32 %v4411_v9  ;;  %v4508_v7 = vmul.f32 %v9427_v51, %v4470_v11 }
 0xdd4   : > { %v6948_v20 = vpop.eup %6947  ;;  %v4414_v22 = vadd.f32 1e-05, %v4382_v8  ;;  %v4507_v47 = vmul.f32 %v9427_v51, %v4469_v41  ;;  %v4573_v25 = vpack.c.bf16 %v4543_v0, %v4542_v52 }
 0xdd5   : > { %v4413_v17 = vadd.f32 1e-05, %v4381_v36  ;;  %v6950_v26 = vpop.eup %6949  ;;  %v4472_v32 = vmul.f32 %v6948_v20, %v9266_v27  ;;  %v4322_v46 = vpop.xlane.xlu1 %4321  ;;  %v4546_v52 = vadd.f32 %v9434_v54, %v4508_v7 }
 0xdd6   : > { %v4319_v21 = vpop.xlane.xlu0 %4318  ;;  %v4471_v9 = vmul.f32 %v6950_v26, %v9270_v1  ;;  %6959 = vrsqrt.f32 %v4414_v22  ;;  %v4384_v56 = vmul.f32 0.03125, %v4322_v46  ;;  %6493 = vmatmul.mubr.msk.bf16.vlgmr.msra.gmra.mrb[68].mxu1 %vm969_vm0, %v4573_v25  ;;  %v4545_v15 = vadd.f32 %v9434_v54, %v4507_v47 }
 0xdd7   : > { %v4383_v58 = vmul.f32 0.03125, %v4319_v21  ;;  %6961 = vrsqrt.f32 %v4413_v17  ;;  %v4510_v0 = vmul.f32 %v9427_v51, %v4472_v32 }
 0xdd8   : > { %v6952_v30 = vpop.eup %6951  ;;  %v4416_v33 = vadd.f32 1e-05, %v4384_v56  ;;  %v4509_v41 = vmul.f32 %v9427_v51, %v4471_v9  ;;  %v4574_v36 = vpack.c.bf16 %v4545_v15, %v4544_v53 }
 0xdd9   : > { %v4415_v27 = vadd.f32 1e-05, %v4383_v58  ;;  %v6954_v8 = vpop.eup %6953  ;;  %v4474_v11 = vmul.f32 %v6952_v30, %v9278_v40  ;;  %v4548_v25 = vadd.f32 %v9434_v54, %v4510_v0 }
 0xdda   : > { %v4325_v1 = vpop.xlane.xlu0 %4324  ;;  %v4473_v20 = vmul.f32 %v6954_v8, %v9282_v37  ;;  %6963 = vrsqrt.f32 %v4416_v33  ;;  %v4547_v22 = vadd.f32 %v9434_v54, %v4509_v41  ;;  %6496 = vmatprep.mubr.msk.bf16.mxu1 %vm969_vm0, %v4574_v36 }
 0xddb   : > { %v4385_v10 = vmul.f32 0.03125, %v4325_v1  ;;  %6965 = vrsqrt.f32 %v4415_v27  ;;  %v4512_v21 = vmul.f32 %v9427_v51, %v4474_v11 }
 0xddc   : > { %v6956_v17 = vpop.eup %6955  ;;  %v4575_v26 = vpack.c.bf16 %v4547_v22, %v4546_v52  ;;  %v4511_v40 = vmul.f32 %v9427_v51, %v4473_v20 }
 0xddd   : > { %v4417_v47 = vadd.f32 1e-05, %v4385_v10  ;;  %v6958_v46 = vpop.eup %6957  ;;  %v4476_v32 = vmul.f32 %v6956_v17, %v9290_v19  ;;  %v4550_v15 = vadd.f32 %v9434_v54, %v4512_v21 }
 0xdde   : > { %v4475_v37 = vmul.f32 %v6958_v46, %v9294_v24  ;;  %v4549_v7 = vadd.f32 %v9434_v54, %v4511_v40  ;;  %6497 = vmatmul.mubr.msk.bf16.gmra.mrb[72].mxu1 %vm969_vm0, %v4575_v26 }
 0xddf   : > { %6967 = vrsqrt.f32 %v4417_v47  ;;  %v4514_v24 = vmul.f32 %v9427_v51, %v4476_v32 }
 0xde0   : > { %v6960_v9 = vpop.eup %6959  ;;  %v4576_v56 = vpack.c.bf16 %v4549_v7, %v4548_v25  ;;  %v4513_v58 = vmul.f32 %v9427_v51, %v4475_v37 }
 0xde1   : > { %v6962_v53 = vpop.eup %6961  ;;  %v4478_v30 = vmul.f32 %v6960_v9, %v9302_v2  ;;  %v4552_v52 = vadd.f32 %v9434_v54, %v4514_v24 }
 0xde2   : > { %v4477_v33 = vmul.f32 %v6962_v53, %v9306_v45  ;;  %6500 = vmatprep.mubr.msk.bf16.mxu1 %vm969_vm0, %v4576_v56  ;;  %v4551_v19 = vadd.f32 %v9434_v54, %v4513_v58 }
 0xde3   : > { %v4516_v45 = vmul.f32 %v9427_v51, %v4478_v30 }
 0xde4   : > { %v6964_v27 = vpop.eup %6963  ;;  %v4577_v41 = vpack.c.bf16 %v4551_v19, %v4550_v15  ;;  %v4515_v8 = vmul.f32 %v9427_v51, %v4477_v33 }
 0xde5   : > { %v6966_v11 = vpop.eup %6965  ;;  %v4480_v36 = vmul.f32 %v6964_v27, %v9314_v38  ;;  %v4554_v38 = vadd.f32 %v9434_v54, %v4516_v45 }
 0xde6   : > { %v4479_v1 = vmul.f32 %v6966_v11, %v9318_v6  ;;  %v4553_v2 = vadd.f32 %v9434_v54, %v4515_v8  ;;  %6501 = vmatmul.mubr.msk.bf16.gmra.mrb[76].mxu1 %vm969_vm0, %v4577_v41 }
 0xde7   : > { %v4518_v17 = vmul.f32 %v9427_v51, %v4480_v36 }
 0xde8   : > { %v4578_v20 = vpack.c.bf16 %v4553_v2, %v4552_v52  ;;  %v4517_v10 = vmul.f32 %v9427_v51, %v4479_v1 }
 0xde9   : > { %v6968_v0 = vpop.eup %6967  ;;  %v4556_v40 = vadd.f32 %v9434_v54, %v4518_v17 }
 0xdea   : > { %v4481_v22 = vmul.f32 %v6968_v0, %v9327_v60  ;;  %6504 = vmatprep.mubr.msk.bf16.mxu1 %vm969_vm0, %v4578_v20  ;;  %v4555_v6 = vadd.f32 %v9434_v54, %v4517_v10 }
 0xdec   : > { %v4519_v47 = vmul.f32 %v9427_v51, %v4481_v22  ;;  %v4579_v26 = vpack.c.bf16 %v4555_v6, %v4554_v38 }
 0xdee   : > { %v4557_v46 = vadd.f32 %v9434_v54, %v4519_v47  ;;  %6505 = vmatmul.mubr.msk.bf16.gmra.mrb[80].mxu1 %vm969_vm0, %v4579_v26 }
 0xdf0   : > { %v4580_v25 = vpack.c.bf16 %v4557_v46, %v4556_v40 }
 0xdf2   : > { %6508 = vmatprep.mubr.msk.bf16.mxu1 %vm969_vm0, %v4580_v25 }
 0xe05   : > { %v4331_v60 = vpop.xlane.xlu0 %4330 }
 0xe06   : > { %v4387_v21 = vmul.f32 0.03125, %v4331_v60 }
 0xe08   : > { %v4419_v32 = vadd.f32 1e-05, %v4387_v21  ;;  %v4328_v37 = vpop.xlane.xlu1 %4327 }
 0xe09   : > { %v4386_v7 = vmul.f32 0.03125, %v4328_v37  ;;  %v4337_v9 = vpop.xlane.xlu0 %4336 }
 0xe0a   : > { %6969 = vrsqrt.f32 %v4419_v32  ;;  %v4389_v56 = vmul.f32 0.03125, %v4337_v9 }
 0xe0b   : > { %v4418_v58 = vadd.f32 1e-05, %v4386_v7 }
 0xe0c   : > { %v4421_v53 = vadd.f32 1e-05, %v4389_v56  ;;  %v4334_v15 = vpop.xlane.xlu1 %4333 }
 0xe0d   : > { %6971 = vrsqrt.f32 %v4418_v58  ;;  %v4388_v30 = vmul.f32 0.03125, %v4334_v15  ;;  %v4343_v33 = vpop.xlane.xlu0 %4342 }
 0xe0e   : > { %6973 = vrsqrt.f32 %v4421_v53  ;;  %v4391_v19 = vmul.f32 0.03125, %v4343_v33 }
 0xe0f   : > { %v4420_v24 = vadd.f32 1e-05, %v4388_v30 }
 0xe10   : > { %v4423_v27 = vadd.f32 1e-05, %v4391_v19  ;;  %v4340_v41 = vpop.xlane.xlu1 %4339 }
 0xe11   : > { %6975 = vrsqrt.f32 %v4420_v24  ;;  %v4390_v8 = vmul.f32 0.03125, %v4340_v41  ;;  %v4349_v11 = vpop.xlane.xlu0 %4348 }
 0xe12   : > { %6977 = vrsqrt.f32 %v4423_v27  ;;  %v4393_v36 = vmul.f32 0.03125, %v4349_v11 }
 0xe13   : > { %v4422_v1 = vadd.f32 1e-05, %v4390_v8 }
 0xe14   : > { %v6970_v52 = vpop.eup %6969  ;;  %v4425_v2 = vadd.f32 1e-05, %v4393_v36  ;;  %v4346_v45 = vpop.xlane.xlu1 %4345 }
 0xe15   : > { %v4483_v0 = vmul.f32 %v6970_v52, %v9340_v57  ;;  %6979 = vrsqrt.f32 %v4422_v1  ;;  %v4392_v20 = vmul.f32 0.03125, %v4346_v45  ;;  %v4355_v10 = vpop.xlane.xlu0 %4354 }
 0xe16   : > { %6981 = vrsqrt.f32 %v4425_v2  ;;  %v4395_v22 = vmul.f32 0.03125, %v4355_v10 }
 0xe17   : > { %v6972_v17 = vpop.eup %6971  ;;  %v4424_v38 = vadd.f32 1e-05, %v4392_v20  ;;  %v4521_v46 = vmul.f32 %v9427_v51, %v4483_v0 }
 0xe18   : > { %v6974_v6 = vpop.eup %6973  ;;  %v4482_v47 = vmul.f32 %v6972_v17, %v9345_v3  ;;  %v4427_v26 = vadd.f32 1e-05, %v4395_v22  ;;  %v4352_v40 = vpop.xlane.xlu1 %4351 }
 0xe19   : > { %v4485_v25 = vmul.f32 %v6974_v6, %v9348_v63  ;;  %6983 = vrsqrt.f32 %v4424_v38  ;;  %v4394_v60 = vmul.f32 0.03125, %v4352_v40  ;;  %v4361_v21 = vpop.xlane.xlu0 %4360  ;;  %v4559_v63 = vadd.f32 %v9434_v54, %v4521_v46 }
 0xe1a   : > { %6985 = vrsqrt.f32 %v4427_v26  ;;  %v4397_v57 = vmul.f32 0.03125, %v4361_v21  ;;  %v4520_v32 = vmul.f32 %v9427_v51, %v4482_v47 }
 0xe1b   : > { %v6976_v37 = vpop.eup %6975  ;;  %v4426_v7 = vadd.f32 1e-05, %v4394_v60  ;;  %v4523_v9 = vmul.f32 %v9427_v51, %v4485_v25 }
 0xe1c   : > { %v6978_v56 = vpop.eup %6977  ;;  %v4484_v3 = vmul.f32 %v6976_v37, %v9356_v29  ;;  %v4429_v58 = vadd.f32 1e-05, %v4397_v57  ;;  %v4358_v53 = vpop.xlane.xlu1 %4357  ;;  %v4558_v15 = vadd.f32 %v9434_v54, %v4520_v32 }
 0xe1d   : > { %v4487_v30 = vmul.f32 %v6978_v56, %v9360_v50  ;;  %6987 = vrsqrt.f32 %v4426_v7  ;;  %v4396_v33 = vmul.f32 0.03125, %v4358_v53  ;;  %v4367_v19 = vpop.xlane.xlu0 %4366  ;;  %v4561_v29 = vadd.f32 %v9434_v54, %v4523_v9 }
 0xe1e   : > { %6989 = vrsqrt.f32 %v4429_v58  ;;  %v4399_v24 = vmul.f32 0.03125, %v4367_v19  ;;  %v4581_v27 = vpack.c.bf16 %v4559_v63, %v4558_v15  ;;  %v4522_v41 = vmul.f32 %v9427_v51, %v4484_v3 }
 0xe1f   : > { %v6980_v8 = vpop.eup %6979  ;;  %v4428_v11 = vadd.f32 1e-05, %v4396_v33  ;;  %v4525_v45 = vmul.f32 %v9427_v51, %v4487_v30 }
 0xe20   : > { %v6982_v36 = vpop.eup %6981  ;;  %v4486_v1 = vmul.f32 %v6980_v8, %v9368_v42  ;;  %v4431_v52 = vadd.f32 1e-05, %v4399_v24  ;;  %v4364_v2 = vpop.xlane.xlu1 %4363  ;;  %6509 = vmatmul.mubr.msk.bf16.gmra.mrb[84].mxu1 %vm969_vm0, %v4581_v27  ;;  %v4560_v50 = vadd.f32 %v9434_v54, %v4522_v41 }
 0xe21   : > { %v4489_v0 = vmul.f32 %v6982_v36, %v9372_v44  ;;  %6991 = vrsqrt.f32 %v4428_v11  ;;  %v4398_v20 = vmul.f32 0.03125, %v4364_v2  ;;  %v4563_v26 = vadd.f32 %v9434_v54, %v4525_v45  ;;  %v6642_v36 = vld [vmem:[%s10213_s13 + $0x28] sm:$0xff]  }
 0xe22   : > { %6993 = vrsqrt.f32 %v4431_v52  ;;  %v4582_v10 = vpack.c.bf16 %v4561_v29, %v4560_v50  ;;  %v4524_v22 = vmul.f32 %v9427_v51, %v4486_v1  ;;  %v9560_v1 = vld [vmem:[%s10212_s12 + $0x1] ss:$0 sm:$0xff] }
 0xe23   : > { %v6984_v17 = vpop.eup %6983  ;;  %v4430_v38 = vadd.f32 1e-05, %v4398_v20  ;;  %v4527_v40 = vmul.f32 %v9427_v51, %v4489_v0 }
 0xe24   : > { %v6986_v6 = vpop.eup %6985  ;;  %v4488_v42 = vmul.f32 %v6984_v17, %v9380_v23  ;;  %6512 = vmatprep.mubr.msk.bf16.mxu1 %vm969_vm0, %v4582_v10  ;;  %v4562_v47 = vadd.f32 %v9434_v54, %v4524_v22 }
 0xe25   : > { %v4491_v44 = vmul.f32 %v6986_v6, %v9384_v39  ;;  %6995 = vrsqrt.f32 %v4430_v38  ;;  %v4565_v32 = vadd.f32 %v9434_v54, %v4527_v40 }
 0xe26   : > { %v4583_v46 = vpack.c.bf16 %v4563_v26, %v4562_v47  ;;  %v4526_v25 = vmul.f32 %v9427_v51, %v4488_v42 }
 0xe27   : > { %v6988_v60 = vpop.eup %6987  ;;  %v4529_v37 = vmul.f32 %v9427_v51, %v4491_v44 }
 0xe28   : > { %v6990_v21 = vpop.eup %6989  ;;  %v4490_v57 = vmul.f32 %v6988_v60, %v9392_v18  ;;  %6513 = vmatmul.mubr.msk.bf16.gmra.mrb[88].mxu1 %vm969_vm0, %v4583_v46  ;;  %v4564_v23 = vadd.f32 %v9434_v54, %v4526_v25 }
 0xe29   : > { %v4493_v7 = vmul.f32 %v6990_v21, %v9396_v28  ;;  %v4567_v53 = vadd.f32 %v9434_v54, %v4529_v37 }
 0xe2a   : > { %v4584_v9 = vpack.c.bf16 %v4565_v32, %v4564_v23  ;;  %v4528_v39 = vmul.f32 %v9427_v51, %v4490_v57 }
 0xe2b   : > { %v6992_v56 = vpop.eup %6991  ;;  %v4531_v15 = vmul.f32 %v9427_v51, %v4493_v7 }
 0xe2c   : > { %v6994_v3 = vpop.eup %6993  ;;  %v4492_v58 = vmul.f32 %v6992_v56, %v9404_v59  ;;  %6516 = vmatprep.mubr.msk.bf16.mxu1 %vm969_vm0, %v4584_v9  ;;  %v4566_v18 = vadd.f32 %v9434_v54, %v4528_v39 }
 0xe2d   : > { %v4495_v63 = vmul.f32 %v6994_v3, %v9408_v49  ;;  %v4569_v24 = vadd.f32 %v9434_v54, %v4531_v15  ;;  %v6641_v49 = vld [vmem:[%s10213_s13 + $0x20] sm:$0xff]  }
 0xe2e   : > { %v4585_v30 = vpack.c.bf16 %v4567_v53, %v4566_v18  ;;  %v4530_v28 = vmul.f32 %v9427_v51, %v4492_v58  ;;  %6524 = vmatprep.subr.bf16.mxu0 %v6641_v49 }
 0xe2f   : > { %v6996_v33 = vpop.eup %6995  ;;  %v4533_v27 = vmul.f32 %v9427_v51, %v4495_v63  ;;  %6525 = vmatpush3.bf16.msra.mxu0 %v6641_v49 }
 0xe30   : > { %v4494_v19 = vmul.f32 %v6996_v33, %v9416_v4  ;;  %6517 = vmatmul.mubr.msk.bf16.gmra.mrb[92].mxu1 %vm969_vm0, %v4585_v30  ;;  %v4568_v59 = vadd.f32 %v9434_v54, %v4530_v28  ;;  %6526 = vmatprep.subr.bf16.mxu0 %v6642_v36 }
 0xe31   : > { %v4571_v4 = vadd.f32 %v9434_v54, %v4533_v27 }
 0xe32   : > { %v4586_v41 = vpack.c.bf16 %v4569_v24, %v4568_v59  ;;  %v4532_v8 = vmul.f32 %v9427_v51, %v4494_v19  ;;  %v6643_v51 = vld [vmem:[%s10213_s13 + $0x30] sm:$0xff]  }
 0xe33   : > { %6527 = vmatpush3.bf16.msra.mxu0 %v6642_v36 }
 0xe34   : > { %6520 = vmatprep.mubr.msk.bf16.mxu1 %vm969_vm0, %v4586_v41  ;;  %v4570_v11 = vadd.f32 %v9434_v54, %v4532_v8  ;;  %6528 = vmatprep.subr.bf16.mxu0 %v6643_v51  ;;  %v6644_v54 = vld [vmem:[%s10213_s13 + $0x38] sm:$0xff]  }
 0xe36   : > { %v4587_v29 = vpack.c.bf16 %v4571_v4, %v4570_v11 }
 0xe37   : > { %6529 = vmatpush3.bf16.msra.mxu0 %v6643_v51 }
 0xe38   : > { %6521 = vmatmul.mubr.msk.bf16.gmra.mrb[96].mxu1 %vm969_vm0, %v4587_v29  ;;  %6530 = vmatprep.subr.bf16.mxu0 %v6644_v54 }
 0xe3b   : > { %6531 = vmatpush3.bf16.msra.mxu0 %v6644_v54 }
 0xea9   : > { %v6494_v52 = vpop.f32.mrb[68].mxu1 }
 0xeaa   : > { %v4704_v2 = vadd.f32 %v6494_v52, %v9560_v1  ;;  %v4695_v50 = vpop.f32.mrb[69].mxu1 }
 0xeab   : > { %v4696_v45 = vadd.f32 %v9560_v1, %v4695_v50  ;;  %v6495_v0 = vpop.f32.mrb[70].mxu1 }
 0xeac   : > { %v4856_v20 = vmul.f32 0.70710677, %v4704_v2  ;;  %v4707_v10 = vadd.f32 %v6495_v0, %v9560_v1  ;;  %v4698_v22 = vpop.f32.mrb[71].mxu1  ;;  %v4824_v63 = vmul.f32 0.5, %v4704_v2 }
 0xead   : > { %v4854_v17 = vmul.f32 0.70710677, %v4696_v45  ;;  %v4699_v38 = vadd.f32 %v9560_v1, %v4698_v22  ;;  %v4822_v59 = vmul.f32 0.5, %v4696_v45 }
 0xeae   : > { %6997 = verf.f32 %v4856_v20  ;;  %v4857_v6 = vmul.f32 0.70710677, %v4707_v10  ;;  %v4825_v30 = vmul.f32 0.5, %v4707_v10 }
 0xeaf   : > { %6999 = verf.f32 %v4854_v17  ;;  %v4855_v42 = vmul.f32 0.70710677, %v4699_v38  ;;  %v4823_v24 = vmul.f32 0.5, %v4699_v38 }
 0xeb0   : > { %7001 = verf.f32 %v4857_v6 }
 0xeb1   : > { %7003 = verf.f32 %v4855_v42  ;;  %v6498_v47 = vpop.f32.mrb[72].mxu1 }
 0xeb2   : > { %v4720_v26 = vadd.f32 %v6498_v47, %v9560_v1  ;;  %v4711_v40 = vpop.f32.mrb[73].mxu1 }
 0xeb3   : > { %v9568_v44 = vadd.f32 %v9560_v1, %v4711_v40  ;;  %v6499_v46 = vpop.f32.mrb[74].mxu1 }
 0xeb4   : > { %v4860_v25 = vmul.f32 0.70710677, %v4720_v26  ;;  %v4723_v60 = vadd.f32 %v6499_v46, %v9560_v1  ;;  %v4714_v21 = vpop.f32.mrb[75].mxu1  ;;  %v4828_v40 = vmul.f32 0.5, %v4720_v26 }
 0xeb5   : > { %v4858_v57 = vmul.f32 0.70710677, %v9568_v44  ;;  %v4715_v23 = vadd.f32 %v9560_v1, %v4714_v21 }
 0xeb6   : > { %7005 = verf.f32 %v4860_v25  ;;  %v4861_v32 = vmul.f32 0.70710677, %v4723_v60  ;;  %v4829_v46 = vmul.f32 0.5, %v4723_v60 }
 0xeb7   : > { %7007 = verf.f32 %v4858_v57  ;;  %v4859_v37 = vmul.f32 0.70710677, %v4715_v23 }
 0xeb8   : > { %v6998_v7 = vpop.eup %6997  ;;  %7009 = verf.f32 %v4861_v32  ;;  %v4826_v32 = vmul.f32 0.5, %v9568_v44 }
 0xeb9   : > { %v7000_v9 = vpop.eup %6999  ;;  %v4920_v39 = vadd.f32 1.0, %v6998_v7  ;;  %7011 = verf.f32 %v4859_v37  ;;  %v6502_v56 = vpop.f32.mrb[76].mxu1  ;;  %v4827_v37 = vmul.f32 0.5, %v4715_v23 }
 0xeba   : > { %v7002_v3 = vpop.eup %7001  ;;  %v4918_v58 = vadd.f32 1.0, %v7000_v9  ;;  %v9574_v18 = vadd.f32 %v6502_v56, %v9560_v1  ;;  %v4727_v53 = vpop.f32.mrb[77].mxu1 }
 0xebb   : > { %v7004_v15 = vpop.eup %7003  ;;  %v4921_v28 = vadd.f32 1.0, %v7002_v3  ;;  %v9577_v33 = vadd.f32 %v9560_v1, %v4727_v53  ;;  %v6503_v19 = vpop.f32.mrb[78].mxu1  ;;  %v4952_v49 = vmul.f32 %v4920_v39, %v4824_v63 }
 0xebc   : > { %v4919_v27 = vadd.f32 1.0, %v7004_v15  ;;  %v4864_v41 = vmul.f32 0.70710677, %v9574_v18  ;;  %v4730_v8 = vpop.f32.mrb[79].mxu1  ;;  %v4739_v29 = vadd.f32 %v6503_v19, %v9560_v1  ;;  %v4950_v36 = vmul.f32 %v4918_v58, %v4822_v59 }
 0xebd   : > { %v4953_v11 = vmul.f32 %v4921_v28, %v4825_v30  ;;  %v4862_v4 = vmul.f32 0.70710677, %v9577_v33  ;;  %v4731_v54 = vadd.f32 %v9560_v1, %v4730_v8  ;;  %v4832_v8 = vmul.f32 0.5, %v9574_v18 }
 0xebe   : > { %v4951_v51 = vmul.f32 %v4919_v27, %v4823_v24  ;;  %7013 = verf.f32 %v4864_v41  ;;  %v4865_v2 = vmul.f32 0.70710677, %v4739_v29 }
 0xebf   : > { %v4983_v52 = vpack.c.bf16 %v4953_v11, %v4952_v49  ;;  %7015 = verf.f32 %v4862_v4  ;;  %v4863_v0 = vmul.f32 0.70710677, %v4731_v54  ;;  %v4833_v49 = vmul.f32 0.5, %v4739_v29 }
 0xec0   : > { %v7006_v50 = vpop.eup %7005  ;;  %v4982_v45 = vpack.c.bf16 %v4951_v51, %v4950_v36  ;;  %7017 = verf.f32 %v4865_v2  ;;  %v4830_v4 = vmul.f32 0.5, %v9577_v33  ;;  %v4831_v36 = vmul.f32 0.5, %v4731_v54 }
 0xec1   : > { %v7008_v20 = vpop.eup %7007  ;;  %v4924_v10 = vadd.f32 1.0, %v7006_v50  ;;  %v6506_v22 = vpop.f32.mrb[80].mxu1  ;;  %7019 = verf.f32 %v4863_v0 }
 0xec2   : > { %v7010_v17 = vpop.eup %7009  ;;  %v4922_v38 = vadd.f32 1.0, %v7008_v20  ;;  %v4752_v6 = vadd.f32 %v6506_v22, %v9560_v1  ;;  %v4743_v42 = vpop.f32.mrb[81].mxu1  ;;  %6532 = vmatprep.mubr.msk.bf16.mxu0 %vm1518_vm1, %v4982_v45 }
 0xec3   : > { %v7012_v47 = vpop.eup %7011  ;;  %v4925_v25 = vadd.f32 1.0, %v7010_v17  ;;  %v4744_v21 = vadd.f32 %v9560_v1, %v4743_v42  ;;  %v6507_v57 = vpop.f32.mrb[82].mxu1  ;;  %6533 = vmatmul.mubr.msk.bf16.vlgmr.msra.gmra.mrb[60].mxu0 %vm1518_vm1, %v4983_v52  ;;  %v4956_v56 = vmul.f32 %v4924_v10, %v4828_v40 }
 0xec4   : > { %v4923_v7 = vadd.f32 1.0, %v7012_v47  ;;  %v4868_v9 = vmul.f32 0.70710677, %v4752_v6  ;;  %v4746_v39 = vpop.f32.mrb[83].mxu1  ;;  %v4755_v53 = vadd.f32 %v6507_v57, %v9560_v1  ;;  %v4954_v15 = vmul.f32 %v4922_v38, %v4826_v32 }
 0xec5   : > { %v4957_v3 = vmul.f32 %v4925_v25, %v4829_v46  ;;  %v4866_v58 = vmul.f32 0.70710677, %v4744_v21  ;;  %v4747_v60 = vadd.f32 %v9560_v1, %v4746_v39  ;;  %v4836_v29 = vmul.f32 0.5, %v4752_v6 }
 0xec6   : > { %v4955_v26 = vmul.f32 %v4923_v7, %v4827_v37  ;;  %7021 = verf.f32 %v4868_v9  ;;  %v4869_v30 = vmul.f32 0.70710677, %v4755_v53  ;;  %v4837_v47 = vmul.f32 0.5, %v4755_v53 }
 0xec7   : > { %v4985_v63 = vpack.c.bf16 %v4957_v3, %v4956_v56  ;;  %7023 = verf.f32 %v4866_v58  ;;  %v4867_v44 = vmul.f32 0.70710677, %v4747_v60  ;;  %v4834_v33 = vmul.f32 0.5, %v4744_v21 }
 0xec8   : > { %v7014_v28 = vpop.eup %7013  ;;  %v4984_v19 = vpack.c.bf16 %v4955_v26, %v4954_v15  ;;  %7025 = verf.f32 %v4869_v30  ;;  %v4835_v54 = vmul.f32 0.5, %v4747_v60 }
 0xec9   : > { %v7016_v23 = vpop.eup %7015  ;;  %v4928_v59 = vadd.f32 1.0, %v7014_v28  ;;  %7027 = verf.f32 %v4867_v44 }
 0xeca   : > { %6536 = vmatprep.mubr.msk.bf16.mxu0 %vm1518_vm1, %v4984_v19  ;;  %v7018_v24 = vpop.eup %7017  ;;  %v4926_v27 = vadd.f32 1.0, %v7016_v23 }
 0xecb   : > { %6537 = vmatmul.mubr.msk.bf16.gmra.mrb[64].mxu0 %vm1518_vm1, %v4985_v63  ;;  %v7020_v41 = vpop.eup %7019  ;;  %v4929_v11 = vadd.f32 1.0, %v7018_v24  ;;  %v4960_v52 = vmul.f32 %v4928_v59, %v4832_v8 }
 0xecc   : > { %v4927_v51 = vadd.f32 1.0, %v7020_v41  ;;  %v4958_v50 = vmul.f32 %v4926_v27, %v4830_v4 }
 0xecd   : > { %v4961_v2 = vmul.f32 %v4929_v11, %v4833_v49 }
 0xece   : > { %v4959_v45 = vmul.f32 %v4927_v51, %v4831_v36 }
 0xecf   : > { %v4987_v20 = vpack.c.bf16 %v4961_v2, %v4960_v52 }
 0xed0   : > { %v7022_v0 = vpop.eup %7021  ;;  %v4986_v22 = vpack.c.bf16 %v4959_v45, %v4958_v50 }
 0xed1   : > { %v7024_v10 = vpop.eup %7023  ;;  %v4932_v17 = vadd.f32 1.0, %v7022_v0 }
 0xed2   : > { %v7026_v38 = vpop.eup %7025  ;;  %v4930_v42 = vadd.f32 1.0, %v7024_v10  ;;  %6540 = vmatprep.mubr.msk.bf16.mxu0 %vm1518_vm1, %v4986_v22 }
 0xed3   : > { %v7028_v18 = vpop.eup %7027  ;;  %v4933_v40 = vadd.f32 1.0, %v7026_v38  ;;  %6541 = vmatmul.mubr.msk.bf16.gmra.mrb[68].mxu0 %vm1518_vm1, %v4987_v20  ;;  %v4964_v25 = vmul.f32 %v4932_v17, %v4836_v29 }
 0xed4   : > { %v4931_v46 = vadd.f32 1.0, %v7028_v18  ;;  %v4962_v32 = vmul.f32 %v4930_v42, %v4834_v33 }
 0xed5   : > { %v4965_v57 = vmul.f32 %v4933_v40, %v4837_v47 }
 0xed6   : > { %v4963_v37 = vmul.f32 %v4931_v46, %v4835_v54 }
 0xed7   : > { %v4989_v7 = vpack.c.bf16 %v4965_v57, %v4964_v25 }
 0xed8   : > { %v4988_v9 = vpack.c.bf16 %v4963_v37, %v4962_v32 }
 0xeda   : > { %6544 = vmatprep.mubr.msk.bf16.mxu0 %vm1518_vm1, %v4988_v9 }
 0xedb   : > { %6545 = vmatmul.mubr.msk.bf16.gmra.mrb[72].mxu0 %vm1518_vm1, %v4989_v7 }
 0xef3   : > { %v6510_v39 = vpop.f32.mrb[84].mxu1 }
 0xef4   : > { %v4768_v6 = vadd.f32 %v6510_v39, %v9560_v1  ;;  %v4759_v56 = vpop.f32.mrb[85].mxu1 }
 0xef5   : > { %v4760_v3 = vadd.f32 %v9560_v1, %v4759_v56  ;;  %v6511_v58 = vpop.f32.mrb[86].mxu1 }
 0xef6   : > { %v4872_v21 = vmul.f32 0.70710677, %v4768_v6  ;;  %v4771_v53 = vadd.f32 %v6511_v58, %v9560_v1  ;;  %v4762_v15 = vpop.f32.mrb[87].mxu1  ;;  %v4840_v22 = vmul.f32 0.5, %v4768_v6 }
 0xef7   : > { %v4870_v26 = vmul.f32 0.70710677, %v4760_v3  ;;  %v4763_v60 = vadd.f32 %v9560_v1, %v4762_v15  ;;  %v4838_v29 = vmul.f32 0.5, %v4760_v3 }
 0xef8   : > { %7029 = verf.f32 %v4872_v21  ;;  %v4873_v63 = vmul.f32 0.70710677, %v4771_v53  ;;  %v4841_v17 = vmul.f32 0.5, %v4771_v53 }
 0xef9   : > { %7031 = verf.f32 %v4870_v26  ;;  %v4871_v30 = vmul.f32 0.70710677, %v4763_v60  ;;  %v4839_v47 = vmul.f32 0.5, %v4763_v60 }
 0xefa   : > { %7033 = verf.f32 %v4873_v63 }
 0xefb   : > { %7035 = verf.f32 %v4871_v30  ;;  %v6514_v28 = vpop.f32.mrb[88].mxu1 }
 0xefc   : > { %v4784_v19 = vadd.f32 %v6514_v28, %v9560_v1  ;;  %v4775_v44 = vpop.f32.mrb[89].mxu1 }
 0xefd   : > { %v9604_v23 = vadd.f32 %v9560_v1, %v4775_v44  ;;  %v6515_v59 = vpop.f32.mrb[90].mxu1 }
 0xefe   : > { %v4876_v24 = vmul.f32 0.70710677, %v4784_v19  ;;  %v4787_v27 = vadd.f32 %v6515_v59, %v9560_v1  ;;  %v4778_v41 = vpop.f32.mrb[91].mxu1  ;;  %v4844_v44 = vmul.f32 0.5, %v4784_v19 }
 0xeff   : > { %v4874_v8 = vmul.f32 0.70710677, %v9604_v23  ;;  %v4779_v49 = vadd.f32 %v9560_v1, %v4778_v41 }
 0xf00   : > { %7037 = verf.f32 %v4876_v24  ;;  %v4877_v11 = vmul.f32 0.70710677, %v4787_v27  ;;  %v4845_v59 = vmul.f32 0.5, %v4787_v27 }
 0xf01   : > { %7039 = verf.f32 %v4874_v8  ;;  %v4875_v4 = vmul.f32 0.70710677, %v4779_v49 }
 0xf02   : > { %v7030_v36 = vpop.eup %7029  ;;  %7041 = verf.f32 %v4877_v11  ;;  %v4842_v11 = vmul.f32 0.5, %v9604_v23 }
 0xf03   : > { %v7032_v51 = vpop.eup %7031  ;;  %v4936_v52 = vadd.f32 1.0, %v7030_v36  ;;  %7043 = verf.f32 %v4875_v4  ;;  %v6518_v2 = vpop.f32.mrb[92].mxu1  ;;  %v4843_v4 = vmul.f32 0.5, %v4779_v49 }
 0xf04   : > { %v7034_v50 = vpop.eup %7033  ;;  %v4934_v45 = vadd.f32 1.0, %v7032_v51  ;;  %v9610_v0 = vadd.f32 %v6518_v2, %v9560_v1  ;;  %v4791_v20 = vpop.f32.mrb[93].mxu1 }
 0xf05   : > { %v7036_v10 = vpop.eup %7035  ;;  %v4937_v38 = vadd.f32 1.0, %v7034_v50  ;;  %v9613_v42 = vadd.f32 %v9560_v1, %v4791_v20  ;;  %v6519_v18 = vpop.f32.mrb[94].mxu1  ;;  %v4968_v46 = vmul.f32 %v4936_v52, %v4840_v22 }
 0xf06   : > { %v4935_v40 = vadd.f32 1.0, %v7036_v10  ;;  %v4880_v33 = vmul.f32 0.70710677, %v9610_v0  ;;  %v4794_v54 = vpop.f32.mrb[95].mxu1  ;;  %v4803_v32 = vadd.f32 %v6519_v18, %v9560_v1  ;;  %v4966_v37 = vmul.f32 %v4934_v45, %v4838_v29 }
 0xf07   : > { %v4969_v25 = vmul.f32 %v4937_v38, %v4841_v17  ;;  %v4878_v57 = vmul.f32 0.70710677, %v9613_v42  ;;  %v4795_v9 = vadd.f32 %v9560_v1, %v4794_v54  ;;  %v4848_v54 = vmul.f32 0.5, %v9610_v0 }
 0xf08   : > { %v4967_v7 = vmul.f32 %v4935_v40, %v4839_v47  ;;  %7045 = verf.f32 %v4880_v33  ;;  %v4881_v6 = vmul.f32 0.70710677, %v4803_v32 }
 0xf09   : > { %v4991_v39 = vpack.c.bf16 %v4969_v25, %v4968_v46  ;;  %7047 = verf.f32 %v4878_v57  ;;  %v4879_v58 = vmul.f32 0.70710677, %v4795_v9  ;;  %v4846_v25 = vmul.f32 0.5, %v9613_v42 }
 0xf0a   : > { %v7038_v56 = vpop.eup %7037  ;;  %v4990_v3 = vpack.c.bf16 %v4967_v7, %v4966_v37  ;;  %7049 = verf.f32 %v4881_v6  ;;  %v4847_v57 = vmul.f32 0.5, %v4795_v9 }
 0xf0b   : > { %v7040_v21 = vpop.eup %7039  ;;  %v4940_v53 = vadd.f32 1.0, %v7038_v56  ;;  %v6522_v15 = vpop.f32.mrb[96].mxu1  ;;  %7051 = verf.f32 %v4879_v58 }
 0xf0c   : > { %v7042_v26 = vpop.eup %7041  ;;  %v4938_v60 = vadd.f32 1.0, %v7040_v21  ;;  %v4816_v63 = vadd.f32 %v6522_v15, %v9560_v1  ;;  %v4807_v30 = vpop.f32.mrb[97].mxu1  ;;  %6548 = vmatprep.mubr.msk.bf16.mxu0 %vm1518_vm1, %v4990_v3 }
 0xf0d   : > { %v7044_v28 = vpop.eup %7043  ;;  %v4941_v24 = vadd.f32 1.0, %v7042_v26  ;;  %v4808_v41 = vadd.f32 %v9560_v1, %v4807_v30  ;;  %v6523_v8 = vpop.f32.mrb[98].mxu1  ;;  %6549 = vmatmul.mubr.msk.bf16.gmra.mrb[76].mxu0 %vm1518_vm1, %v4991_v39  ;;  %v4972_v2 = vmul.f32 %v4940_v53, %v4844_v44 }
 0xf0e   : > { %v4939_v36 = vadd.f32 1.0, %v7044_v28  ;;  %v4884_v51 = vmul.f32 0.70710677, %v4816_v63  ;;  %v4810_v52 = vpop.f32.mrb[99].mxu1  ;;  %v4819_v20 = vadd.f32 %v6523_v8, %v9560_v1  ;;  %v4970_v10 = vmul.f32 %v4938_v60, %v4842_v11 }
 0xf0f   : > { %v4973_v50 = vmul.f32 %v4941_v24, %v4845_v59  ;;  %v4882_v45 = vmul.f32 0.70710677, %v4808_v41  ;;  %v4811_v27 = vadd.f32 %v9560_v1, %v4810_v52  ;;  %v4849_v1 = vmul.f32 0.5, %v4803_v32 }
 0xf10   : > { %v4971_v19 = vmul.f32 %v4939_v36, %v4843_v4  ;;  %7053 = verf.f32 %v4884_v51  ;;  %v4885_v17 = vmul.f32 0.70710677, %v4819_v20  ;;  %v4852_v32 = vmul.f32 0.5, %v4816_v63  ;;  %v9637_v63 = vld [vmem:[%s10214_s14 + $0x1] ss:$0 sm:$0xff] }
 0xf11   : > { %v4993_v22 = vpack.c.bf16 %v4973_v50, %v4972_v2  ;;  %7055 = verf.f32 %v4882_v45  ;;  %v4883_v23 = vmul.f32 0.70710677, %v4811_v27  ;;  %v4853_v30 = vmul.f32 0.5, %v4819_v20 }
 0xf12   : > { %v7046_v38 = vpop.eup %7045  ;;  %v4992_v18 = vpack.c.bf16 %v4971_v19, %v4970_v10  ;;  %7057 = verf.f32 %v4885_v17  ;;  %v4850_v42 = vmul.f32 0.5, %v4808_v41  ;;  %v4851_v9 = vmul.f32 0.5, %v4811_v27 }
 0xf13   : > { %v7048_v49 = vpop.eup %7047  ;;  %v4944_v29 = vadd.f32 1.0, %v7046_v38  ;;  %7059 = verf.f32 %v4883_v23 }
 0xf14   : > { %6552 = vmatprep.mubr.msk.bf16.mxu0 %vm1518_vm1, %v4992_v18  ;;  %v7050_v47 = vpop.eup %7049  ;;  %v4942_v40 = vadd.f32 1.0, %v7048_v49 }
 0xf15   : > { %6553 = vmatmul.mubr.msk.bf16.gmra.mrb[80].mxu0 %vm1518_vm1, %v4993_v22  ;;  %v7052_v33 = vpop.eup %7051  ;;  %v4945_v46 = vadd.f32 1.0, %v7050_v47  ;;  %v4976_v7 = vmul.f32 %v4944_v29, %v4848_v54 }
 0xf16   : > { %v4943_v37 = vadd.f32 1.0, %v7052_v33  ;;  %v4974_v6 = vmul.f32 %v4942_v40, %v4846_v25 }
 0xf17   : > { %v4977_v39 = vmul.f32 %v4945_v46, %v4849_v1 }
 0xf18   : > { %v4975_v56 = vmul.f32 %v4943_v37, %v4847_v57 }
 0xf19   : > { %v4995_v58 = vpack.c.bf16 %v4977_v39, %v4976_v7 }
 0xf1a   : > { %v7054_v3 = vpop.eup %7053  ;;  %v4994_v53 = vpack.c.bf16 %v4975_v56, %v4974_v6 }
 0xf1b   : > { %v7056_v21 = vpop.eup %7055  ;;  %v4948_v15 = vadd.f32 1.0, %v7054_v3 }
 0xf1c   : > { %v7058_v26 = vpop.eup %7057  ;;  %v4946_v60 = vadd.f32 1.0, %v7056_v21  ;;  %6556 = vmatprep.mubr.msk.bf16.mxu0 %vm1518_vm1, %v4994_v53 }
 0xf1d   : > { %v7060_v0 = vpop.eup %7059  ;;  %v4949_v28 = vadd.f32 1.0, %v7058_v26  ;;  %6557 = vmatmul.mubr.msk.bf16.gmra.mrb[84].mxu0 %vm1518_vm1, %v4995_v58  ;;  %v4980_v59 = vmul.f32 %v4948_v15, %v4852_v32 }
 0xf1e   : > { %v4947_v44 = vadd.f32 1.0, %v7060_v0  ;;  %v4978_v8 = vmul.f32 %v4946_v60, %v4850_v42 }
 0xf1f   : > { %v4981_v24 = vmul.f32 %v4949_v28, %v4853_v30 }
 0xf20   : > { %v4979_v11 = vmul.f32 %v4947_v44, %v4851_v9 }
 0xf21   : > { %v4997_v4 = vpack.c.bf16 %v4981_v24, %v4980_v59  ;;  %v10481_v24 = vld [vmem:[#allocation26_spill] sm:$0xff] }
 0xf22   : > { %v4996_v36 = vpack.c.bf16 %v4979_v11, %v4978_v8  ;;  %v10482_v11 = vld [vmem:[#allocation16_spill] sm:$0xff] }
 0xf24   : > { %6560 = vmatprep.mubr.msk.bf16.mxu0 %vm1518_vm1, %v4996_v36 }
 0xf25   : > { %6561 = vmatmul.mubr.msk.bf16.gmra.mrb[88].mxu0 %vm1518_vm1, %v4997_v4 }
 0xf96   : > { %v6534_v51 = vpop.f32.mrb[60].mxu0 }
 0xf97   : > { %v5130_v41 = vadd.f32 %v6534_v51, %v9637_v63  ;;  %v5121_v52 = vpop.f32.mrb[61].mxu0 }
 0xf98   : > { %v5122_v2 = vadd.f32 %v9637_v63, %v5121_v52  ;;  %v6535_v50 = vpop.f32.mrb[62].mxu0 }
 0xf99   : > { %v9642_v45 = vadd.f32 %v5130_v41, %v9071_v35  ;;  %v5133_v20 = vadd.f32 %v6535_v50, %v9637_v63  ;;  %v5124_v10 = vpop.f32.mrb[63].mxu0 }
 0xf9a   : > { %v5125_v19 = vadd.f32 %v9637_v63, %v5124_v10  ;;  %v9647_v27 = vadd.f32 %v5122_v2, %v9032_v55 }
 0xf9b   : > { %v9650_v22 = vadd.f32 %v5133_v20, %v9077_v31  ;;  %v5288_v17 = vsel %vm969_vm0, %v9642_v45, 0.0 }
 0xf9c   : > { %5289 = vadd.xlane.f32.xlu1 %v5288_v17  ;;  %v9655_v38 = vadd.f32 %v5125_v19, %v9029_v13  ;;  %v5282_v55 = vsel %vm969_vm0, %v9647_v27, 0.0 }
 0xf9d   : > { %v5291_v35 = vsel %vm969_vm0, %v9650_v22, 0.0 }
 0xf9e   : > { %5292 = vadd.xlane.f32.xlu0 %v5291_v35  ;;  %v6538_v18 = vpop.f32.mrb[64].mxu0  ;;  %v5285_v33 = vsel %vm969_vm0, %v9655_v38, 0.0  ;;  %v10484_v35 = vld [vmem:[#allocation11_spill] sm:$0xff] }
 0xf9f   : > { %v5146_v23 = vadd.f32 %v6538_v18, %v9637_v63  ;;  %v5137_v49 = vpop.f32.mrb[65].mxu0 }
 0xfa0   : > { %v5138_v31 = vadd.f32 %v9637_v63, %v5137_v49  ;;  %5283 = vadd.xlane.f32.xlu1 %v5282_v55  ;;  %v6539_v29 = vpop.f32.mrb[66].mxu0 }
 0xfa1   : > { %v9664_v47 = vadd.f32 %v5146_v23, %v9082_v12  ;;  %v5149_v13 = vadd.f32 %v6539_v29, %v9637_v63  ;;  %v5140_v40 = vpop.f32.mrb[67].mxu0 }
 0xfa2   : > { %v5141_v54 = vadd.f32 %v9637_v63, %v5140_v40  ;;  %5286 = vadd.xlane.f32.xlu0 %v5285_v33  ;;  %v9671_v1 = vadd.f32 %v5138_v31, %v9074_v14  ;;  %v10485_v31 = vld [vmem:[#allocation8_spill] sm:$0xff] }
 0xfa3   : > { %v9674_v46 = vadd.f32 %v5149_v13, %v9097_v62  ;;  %v5300_v25 = vsel %vm969_vm0, %v9664_v47, 0.0  ;;  %v10486_v13 = vld [vmem:[#allocation14_spill] sm:$0xff] }
 0xfa4   : > { %5301 = vadd.xlane.f32.xlu1 %v5300_v25  ;;  %v9679_v12 = vadd.f32 %v5141_v54, %v9087_v16  ;;  %v5294_v7 = vsel %vm969_vm0, %v9671_v1, 0.0  ;;  %v10487_v54 = vld [vmem:[#allocation6_spill] sm:$0xff] }
 0xfa5   : > { %v5303_v57 = vsel %vm969_vm0, %v9674_v46, 0.0 }
 0xfa6   : > { %5304 = vadd.xlane.f32.xlu0 %v5303_v57  ;;  %v6542_v37 = vpop.f32.mrb[68].mxu0  ;;  %v5297_v56 = vsel %vm969_vm0, %v9679_v12, 0.0 }
 0xfa7   : > { %v5162_v14 = vadd.f32 %v6542_v37, %v9637_v63  ;;  %v5153_v39 = vpop.f32.mrb[69].mxu0 }
 0xfa8   : > { %5295 = vadd.xlane.f32.xlu1 %v5294_v7  ;;  %v5154_v62 = vadd.f32 %v9637_v63, %v5153_v39  ;;  %v6543_v6 = vpop.f32.mrb[70].mxu0 }
 0xfa9   : > { %v9690_v16 = vadd.f32 %v5162_v14, %v9102_v61  ;;  %v5165_v3 = vadd.f32 %v6543_v6, %v9637_v63  ;;  %v5156_v58 = vpop.f32.mrb[71].mxu0 }
 0xfaa   : > { %5298 = vadd.xlane.f32.xlu0 %v5297_v56  ;;  %v5157_v21 = vadd.f32 %v9637_v63, %v5156_v58  ;;  %v9695_v53 = vadd.f32 %v5154_v62, %v9094_v34  ;;  %v10488_v56 = vld [vmem:[#allocation22_spill] sm:$0xff] }
 0xfab   : > { %v9698_v15 = vadd.f32 %v5165_v3, %v9118_v5  ;;  %v5312_v26 = vsel %vm969_vm0, %v9690_v16, 0.0 }
 0xfac   : > { %5313 = vadd.xlane.f32.xlu1 %v5312_v26  ;;  %v9703_v60 = vadd.f32 %v5157_v21, %v9110_v48  ;;  %v5306_v34 = vsel %vm969_vm0, %v9695_v53, 0.0 }
 0xfad   : > { %v5315_v61 = vsel %vm969_vm0, %v9698_v15, 0.0 }
 0xfae   : > { %5316 = vadd.xlane.f32.xlu0 %v5315_v61  ;;  %v6546_v0 = vpop.f32.mrb[72].mxu0  ;;  %v5309_v44 = vsel %vm969_vm0, %v9703_v60, 0.0 }
 0xfaf   : > { %v5178_v32 = vadd.f32 %v6546_v0, %v9637_v63  ;;  %v5169_v30 = vpop.f32.mrb[73].mxu0  ;;  %v10489_v0 = vld [vmem:[#allocation2_spill] sm:$0xff] }
 0xfb0   : > { %v5170_v5 = vadd.f32 %v9637_v63, %v5169_v30  ;;  %5307 = vadd.xlane.f32.xlu1 %v5306_v34  ;;  %v6547_v28 = vpop.f32.mrb[74].mxu0  ;;  %v10490_v30 = vld [vmem:[#allocation28_spill] sm:$0xff] }
 0xfb1   : > { %v9712_v42 = vadd.f32 %v5178_v32, %v9123_v43  ;;  %v5181_v48 = vadd.f32 %v6547_v28, %v9637_v63  ;;  %v5172_v9 = vpop.f32.mrb[75].mxu0  ;;  %v10483_v43 = vld [vmem:[#allocation13_spill] sm:$0xff]  ;;  %v10491_v28 = vld [vmem:[#allocation23_spill] sm:$0xff] }
 0xfb2   : > { %v5173_v59 = vadd.f32 %v9637_v63, %v5172_v9  ;;  %5310 = vadd.xlane.f32.xlu0 %v5309_v44  ;;  %v9719_v8 = vadd.f32 %v5170_v5, %v10481_v24 }
 0xfb3   : > { %v9722_v4 = vadd.f32 %v5181_v48, %v10482_v11  ;;  %v5324_v36 = vsel %vm969_vm0, %v9712_v42, 0.0 }
 0xfb4   : > { %5325 = vadd.xlane.f32.xlu1 %v5324_v36  ;;  %v9727_v51 = vadd.f32 %v5173_v59, %v10483_v43  ;;  %v5318_v52 = vsel %vm969_vm0, %v9719_v8, 0.0 }
 0xfb5   : > { %v5327_v41 = vsel %vm969_vm0, %v9722_v4, 0.0 }
 0xfb6   : > { %5328 = vadd.xlane.f32.xlu0 %v5327_v41  ;;  %v5321_v2 = vsel %vm969_vm0, %v9727_v51, 0.0 }
 0xfb8   : > { %5319 = vadd.xlane.f32.xlu1 %v5318_v52  ;;  %v10492_v52 = vld [vmem:[#allocation27_spill] sm:$0xff] }
 0xfba   : > { %5322 = vadd.xlane.f32.xlu0 %v5321_v2 }
 0xfe0   : > { %v6550_v50 = vpop.f32.mrb[76].mxu0 }
 0xfe1   : > { %v5194_v20 = vadd.f32 %v6550_v50, %v9637_v63  ;;  %v5185_v10 = vpop.f32.mrb[77].mxu0 }
 0xfe2   : > { %v5186_v19 = vadd.f32 %v9637_v63, %v5185_v10  ;;  %v6551_v17 = vpop.f32.mrb[78].mxu0 }
 0xfe3   : > { %v9738_v18 = vadd.f32 %v5194_v20, %v10484_v35  ;;  %v5197_v23 = vadd.f32 %v6551_v17, %v9637_v63  ;;  %v5188_v49 = vpop.f32.mrb[79].mxu0  ;;  %v10494_v35 = vld [vmem:[#allocation29_spill] sm:$0xff] }
 0xfe4   : > { %v5189_v55 = vadd.f32 %v9637_v63, %v5188_v49  ;;  %v9743_v29 = vadd.f32 %v5186_v19, %v10485_v31  ;;  %v10493_v19 = vld [vmem:[#allocation3_spill] sm:$0xff] }
 0xfe5   : > { %v9746_v40 = vadd.f32 %v5197_v23, %v10486_v13  ;;  %v5336_v33 = vsel %vm969_vm0, %v9738_v18, 0.0 }
 0xfe6   : > { %5337 = vadd.xlane.f32.xlu1 %v5336_v33  ;;  %v9751_v25 = vadd.f32 %v5189_v55, %v10487_v54  ;;  %v5330_v39 = vsel %vm969_vm0, %v9743_v29, 0.0  ;;  %v10495_v55 = vld [vmem:[#allocation24_spill] sm:$0xff] }
 0xfe7   : > { %v5339_v57 = vsel %vm969_vm0, %v9746_v40, 0.0 }
 0xfe8   : > { %5340 = vadd.xlane.f32.xlu0 %v5339_v57  ;;  %v6554_v37 = vpop.f32.mrb[80].mxu0  ;;  %v5333_v26 = vsel %vm969_vm0, %v9751_v25, 0.0 }
 0xfe9   : > { %v5210_v7 = vadd.f32 %v6554_v37, %v9637_v63  ;;  %v5201_v14 = vpop.f32.mrb[81].mxu0 }
 0xfea   : > { %v5202_v62 = vadd.f32 %v9637_v63, %v5201_v14  ;;  %5331 = vadd.xlane.f32.xlu1 %v5330_v39  ;;  %v6555_v6 = vpop.f32.mrb[82].mxu0 }
 0xfeb   : > { %v9760_v3 = vadd.f32 %v5210_v7, %v10488_v56  ;;  %v5213_v58 = vadd.f32 %v6555_v6, %v9637_v63  ;;  %v5204_v21 = vpop.f32.mrb[83].mxu0  ;;  %v10496_v6 = vld [vmem:[#allocation4_spill] sm:$0xff] }
 0xfec   : > { %v5205_v61 = vadd.f32 %v9637_v63, %v5204_v21  ;;  %5334 = vadd.xlane.f32.xlu0 %v5333_v26  ;;  %v9767_v32 = vadd.f32 %v5202_v62, %v10489_v0  ;;  %v10497_v26 = vld [vmem:[#allocation5_spill] sm:$0xff]  ;;  %v10498_v0 = vld [vmem:[#allocation7_spill] sm:$0xff] }
 0xfed   : > { %v9770_v34 = vadd.f32 %v5213_v58, %v10490_v30  ;;  %v5348_v5 = vsel %vm969_vm0, %v9760_v3, 0.0 }
 0xfee   : > { %5349 = vadd.xlane.f32.xlu1 %v5348_v5  ;;  %v9775_v48 = vadd.f32 %v5205_v61, %v10491_v28  ;;  %v5342_v59 = vsel %vm969_vm0, %v9767_v32, 0.0  ;;  %v10499_v28 = vld [vmem:[#allocation9_spill] sm:$0xff] }
 0xfef   : > { %v5351_v9 = vsel %vm969_vm0, %v9770_v34, 0.0 }
 0xff0   : > { %5352 = vadd.xlane.f32.xlu0 %v5351_v9  ;;  %v6558_v44 = vpop.f32.mrb[84].mxu0  ;;  %v5345_v41 = vsel %vm969_vm0, %v9775_v48, 0.0 }
 0xff1   : > { %v5226_v24 = vadd.f32 %v6558_v44, %v9637_v63  ;;  %v5217_v11 = vpop.f32.mrb[85].mxu0 }
 0xff2   : > { %5343 = vadd.xlane.f32.xlu1 %v5342_v59  ;;  %v5218_v36 = vadd.f32 %v9637_v63, %v5217_v11  ;;  %v6559_v43 = vpop.f32.mrb[86].mxu0 }
 0xff3   : > { %v9786_v2 = vadd.f32 %v5226_v24, %v10492_v52  ;;  %v5229_v50 = vadd.f32 %v6559_v43, %v9637_v63  ;;  %v5220_v20 = vpop.f32.mrb[87].mxu0 }
 0xff4   : > { %5346 = vadd.xlane.f32.xlu0 %v5345_v41  ;;  %v5221_v10 = vadd.f32 %v9637_v63, %v5220_v20  ;;  %v9791_v17 = vadd.f32 %v5218_v36, %v10493_v19 }
 0xff5   : > { %v9794_v23 = vadd.f32 %v5229_v50, %v10494_v35  ;;  %v5360_v49 = vsel %vm969_vm0, %v9786_v2, 0.0 }
 0xff6   : > { %5361 = vadd.xlane.f32.xlu1 %v5360_v49  ;;  %v9799_v31 = vadd.f32 %v5221_v10, %v10495_v55  ;;  %v5354_v57 = vsel %vm969_vm0, %v9791_v17, 0.0 }
 0xff7   : > { %v5363_v13 = vsel %vm969_vm0, %v9794_v23, 0.0 }
 0xff8   : > { %5364 = vadd.xlane.f32.xlu0 %v5363_v13  ;;  %v6562_v33 = vpop.f32.mrb[88].mxu0  ;;  %v5357_v62 = vsel %vm969_vm0, %v9799_v31, 0.0 }
 0xff9   : > { %v5233_v54 = vpop.f32.mrb[89].mxu0  ;;  %v5242_v37 = vadd.f32 %v6562_v33, %v9637_v63 }
 0xffa   : > { %v5234_v7 = vadd.f32 %v9637_v63, %v5233_v54  ;;  %5355 = vadd.xlane.f32.xlu1 %v5354_v57  ;;  %v6563_v14 = vpop.f32.mrb[90].mxu0 }
 0xffb   : > { %v5236_v39 = vpop.f32.mrb[91].mxu0  ;;  %v5245_v58 = vadd.f32 %v6563_v14, %v9637_v63  ;;  %v9815_v61 = vadd.f32 %v5242_v37, %v10497_v26 }
 0xffc   : > { %v9810_v56 = vadd.f32 %v5234_v7, %v10496_v6  ;;  %v5237_v21 = vadd.f32 %v9637_v63, %v5236_v39  ;;  %5358 = vadd.xlane.f32.xlu0 %v5357_v62 }
 0xffd   : > { %v9823_v9 = vadd.f32 %v5245_v58, %v10499_v28  ;;  %v5372_v63 = vsel %vm969_vm0, %v9815_v61, 0.0 }
 0xffe   : > { %v9818_v30 = vadd.f32 %v5237_v21, %v10498_v0  ;;  %v5366_v5 = vsel %vm969_vm0, %v9810_v56, 0.0 }
 0xfff   : > { %5367 = vadd.xlane.f32.xlu1 %v5366_v5  ;;  %v5375_v59 = vsel %vm969_vm0, %v9823_v9, 0.0 }
0x1000   : > { %v5369_v44 = vsel %vm969_vm0, %v9818_v30, 0.0 }
0x1001   : > { %5370 = vadd.xlane.f32.xlu0 %v5369_v44 }
0x1003   : > { %5373 = vadd.xlane.f32.xlu1 %v5372_v63 }
0x1005   : > { %5376 = vadd.xlane.f32.xlu0 %v5375_v59 }
0x1029   : > { %v5290_v24 = vpop.xlane.xlu1 %5289 }
0x102a   : > { %v5380_v11 = vmul.f32 0.03125, %v5290_v24 }
0x102b   : > { %v5293_v36 = vpop.xlane.xlu0 %5292 }
0x102c   : > { %v9832_v43 = vsub.f32 %v9642_v45, %v5380_v11  ;;  %v5381_v41 = vmul.f32 0.03125, %v5293_v36 }
0x102d   : > { %v5284_v52 = vpop.xlane.xlu1 %5283 }
0x102e   : > { %v9835_v50 = vsub.f32 %v9650_v22, %v5381_v41  ;;  %v5378_v20 = vmul.f32 0.03125, %v5284_v52  ;;  %v5444_v10 = vmul.f32 %v9832_v43, %v9832_v43 }
0x102f   : > { %v5287_v19 = vpop.xlane.xlu0 %5286 }
0x1030   : > { %v9840_v35 = vsub.f32 %v9647_v27, %v5378_v20  ;;  %v5379_v49 = vmul.f32 0.03125, %v5287_v19  ;;  %v5480_v55 = vsel %vm969_vm0, %v5444_v10, 0.0  ;;  %v5445_v45 = vmul.f32 %v9835_v50, %v9835_v50 }
0x1031   : > { %v5302_v13 = vpop.xlane.xlu1 %5301  ;;  %5481 = vadd.xlane.f32.xlu1 %v5480_v55 }
0x1032   : > { %v9846_v33 = vsub.f32 %v9655_v38, %v5379_v49  ;;  %v5384_v22 = vmul.f32 0.03125, %v5302_v13  ;;  %v5483_v54 = vsel %vm969_vm0, %v5445_v45, 0.0  ;;  %v5442_v57 = vmul.f32 %v9840_v35, %v9840_v35 }
0x1033   : > { %5484 = vadd.xlane.f32.xlu0 %v5483_v54  ;;  %v5305_v27 = vpop.xlane.xlu0 %5304 }
0x1034   : > { %v9852_v37 = vsub.f32 %v9664_v47, %v5384_v22  ;;  %v5385_v7 = vmul.f32 0.03125, %v5305_v27  ;;  %v5474_v14 = vsel %vm969_vm0, %v5442_v57, 0.0  ;;  %v5443_v39 = vmul.f32 %v9846_v33, %v9846_v33 }
0x1035   : > { %v5296_v62 = vpop.xlane.xlu1 %5295  ;;  %5475 = vadd.xlane.f32.xlu1 %v5474_v14 }
0x1036   : > { %v9858_v38 = vsub.f32 %v9674_v46, %v5385_v7  ;;  %v5382_v6 = vmul.f32 0.03125, %v5296_v62  ;;  %v5477_v58 = vsel %vm969_vm0, %v5443_v39, 0.0  ;;  %v5448_v21 = vmul.f32 %v9852_v37, %v9852_v37 }
0x1037   : > { %5478 = vadd.xlane.f32.xlu0 %v5477_v58  ;;  %v5299_v47 = vpop.xlane.xlu0 %5298 }
0x1038   : > { %v9864_v26 = vsub.f32 %v9671_v1, %v5382_v6  ;;  %v5383_v0 = vmul.f32 0.03125, %v5299_v47  ;;  %v5492_v5 = vsel %vm969_vm0, %v5448_v21, 0.0  ;;  %v5449_v28 = vmul.f32 %v9858_v38, %v9858_v38 }
0x1039   : > { %5493 = vadd.xlane.f32.xlu1 %v5492_v5  ;;  %v5314_v44 = vpop.xlane.xlu1 %5313 }
0x103a   : > { %v9870_v46 = vsub.f32 %v9679_v12, %v5383_v0  ;;  %v5495_v63 = vsel %vm969_vm0, %v5449_v28, 0.0  ;;  %v5446_v59 = vmul.f32 %v9864_v26, %v9864_v26  ;;  %v5388_v24 = vmul.f32 0.03125, %v5314_v44 }
0x103b   : > { %5496 = vadd.xlane.f32.xlu0 %v5495_v63  ;;  %v5317_v1 = vpop.xlane.xlu0 %5316 }
0x103c   : > { %v5486_v11 = vsel %vm969_vm0, %v5446_v59, 0.0  ;;  %v5447_v36 = vmul.f32 %v9870_v46, %v9870_v46  ;;  %v9879_v41 = vsub.f32 %v9690_v16, %v5388_v24  ;;  %v5389_v52 = vmul.f32 0.03125, %v5317_v1 }
0x103d   : > { %5487 = vadd.xlane.f32.xlu1 %v5486_v11  ;;  %v5308_v12 = vpop.xlane.xlu1 %5307 }
0x103e   : > { %v5489_v20 = vsel %vm969_vm0, %v5447_v36, 0.0  ;;  %v9883_v10 = vsub.f32 %v9698_v15, %v5389_v52  ;;  %v5386_v19 = vmul.f32 0.03125, %v5308_v12  ;;  %v5452_v49 = vmul.f32 %v9879_v41, %v9879_v41 }
0x103f   : > { %5490 = vadd.xlane.f32.xlu0 %v5489_v20  ;;  %v5311_v55 = vpop.xlane.xlu0 %5310 }
0x1040   : > { %v9888_v45 = vsub.f32 %v9695_v53, %v5386_v19  ;;  %v5387_v13 = vmul.f32 0.03125, %v5311_v55  ;;  %v5504_v16 = vsel %vm969_vm0, %v5452_v49, 0.0  ;;  %v5453_v22 = vmul.f32 %v9883_v10, %v9883_v10 }
0x1041   : > { %v5326_v54 = vpop.xlane.xlu1 %5325  ;;  %5505 = vadd.xlane.f32.xlu1 %v5504_v16 }
0x1042   : > { %v9894_v15 = vsub.f32 %v9703_v60, %v5387_v13  ;;  %v5392_v57 = vmul.f32 0.03125, %v5326_v54  ;;  %v5507_v27 = vsel %vm969_vm0, %v5453_v22, 0.0  ;;  %v5450_v7 = vmul.f32 %v9888_v45, %v9888_v45 }
0x1043   : > { %5508 = vadd.xlane.f32.xlu0 %v5507_v27  ;;  %v5329_v53 = vpop.xlane.xlu0 %5328 }
0x1044   : > { %v9900_v14 = vsub.f32 %v9712_v42, %v5392_v57  ;;  %v5393_v39 = vmul.f32 0.03125, %v5329_v53  ;;  %v5498_v62 = vsel %vm969_vm0, %v5450_v7, 0.0  ;;  %v5451_v6 = vmul.f32 %v9894_v15, %v9894_v15 }
0x1045   : > { %v5320_v58 = vpop.xlane.xlu1 %5319  ;;  %5499 = vadd.xlane.f32.xlu1 %v5498_v62 }
0x1046   : > { %v9906_v60 = vsub.f32 %v9722_v4, %v5393_v39  ;;  %v5390_v21 = vmul.f32 0.03125, %v5320_v58  ;;  %v5501_v47 = vsel %vm969_vm0, %v5451_v6, 0.0  ;;  %v5456_v0 = vmul.f32 %v9900_v14, %v9900_v14 }
0x1047   : > { %5502 = vadd.xlane.f32.xlu0 %v5501_v47  ;;  %v5323_v42 = vpop.xlane.xlu0 %5322 }
0x1048   : > { %v9912_v5 = vsub.f32 %v9719_v8, %v5390_v21  ;;  %v5391_v28 = vmul.f32 0.03125, %v5323_v42  ;;  %v5516_v44 = vsel %vm969_vm0, %v5456_v0, 0.0  ;;  %v5457_v63 = vmul.f32 %v9906_v60, %v9906_v60 }
0x1049   : > { %5517 = vadd.xlane.f32.xlu1 %v5516_v44 }
0x104a   : > { %v9918_v4 = vsub.f32 %v9727_v51, %v5391_v28  ;;  %v5519_v59 = vsel %vm969_vm0, %v5457_v63, 0.0  ;;  %v5454_v24 = vmul.f32 %v9912_v5, %v9912_v5 }
0x104b   : > { %5520 = vadd.xlane.f32.xlu0 %v5519_v59 }
0x104c   : > { %v5510_v1 = vsel %vm969_vm0, %v5454_v24, 0.0  ;;  %v5455_v8 = vmul.f32 %v9918_v4, %v9918_v4 }
0x104d   : > { %5511 = vadd.xlane.f32.xlu1 %v5510_v1 }
0x104e   : > { %v5513_v11 = vsel %vm969_vm0, %v5455_v8, 0.0 }
0x104f   : > { %5514 = vadd.xlane.f32.xlu0 %v5513_v11 }
0x1073   : > { %v5338_v36 = vpop.xlane.xlu1 %5337 }
0x1074   : > { %v5396_v52 = vmul.f32 0.03125, %v5338_v36 }
0x1075   : > { %v5341_v12 = vpop.xlane.xlu0 %5340 }
0x1076   : > { %v9928_v51 = vsub.f32 %v9738_v18, %v5396_v52  ;;  %v5397_v20 = vmul.f32 0.03125, %v5341_v12 }
0x1077   : > { %v5332_v19 = vpop.xlane.xlu1 %5331 }
0x1078   : > { %v9931_v49 = vsub.f32 %v9746_v40, %v5397_v20  ;;  %v5394_v55 = vmul.f32 0.03125, %v5332_v19  ;;  %v5460_v13 = vmul.f32 %v9928_v51, %v9928_v51 }
0x1079   : > { %v5335_v16 = vpop.xlane.xlu0 %5334 }
0x107a   : > { %v9936_v22 = vsub.f32 %v9743_v29, %v5394_v55  ;;  %v5395_v54 = vmul.f32 0.03125, %v5335_v16  ;;  %v5528_v57 = vsel %vm969_vm0, %v5460_v13, 0.0  ;;  %v5461_v18 = vmul.f32 %v9931_v49, %v9931_v49 }
0x107b   : > { %v5350_v27 = vpop.xlane.xlu1 %5349  ;;  %5529 = vadd.xlane.f32.xlu1 %v5528_v57 }
0x107c   : > { %v9942_v7 = vsub.f32 %v9751_v25, %v5395_v54  ;;  %v5400_v40 = vmul.f32 0.03125, %v5350_v27  ;;  %v5531_v53 = vsel %vm969_vm0, %v5461_v18, 0.0  ;;  %v5458_v39 = vmul.f32 %v9936_v22, %v9936_v22 }
0x107d   : > { %5532 = vadd.xlane.f32.xlu0 %v5531_v53  ;;  %v5353_v29 = vpop.xlane.xlu0 %5352 }
0x107e   : > { %v9948_v62 = vsub.f32 %v9760_v3, %v5400_v40  ;;  %v5401_v6 = vmul.f32 0.03125, %v5353_v29  ;;  %v5522_v58 = vsel %vm969_vm0, %v5458_v39, 0.0  ;;  %v5459_v21 = vmul.f32 %v9942_v7, %v9942_v7 }
0x107f   : > { %v5344_v47 = vpop.xlane.xlu1 %5343  ;;  %5523 = vadd.xlane.f32.xlu1 %v5522_v58 }
0x1080   : > { %v9954_v25 = vsub.f32 %v9770_v34, %v5401_v6  ;;  %v5398_v0 = vmul.f32 0.03125, %v5344_v47  ;;  %v5525_v42 = vsel %vm969_vm0, %v5459_v21, 0.0  ;;  %v5464_v28 = vmul.f32 %v9948_v62, %v9948_v62 }
0x1081   : > { %5526 = vadd.xlane.f32.xlu0 %v5525_v42  ;;  %v5347_v3 = vpop.xlane.xlu0 %5346 }
0x1082   : > { %v9960_v44 = vsub.f32 %v9767_v32, %v5398_v0  ;;  %v5399_v63 = vmul.f32 0.03125, %v5347_v3  ;;  %v5540_v59 = vsel %vm969_vm0, %v5464_v28, 0.0  ;;  %v5465_v24 = vmul.f32 %v9954_v25, %v9954_v25 }
0x1083   : > { %5541 = vadd.xlane.f32.xlu1 %v5540_v59  ;;  %v5362_v1 = vpop.xlane.xlu1 %5361 }
0x1084   : > { %v9966_v34 = vsub.f32 %v9775_v48, %v5399_v63  ;;  %v5543_v8 = vsel %vm969_vm0, %v5465_v24, 0.0  ;;  %v5462_v11 = vmul.f32 %v9960_v44, %v9960_v44  ;;  %v5404_v36 = vmul.f32 0.03125, %v5362_v1 }
0x1085   : > { %5544 = vadd.xlane.f32.xlu0 %v5543_v8  ;;  %v5365_v32 = vpop.xlane.xlu0 %5364 }
0x1086   : > { %v5534_v52 = vsel %vm969_vm0, %v5462_v11, 0.0  ;;  %v5463_v12 = vmul.f32 %v9966_v34, %v9966_v34  ;;  %v9975_v20 = vsub.f32 %v9786_v2, %v5404_v36  ;;  %v5405_v19 = vmul.f32 0.03125, %v5365_v32 }
0x1087   : > { %5535 = vadd.xlane.f32.xlu1 %v5534_v52  ;;  %v5356_v48 = vpop.xlane.xlu1 %5355 }
0x1088   : > { %v5537_v55 = vsel %vm969_vm0, %v5463_v12, 0.0  ;;  %v9979_v13 = vsub.f32 %v9794_v23, %v5405_v19  ;;  %v5402_v16 = vmul.f32 0.03125, %v5356_v48  ;;  %v5468_v54 = vmul.f32 %v9975_v20, %v9975_v20  ;;  %v5942_v12 = vld [vmem:[%s10217_s17 + $0x8] sm:$0xff] }
0x1089   : > { %5538 = vadd.xlane.f32.xlu0 %v5537_v55  ;;  %v5359_v57 = vpop.xlane.xlu0 %5358 }
0x108a   : > { %v9984_v18 = vsub.f32 %v9791_v17, %v5402_v16  ;;  %v5403_v27 = vmul.f32 0.03125, %v5359_v57  ;;  %v5552_v2 = vsel %vm969_vm0, %v5468_v54, 0.0  ;;  %v5469_v40 = vmul.f32 %v9979_v13, %v9979_v13 }
0x108b   : > { %5553 = vadd.xlane.f32.xlu1 %v5552_v2 }
0x108c   : > { %v9990_v53 = vsub.f32 %v9799_v31, %v5403_v27  ;;  %v5368_v23 = vpop.xlane.xlu1 %5367  ;;  %v5555_v39 = vsel %vm969_vm0, %v5469_v40, 0.0  ;;  %v5466_v29 = vmul.f32 %v9984_v18, %v9984_v18 }
0x108d   : > { %v5406_v6 = vmul.f32 0.03125, %v5368_v23  ;;  %5556 = vadd.xlane.f32.xlu0 %v5555_v39 }
0x108e   : > { %v5371_v17 = vpop.xlane.xlu0 %5370  ;;  %v5546_v58 = vsel %vm969_vm0, %v5466_v29, 0.0  ;;  %v5467_v21 = vmul.f32 %v9990_v53, %v9990_v53 }
0x108f   : > { %v9999_v47 = vsub.f32 %v9810_v56, %v5406_v6  ;;  %v5407_v0 = vmul.f32 0.03125, %v5371_v17  ;;  %5547 = vadd.xlane.f32.xlu1 %v5546_v58 }
0x1090   : > { %v5374_v31 = vpop.xlane.xlu1 %5373  ;;  %v5549_v42 = vsel %vm969_vm0, %v5467_v21, 0.0 }
0x1091   : > { %v10003_v28 = vsub.f32 %v9818_v30, %v5407_v0  ;;  %v5408_v3 = vmul.f32 0.03125, %v5374_v31  ;;  %5550 = vadd.xlane.f32.xlu0 %v5549_v42  ;;  %v5470_v63 = vmul.f32 %v9999_v47, %v9999_v47 }
0x1092   : > { %v5377_v59 = vpop.xlane.xlu0 %5376 }
0x1093   : > { %v10008_v24 = vsub.f32 %v9815_v61, %v5408_v3  ;;  %v5409_v1 = vmul.f32 0.03125, %v5377_v59  ;;  %v5558_v56 = vsel %vm969_vm0, %v5470_v63, 0.0  ;;  %v5471_v8 = vmul.f32 %v10003_v28, %v10003_v28 }
0x1094   : > { %5559 = vadd.xlane.f32.xlu1 %v5558_v56 }
0x1095   : > { %v10014_v11 = vsub.f32 %v9823_v9, %v5409_v1  ;;  %v5561_v30 = vsel %vm969_vm0, %v5471_v8, 0.0  ;;  %v5472_v36 = vmul.f32 %v10008_v24, %v10008_v24  ;;  %v5941_v9 = vld [vmem:[%s10217_s17] sm:$0xff]  ;;  %v5943_v8 = vld [vmem:[%s10217_s17 + $0x10] sm:$0xff] }
0x1096   : > { %5562 = vadd.xlane.f32.xlu0 %v5561_v30  ;;  %v6575_v19 = vpack.c.bf16 %v5942_v12, %v5941_v9  ;;  %v5944_v30 = vld [vmem:[%s10217_s17 + $0x18] sm:$0xff] }
0x1097   : > { %v5564_v32 = vsel %vm969_vm0, %v5472_v36, 0.0  ;;  %v5473_v61 = vmul.f32 %v10014_v11, %v10014_v11  ;;  %v6579_v36 = vpack.c.bf16 %v5944_v30, %v5943_v8 }
0x1098   : > { %5565 = vadd.xlane.f32.xlu1 %v5564_v32  ;;  %6576 = vmatprep.subr.bf16.mxu1 %v6575_v19 }
0x1099   : > { %v5567_v52 = vsel %vm969_vm0, %v5473_v61, 0.0  ;;  %6578 = vmatpush3.bf16.msra.mxu1 %v6575_v19 }
0x109a   : > { %5568 = vadd.xlane.f32.xlu0 %v5567_v52  ;;  %6580 = vmatprep.subr.bf16.mxu1 %v6579_v36 }
0x109d   : > { %6582 = vmatpush3.bf16.msra.mxu1 %v6579_v36 }
0x10be   : > { %v5482_v48 = vpop.xlane.xlu1 %5481 }
0x10bf   : > { %v5572_v55 = vmul.f32 0.03125, %v5482_v48 }
0x10c0   : > { %v5485_v16 = vpop.xlane.xlu0 %5484 }
0x10c1   : > { %v5573_v54 = vmul.f32 0.03125, %v5485_v16  ;;  %v5604_v27 = vadd.f32 1e-05, %v5572_v55 }
0x10c2   : > { %v5476_v57 = vpop.xlane.xlu1 %5475 }
0x10c3   : > { %v5605_v2 = vadd.f32 1e-05, %v5573_v54  ;;  %v5570_v40 = vmul.f32 0.03125, %v5476_v57 }
0x10c4   : > { %v5479_v23 = vpop.xlane.xlu0 %5478 }
0x10c5   : > { %v5602_v39 = vadd.f32 1e-05, %v5570_v40  ;;  %v5571_v29 = vmul.f32 0.03125, %v5479_v23  ;;  %7061 = vrsqrt.f32 %v5605_v2  ;;  %v10041_v23 = vld [vmem:[%s10215_s15] ss:$0 sm:$0xff] }
0x10c6   : > { %v5494_v6 = vpop.xlane.xlu1 %5493  ;;  %7063 = vrsqrt.f32 %v5604_v27 }
0x10c7   : > { %v5603_v17 = vadd.f32 1e-05, %v5571_v29  ;;  %v5576_v58 = vmul.f32 0.03125, %v5494_v6  ;;  %7065 = vrsqrt.f32 %v5602_v39 }
0x10c8   : > { %v5497_v21 = vpop.xlane.xlu0 %5496 }
0x10c9   : > { %7067 = vrsqrt.f32 %v5603_v17  ;;  %v5577_v0 = vmul.f32 0.03125, %v5497_v21  ;;  %v5608_v31 = vadd.f32 1e-05, %v5576_v58 }
0x10ca   : > { %v5488_v42 = vpop.xlane.xlu1 %5487 }
0x10cb   : > { %v5609_v3 = vadd.f32 1e-05, %v5577_v0  ;;  %v5574_v63 = vmul.f32 0.03125, %v5488_v42 }
0x10cc   : > { %v5491_v59 = vpop.xlane.xlu0 %5490 }
0x10cd   : > { %7069 = vrsqrt.f32 %v5609_v3  ;;  %v5606_v1 = vadd.f32 1e-05, %v5574_v63  ;;  %v5575_v56 = vmul.f32 0.03125, %v5491_v59 }
0x10ce   : > { %7071 = vrsqrt.f32 %v5608_v31  ;;  %v5506_v61 = vpop.xlane.xlu1 %5505 }
0x10cf   : > { %7073 = vrsqrt.f32 %v5606_v1  ;;  %v5607_v32 = vadd.f32 1e-05, %v5575_v56  ;;  %v7062_v52 = vpop.eup %7061  ;;  %v5580_v9 = vmul.f32 0.03125, %v5506_v61  ;;  %v10051_v1 = vld [vmem:[%s10216_s16] ss:$0 sm:$0xff] }
0x10d0   : > { %v7064_v12 = vpop.eup %7063  ;;  %v5509_v19 = vpop.xlane.xlu0 %5508  ;;  %v5669_v54 = vmul.f32 %v7062_v52, %v9835_v50 }
0x10d1   : > { %7075 = vrsqrt.f32 %v5607_v32  ;;  %v7066_v48 = vpop.eup %7065  ;;  %v5612_v55 = vadd.f32 1e-05, %v5580_v9  ;;  %v5581_v57 = vmul.f32 0.03125, %v5509_v19  ;;  %v5668_v2 = vmul.f32 %v7064_v12, %v9832_v43 }
0x10d2   : > { %v5500_v27 = vpop.xlane.xlu1 %5499  ;;  %v5666_v39 = vmul.f32 %v7066_v48, %v9840_v35  ;;  %v5707_v50 = vmul.f32 %v10041_v23, %v5669_v54 }
0x10d3   : > { %v7068_v16 = vpop.eup %7067  ;;  %7077 = vrsqrt.f32 %v5612_v55  ;;  %v5613_v29 = vadd.f32 1e-05, %v5581_v57  ;;  %v5578_v6 = vmul.f32 0.03125, %v5500_v27 }
0x10d4   : > { %v5667_v40 = vmul.f32 %v7068_v16, %v9846_v33  ;;  %v5503_v17 = vpop.xlane.xlu0 %5502  ;;  %v5706_v33 = vmul.f32 %v10041_v23, %v5668_v2  ;;  %v5704_v63 = vmul.f32 %v10041_v23, %v5666_v39  ;;  %v5745_v32 = vadd.f32 %v10051_v1, %v5707_v50 }
0x10d5   : > { %7079 = vrsqrt.f32 %v5613_v29  ;;  %v5610_v21 = vadd.f32 1e-05, %v5578_v6  ;;  %v5579_v0 = vmul.f32 0.03125, %v5503_v17 }
0x10d6   : > { %v5518_v43 = vpop.xlane.xlu1 %5517  ;;  %v5705_v42 = vmul.f32 %v10041_v23, %v5667_v40  ;;  %v5744_v55 = vadd.f32 %v10051_v1, %v5706_v33  ;;  %v5784_v27 = vsel %vm969_vm0, %v5745_v32, 0.0 }
0x10d7   : > { %v7070_v58 = vpop.eup %7069  ;;  %7081 = vrsqrt.f32 %v5610_v21  ;;  %v5611_v35 = vadd.f32 1e-05, %v5579_v0  ;;  %v5584_v59 = vmul.f32 0.03125, %v5518_v43 }
0x10d8   : > { %v7072_v31 = vpop.eup %7071  ;;  %v5673_v56 = vmul.f32 %v7070_v58, %v9858_v38  ;;  %v5521_v30 = vpop.xlane.xlu0 %5520  ;;  %v5743_v12 = vadd.f32 %v10051_v1, %v5705_v42  ;;  %v5742_v38 = vadd.f32 %v10051_v1, %v5704_v63  ;;  %v5783_v58 = vsel %vm969_vm0, %v5744_v55, 0.0 }
0x10d9   : > { %v7074_v3 = vpop.eup %7073  ;;  %v5672_v61 = vmul.f32 %v7072_v31, %v9852_v37  ;;  %7083 = vrsqrt.f32 %v5611_v35  ;;  %v5616_v52 = vadd.f32 1e-05, %v5584_v59 }
0x10da   : > { %v5670_v8 = vmul.f32 %v7074_v3, %v9864_v26  ;;  %v5512_v9 = vpop.xlane.xlu1 %5511  ;;  %v5585_v26 = vmul.f32 0.03125, %v5521_v30  ;;  %v5711_v16 = vmul.f32 %v10041_v23, %v5673_v56  ;;  %v5775_v39 = vsel %vm969_vm0, %v5743_v12, 0.0 }
0x10db   : > { %v7076_v36 = vpop.eup %7075  ;;  %7085 = vrsqrt.f32 %v5616_v52  ;;  %v5582_v37 = vmul.f32 0.03125, %v5512_v9  ;;  %v5710_v2 = vmul.f32 %v10041_v23, %v5672_v61  ;;  %v5774_v50 = vsel %vm969_vm0, %v5742_v38, 0.0 }
0x10dc   : > { %v5708_v19 = vmul.f32 %v10041_v23, %v5670_v8  ;;  %v5671_v48 = vmul.f32 %v7076_v36, %v9870_v46  ;;  %v5617_v40 = vadd.f32 1e-05, %v5585_v26  ;;  %v5515_v0 = vpop.xlane.xlu0 %5514  ;;  %v5749_v43 = vadd.f32 %v10051_v1, %v5711_v16 }
0x10dd   : > { %v7078_v57 = vpop.eup %7077  ;;  %v5614_v6 = vadd.f32 1e-05, %v5582_v37  ;;  %v5785_v3 = vadd.f32 %v5784_v27, %v5783_v58  ;;  %v5776_v63 = vadd.f32 %v5775_v39, %v5774_v50  ;;  %v5748_v35 = vadd.f32 %v10051_v1, %v5710_v2 }
0x10de   : > { %v5709_v54 = vmul.f32 %v10041_v23, %v5671_v48  ;;  %v5746_v46 = vadd.f32 %v10051_v1, %v5708_v19  ;;  %v5676_v21 = vmul.f32 %v7078_v57, %v9879_v41  ;;  %7087 = vrsqrt.f32 %v5617_v40 }
0x10df   : > { %v7080_v17 = vpop.eup %7079  ;;  %7089 = vrsqrt.f32 %v5614_v6  ;;  %v5583_v8 = vmul.f32 0.03125, %v5515_v0  ;;  %v5802_v61 = vsel %vm969_vm0, %v5749_v43, 0.0  ;;  %v5786_v12 = vrot.slane %v5785_v3, 4 }
0x10e0   : > { %v5747_v29 = vadd.f32 %v10051_v1, %v5709_v54  ;;  %v5677_v33 = vmul.f32 %v7080_v17, %v9883_v10  ;;  %v5792_v59 = vsel %vm969_vm0, %v5746_v46, 0.0  ;;  %v5714_v32 = vmul.f32 %v10041_v23, %v5676_v21 }
0x10e1   : > { %v7082_v42 = vpop.eup %7081  ;;  %v5801_v19 = vsel %vm969_vm0, %v5748_v35, 0.0  ;;  %v5615_v55 = vadd.f32 1e-05, %v5583_v8  ;;  %v5777_v38 = vrot.slane %v5776_v63, 4  ;;  %v5787_v40 = vadd.f32 %v5786_v12, %v5785_v3 }
0x10e2   : > { %v5793_v31 = vsel %vm969_vm0, %v5747_v29, 0.0  ;;  %v5715_v56 = vmul.f32 %v10041_v23, %v5677_v33  ;;  %v5674_v41 = vmul.f32 %v7082_v42, %v9888_v45  ;;  %v5803_v54 = vadd.f32 %v5802_v61, %v5801_v19 }
0x10e3   : > { %v7084_v30 = vpop.eup %7083  ;;  %v5794_v36 = vadd.f32 %v5793_v31, %v5792_v59  ;;  %v5752_v57 = vadd.f32 %v10051_v1, %v5714_v32  ;;  %7091 = vrsqrt.f32 %v5615_v55  ;;  %v5778_v29 = vadd.f32 %v5777_v38, %v5776_v63 }
0x10e4   : > { %v5712_v10 = vmul.f32 %v10041_v23, %v5674_v41  ;;  %v5675_v52 = vmul.f32 %v7084_v30, %v9894_v15  ;;  %v5753_v48 = vadd.f32 %v10051_v1, %v5715_v56  ;;  %v5804_v58 = vrot.slane %v5803_v54, 4 }
0x10e5   : > { %v7086_v9 = vpop.eup %7085  ;;  %v5795_v37 = vrot.slane %v5794_v36, 4  ;;  %v5819_v21 = vsel %vm969_vm0, %v5752_v57, 0.0  ;;  %v5779_v63 = vrot.slane %v5778_v29, 2  ;;  %v5788_v59 = vrot.slane %v5787_v40, 2 }
0x10e6   : > { %v5750_v45 = vadd.f32 %v10051_v1, %v5712_v10  ;;  %v5713_v26 = vmul.f32 %v10041_v23, %v5675_v52  ;;  %v5680_v16 = vmul.f32 %v7086_v9, %v9900_v14  ;;  %v5820_v39 = vsel %vm969_vm0, %v5753_v48, 0.0 }
0x10e7   : > { %v5796_v50 = vadd.f32 %v5795_v37, %v5794_v36  ;;  %v5821_v43 = vadd.f32 %v5820_v39, %v5819_v21  ;;  %v5805_v56 = vadd.f32 %v5804_v58, %v5803_v54  ;;  %v5780_v52 = vadd.f32 %v5779_v63, %v5778_v29 }
0x10e8   : > { %v5751_v15 = vadd.f32 %v10051_v1, %v5713_v26  ;;  %v5718_v27 = vmul.f32 %v10041_v23, %v5680_v16  ;;  %v7088_v2 = vpop.eup %7087  ;;  %v5810_v6 = vsel %vm969_vm0, %v5750_v45, 0.0  ;;  %v5789_v9 = vadd.f32 %v5788_v59, %v5787_v40 }
0x10e9   : > { %v7090_v46 = vpop.eup %7089  ;;  %v5681_v14 = vmul.f32 %v7088_v2, %v9906_v60  ;;  %v5797_v41 = vrot.slane %v5796_v50, 2  ;;  %v5822_v8 = vrot.slane %v5821_v43, 4  ;;  %v5806_v55 = vrot.slane %v5805_v56, 2 }
0x10ea   : > { %v5811_v17 = vsel %vm969_vm0, %v5751_v15, 0.0  ;;  %v5756_v31 = vadd.f32 %v10051_v1, %v5718_v27  ;;  %v5678_v42 = vmul.f32 %v7090_v46, %v9912_v5  ;;  %v5781_v16 = vrot.slane %v5780_v52, 1 }
0x10eb   : > { %v5812_v0 = vadd.f32 %v5811_v17, %v5810_v6  ;;  %v5719_v33 = vmul.f32 %v10041_v23, %v5681_v14  ;;  %v5798_v12 = vadd.f32 %v5797_v41, %v5796_v50  ;;  %v5823_v26 = vadd.f32 %v5822_v8, %v5821_v43 }
0x10ec   : > { %v5837_v30 = vsel %vm969_vm0, %v5756_v31, 0.0  ;;  %v5716_v32 = vmul.f32 %v10041_v23, %v5678_v42  ;;  %v5790_v57 = vrot.slane %v5789_v9, 1  ;;  %v5807_v40 = vadd.f32 %v5806_v55, %v5805_v56 }
0x10ed   : > { %v5813_v3 = vrot.slane %v5812_v0, 4  ;;  %v5757_v35 = vadd.f32 %v10051_v1, %v5719_v33  ;;  %v7092_v61 = vpop.eup %7091  ;;  %v5799_v15 = vrot.slane %v5798_v12, 1  ;;  %v5824_v39 = vrot.slane %v5823_v26, 2 }
0x10ee   : > { %v5679_v5 = vmul.f32 %v7092_v61, %v9918_v4  ;;  %v5754_v38 = vadd.f32 %v10051_v1, %v5716_v32  ;;  %v5782_v29 = vadd.f32 %v5781_v16, %v5780_v52  ;;  %v5791_v50 = vadd.f32 %v5790_v57, %v5789_v9 }
0x10ef   : > { %v5814_v60 = vadd.f32 %v5813_v3, %v5812_v0  ;;  %v5838_v36 = vsel %vm969_vm0, %v5757_v35, 0.0  ;;  %v5800_v17 = vadd.f32 %v5799_v15, %v5798_v12  ;;  %v5808_v21 = vrot.slane %v5807_v40, 1 }
0x10f0   : > { %v5839_v10 = vadd.f32 %v5838_v36, %v5837_v30  ;;  %v5717_v45 = vmul.f32 %v10041_v23, %v5679_v5  ;;  %v5828_v2 = vsel %vm969_vm0, %v5754_v38, 0.0  ;;  %v5825_v0 = vadd.f32 %v5824_v39, %v5823_v26 }
0x10f1   : > { %v5815_v19 = vrot.slane %v5814_v60, 2  ;;  %v5919_v33 = vsel %vm5918_vm4, %v5782_v29, %v5791_v50  ;;  %v5809_v35 = vadd.f32 %v5808_v21, %v5807_v40 }
0x10f2   : > { %v5840_v48 = vrot.slane %v5839_v10, 4  ;;  %v5755_v54 = vadd.f32 %v10051_v1, %v5717_v45  ;;  %v5921_v63 = vsel %vm5920_vm5, %v5919_v33, %v5800_v17  ;;  %v5826_v59 = vrot.slane %v5825_v0, 1 }
0x10f3   : > { %v5816_v27 = vadd.f32 %v5815_v19, %v5814_v60  ;;  %v5923_v60 = vsel %vm5922_vm6, %v5921_v63, %v5809_v35 }
0x10f4   : > { %v5841_v37 = vadd.f32 %v5840_v48, %v5839_v10  ;;  %v5829_v4 = vsel %vm969_vm0, %v5755_v54, 0.0  ;;  %v5827_v36 = vadd.f32 %v5826_v59, %v5825_v0 }
0x10f5   : > { %v5830_v46 = vadd.f32 %v5829_v4, %v5828_v2  ;;  %v5817_v14 = vrot.slane %v5816_v27, 1 }
0x10f6   : > { %v5842_v6 = vrot.slane %v5841_v37, 2 }
0x10f7   : > { %v5831_v58 = vrot.slane %v5830_v46, 4  ;;  %v5818_v42 = vadd.f32 %v5817_v14, %v5816_v27 }
0x10f8   : > { %v5843_v31 = vadd.f32 %v5842_v6, %v5841_v37 }
0x10f9   : > { %v5832_v43 = vadd.f32 %v5831_v58, %v5830_v46  ;;  %v5925_v30 = vsel %vm5924_vm7, %v5923_v60, %v5818_v42 }
0x10fa   : > { %v5844_v41 = vrot.slane %v5843_v31, 1  ;;  %v5927_v52 = vsel %vm5926_vm8, %v5925_v30, %v5827_v36 }
0x10fb   : > { %v5833_v3 = vrot.slane %v5832_v43, 2 }
0x10fc   : > { %v5845_v10 = vadd.f32 %v5844_v41, %v5843_v31 }
0x10fd   : > { %v5834_v56 = vadd.f32 %v5833_v3, %v5832_v43 }
0x10ff   : > { %v5835_v8 = vrot.slane %v5834_v56, 1 }
0x1101   : > { %v5836_v32 = vadd.f32 %v5835_v8, %v5834_v56 }
0x1103   : > { %v5929_v5 = vsel %vm5928_vm9, %v5927_v52, %v5836_v32 }
0x1104   : > { %v5931_v12 = vsel %vm5930_vm10, %v5929_v5, %v5845_v10 }
0x1105   : > { %v5939_v48 = vmul.f32 0.0625, %v5931_v12 }
0x1107   : > { %6572 = vmatprep.mubr.msk.f32.mxu1 %vm969_vm0, %v5939_v48 }
0x1108   : > { %v5530_v61 = vpop.xlane.xlu1 %5529 }
0x1109   : > { %v5588_v55 = vmul.f32 0.03125, %v5530_v61 }
0x110a   : > { %v5533_v9 = vpop.xlane.xlu0 %5532 }
0x110b   : > { %v5589_v19 = vmul.f32 0.03125, %v5533_v9  ;;  %v5620_v57 = vadd.f32 1e-05, %v5588_v55 }
0x110c   : > { %v5524_v38 = vpop.xlane.xlu1 %5523 }
0x110d   : > { %v5621_v45 = vadd.f32 1e-05, %v5589_v19  ;;  %v5586_v26 = vmul.f32 0.03125, %v5524_v38 }
0x110e   : > { %v5527_v16 = vpop.xlane.xlu0 %5526 }
0x110f   : > { %v5618_v54 = vadd.f32 1e-05, %v5586_v26  ;;  %v5587_v37 = vmul.f32 0.03125, %v5527_v16  ;;  %7093 = vrsqrt.f32 %v5621_v45 }
0x1110   : > { %v5542_v15 = vpop.xlane.xlu1 %5541 }
0x1111   : > { %v5619_v27 = vadd.f32 1e-05, %v5587_v37  ;;  %7095 = vrsqrt.f32 %v5618_v54  ;;  %v5592_v2 = vmul.f32 0.03125, %v5542_v15 }
0x1112   : > { %v5545_v4 = vpop.xlane.xlu0 %5544 }
0x1113   : > { %7097 = vrsqrt.f32 %v5619_v27  ;;  %v5593_v40 = vmul.f32 0.03125, %v5545_v4  ;;  %v5624_v6 = vadd.f32 1e-05, %v5592_v2 }
0x1114   : > { %7099 = vrsqrt.f32 %v5620_v57  ;;  %v5536_v39 = vpop.xlane.xlu1 %5535 }
0x1115   : > { %v5625_v46 = vadd.f32 1e-05, %v5593_v40  ;;  %v5590_v29 = vmul.f32 0.03125, %v5536_v39 }
0x1116   : > { %v5539_v17 = vpop.xlane.xlu0 %5538 }
0x1117   : > { %v5622_v14 = vadd.f32 1e-05, %v5590_v29  ;;  %v5591_v58 = vmul.f32 0.03125, %v5539_v17  ;;  %7101 = vrsqrt.f32 %v5625_v46 }
0x1118   : > { %v5554_v21 = vpop.xlane.xlu1 %5553 }
0x1119   : > { %7103 = vrsqrt.f32 %v5622_v14  ;;  %v5623_v50 = vadd.f32 1e-05, %v5591_v58  ;;  %v5596_v0 = vmul.f32 0.03125, %v5554_v21  ;;  %v7094_v43 = vpop.eup %7093 }
0x111a   : > { %7105 = vrsqrt.f32 %v5624_v6  ;;  %v5557_v31 = vpop.xlane.xlu0 %5556  ;;  %v5685_v41 = vmul.f32 %v7094_v43, %v9931_v49 }
0x111b   : > { %7107 = vrsqrt.f32 %v5623_v50  ;;  %v7096_v33 = vpop.eup %7095  ;;  %v5628_v42 = vadd.f32 1e-05, %v5596_v0  ;;  %v5597_v63 = vmul.f32 0.03125, %v5557_v31 }
0x111c   : > { %v5548_v35 = vpop.xlane.xlu1 %5547  ;;  %v5682_v36 = vmul.f32 %v7096_v33, %v9936_v22 }
0x111d   : > { %v7098_v3 = vpop.eup %7097  ;;  %7109 = vrsqrt.f32 %v5628_v42  ;;  %v5629_v60 = vadd.f32 1e-05, %v5597_v63  ;;  %v5594_v8 = vmul.f32 0.03125, %v5548_v35 }
0x111e   : > { %v7100_v59 = vpop.eup %7099  ;;  %v5683_v56 = vmul.f32 %v7098_v3, %v9942_v7  ;;  %v5551_v30 = vpop.xlane.xlu0 %5550  ;;  %v5723_v7 = vmul.f32 %v10041_v23, %v5685_v41  ;;  %v5720_v55 = vmul.f32 %v10041_v23, %v5682_v36 }
0x111f   : > { %v5684_v32 = vmul.f32 %v7100_v59, %v9928_v51  ;;  %7111 = vrsqrt.f32 %v5629_v60  ;;  %v5626_v61 = vadd.f32 1e-05, %v5594_v8  ;;  %v5595_v10 = vmul.f32 0.03125, %v5551_v30 }
0x1120   : > { %v5721_v5 = vmul.f32 %v10041_v23, %v5683_v56  ;;  %v5761_v27 = vadd.f32 %v10051_v1, %v5723_v7  ;;  %v5758_v4 = vadd.f32 %v10051_v1, %v5720_v55 }
0x1121   : > { %v7102_v52 = vpop.eup %7101  ;;  %v5560_v9 = vpop.xlane.xlu1 %5559  ;;  %7113 = vrsqrt.f32 %v5626_v61  ;;  %v5627_v49 = vadd.f32 1e-05, %v5595_v10  ;;  %v5722_v45 = vmul.f32 %v10041_v23, %v5684_v32 }
0x1122   : > { %v5598_v19 = vmul.f32 0.03125, %v5560_v9  ;;  %v5689_v26 = vmul.f32 %v7102_v52, %v9954_v25  ;;  %v5759_v54 = vadd.f32 %v10051_v1, %v5721_v5  ;;  %v5856_v50 = vsel %vm969_vm0, %v5761_v27, 0.0 }
0x1123   : > { %v7104_v12 = vpop.eup %7103  ;;  %v5563_v38 = vpop.xlane.xlu0 %5562  ;;  %7115 = vrsqrt.f32 %v5627_v49  ;;  %v5760_v46 = vadd.f32 %v10051_v1, %v5722_v45  ;;  %v5846_v31 = vsel %vm969_vm0, %v5758_v4, 0.0 }
0x1124   : > { %v7106_v48 = vpop.eup %7105  ;;  %v5686_v22 = vmul.f32 %v7104_v12, %v9960_v44  ;;  %v5630_v16 = vadd.f32 1e-05, %v5598_v19  ;;  %v5599_v44 = vmul.f32 0.03125, %v5563_v38  ;;  %v5727_v29 = vmul.f32 %v10041_v23, %v5689_v26 }
0x1125   : > { %v7108_v51 = vpop.eup %7107  ;;  %v5566_v15 = vpop.xlane.xlu1 %5565  ;;  %v5688_v2 = vmul.f32 %v7106_v48, %v9948_v62  ;;  %v5855_v63 = vsel %vm969_vm0, %v5760_v46, 0.0 }
0x1126   : > { %v5724_v37 = vmul.f32 %v10041_v23, %v5686_v22  ;;  %v5687_v57 = vmul.f32 %v7108_v51, %v9966_v34  ;;  %7117 = vrsqrt.f32 %v5630_v16  ;;  %v5600_v25 = vmul.f32 0.03125, %v5566_v15 }
0x1127   : > { %v7110_v39 = vpop.eup %7109  ;;  %v5631_v6 = vadd.f32 1e-05, %v5599_v44  ;;  %v5847_v34 = vsel %vm969_vm0, %v5759_v54, 0.0  ;;  %v5726_v21 = vmul.f32 %v10041_v23, %v5688_v2  ;;  %v5569_v43 = vpop.xlane.xlu0 %5568  ;;  %v5765_v59 = vadd.f32 %v10051_v1, %v5727_v29 }
0x1128   : > { %v5725_v40 = vmul.f32 %v10041_v23, %v5687_v57  ;;  %v5762_v17 = vadd.f32 %v10051_v1, %v5724_v37  ;;  %v5632_v62 = vadd.f32 1e-05, %v5600_v25  ;;  %v5692_v0 = vmul.f32 %v7110_v39, %v9975_v20 }
0x1129   : > { %v7112_v58 = vpop.eup %7111  ;;  %7119 = vrsqrt.f32 %v5631_v6  ;;  %v5848_v35 = vadd.f32 %v5847_v34, %v5846_v31  ;;  %v5601_v60 = vmul.f32 0.03125, %v5569_v43  ;;  %v5857_v30 = vadd.f32 %v5856_v50, %v5855_v63 }
0x112a   : > { %v5763_v14 = vadd.f32 %v10051_v1, %v5725_v40  ;;  %v5693_v42 = vmul.f32 %v7112_v58, %v9979_v13  ;;  %7121 = vrsqrt.f32 %v5632_v62  ;;  %v5864_v56 = vsel %vm969_vm0, %v5762_v17, 0.0 }
0x112b   : > { %v7114_v3 = vpop.eup %7113  ;;  %v5764_v36 = vadd.f32 %v10051_v1, %v5726_v21  ;;  %v5730_v13 = vmul.f32 %v10041_v23, %v5692_v0  ;;  %v5874_v5 = vsel %vm969_vm0, %v5765_v59, 0.0  ;;  %v5633_v12 = vadd.f32 1e-05, %v5601_v60 }
0x112c   : > { %v5865_v33 = vsel %vm969_vm0, %v5763_v14, 0.0  ;;  %v5731_v41 = vmul.f32 %v10041_v23, %v5693_v42  ;;  %v5690_v20 = vmul.f32 %v7114_v3, %v9984_v18  ;;  %v5849_v7 = vrot.slane %v5848_v35, 4 }
0x112d   : > { %v7116_v8 = vpop.eup %7115  ;;  %v5866_v32 = vadd.f32 %v5865_v33, %v5864_v56  ;;  %v5858_v48 = vrot.slane %v5857_v30, 4  ;;  %v5873_v55 = vsel %vm969_vm0, %v5764_v36, 0.0  ;;  %v5768_v38 = vadd.f32 %v10051_v1, %v5730_v13 }
0x112e   : > { %v5728_v61 = vmul.f32 %v10041_v23, %v5690_v20  ;;  %v5691_v10 = vmul.f32 %v7116_v8, %v9990_v53  ;;  %v5769_v9 = vadd.f32 %v10051_v1, %v5731_v41  ;;  %v5875_v53 = vadd.f32 %v5874_v5, %v5873_v55 }
0x112f   : > { %v5867_v22 = vrot.slane %v5866_v32, 4  ;;  %7123 = vrsqrt.f32 %v5633_v12  ;;  %v5850_v37 = vadd.f32 %v5849_v7, %v5848_v35  ;;  %v5859_v27 = vadd.f32 %v5858_v48, %v5857_v30 }
0x1130   : > { %v7118_v52 = vpop.eup %7117  ;;  %v5766_v18 = vadd.f32 %v10051_v1, %v5728_v61  ;;  %v5729_v49 = vmul.f32 %v10041_v23, %v5691_v10  ;;  %v5892_v16 = vsel %vm969_vm0, %v5769_v9, 0.0  ;;  %v5891_v44 = vsel %vm969_vm0, %v5768_v38, 0.0 }
0x1131   : > { %v5694_v19 = vmul.f32 %v7118_v52, %v9999_v47  ;;  %v5868_v2 = vadd.f32 %v5867_v22, %v5866_v32  ;;  %v5876_v40 = vrot.slane %v5875_v53, 4  ;;  %v5893_v25 = vadd.f32 %v5892_v16, %v5891_v44 }
0x1132   : > { %v5767_v51 = vadd.f32 %v10051_v1, %v5729_v49  ;;  %v5882_v57 = vsel %vm969_vm0, %v5766_v18, 0.0  ;;  %v5851_v34 = vrot.slane %v5850_v37, 2  ;;  %v5860_v14 = vrot.slane %v5859_v27, 2 }
0x1133   : > { %v5732_v45 = vmul.f32 %v10041_v23, %v5694_v19  ;;  %v7120_v26 = vpop.eup %7119  ;;  %v5869_v62 = vrot.slane %v5868_v2, 2  ;;  %v5877_v58 = vadd.f32 %v5876_v40, %v5875_v53  ;;  %v5894_v50 = vrot.slane %v5893_v25, 4 }
0x1134   : > { %v7122_v54 = vpop.eup %7121  ;;  %v5883_v47 = vsel %vm969_vm0, %v5767_v51, 0.0  ;;  %v5695_v15 = vmul.f32 %v7120_v26, %v10003_v28  ;;  %v5852_v42 = vadd.f32 %v5851_v34, %v5850_v37  ;;  %v5861_v59 = vadd.f32 %v5860_v14, %v5859_v27 }
0x1135   : > { %v5884_v4 = vadd.f32 %v5883_v47, %v5882_v57  ;;  %v5770_v39 = vadd.f32 %v10051_v1, %v5732_v45  ;;  %v5696_v6 = vmul.f32 %v7122_v54, %v10008_v24  ;;  %v5870_v3 = vadd.f32 %v5869_v62, %v5868_v2 }
0x1136   : > { %v5733_v46 = vmul.f32 %v10041_v23, %v5695_v15  ;;  %v5878_v56 = vrot.slane %v5877_v58, 2  ;;  %v5895_v41 = vadd.f32 %v5894_v50, %v5893_v25  ;;  %v5853_v30 = vrot.slane %v5852_v42, 1 }
0x1137   : > { %v5885_v29 = vrot.slane %v5884_v4, 4  ;;  %v5900_v21 = vsel %vm969_vm0, %v5770_v39, 0.0  ;;  %v5734_v31 = vmul.f32 %v10041_v23, %v5696_v6  ;;  %v5871_v36 = vrot.slane %v5870_v3, 1 }
0x1138   : > { %v5771_v17 = vadd.f32 %v10051_v1, %v5733_v46  ;;  %v5862_v10 = vrot.slane %v5861_v59, 1  ;;  %v5879_v52 = vadd.f32 %v5878_v56, %v5877_v58  ;;  %v5896_v5 = vrot.slane %v5895_v41, 2  ;;  %v6253_v46 = vld [vmem:[%s10218_s18] ss:$0 sm:$0xff] }
0x1139   : > { %v5886_v28 = vadd.f32 %v5885_v29, %v5884_v4  ;;  %v7124_v33 = vpop.eup %7123  ;;  %v5772_v60 = vadd.f32 %v10051_v1, %v5734_v31  ;;  %v5854_v12 = vadd.f32 %v5853_v30, %v5852_v42  ;;  %v5872_v18 = vadd.f32 %v5871_v36, %v5870_v3 }
0x113a   : > { %v5901_v0 = vsel %vm969_vm0, %v5771_v17, 0.0  ;;  %v5697_v35 = vmul.f32 %v7124_v33, %v10014_v11  ;;  %v5863_v48 = vadd.f32 %v5862_v10, %v5861_v59  ;;  %v5897_v55 = vadd.f32 %v5896_v5, %v5895_v41 }
0x113b   : > { %v5902_v43 = vadd.f32 %v5901_v0, %v5900_v21  ;;  %v5887_v63 = vrot.slane %v5886_v28, 2  ;;  %v5909_v9 = vsel %vm969_vm0, %v5772_v60, 0.0 }
0x113c   : > { %v5735_v8 = vmul.f32 %v10041_v23, %v5697_v35  ;;  %v5880_v23 = vrot.slane %v5879_v52, 1  ;;  %v5932_v38 = vsel %vm5918_vm4, %v5854_v12, %v5863_v48  ;;  %v5898_v16 = vrot.slane %v5897_v55, 1 }
0x113d   : > { %v5903_v24 = vrot.slane %v5902_v43, 4  ;;  %v5888_v32 = vadd.f32 %v5887_v63, %v5886_v28  ;;  %v5933_v45 = vsel %vm5920_vm5, %v5932_v38, %v5872_v18 }
0x113e   : > { %v5773_v61 = vadd.f32 %v10051_v1, %v5735_v8  ;;  %v5881_v26 = vadd.f32 %v5880_v23, %v5879_v52  ;;  %v5899_v27 = vadd.f32 %v5898_v16, %v5897_v55 }
0x113f   : > { %v5904_v20 = vadd.f32 %v5903_v24, %v5902_v43  ;;  %v5889_v49 = vrot.slane %v5888_v32, 1 }
0x1140   : > { %v5910_v11 = vsel %vm969_vm0, %v5773_v61, 0.0  ;;  %v5934_v57 = vsel %vm5922_vm6, %v5933_v45, %v5881_v26 }
0x1141   : > { %v5905_v13 = vrot.slane %v5904_v20, 2  ;;  %v5911_v7 = vadd.f32 %v5910_v11, %v5909_v9  ;;  %v5890_v1 = vadd.f32 %v5889_v49, %v5888_v32 }
0x1143   : > { %v5906_v19 = vadd.f32 %v5905_v13, %v5904_v20  ;;  %v5912_v22 = vrot.slane %v5911_v7, 4  ;;  %v5935_v15 = vsel %vm5924_vm7, %v5934_v57, %v5890_v1 }
0x1144   : > { %v5936_v4 = vsel %vm5926_vm8, %v5935_v15, %v5899_v27 }
0x1145   : > { %v5913_v53 = vadd.f32 %v5912_v22, %v5911_v7  ;;  %v5907_v51 = vrot.slane %v5906_v19, 1 }
0x1147   : > { %v5914_v54 = vrot.slane %v5913_v53, 2  ;;  %v5908_v47 = vadd.f32 %v5907_v51, %v5906_v19 }
0x1149   : > { %v5915_v37 = vadd.f32 %v5914_v54, %v5913_v53  ;;  %v5937_v40 = vsel %vm5928_vm9, %v5936_v4, %v5908_v47 }
0x114b   : > { %v5916_v2 = vrot.slane %v5915_v37, 1 }
0x114d   : > { %v5917_v44 = vadd.f32 %v5916_v2, %v5915_v37 }
0x114f   : > { %v5938_v25 = vsel %vm5930_vm10, %v5937_v40, %v5917_v44 }
0x1150   : > { %v5940_v39 = vmul.f32 0.0625, %v5938_v25 }
0x1152   : > { %6573 = vmatmul.mubr.msk.f32.vlgmr.msra.gmra.mrb[100].mxu1 %vm969_vm0, %v5940_v39 }
0x1225   : > { %v6574_v29 = vpop.f32.mrb[100].mxu1 }
0x1226   : > { %v6024_v6 = vpop.f32.mrb[101].mxu1  ;;  %v6030_v17 = vadd.f32 %v6574_v29, %v6253_v46 }
0x1227   : > { %v6025_v34 = vadd.f32 %v6253_v46, %v6024_v6 }
0x1228   : > { %6034 = vst [vmem:[%s604_s20 + $0x8] sm:$0xff] %v6030_v17 }
0x1229   : > { %6033 = vst [vmem:[%s604_s20] sm:$0xff] %v6025_v34 }
0x122a PF: > { %s29_s0 = sadd.s32 1, %s7131_s0  }
0x122b   : > { %p26_p5 = scmp.ge.s32.totalorder %s29_s0, 4  }
0x122d   :  { %28 = sbr.rel (!%p26_p5) target bundleno = 5 (0x5), region = 138 }

</bundles_post_ra>
